<compile_context>
chip_gen: v7x
topology: tpu7x:2x2x1
jax: 0.10.0
libtpu: 0.0.40
codegen_flags: <defaults>
</compile_context>

<pallas_src>
import functools
import math

import jax
import jax.numpy as jnp
from jax.experimental import pallas as pl
from jax.experimental.pallas import tpu as pltpu


def _round_up(x, m):
    return ((x + m - 1) // m) * m


# --------------------------------------------------------------------------
# Single-reduce packed top-k helpers
# --------------------------------------------------------------------------
_PACK_BITS_MAX = 10          # packed path keeps >= 13 mantissa bits of score
_INT32_MIN = -(2 ** 31)


def _to_sortable_int(x):
    """Monotone f32 -> int32 key (a > b  <=>  key(a) > key(b))."""
    u = pltpu.bitcast(x, jnp.int32)
    return jnp.where(u >= 0, u, u ^ jnp.int32(0x7FFFFFFF))


def _from_sortable_int(key):
    u = jnp.where(key >= 0, key, key ^ jnp.int32(0x7FFFFFFF))
    return pltpu.bitcast(u, jnp.float32)


def _select_topk(scores, payload, payload_bits, num_select):
    """num_select descending (score, payload) selections along the last axis.

    scores:  (T, L) float32.
    payload: (T, L) int32, unique per lane, values in [0, 2**payload_bits).
    Returns two length-num_select lists of (T, 1) arrays (scores, payloads).

    Fast path: pack the complemented payload (so ties resolve to the lowest
    payload) into the low bits of a rounded monotone int32 key -> ONE
    cross-lane max (XLU reduce) per selection.  Exact two-reduce fallback when
    the payload would eat too many mantissa bits.
    """
    if payload_bits <= _PACK_BITS_MAX:
        low_mask = (1 << payload_bits) - 1
        half = 1 << (payload_bits - 1)
        key = _to_sortable_int(scores)
        key = jnp.bitwise_and(key + jnp.int32(half), jnp.int32(~low_mask))
        work = jnp.bitwise_or(key, jnp.int32(low_mask) - payload)
        s_out, p_out = [], []
        for _ in range(num_select):
            best = jnp.max(work, axis=-1, keepdims=True)
            p_out.append(jnp.int32(low_mask)
                         - jnp.bitwise_and(best, jnp.int32(low_mask)))
            s_out.append(_from_sortable_int(
                jnp.bitwise_and(best, jnp.int32(~low_mask))))
            work = jnp.where(work == best, jnp.int32(_INT32_MIN), work)
        return s_out, p_out

    # Exact fallback: full-precision max + masked arg-min (2 reduces/select).
    s_out, p_out = [], []
    work = scores
    big = jnp.int32(2 ** 31 - 1)
    for _ in range(num_select):
        m = jnp.max(work, axis=-1, keepdims=True)
        pick = jnp.min(jnp.where(work == m, payload, big), axis=-1,
                       keepdims=True)
        s_out.append(m)
        p_out.append(pick)
        work = jnp.where(payload == pick, -jnp.inf, work)
    return s_out, p_out


# --------------------------------------------------------------------------
# Fused PKM kernel: projection + LayerNorm + product-key top-k + softmax +
# EmbeddingBag('sum', per_sample_weights)
# --------------------------------------------------------------------------
def pkm_fused_kernel(x_ref, wq_ref, ln_g_ref, ln_b_ref, keys_ref, values_ref,
                     out_ref, *, heads, num_keys, topk, dim_head, ln_eps):
    T = x_ref.shape[0]
    h, n, k, d = heads, num_keys, topk, dim_head
    kk = k * k
    nn = n * n
    n_bits = max(1, (n - 1).bit_length())
    kk_bits = max(1, (kk - 1).bit_length())

    x = x_ref[...]                                       # (T, dim)   bf16
    gamma = ln_g_ref[...]                                # (1, d)     f32
    beta = ln_b_ref[...]                                 # (1, d)     f32

    # ---- fused query projection: one full-width MXU matmul for all 2h heads.
    qs_all = jnp.dot(x, wq_ref[...], preferred_element_type=jnp.float32)

    niota = jax.lax.broadcasted_iota(jnp.int32, (T, n), 1)
    kiota = jax.lax.broadcasted_iota(jnp.int32, (T, k), 1)
    kk_pos = jax.lax.broadcasted_iota(jnp.int32, (T, kk), 1)
    nniota = jax.lax.broadcasted_iota(jnp.int32, (T, nn), 1)

    gates = jnp.zeros((T, nn), jnp.float32)

    for hh in range(h):
        per_axis = []
        for p in range(2):
            ph = p * h + hh
            qs = qs_all[:, ph * d:(ph + 1) * d]          # static lane slice
            mu = jnp.mean(qs, axis=-1, keepdims=True)
            var = jnp.mean(jnp.square(qs - mu), axis=-1, keepdims=True)
            qn = (qs - mu) * jax.lax.rsqrt(var + ln_eps) * gamma + beta
            dots = jnp.dot(qn.astype(x.dtype), keys_ref[ph],
                           preferred_element_type=jnp.float32)   # (T, n)
            per_axis.append(_select_topk(dots, niota, n_bits, k))
        (sx, ix), (sy, iy) = per_axis                    # lists of (T, 1)

        # ---- cartesian candidates via O(k) narrow ops + lane concatenation.
        sy_vec = jnp.concatenate(sy, axis=1)             # (T, k)
        iy_vec = jnp.concatenate(iy, axis=1)             # (T, k)
        ix_vec = jnp.concatenate(ix, axis=1)             # (T, k)
        all_s = jnp.concatenate([sx[i] + sy_vec for i in range(k)], axis=1)

        # ---- second top-k over the k*k candidates (payload = position).
        fs, fpos = _select_topk(all_s, kk_pos, kk_bits, k)

        # ---- softmax gate (fs is non-increasing; fs[0] is the max).
        exps = [jnp.exp(s - fs[0]) for s in fs]
        denom = exps[0]
        for e in exps[1:]:
            denom = denom + e
        inv = 1.0 / denom

        for j in range(k):
            pos = fpos[j]                                # (T, 1) in [0, k*k)
            # Recover (i, j) and the flat value row id with k-lane masked
            # reduces (no division, no gathers).
            in_blk = jnp.logical_and(pos >= kiota * k, pos < kiota * k + k)
            ix_sel = jnp.max(jnp.where(in_blk, ix_vec, 0), axis=-1,
                             keepdims=True)
            i_idx = jnp.max(jnp.where(in_blk, kiota, 0), axis=-1,
                            keepdims=True)
            j_idx = pos - i_idx * k
            iy_sel = jnp.max(jnp.where(kiota == j_idx, iy_vec, 0), axis=-1,
                             keepdims=True)
            vidx = ix_sel * n + iy_sel                   # (T, 1) value row id
            attn_j = exps[j] * inv                       # (T, 1) gate weight
            gates = gates + jnp.where(nniota == vidx, attn_j, 0.0)

    # ---- fused EmbeddingBag('sum', per_sample_weights): gate-weighted mix of
    #      the resident value table on the MXU -> dense (T, dim) output slab.
    vals = values_ref[...].astype(jnp.float32)
    out_ref[...] = jnp.dot(
        gates, vals, preferred_element_type=jnp.float32).astype(out_ref.dtype)


# --------------------------------------------------------------------------
# Wrapper
# --------------------------------------------------------------------------
def _idx_tile(i):
    return (i, 0)


def _idx_const2(i):
    return (0, 0)


def _idx_const3(i):
    return (0, 0, 0)


def _pick_vmem_limit(resident_bytes, per_tile_bytes):
    """Generation-aware VMEM budget (v5e/v6e: 128 MiB, v7x: 64 MiB)."""
    try:
        cap = int(pltpu.get_tpu_info().vmem_capacity_bytes)
    except Exception:
        cap = 64 * 2 ** 20
    want = 2 * resident_bytes + 4 * per_tile_bytes + (8 << 20)
    return int(min(max(want, 16 << 20), (cap * 3) // 4))


def pkm_forward(x, wq_t, ln_g, ln_b, keys, values, *, heads, num_keys, topk,
                dim_head, tile_bt=None, compute_dtype=jnp.bfloat16,
                ln_eps=1e-5):
    b, t, dim = x.shape
    h, n, k, d = heads, num_keys, topk, dim_head
    nn = n * n
    bt = b * t
    assert 1 <= k <= n, "topk must satisfy 1 <= topk <= num_keys"

    if tile_bt is None:
        tile_bt = min(512, _round_up(bt, 8))
    tile_bt = max(8, _round_up(tile_bt, 8))
    bt_pad = _round_up(bt, tile_bt)
    grid = (bt_pad // tile_bt,)

    x2 = x.reshape(bt, dim)
    if bt_pad != bt:
        x2 = jnp.pad(x2, ((0, bt_pad - bt), (0, 0)))
    x2 = x2.astype(compute_dtype)

    # Packed projection weight stays in its (dim, 2*h*d) layout (fused MXU
    # matmul in-kernel); keys go to (2*h, d, n) so keys_r[p*h + hh] is the
    # (d, n) operand for product-axis p of head hh.
    wq = wq_t.astype(compute_dtype)
    keys_r = (jnp.transpose(keys, (2, 0, 3, 1)).reshape(2 * h, d, n)
              .astype(compute_dtype))
    values2 = values.reshape(nn, dim)                    # keep stored dtype
    gamma = ln_g.reshape(1, d).astype(jnp.float32)
    beta = ln_b.reshape(1, d).astype(jnp.float32)

    resident = ((wq.size + keys_r.size) * 2 + 2 * d * 4
                + nn * dim * values2.dtype.itemsize)
    per_tile = tile_bt * (dim * 6 + 2 * h * d * 4 + nn * 4
                          + 6 * k * k * 4 + 4 * n * 4)
    vmem_limit = _pick_vmem_limit(resident, per_tile)

    cost = pl.CostEstimate(
        flops=int(2 * bt_pad * (dim * 2 * h * d + 2 * h * d * n + nn * dim)),
        transcendentals=int(bt_pad * h * k),
        bytes_accessed=int(x2.size * x2.dtype.itemsize + resident
                           + bt_pad * dim * 4),
    )

    kernel = functools.partial(pkm_fused_kernel, heads=h, num_keys=n, topk=k,
                               dim_head=d, ln_eps=ln_eps)
    args = (x2, wq, gamma, beta, keys_r, values2)

    def build(single_buffer_residents):
        def resident_spec(shape):
            imap = _idx_const2 if len(shape) == 2 else _idx_const3
            if single_buffer_residents:
                return pl.BlockSpec(shape, imap, pipeline_mode=pl.Buffered(1))
            return pl.BlockSpec(shape, imap)

        return pl.pallas_call(
            kernel,
            out_shape=jax.ShapeDtypeStruct((bt_pad, dim), jnp.float32),
            grid_spec=pltpu.PrefetchScalarGridSpec(
                num_scalar_prefetch=0,
                grid=grid,
                in_specs=[
                    pl.BlockSpec((tile_bt, dim), _idx_tile),
                    resident_spec((dim, 2 * h * d)),
                    resident_spec((1, d)),
                    resident_spec((1, d)),
                    resident_spec((2 * h, d, n)),
                    resident_spec((nn, dim)),
                ],
                out_specs=pl.BlockSpec((tile_bt, dim), _idx_tile),
            ),
            compiler_params=pltpu.CompilerParams(
                dimension_semantics=("parallel",),
                vmem_limit_bytes=vmem_limit,
            ),
            cost_estimate=cost,
        )

    try:
        out = build(True)(*args)
    except Exception:
        # pipeline_mode=pl.Buffered(1) unsupported by this Pallas build --
        # fall back to default (double-buffered) resident specs.
        out = build(False)(*args)

    if bt_pad != bt:
        out = out[:bt]
    return out.reshape(b, t, dim)


# --------------------------------------------------------------------------
# Pure-JAX reference mirroring the PyTorch forward (and the kernel's mixed
# precision: bf16 MXU inputs, f32 accumulation / LayerNorm / top-k / softmax).
# --------------------------------------------------------------------------
def pkm_reference(x, wq_t, ln_g, ln_b, keys, values, *, heads, num_keys, topk,
                  dim_head, compute_dtype=jnp.bfloat16, ln_eps=1e-5):
    b, t, dim = x.shape
    h, n, k, d = heads, num_keys, topk, dim_head
    q = jnp.dot(x.reshape(b * t, dim).astype(compute_dtype),
                wq_t.astype(compute_dtype),
                preferred_element_type=jnp.float32).reshape(b, t, 2, h, d)
    mu = q.mean(-1, keepdims=True)
    var = jnp.square(q - mu).mean(-1, keepdims=True)
    qn = (q - mu) * jax.lax.rsqrt(var + ln_eps) * ln_g + ln_b
    dots = jnp.einsum('btphd,hnpd->bthpn', qn.astype(compute_dtype),
                      keys.astype(compute_dtype),
                      preferred_element_type=jnp.float32)
    scores, indices = jax.lax.top_k(dots, k)
    sx, sy = scores[..., 0, :], scores[..., 1, :]
    ix, iy = indices[..., 0, :], indices[..., 1, :]
    all_s = (sx[..., :, None] + sy[..., None, :]).reshape(b, t, h, k * k)
    all_i = (ix[..., :, None] * n + iy[..., None, :]).reshape(b, t, h, k * k)
    fs, fpos = jax.lax.top_k(all_s, k)
    vi = jnp.take_along_axis(all_i, fpos, axis=-1)
    attn = jax.nn.softmax(fs, axis=-1)
    emb = values[vi]                                     # (b, t, h, k, dim)
    return (emb * attn[..., None]).sum(axis=(2, 3))


if __name__ == "__main__":
    # Small shapes consistent with the module.
    b, t, dim = 2, 8, 32
    heads, num_keys, topk, dim_head = 2, 16, 4, 16
    dim_query = dim_head * heads * 2

    key = jax.random.PRNGKey(0)
    k1, k2, k3, k4 = jax.random.split(key, 4)

    x = jax.random.normal(k1, (b, t, dim), jnp.float32)
    # to_queries weight, stored already transposed: (dim, dim_query)
    wq_t = jax.random.normal(k2, (dim, dim_query), jnp.float32) * (
        1.0 / math.sqrt(dim))
    # keys: (heads, num_keys, 2, dim_head), std = 1/sqrt(dim_head)
    keys = jax.random.normal(k3, (heads, num_keys, 2, dim_head),
                             jnp.float32) * (1.0 / math.sqrt(dim_head))
    # EmbeddingBag weight: (num_keys**2, dim), std = 1/sqrt(dim)
    values = jax.random.normal(k4, (num_keys ** 2, dim), jnp.float32) * (
        1.0 / math.sqrt(dim))
    ln_g = jnp.ones((dim_head,), jnp.float32)
    ln_b = jnp.zeros((dim_head,), jnp.float32)

    out = pkm_forward(x, wq_t, ln_g, ln_b, keys, values,
                      heads=heads, num_keys=num_keys, topk=topk,
                      dim_head=dim_head, tile_bt=8)       # 2-step token grid
    out = jax.block_until_ready(out)

    ref = pkm_reference(x, wq_t, ln_g, ln_b, keys, values,
                        heads=heads, num_keys=num_keys, topk=topk,
                        dim_head=dim_head)
    assert out.shape == (b, t, dim)
    max_err = float(jnp.max(jnp.abs(out - ref)))
    assert jnp.allclose(out, ref, rtol=2e-3, atol=2e-3), (
        f"mismatch vs reference (max abs err {max_err})")

    print("KERNEL_OK")
</pallas_src>

<mosaic_0001>
module attributes {stable_mosaic.version = 11 : i64} {
  func.func @pkm_fused_kernel(%arg0: i32, %arg1: memref<8x32xbf16, #tpu.memory_space<vmem>>, %arg2: memref<32x64xbf16, #tpu.memory_space<vmem>>, %arg3: memref<1x16xf32, #tpu.memory_space<vmem>>, %arg4: memref<1x16xf32, #tpu.memory_space<vmem>>, %arg5: memref<4x16x16xbf16, #tpu.memory_space<vmem>>, %arg6: memref<256x32xf32, #tpu.memory_space<vmem>>, %arg7: memref<8x32xf32, #tpu.memory_space<vmem>>) attributes {dimension_semantics = [#tpu.dimension_semantics<parallel>], iteration_bounds = array<i64: 2>, scalar_prefetch = 0 : i64, scratch_operands = 0 : i64, tpu.core_type = #tpu.core_type<tc>, window_params = [{transform_indices = @transform_0, window_bounds = array<i64: 8, 32>}, {pipeline_mode = #tpu.pipeline_mode<synchronous>, transform_indices = @transform_1, window_bounds = array<i64: 32, 64>}, {pipeline_mode = #tpu.pipeline_mode<synchronous>, transform_indices = @transform_2, window_bounds = array<i64: 1, 16>}, {pipeline_mode = #tpu.pipeline_mode<synchronous>, transform_indices = @transform_3, window_bounds = array<i64: 1, 16>}, {pipeline_mode = #tpu.pipeline_mode<synchronous>, transform_indices = @transform_4, window_bounds = array<i64: 4, 16, 16>}, {pipeline_mode = #tpu.pipeline_mode<synchronous>, transform_indices = @transform_5, window_bounds = array<i64: 256, 32>}, {transform_indices = @transform_6, window_bounds = array<i64: 8, 32>}]} {
    %c0 = arith.constant 0 : index
    %c0_0 = arith.constant 0 : index
    %0 = vector.load %arg1[%c0, %c0_0] : memref<8x32xbf16, #tpu.memory_space<vmem>>, vector<8x32xbf16>
    %c0_1 = arith.constant 0 : index
    %c0_2 = arith.constant 0 : index
    %1 = vector.load %arg3[%c0_1, %c0_2] : memref<1x16xf32, #tpu.memory_space<vmem>>, vector<1x16xf32>
    %c0_3 = arith.constant 0 : index
    %c0_4 = arith.constant 0 : index
    %2 = vector.load %arg4[%c0_3, %c0_4] : memref<1x16xf32, #tpu.memory_space<vmem>>, vector<1x16xf32>
    %c0_5 = arith.constant 0 : index
    %c0_6 = arith.constant 0 : index
    %3 = vector.load %arg2[%c0_5, %c0_6] : memref<32x64xbf16, #tpu.memory_space<vmem>>, vector<32x64xbf16>
    %cst = arith.constant dense<0.000000e+00> : vector<8x64xf32>
    %4 = tpu.matmul %0, %3, %cst {dimension_numbers = #tpu.dot_dimension_numbers<[1], [0], [0], [1], [0, 0, 1, 1], [], []>} : vector<8x32xbf16>, vector<32x64xbf16>, vector<8x64xf32> -> vector<8x64xf32>
    %5 = tpu.iota {dimensions = array<i32: 1>} : vector<8x16xi32>
    %6 = tpu.iota {dimensions = array<i32: 1>} : vector<8x4xi32>
    %7 = tpu.iota {dimensions = array<i32: 1>} : vector<8x16xi32>
    %8 = tpu.iota {dimensions = array<i32: 1>} : vector<8x256xi32>
    %cst_7 = arith.constant 0.000000e+00 : f32
    %9 = vector.broadcast %cst_7 : f32 to vector<8x256xf32>
    %10 = vector.extract_strided_slice %4 {offsets = [0, 0], sizes = [8, 16], strides = [1, 1]} : vector<8x64xf32> to vector<8x16xf32>
    %cst_8 = arith.constant dense<0.000000e+00> : vector<8xf32>
    %11 = vector.multi_reduction <add>, %10, %cst_8 [1] : vector<8x16xf32> to vector<8xf32>
    %12 = vector.shape_cast %11 : vector<8xf32> to vector<8x1xf32>
    %cst_9 = arith.constant 1.600000e+01 : f32
    %13 = vector.broadcast %cst_9 : f32 to vector<8x1xf32>
    %14 = arith.divf %12, %13 : vector<8x1xf32>
    %15 = vector.broadcast %14 : vector<8x1xf32> to vector<8x16xf32>
    %16 = arith.subf %10, %15 : vector<8x16xf32>
    %17 = arith.mulf %16, %16 : vector<8x16xf32>
    %cst_10 = arith.constant dense<0.000000e+00> : vector<8xf32>
    %18 = vector.multi_reduction <add>, %17, %cst_10 [1] : vector<8x16xf32> to vector<8xf32>
    %19 = vector.shape_cast %18 : vector<8xf32> to vector<8x1xf32>
    %cst_11 = arith.constant 1.600000e+01 : f32
    %20 = vector.broadcast %cst_11 : f32 to vector<8x1xf32>
    %21 = arith.divf %19, %20 : vector<8x1xf32>
    %22 = vector.broadcast %14 : vector<8x1xf32> to vector<8x16xf32>
    %23 = arith.subf %10, %22 : vector<8x16xf32>
    %cst_12 = arith.constant 9.99999974E-6 : f32
    %24 = vector.broadcast %cst_12 : f32 to vector<8x1xf32>
    %25 = arith.addf %21, %24 : vector<8x1xf32>
    %26 = math.rsqrt %25 : vector<8x1xf32>
    %27 = vector.broadcast %26 : vector<8x1xf32> to vector<8x16xf32>
    %28 = arith.mulf %23, %27 : vector<8x16xf32>
    %29 = vector.broadcast %1 : vector<1x16xf32> to vector<8x16xf32>
    %30 = arith.mulf %28, %29 : vector<8x16xf32>
    %31 = vector.broadcast %2 : vector<1x16xf32> to vector<8x16xf32>
    %32 = arith.addf %30, %31 : vector<8x16xf32>
    %33 = arith.truncf %32 : vector<8x16xf32> to vector<8x16xbf16>
    %c0_13 = arith.constant 0 : index
    %c0_14 = arith.constant 0 : index
    %c0_15 = arith.constant 0 : index
    %34 = vector.load %arg5[%c0_13, %c0_14, %c0_15] : memref<4x16x16xbf16, #tpu.memory_space<vmem>>, vector<1x16x16xbf16>
    %35 = vector.shape_cast %34 : vector<1x16x16xbf16> to vector<16x16xbf16>
    %cst_16 = arith.constant dense<0.000000e+00> : vector<8x16xf32>
    %36 = tpu.matmul %33, %35, %cst_16 {dimension_numbers = #tpu.dot_dimension_numbers<[1], [0], [0], [1], [0, 0, 1, 1], [], []>} : vector<8x16xbf16>, vector<16x16xbf16>, vector<8x16xf32> -> vector<8x16xf32>
    %37 = tpu.bitcast %36 : vector<8x16xf32> -> vector<8x16xi32>
    %c0_i32 = arith.constant 0 : i32
    %38 = vector.broadcast %c0_i32 : i32 to vector<8x16xi32>
    %39 = arith.cmpi sge, %37, %38 : vector<8x16xi32>
    %c2147483647_i32 = arith.constant 2147483647 : i32
    %40 = vector.broadcast %c2147483647_i32 : i32 to vector<8x16xi32>
    %41 = arith.xori %37, %40 : vector<8x16xi32>
    %42 = arith.select %39, %37, %41 : vector<8x16xi1>, vector<8x16xi32>
    %c8_i32 = arith.constant 8 : i32
    %43 = vector.broadcast %c8_i32 : i32 to vector<8x16xi32>
    %44 = arith.addi %42, %43 : vector<8x16xi32>
    %c-16_i32 = arith.constant -16 : i32
    %45 = vector.broadcast %c-16_i32 : i32 to vector<8x16xi32>
    %46 = arith.andi %44, %45 : vector<8x16xi32>
    %c15_i32 = arith.constant 15 : i32
    %47 = vector.broadcast %c15_i32 : i32 to vector<8x16xi32>
    %48 = arith.subi %47, %5 : vector<8x16xi32>
    %49 = arith.ori %46, %48 : vector<8x16xi32>
    %cst_17 = arith.constant dense<-2147483648> : vector<8xi32>
    %50 = vector.multi_reduction <maxsi>, %49, %cst_17 [1] : vector<8x16xi32> to vector<8xi32>
    %51 = vector.shape_cast %50 : vector<8xi32> to vector<8x1xi32>
    %c15_i32_18 = arith.constant 15 : i32
    %52 = vector.broadcast %c15_i32_18 : i32 to vector<8x1xi32>
    %53 = arith.andi %51, %52 : vector<8x1xi32>
    %c15_i32_19 = arith.constant 15 : i32
    %54 = vector.broadcast %c15_i32_19 : i32 to vector<8x1xi32>
    %55 = arith.subi %54, %53 : vector<8x1xi32>
    %c-16_i32_20 = arith.constant -16 : i32
    %56 = vector.broadcast %c-16_i32_20 : i32 to vector<8x1xi32>
    %57 = arith.andi %51, %56 : vector<8x1xi32>
    %c0_i32_21 = arith.constant 0 : i32
    %58 = vector.broadcast %c0_i32_21 : i32 to vector<8x1xi32>
    %59 = arith.cmpi sge, %57, %58 : vector<8x1xi32>
    %c2147483647_i32_22 = arith.constant 2147483647 : i32
    %60 = vector.broadcast %c2147483647_i32_22 : i32 to vector<8x1xi32>
    %61 = arith.xori %57, %60 : vector<8x1xi32>
    %62 = arith.select %59, %57, %61 : vector<8x1xi1>, vector<8x1xi32>
    %63 = tpu.bitcast %62 : vector<8x1xi32> -> vector<8x1xf32>
    %64 = vector.broadcast %51 : vector<8x1xi32> to vector<8x16xi32>
    %65 = arith.cmpi eq, %49, %64 : vector<8x16xi32>
    %c-2147483648_i32 = arith.constant -2147483648 : i32
    %66 = vector.broadcast %c-2147483648_i32 : i32 to vector<8x16xi32>
    %67 = arith.select %65, %66, %49 : vector<8x16xi1>, vector<8x16xi32>
    %cst_23 = arith.constant dense<-2147483648> : vector<8xi32>
    %68 = vector.multi_reduction <maxsi>, %67, %cst_23 [1] : vector<8x16xi32> to vector<8xi32>
    %69 = vector.shape_cast %68 : vector<8xi32> to vector<8x1xi32>
    %c15_i32_24 = arith.constant 15 : i32
    %70 = vector.broadcast %c15_i32_24 : i32 to vector<8x1xi32>
    %71 = arith.andi %69, %70 : vector<8x1xi32>
    %c15_i32_25 = arith.constant 15 : i32
    %72 = vector.broadcast %c15_i32_25 : i32 to vector<8x1xi32>
    %73 = arith.subi %72, %71 : vector<8x1xi32>
    %c-16_i32_26 = arith.constant -16 : i32
    %74 = vector.broadcast %c-16_i32_26 : i32 to vector<8x1xi32>
    %75 = arith.andi %69, %74 : vector<8x1xi32>
    %c0_i32_27 = arith.constant 0 : i32
    %76 = vector.broadcast %c0_i32_27 : i32 to vector<8x1xi32>
    %77 = arith.cmpi sge, %75, %76 : vector<8x1xi32>
    %c2147483647_i32_28 = arith.constant 2147483647 : i32
    %78 = vector.broadcast %c2147483647_i32_28 : i32 to vector<8x1xi32>
    %79 = arith.xori %75, %78 : vector<8x1xi32>
    %80 = arith.select %77, %75, %79 : vector<8x1xi1>, vector<8x1xi32>
    %81 = tpu.bitcast %80 : vector<8x1xi32> -> vector<8x1xf32>
    %82 = vector.broadcast %69 : vector<8x1xi32> to vector<8x16xi32>
    %83 = arith.cmpi eq, %67, %82 : vector<8x16xi32>
    %c-2147483648_i32_29 = arith.constant -2147483648 : i32
    %84 = vector.broadcast %c-2147483648_i32_29 : i32 to vector<8x16xi32>
    %85 = arith.select %83, %84, %67 : vector<8x16xi1>, vector<8x16xi32>
    %cst_30 = arith.constant dense<-2147483648> : vector<8xi32>
    %86 = vector.multi_reduction <maxsi>, %85, %cst_30 [1] : vector<8x16xi32> to vector<8xi32>
    %87 = vector.shape_cast %86 : vector<8xi32> to vector<8x1xi32>
    %c15_i32_31 = arith.constant 15 : i32
    %88 = vector.broadcast %c15_i32_31 : i32 to vector<8x1xi32>
    %89 = arith.andi %87, %88 : vector<8x1xi32>
    %c15_i32_32 = arith.constant 15 : i32
    %90 = vector.broadcast %c15_i32_32 : i32 to vector<8x1xi32>
    %91 = arith.subi %90, %89 : vector<8x1xi32>
    %c-16_i32_33 = arith.constant -16 : i32
    %92 = vector.broadcast %c-16_i32_33 : i32 to vector<8x1xi32>
    %93 = arith.andi %87, %92 : vector<8x1xi32>
    %c0_i32_34 = arith.constant 0 : i32
    %94 = vector.broadcast %c0_i32_34 : i32 to vector<8x1xi32>
    %95 = arith.cmpi sge, %93, %94 : vector<8x1xi32>
    %c2147483647_i32_35 = arith.constant 2147483647 : i32
    %96 = vector.broadcast %c2147483647_i32_35 : i32 to vector<8x1xi32>
    %97 = arith.xori %93, %96 : vector<8x1xi32>
    %98 = arith.select %95, %93, %97 : vector<8x1xi1>, vector<8x1xi32>
    %99 = tpu.bitcast %98 : vector<8x1xi32> -> vector<8x1xf32>
    %100 = vector.broadcast %87 : vector<8x1xi32> to vector<8x16xi32>
    %101 = arith.cmpi eq, %85, %100 : vector<8x16xi32>
    %c-2147483648_i32_36 = arith.constant -2147483648 : i32
    %102 = vector.broadcast %c-2147483648_i32_36 : i32 to vector<8x16xi32>
    %103 = arith.select %101, %102, %85 : vector<8x16xi1>, vector<8x16xi32>
    %cst_37 = arith.constant dense<-2147483648> : vector<8xi32>
    %104 = vector.multi_reduction <maxsi>, %103, %cst_37 [1] : vector<8x16xi32> to vector<8xi32>
    %105 = vector.shape_cast %104 : vector<8xi32> to vector<8x1xi32>
    %c15_i32_38 = arith.constant 15 : i32
    %106 = vector.broadcast %c15_i32_38 : i32 to vector<8x1xi32>
    %107 = arith.andi %105, %106 : vector<8x1xi32>
    %c15_i32_39 = arith.constant 15 : i32
    %108 = vector.broadcast %c15_i32_39 : i32 to vector<8x1xi32>
    %109 = arith.subi %108, %107 : vector<8x1xi32>
    %c-16_i32_40 = arith.constant -16 : i32
    %110 = vector.broadcast %c-16_i32_40 : i32 to vector<8x1xi32>
    %111 = arith.andi %105, %110 : vector<8x1xi32>
    %c0_i32_41 = arith.constant 0 : i32
    %112 = vector.broadcast %c0_i32_41 : i32 to vector<8x1xi32>
    %113 = arith.cmpi sge, %111, %112 : vector<8x1xi32>
    %c2147483647_i32_42 = arith.constant 2147483647 : i32
    %114 = vector.broadcast %c2147483647_i32_42 : i32 to vector<8x1xi32>
    %115 = arith.xori %111, %114 : vector<8x1xi32>
    %116 = arith.select %113, %111, %115 : vector<8x1xi1>, vector<8x1xi32>
    %117 = tpu.bitcast %116 : vector<8x1xi32> -> vector<8x1xf32>
    %118 = vector.extract_strided_slice %4 {offsets = [0, 32], sizes = [8, 16], strides = [1, 1]} : vector<8x64xf32> to vector<8x16xf32>
    %cst_43 = arith.constant dense<0.000000e+00> : vector<8xf32>
    %119 = vector.multi_reduction <add>, %118, %cst_43 [1] : vector<8x16xf32> to vector<8xf32>
    %120 = vector.shape_cast %119 : vector<8xf32> to vector<8x1xf32>
    %cst_44 = arith.constant 1.600000e+01 : f32
    %121 = vector.broadcast %cst_44 : f32 to vector<8x1xf32>
    %122 = arith.divf %120, %121 : vector<8x1xf32>
    %123 = vector.broadcast %122 : vector<8x1xf32> to vector<8x16xf32>
    %124 = arith.subf %118, %123 : vector<8x16xf32>
    %125 = arith.mulf %124, %124 : vector<8x16xf32>
    %cst_45 = arith.constant dense<0.000000e+00> : vector<8xf32>
    %126 = vector.multi_reduction <add>, %125, %cst_45 [1] : vector<8x16xf32> to vector<8xf32>
    %127 = vector.shape_cast %126 : vector<8xf32> to vector<8x1xf32>
    %cst_46 = arith.constant 1.600000e+01 : f32
    %128 = vector.broadcast %cst_46 : f32 to vector<8x1xf32>
    %129 = arith.divf %127, %128 : vector<8x1xf32>
    %130 = vector.broadcast %122 : vector<8x1xf32> to vector<8x16xf32>
    %131 = arith.subf %118, %130 : vector<8x16xf32>
    %cst_47 = arith.constant 9.99999974E-6 : f32
    %132 = vector.broadcast %cst_47 : f32 to vector<8x1xf32>
    %133 = arith.addf %129, %132 : vector<8x1xf32>
    %134 = math.rsqrt %133 : vector<8x1xf32>
    %135 = vector.broadcast %134 : vector<8x1xf32> to vector<8x16xf32>
    %136 = arith.mulf %131, %135 : vector<8x16xf32>
    %137 = vector.broadcast %1 : vector<1x16xf32> to vector<8x16xf32>
    %138 = arith.mulf %136, %137 : vector<8x16xf32>
    %139 = vector.broadcast %2 : vector<1x16xf32> to vector<8x16xf32>
    %140 = arith.addf %138, %139 : vector<8x16xf32>
    %141 = arith.truncf %140 : vector<8x16xf32> to vector<8x16xbf16>
    %c2 = arith.constant 2 : index
    %c0_48 = arith.constant 0 : index
    %c0_49 = arith.constant 0 : index
    %142 = vector.load %arg5[%c2, %c0_48, %c0_49] : memref<4x16x16xbf16, #tpu.memory_space<vmem>>, vector<1x16x16xbf16>
    %143 = vector.shape_cast %142 : vector<1x16x16xbf16> to vector<16x16xbf16>
    %cst_50 = arith.constant dense<0.000000e+00> : vector<8x16xf32>
    %144 = tpu.matmul %141, %143, %cst_50 {dimension_numbers = #tpu.dot_dimension_numbers<[1], [0], [0], [1], [0, 0, 1, 1], [], []>} : vector<8x16xbf16>, vector<16x16xbf16>, vector<8x16xf32> -> vector<8x16xf32>
    %145 = tpu.bitcast %144 : vector<8x16xf32> -> vector<8x16xi32>
    %c0_i32_51 = arith.constant 0 : i32
    %146 = vector.broadcast %c0_i32_51 : i32 to vector<8x16xi32>
    %147 = arith.cmpi sge, %145, %146 : vector<8x16xi32>
    %c2147483647_i32_52 = arith.constant 2147483647 : i32
    %148 = vector.broadcast %c2147483647_i32_52 : i32 to vector<8x16xi32>
    %149 = arith.xori %145, %148 : vector<8x16xi32>
    %150 = arith.select %147, %145, %149 : vector<8x16xi1>, vector<8x16xi32>
    %c8_i32_53 = arith.constant 8 : i32
    %151 = vector.broadcast %c8_i32_53 : i32 to vector<8x16xi32>
    %152 = arith.addi %150, %151 : vector<8x16xi32>
    %c-16_i32_54 = arith.constant -16 : i32
    %153 = vector.broadcast %c-16_i32_54 : i32 to vector<8x16xi32>
    %154 = arith.andi %152, %153 : vector<8x16xi32>
    %c15_i32_55 = arith.constant 15 : i32
    %155 = vector.broadcast %c15_i32_55 : i32 to vector<8x16xi32>
    %156 = arith.subi %155, %5 : vector<8x16xi32>
    %157 = arith.ori %154, %156 : vector<8x16xi32>
    %cst_56 = arith.constant dense<-2147483648> : vector<8xi32>
    %158 = vector.multi_reduction <maxsi>, %157, %cst_56 [1] : vector<8x16xi32> to vector<8xi32>
    %159 = vector.shape_cast %158 : vector<8xi32> to vector<8x1xi32>
    %c15_i32_57 = arith.constant 15 : i32
    %160 = vector.broadcast %c15_i32_57 : i32 to vector<8x1xi32>
    %161 = arith.andi %159, %160 : vector<8x1xi32>
    %c15_i32_58 = arith.constant 15 : i32
    %162 = vector.broadcast %c15_i32_58 : i32 to vector<8x1xi32>
    %163 = arith.subi %162, %161 : vector<8x1xi32>
    %c-16_i32_59 = arith.constant -16 : i32
    %164 = vector.broadcast %c-16_i32_59 : i32 to vector<8x1xi32>
    %165 = arith.andi %159, %164 : vector<8x1xi32>
    %c0_i32_60 = arith.constant 0 : i32
    %166 = vector.broadcast %c0_i32_60 : i32 to vector<8x1xi32>
    %167 = arith.cmpi sge, %165, %166 : vector<8x1xi32>
    %c2147483647_i32_61 = arith.constant 2147483647 : i32
    %168 = vector.broadcast %c2147483647_i32_61 : i32 to vector<8x1xi32>
    %169 = arith.xori %165, %168 : vector<8x1xi32>
    %170 = arith.select %167, %165, %169 : vector<8x1xi1>, vector<8x1xi32>
    %171 = tpu.bitcast %170 : vector<8x1xi32> -> vector<8x1xf32>
    %172 = vector.broadcast %159 : vector<8x1xi32> to vector<8x16xi32>
    %173 = arith.cmpi eq, %157, %172 : vector<8x16xi32>
    %c-2147483648_i32_62 = arith.constant -2147483648 : i32
    %174 = vector.broadcast %c-2147483648_i32_62 : i32 to vector<8x16xi32>
    %175 = arith.select %173, %174, %157 : vector<8x16xi1>, vector<8x16xi32>
    %cst_63 = arith.constant dense<-2147483648> : vector<8xi32>
    %176 = vector.multi_reduction <maxsi>, %175, %cst_63 [1] : vector<8x16xi32> to vector<8xi32>
    %177 = vector.shape_cast %176 : vector<8xi32> to vector<8x1xi32>
    %c15_i32_64 = arith.constant 15 : i32
    %178 = vector.broadcast %c15_i32_64 : i32 to vector<8x1xi32>
    %179 = arith.andi %177, %178 : vector<8x1xi32>
    %c15_i32_65 = arith.constant 15 : i32
    %180 = vector.broadcast %c15_i32_65 : i32 to vector<8x1xi32>
    %181 = arith.subi %180, %179 : vector<8x1xi32>
    %c-16_i32_66 = arith.constant -16 : i32
    %182 = vector.broadcast %c-16_i32_66 : i32 to vector<8x1xi32>
    %183 = arith.andi %177, %182 : vector<8x1xi32>
    %c0_i32_67 = arith.constant 0 : i32
    %184 = vector.broadcast %c0_i32_67 : i32 to vector<8x1xi32>
    %185 = arith.cmpi sge, %183, %184 : vector<8x1xi32>
    %c2147483647_i32_68 = arith.constant 2147483647 : i32
    %186 = vector.broadcast %c2147483647_i32_68 : i32 to vector<8x1xi32>
    %187 = arith.xori %183, %186 : vector<8x1xi32>
    %188 = arith.select %185, %183, %187 : vector<8x1xi1>, vector<8x1xi32>
    %189 = tpu.bitcast %188 : vector<8x1xi32> -> vector<8x1xf32>
    %190 = vector.broadcast %177 : vector<8x1xi32> to vector<8x16xi32>
    %191 = arith.cmpi eq, %175, %190 : vector<8x16xi32>
    %c-2147483648_i32_69 = arith.constant -2147483648 : i32
    %192 = vector.broadcast %c-2147483648_i32_69 : i32 to vector<8x16xi32>
    %193 = arith.select %191, %192, %175 : vector<8x16xi1>, vector<8x16xi32>
    %cst_70 = arith.constant dense<-2147483648> : vector<8xi32>
    %194 = vector.multi_reduction <maxsi>, %193, %cst_70 [1] : vector<8x16xi32> to vector<8xi32>
    %195 = vector.shape_cast %194 : vector<8xi32> to vector<8x1xi32>
    %c15_i32_71 = arith.constant 15 : i32
    %196 = vector.broadcast %c15_i32_71 : i32 to vector<8x1xi32>
    %197 = arith.andi %195, %196 : vector<8x1xi32>
    %c15_i32_72 = arith.constant 15 : i32
    %198 = vector.broadcast %c15_i32_72 : i32 to vector<8x1xi32>
    %199 = arith.subi %198, %197 : vector<8x1xi32>
    %c-16_i32_73 = arith.constant -16 : i32
    %200 = vector.broadcast %c-16_i32_73 : i32 to vector<8x1xi32>
    %201 = arith.andi %195, %200 : vector<8x1xi32>
    %c0_i32_74 = arith.constant 0 : i32
    %202 = vector.broadcast %c0_i32_74 : i32 to vector<8x1xi32>
    %203 = arith.cmpi sge, %201, %202 : vector<8x1xi32>
    %c2147483647_i32_75 = arith.constant 2147483647 : i32
    %204 = vector.broadcast %c2147483647_i32_75 : i32 to vector<8x1xi32>
    %205 = arith.xori %201, %204 : vector<8x1xi32>
    %206 = arith.select %203, %201, %205 : vector<8x1xi1>, vector<8x1xi32>
    %207 = tpu.bitcast %206 : vector<8x1xi32> -> vector<8x1xf32>
    %208 = vector.broadcast %195 : vector<8x1xi32> to vector<8x16xi32>
    %209 = arith.cmpi eq, %193, %208 : vector<8x16xi32>
    %c-2147483648_i32_76 = arith.constant -2147483648 : i32
    %210 = vector.broadcast %c-2147483648_i32_76 : i32 to vector<8x16xi32>
    %211 = arith.select %209, %210, %193 : vector<8x16xi1>, vector<8x16xi32>
    %cst_77 = arith.constant dense<-2147483648> : vector<8xi32>
    %212 = vector.multi_reduction <maxsi>, %211, %cst_77 [1] : vector<8x16xi32> to vector<8xi32>
    %213 = vector.shape_cast %212 : vector<8xi32> to vector<8x1xi32>
    %c15_i32_78 = arith.constant 15 : i32
    %214 = vector.broadcast %c15_i32_78 : i32 to vector<8x1xi32>
    %215 = arith.andi %213, %214 : vector<8x1xi32>
    %c15_i32_79 = arith.constant 15 : i32
    %216 = vector.broadcast %c15_i32_79 : i32 to vector<8x1xi32>
    %217 = arith.subi %216, %215 : vector<8x1xi32>
    %c-16_i32_80 = arith.constant -16 : i32
    %218 = vector.broadcast %c-16_i32_80 : i32 to vector<8x1xi32>
    %219 = arith.andi %213, %218 : vector<8x1xi32>
    %c0_i32_81 = arith.constant 0 : i32
    %220 = vector.broadcast %c0_i32_81 : i32 to vector<8x1xi32>
    %221 = arith.cmpi sge, %219, %220 : vector<8x1xi32>
    %c2147483647_i32_82 = arith.constant 2147483647 : i32
    %222 = vector.broadcast %c2147483647_i32_82 : i32 to vector<8x1xi32>
    %223 = arith.xori %219, %222 : vector<8x1xi32>
    %224 = arith.select %221, %219, %223 : vector<8x1xi1>, vector<8x1xi32>
    %225 = tpu.bitcast %224 : vector<8x1xi32> -> vector<8x1xf32>
    %226 = tpu.concatenate %171, %189, %207, %225 in 1 : vector<8x1xf32>, vector<8x1xf32>, vector<8x1xf32>, vector<8x1xf32> -> vector<8x4xf32>
    %227 = tpu.concatenate %163, %181, %199, %217 in 1 : vector<8x1xi32>, vector<8x1xi32>, vector<8x1xi32>, vector<8x1xi32> -> vector<8x4xi32>
    %228 = tpu.concatenate %55, %73, %91, %109 in 1 : vector<8x1xi32>, vector<8x1xi32>, vector<8x1xi32>, vector<8x1xi32> -> vector<8x4xi32>
    %229 = vector.broadcast %63 : vector<8x1xf32> to vector<8x4xf32>
    %230 = arith.addf %229, %226 : vector<8x4xf32>
    %231 = vector.broadcast %81 : vector<8x1xf32> to vector<8x4xf32>
    %232 = arith.addf %231, %226 : vector<8x4xf32>
    %233 = vector.broadcast %99 : vector<8x1xf32> to vector<8x4xf32>
    %234 = arith.addf %233, %226 : vector<8x4xf32>
    %235 = vector.broadcast %117 : vector<8x1xf32> to vector<8x4xf32>
    %236 = arith.addf %235, %226 : vector<8x4xf32>
    %237 = tpu.concatenate %230, %232, %234, %236 in 1 : vector<8x4xf32>, vector<8x4xf32>, vector<8x4xf32>, vector<8x4xf32> -> vector<8x16xf32>
    %238 = tpu.bitcast %237 : vector<8x16xf32> -> vector<8x16xi32>
    %c0_i32_83 = arith.constant 0 : i32
    %239 = vector.broadcast %c0_i32_83 : i32 to vector<8x16xi32>
    %240 = arith.cmpi sge, %238, %239 : vector<8x16xi32>
    %c2147483647_i32_84 = arith.constant 2147483647 : i32
    %241 = vector.broadcast %c2147483647_i32_84 : i32 to vector<8x16xi32>
    %242 = arith.xori %238, %241 : vector<8x16xi32>
    %243 = arith.select %240, %238, %242 : vector<8x16xi1>, vector<8x16xi32>
    %c8_i32_85 = arith.constant 8 : i32
    %244 = vector.broadcast %c8_i32_85 : i32 to vector<8x16xi32>
    %245 = arith.addi %243, %244 : vector<8x16xi32>
    %c-16_i32_86 = arith.constant -16 : i32
    %246 = vector.broadcast %c-16_i32_86 : i32 to vector<8x16xi32>
    %247 = arith.andi %245, %246 : vector<8x16xi32>
    %c15_i32_87 = arith.constant 15 : i32
    %248 = vector.broadcast %c15_i32_87 : i32 to vector<8x16xi32>
    %249 = arith.subi %248, %7 : vector<8x16xi32>
    %250 = arith.ori %247, %249 : vector<8x16xi32>
    %cst_88 = arith.constant dense<-2147483648> : vector<8xi32>
    %251 = vector.multi_reduction <maxsi>, %250, %cst_88 [1] : vector<8x16xi32> to vector<8xi32>
    %252 = vector.shape_cast %251 : vector<8xi32> to vector<8x1xi32>
    %c15_i32_89 = arith.constant 15 : i32
    %253 = vector.broadcast %c15_i32_89 : i32 to vector<8x1xi32>
    %254 = arith.andi %252, %253 : vector<8x1xi32>
    %c15_i32_90 = arith.constant 15 : i32
    %255 = vector.broadcast %c15_i32_90 : i32 to vector<8x1xi32>
    %256 = arith.subi %255, %254 : vector<8x1xi32>
    %c-16_i32_91 = arith.constant -16 : i32
    %257 = vector.broadcast %c-16_i32_91 : i32 to vector<8x1xi32>
    %258 = arith.andi %252, %257 : vector<8x1xi32>
    %c0_i32_92 = arith.constant 0 : i32
    %259 = vector.broadcast %c0_i32_92 : i32 to vector<8x1xi32>
    %260 = arith.cmpi sge, %258, %259 : vector<8x1xi32>
    %c2147483647_i32_93 = arith.constant 2147483647 : i32
    %261 = vector.broadcast %c2147483647_i32_93 : i32 to vector<8x1xi32>
    %262 = arith.xori %258, %261 : vector<8x1xi32>
    %263 = arith.select %260, %258, %262 : vector<8x1xi1>, vector<8x1xi32>
    %264 = tpu.bitcast %263 : vector<8x1xi32> -> vector<8x1xf32>
    %265 = vector.broadcast %252 : vector<8x1xi32> to vector<8x16xi32>
    %266 = arith.cmpi eq, %250, %265 : vector<8x16xi32>
    %c-2147483648_i32_94 = arith.constant -2147483648 : i32
    %267 = vector.broadcast %c-2147483648_i32_94 : i32 to vector<8x16xi32>
    %268 = arith.select %266, %267, %250 : vector<8x16xi1>, vector<8x16xi32>
    %cst_95 = arith.constant dense<-2147483648> : vector<8xi32>
    %269 = vector.multi_reduction <maxsi>, %268, %cst_95 [1] : vector<8x16xi32> to vector<8xi32>
    %270 = vector.shape_cast %269 : vector<8xi32> to vector<8x1xi32>
    %c15_i32_96 = arith.constant 15 : i32
    %271 = vector.broadcast %c15_i32_96 : i32 to vector<8x1xi32>
    %272 = arith.andi %270, %271 : vector<8x1xi32>
    %c15_i32_97 = arith.constant 15 : i32
    %273 = vector.broadcast %c15_i32_97 : i32 to vector<8x1xi32>
    %274 = arith.subi %273, %272 : vector<8x1xi32>
    %c-16_i32_98 = arith.constant -16 : i32
    %275 = vector.broadcast %c-16_i32_98 : i32 to vector<8x1xi32>
    %276 = arith.andi %270, %275 : vector<8x1xi32>
    %c0_i32_99 = arith.constant 0 : i32
    %277 = vector.broadcast %c0_i32_99 : i32 to vector<8x1xi32>
    %278 = arith.cmpi sge, %276, %277 : vector<8x1xi32>
    %c2147483647_i32_100 = arith.constant 2147483647 : i32
    %279 = vector.broadcast %c2147483647_i32_100 : i32 to vector<8x1xi32>
    %280 = arith.xori %276, %279 : vector<8x1xi32>
    %281 = arith.select %278, %276, %280 : vector<8x1xi1>, vector<8x1xi32>
    %282 = tpu.bitcast %281 : vector<8x1xi32> -> vector<8x1xf32>
    %283 = vector.broadcast %270 : vector<8x1xi32> to vector<8x16xi32>
    %284 = arith.cmpi eq, %268, %283 : vector<8x16xi32>
    %c-2147483648_i32_101 = arith.constant -2147483648 : i32
    %285 = vector.broadcast %c-2147483648_i32_101 : i32 to vector<8x16xi32>
    %286 = arith.select %284, %285, %268 : vector<8x16xi1>, vector<8x16xi32>
    %cst_102 = arith.constant dense<-2147483648> : vector<8xi32>
    %287 = vector.multi_reduction <maxsi>, %286, %cst_102 [1] : vector<8x16xi32> to vector<8xi32>
    %288 = vector.shape_cast %287 : vector<8xi32> to vector<8x1xi32>
    %c15_i32_103 = arith.constant 15 : i32
    %289 = vector.broadcast %c15_i32_103 : i32 to vector<8x1xi32>
    %290 = arith.andi %288, %289 : vector<8x1xi32>
    %c15_i32_104 = arith.constant 15 : i32
    %291 = vector.broadcast %c15_i32_104 : i32 to vector<8x1xi32>
    %292 = arith.subi %291, %290 : vector<8x1xi32>
    %c-16_i32_105 = arith.constant -16 : i32
    %293 = vector.broadcast %c-16_i32_105 : i32 to vector<8x1xi32>
    %294 = arith.andi %288, %293 : vector<8x1xi32>
    %c0_i32_106 = arith.constant 0 : i32
    %295 = vector.broadcast %c0_i32_106 : i32 to vector<8x1xi32>
    %296 = arith.cmpi sge, %294, %295 : vector<8x1xi32>
    %c2147483647_i32_107 = arith.constant 2147483647 : i32
    %297 = vector.broadcast %c2147483647_i32_107 : i32 to vector<8x1xi32>
    %298 = arith.xori %294, %297 : vector<8x1xi32>
    %299 = arith.select %296, %294, %298 : vector<8x1xi1>, vector<8x1xi32>
    %300 = tpu.bitcast %299 : vector<8x1xi32> -> vector<8x1xf32>
    %301 = vector.broadcast %288 : vector<8x1xi32> to vector<8x16xi32>
    %302 = arith.cmpi eq, %286, %301 : vector<8x16xi32>
    %c-2147483648_i32_108 = arith.constant -2147483648 : i32
    %303 = vector.broadcast %c-2147483648_i32_108 : i32 to vector<8x16xi32>
    %304 = arith.select %302, %303, %286 : vector<8x16xi1>, vector<8x16xi32>
    %cst_109 = arith.constant dense<-2147483648> : vector<8xi32>
    %305 = vector.multi_reduction <maxsi>, %304, %cst_109 [1] : vector<8x16xi32> to vector<8xi32>
    %306 = vector.shape_cast %305 : vector<8xi32> to vector<8x1xi32>
    %c15_i32_110 = arith.constant 15 : i32
    %307 = vector.broadcast %c15_i32_110 : i32 to vector<8x1xi32>
    %308 = arith.andi %306, %307 : vector<8x1xi32>
    %c15_i32_111 = arith.constant 15 : i32
    %309 = vector.broadcast %c15_i32_111 : i32 to vector<8x1xi32>
    %310 = arith.subi %309, %308 : vector<8x1xi32>
    %c-16_i32_112 = arith.constant -16 : i32
    %311 = vector.broadcast %c-16_i32_112 : i32 to vector<8x1xi32>
    %312 = arith.andi %306, %311 : vector<8x1xi32>
    %c0_i32_113 = arith.constant 0 : i32
    %313 = vector.broadcast %c0_i32_113 : i32 to vector<8x1xi32>
    %314 = arith.cmpi sge, %312, %313 : vector<8x1xi32>
    %c2147483647_i32_114 = arith.constant 2147483647 : i32
    %315 = vector.broadcast %c2147483647_i32_114 : i32 to vector<8x1xi32>
    %316 = arith.xori %312, %315 : vector<8x1xi32>
    %317 = arith.select %314, %312, %316 : vector<8x1xi1>, vector<8x1xi32>
    %318 = tpu.bitcast %317 : vector<8x1xi32> -> vector<8x1xf32>
    %319 = arith.subf %264, %264 : vector<8x1xf32>
    %320 = math.exp %319 : vector<8x1xf32>
    %321 = arith.subf %282, %264 : vector<8x1xf32>
    %322 = math.exp %321 : vector<8x1xf32>
    %323 = arith.subf %300, %264 : vector<8x1xf32>
    %324 = math.exp %323 : vector<8x1xf32>
    %325 = arith.subf %318, %264 : vector<8x1xf32>
    %326 = math.exp %325 : vector<8x1xf32>
    %327 = arith.addf %320, %322 : vector<8x1xf32>
    %328 = arith.addf %327, %324 : vector<8x1xf32>
    %329 = arith.addf %328, %326 : vector<8x1xf32>
    %cst_115 = arith.constant 1.000000e+00 : f32
    %330 = vector.broadcast %cst_115 : f32 to vector<8x1xf32>
    %331 = arith.divf %330, %329 : vector<8x1xf32>
    %c4_i32 = arith.constant 4 : i32
    %332 = vector.broadcast %c4_i32 : i32 to vector<8x4xi32>
    %333 = arith.muli %6, %332 : vector<8x4xi32>
    %334 = vector.broadcast %256 : vector<8x1xi32> to vector<8x4xi32>
    %335 = arith.cmpi sge, %334, %333 : vector<8x4xi32>
    %c4_i32_116 = arith.constant 4 : i32
    %336 = vector.broadcast %c4_i32_116 : i32 to vector<8x4xi32>
    %337 = arith.muli %6, %336 : vector<8x4xi32>
    %c4_i32_117 = arith.constant 4 : i32
    %338 = vector.broadcast %c4_i32_117 : i32 to vector<8x4xi32>
    %339 = arith.addi %337, %338 : vector<8x4xi32>
    %340 = vector.broadcast %256 : vector<8x1xi32> to vector<8x4xi32>
    %341 = arith.cmpi slt, %340, %339 : vector<8x4xi32>
    %342 = arith.andi %335, %341 : vector<8x4xi1>
    %c0_i32_118 = arith.constant 0 : i32
    %343 = vector.broadcast %c0_i32_118 : i32 to vector<8x4xi32>
    %344 = arith.select %342, %228, %343 : vector<8x4xi1>, vector<8x4xi32>
    %cst_119 = arith.constant dense<-2147483648> : vector<8xi32>
    %345 = vector.multi_reduction <maxsi>, %344, %cst_119 [1] : vector<8x4xi32> to vector<8xi32>
    %346 = vector.shape_cast %345 : vector<8xi32> to vector<8x1xi32>
    %c0_i32_120 = arith.constant 0 : i32
    %347 = vector.broadcast %c0_i32_120 : i32 to vector<8x4xi32>
    %348 = arith.select %342, %6, %347 : vector<8x4xi1>, vector<8x4xi32>
    %cst_121 = arith.constant dense<-2147483648> : vector<8xi32>
    %349 = vector.multi_reduction <maxsi>, %348, %cst_121 [1] : vector<8x4xi32> to vector<8xi32>
    %350 = vector.shape_cast %349 : vector<8xi32> to vector<8x1xi32>
    %c4_i32_122 = arith.constant 4 : i32
    %351 = vector.broadcast %c4_i32_122 : i32 to vector<8x1xi32>
    %352 = arith.muli %350, %351 : vector<8x1xi32>
    %353 = arith.subi %256, %352 : vector<8x1xi32>
    %354 = vector.broadcast %353 : vector<8x1xi32> to vector<8x4xi32>
    %355 = arith.cmpi eq, %6, %354 : vector<8x4xi32>
    %c0_i32_123 = arith.constant 0 : i32
    %356 = vector.broadcast %c0_i32_123 : i32 to vector<8x4xi32>
    %357 = arith.select %355, %227, %356 : vector<8x4xi1>, vector<8x4xi32>
    %cst_124 = arith.constant dense<-2147483648> : vector<8xi32>
    %358 = vector.multi_reduction <maxsi>, %357, %cst_124 [1] : vector<8x4xi32> to vector<8xi32>
    %359 = vector.shape_cast %358 : vector<8xi32> to vector<8x1xi32>
    %c16_i32 = arith.constant 16 : i32
    %360 = vector.broadcast %c16_i32 : i32 to vector<8x1xi32>
    %361 = arith.muli %346, %360 : vector<8x1xi32>
    %362 = arith.addi %361, %359 : vector<8x1xi32>
    %363 = arith.mulf %320, %331 : vector<8x1xf32>
    %364 = vector.broadcast %362 : vector<8x1xi32> to vector<8x256xi32>
    %365 = arith.cmpi eq, %8, %364 : vector<8x256xi32>
    %cst_125 = arith.constant 0.000000e+00 : f32
    %366 = vector.shape_cast %363 : vector<8x1xf32> to vector<8x1xf32>
    %367 = vector.broadcast %366 : vector<8x1xf32> to vector<8x256xf32>
    %368 = vector.broadcast %cst_125 : f32 to vector<8x256xf32>
    %369 = arith.select %365, %367, %368 : vector<8x256xi1>, vector<8x256xf32>
    %370 = arith.addf %9, %369 : vector<8x256xf32>
    %c4_i32_126 = arith.constant 4 : i32
    %371 = vector.broadcast %c4_i32_126 : i32 to vector<8x4xi32>
    %372 = arith.muli %6, %371 : vector<8x4xi32>
    %373 = vector.broadcast %274 : vector<8x1xi32> to vector<8x4xi32>
    %374 = arith.cmpi sge, %373, %372 : vector<8x4xi32>
    %c4_i32_127 = arith.constant 4 : i32
    %375 = vector.broadcast %c4_i32_127 : i32 to vector<8x4xi32>
    %376 = arith.muli %6, %375 : vector<8x4xi32>
    %c4_i32_128 = arith.constant 4 : i32
    %377 = vector.broadcast %c4_i32_128 : i32 to vector<8x4xi32>
    %378 = arith.addi %376, %377 : vector<8x4xi32>
    %379 = vector.broadcast %274 : vector<8x1xi32> to vector<8x4xi32>
    %380 = arith.cmpi slt, %379, %378 : vector<8x4xi32>
    %381 = arith.andi %374, %380 : vector<8x4xi1>
    %c0_i32_129 = arith.constant 0 : i32
    %382 = vector.broadcast %c0_i32_129 : i32 to vector<8x4xi32>
    %383 = arith.select %381, %228, %382 : vector<8x4xi1>, vector<8x4xi32>
    %cst_130 = arith.constant dense<-2147483648> : vector<8xi32>
    %384 = vector.multi_reduction <maxsi>, %383, %cst_130 [1] : vector<8x4xi32> to vector<8xi32>
    %385 = vector.shape_cast %384 : vector<8xi32> to vector<8x1xi32>
    %c0_i32_131 = arith.constant 0 : i32
    %386 = vector.broadcast %c0_i32_131 : i32 to vector<8x4xi32>
    %387 = arith.select %381, %6, %386 : vector<8x4xi1>, vector<8x4xi32>
    %cst_132 = arith.constant dense<-2147483648> : vector<8xi32>
    %388 = vector.multi_reduction <maxsi>, %387, %cst_132 [1] : vector<8x4xi32> to vector<8xi32>
    %389 = vector.shape_cast %388 : vector<8xi32> to vector<8x1xi32>
    %c4_i32_133 = arith.constant 4 : i32
    %390 = vector.broadcast %c4_i32_133 : i32 to vector<8x1xi32>
    %391 = arith.muli %389, %390 : vector<8x1xi32>
    %392 = arith.subi %274, %391 : vector<8x1xi32>
    %393 = vector.broadcast %392 : vector<8x1xi32> to vector<8x4xi32>
    %394 = arith.cmpi eq, %6, %393 : vector<8x4xi32>
    %c0_i32_134 = arith.constant 0 : i32
    %395 = vector.broadcast %c0_i32_134 : i32 to vector<8x4xi32>
    %396 = arith.select %394, %227, %395 : vector<8x4xi1>, vector<8x4xi32>
    %cst_135 = arith.constant dense<-2147483648> : vector<8xi32>
    %397 = vector.multi_reduction <maxsi>, %396, %cst_135 [1] : vector<8x4xi32> to vector<8xi32>
    %398 = vector.shape_cast %397 : vector<8xi32> to vector<8x1xi32>
    %c16_i32_136 = arith.constant 16 : i32
    %399 = vector.broadcast %c16_i32_136 : i32 to vector<8x1xi32>
    %400 = arith.muli %385, %399 : vector<8x1xi32>
    %401 = arith.addi %400, %398 : vector<8x1xi32>
    %402 = arith.mulf %322, %331 : vector<8x1xf32>
    %403 = vector.broadcast %401 : vector<8x1xi32> to vector<8x256xi32>
    %404 = arith.cmpi eq, %8, %403 : vector<8x256xi32>
    %cst_137 = arith.constant 0.000000e+00 : f32
    %405 = vector.shape_cast %402 : vector<8x1xf32> to vector<8x1xf32>
    %406 = vector.broadcast %405 : vector<8x1xf32> to vector<8x256xf32>
    %407 = vector.broadcast %cst_137 : f32 to vector<8x256xf32>
    %408 = arith.select %404, %406, %407 : vector<8x256xi1>, vector<8x256xf32>
    %409 = arith.addf %370, %408 : vector<8x256xf32>
    %c4_i32_138 = arith.constant 4 : i32
    %410 = vector.broadcast %c4_i32_138 : i32 to vector<8x4xi32>
    %411 = arith.muli %6, %410 : vector<8x4xi32>
    %412 = vector.broadcast %292 : vector<8x1xi32> to vector<8x4xi32>
    %413 = arith.cmpi sge, %412, %411 : vector<8x4xi32>
    %c4_i32_139 = arith.constant 4 : i32
    %414 = vector.broadcast %c4_i32_139 : i32 to vector<8x4xi32>
    %415 = arith.muli %6, %414 : vector<8x4xi32>
    %c4_i32_140 = arith.constant 4 : i32
    %416 = vector.broadcast %c4_i32_140 : i32 to vector<8x4xi32>
    %417 = arith.addi %415, %416 : vector<8x4xi32>
    %418 = vector.broadcast %292 : vector<8x1xi32> to vector<8x4xi32>
    %419 = arith.cmpi slt, %418, %417 : vector<8x4xi32>
    %420 = arith.andi %413, %419 : vector<8x4xi1>
    %c0_i32_141 = arith.constant 0 : i32
    %421 = vector.broadcast %c0_i32_141 : i32 to vector<8x4xi32>
    %422 = arith.select %420, %228, %421 : vector<8x4xi1>, vector<8x4xi32>
    %cst_142 = arith.constant dense<-2147483648> : vector<8xi32>
    %423 = vector.multi_reduction <maxsi>, %422, %cst_142 [1] : vector<8x4xi32> to vector<8xi32>
    %424 = vector.shape_cast %423 : vector<8xi32> to vector<8x1xi32>
    %c0_i32_143 = arith.constant 0 : i32
    %425 = vector.broadcast %c0_i32_143 : i32 to vector<8x4xi32>
    %426 = arith.select %420, %6, %425 : vector<8x4xi1>, vector<8x4xi32>
    %cst_144 = arith.constant dense<-2147483648> : vector<8xi32>
    %427 = vector.multi_reduction <maxsi>, %426, %cst_144 [1] : vector<8x4xi32> to vector<8xi32>
    %428 = vector.shape_cast %427 : vector<8xi32> to vector<8x1xi32>
    %c4_i32_145 = arith.constant 4 : i32
    %429 = vector.broadcast %c4_i32_145 : i32 to vector<8x1xi32>
    %430 = arith.muli %428, %429 : vector<8x1xi32>
    %431 = arith.subi %292, %430 : vector<8x1xi32>
    %432 = vector.broadcast %431 : vector<8x1xi32> to vector<8x4xi32>
    %433 = arith.cmpi eq, %6, %432 : vector<8x4xi32>
    %c0_i32_146 = arith.constant 0 : i32
    %434 = vector.broadcast %c0_i32_146 : i32 to vector<8x4xi32>
    %435 = arith.select %433, %227, %434 : vector<8x4xi1>, vector<8x4xi32>
    %cst_147 = arith.constant dense<-2147483648> : vector<8xi32>
    %436 = vector.multi_reduction <maxsi>, %435, %cst_147 [1] : vector<8x4xi32> to vector<8xi32>
    %437 = vector.shape_cast %436 : vector<8xi32> to vector<8x1xi32>
    %c16_i32_148 = arith.constant 16 : i32
    %438 = vector.broadcast %c16_i32_148 : i32 to vector<8x1xi32>
    %439 = arith.muli %424, %438 : vector<8x1xi32>
    %440 = arith.addi %439, %437 : vector<8x1xi32>
    %441 = arith.mulf %324, %331 : vector<8x1xf32>
    %442 = vector.broadcast %440 : vector<8x1xi32> to vector<8x256xi32>
    %443 = arith.cmpi eq, %8, %442 : vector<8x256xi32>
    %cst_149 = arith.constant 0.000000e+00 : f32
    %444 = vector.shape_cast %441 : vector<8x1xf32> to vector<8x1xf32>
    %445 = vector.broadcast %444 : vector<8x1xf32> to vector<8x256xf32>
    %446 = vector.broadcast %cst_149 : f32 to vector<8x256xf32>
    %447 = arith.select %443, %445, %446 : vector<8x256xi1>, vector<8x256xf32>
    %448 = arith.addf %409, %447 : vector<8x256xf32>
    %c4_i32_150 = arith.constant 4 : i32
    %449 = vector.broadcast %c4_i32_150 : i32 to vector<8x4xi32>
    %450 = arith.muli %6, %449 : vector<8x4xi32>
    %451 = vector.broadcast %310 : vector<8x1xi32> to vector<8x4xi32>
    %452 = arith.cmpi sge, %451, %450 : vector<8x4xi32>
    %c4_i32_151 = arith.constant 4 : i32
    %453 = vector.broadcast %c4_i32_151 : i32 to vector<8x4xi32>
    %454 = arith.muli %6, %453 : vector<8x4xi32>
    %c4_i32_152 = arith.constant 4 : i32
    %455 = vector.broadcast %c4_i32_152 : i32 to vector<8x4xi32>
    %456 = arith.addi %454, %455 : vector<8x4xi32>
    %457 = vector.broadcast %310 : vector<8x1xi32> to vector<8x4xi32>
    %458 = arith.cmpi slt, %457, %456 : vector<8x4xi32>
    %459 = arith.andi %452, %458 : vector<8x4xi1>
    %c0_i32_153 = arith.constant 0 : i32
    %460 = vector.broadcast %c0_i32_153 : i32 to vector<8x4xi32>
    %461 = arith.select %459, %228, %460 : vector<8x4xi1>, vector<8x4xi32>
    %cst_154 = arith.constant dense<-2147483648> : vector<8xi32>
    %462 = vector.multi_reduction <maxsi>, %461, %cst_154 [1] : vector<8x4xi32> to vector<8xi32>
    %463 = vector.shape_cast %462 : vector<8xi32> to vector<8x1xi32>
    %c0_i32_155 = arith.constant 0 : i32
    %464 = vector.broadcast %c0_i32_155 : i32 to vector<8x4xi32>
    %465 = arith.select %459, %6, %464 : vector<8x4xi1>, vector<8x4xi32>
    %cst_156 = arith.constant dense<-2147483648> : vector<8xi32>
    %466 = vector.multi_reduction <maxsi>, %465, %cst_156 [1] : vector<8x4xi32> to vector<8xi32>
    %467 = vector.shape_cast %466 : vector<8xi32> to vector<8x1xi32>
    %c4_i32_157 = arith.constant 4 : i32
    %468 = vector.broadcast %c4_i32_157 : i32 to vector<8x1xi32>
    %469 = arith.muli %467, %468 : vector<8x1xi32>
    %470 = arith.subi %310, %469 : vector<8x1xi32>
    %471 = vector.broadcast %470 : vector<8x1xi32> to vector<8x4xi32>
    %472 = arith.cmpi eq, %6, %471 : vector<8x4xi32>
    %c0_i32_158 = arith.constant 0 : i32
    %473 = vector.broadcast %c0_i32_158 : i32 to vector<8x4xi32>
    %474 = arith.select %472, %227, %473 : vector<8x4xi1>, vector<8x4xi32>
    %cst_159 = arith.constant dense<-2147483648> : vector<8xi32>
    %475 = vector.multi_reduction <maxsi>, %474, %cst_159 [1] : vector<8x4xi32> to vector<8xi32>
    %476 = vector.shape_cast %475 : vector<8xi32> to vector<8x1xi32>
    %c16_i32_160 = arith.constant 16 : i32
    %477 = vector.broadcast %c16_i32_160 : i32 to vector<8x1xi32>
    %478 = arith.muli %463, %477 : vector<8x1xi32>
    %479 = arith.addi %478, %476 : vector<8x1xi32>
    %480 = arith.mulf %326, %331 : vector<8x1xf32>
    %481 = vector.broadcast %479 : vector<8x1xi32> to vector<8x256xi32>
    %482 = arith.cmpi eq, %8, %481 : vector<8x256xi32>
    %cst_161 = arith.constant 0.000000e+00 : f32
    %483 = vector.shape_cast %480 : vector<8x1xf32> to vector<8x1xf32>
    %484 = vector.broadcast %483 : vector<8x1xf32> to vector<8x256xf32>
    %485 = vector.broadcast %cst_161 : f32 to vector<8x256xf32>
    %486 = arith.select %482, %484, %485 : vector<8x256xi1>, vector<8x256xf32>
    %487 = arith.addf %448, %486 : vector<8x256xf32>
    %488 = vector.extract_strided_slice %4 {offsets = [0, 16], sizes = [8, 16], strides = [1, 1]} : vector<8x64xf32> to vector<8x16xf32>
    %cst_162 = arith.constant dense<0.000000e+00> : vector<8xf32>
    %489 = vector.multi_reduction <add>, %488, %cst_162 [1] : vector<8x16xf32> to vector<8xf32>
    %490 = vector.shape_cast %489 : vector<8xf32> to vector<8x1xf32>
    %cst_163 = arith.constant 1.600000e+01 : f32
    %491 = vector.broadcast %cst_163 : f32 to vector<8x1xf32>
    %492 = arith.divf %490, %491 : vector<8x1xf32>
    %493 = vector.broadcast %492 : vector<8x1xf32> to vector<8x16xf32>
    %494 = arith.subf %488, %493 : vector<8x16xf32>
    %495 = arith.mulf %494, %494 : vector<8x16xf32>
    %cst_164 = arith.constant dense<0.000000e+00> : vector<8xf32>
    %496 = vector.multi_reduction <add>, %495, %cst_164 [1] : vector<8x16xf32> to vector<8xf32>
    %497 = vector.shape_cast %496 : vector<8xf32> to vector<8x1xf32>
    %cst_165 = arith.constant 1.600000e+01 : f32
    %498 = vector.broadcast %cst_165 : f32 to vector<8x1xf32>
    %499 = arith.divf %497, %498 : vector<8x1xf32>
    %500 = vector.broadcast %492 : vector<8x1xf32> to vector<8x16xf32>
    %501 = arith.subf %488, %500 : vector<8x16xf32>
    %cst_166 = arith.constant 9.99999974E-6 : f32
    %502 = vector.broadcast %cst_166 : f32 to vector<8x1xf32>
    %503 = arith.addf %499, %502 : vector<8x1xf32>
    %504 = math.rsqrt %503 : vector<8x1xf32>
    %505 = vector.broadcast %504 : vector<8x1xf32> to vector<8x16xf32>
    %506 = arith.mulf %501, %505 : vector<8x16xf32>
    %507 = vector.broadcast %1 : vector<1x16xf32> to vector<8x16xf32>
    %508 = arith.mulf %506, %507 : vector<8x16xf32>
    %509 = vector.broadcast %2 : vector<1x16xf32> to vector<8x16xf32>
    %510 = arith.addf %508, %509 : vector<8x16xf32>
    %511 = arith.truncf %510 : vector<8x16xf32> to vector<8x16xbf16>
    %c1 = arith.constant 1 : index
    %c0_167 = arith.constant 0 : index
    %c0_168 = arith.constant 0 : index
    %512 = vector.load %arg5[%c1, %c0_167, %c0_168] : memref<4x16x16xbf16, #tpu.memory_space<vmem>>, vector<1x16x16xbf16>
    %513 = vector.shape_cast %512 : vector<1x16x16xbf16> to vector<16x16xbf16>
    %cst_169 = arith.constant dense<0.000000e+00> : vector<8x16xf32>
    %514 = tpu.matmul %511, %513, %cst_169 {dimension_numbers = #tpu.dot_dimension_numbers<[1], [0], [0], [1], [0, 0, 1, 1], [], []>} : vector<8x16xbf16>, vector<16x16xbf16>, vector<8x16xf32> -> vector<8x16xf32>
    %515 = tpu.bitcast %514 : vector<8x16xf32> -> vector<8x16xi32>
    %c0_i32_170 = arith.constant 0 : i32
    %516 = vector.broadcast %c0_i32_170 : i32 to vector<8x16xi32>
    %517 = arith.cmpi sge, %515, %516 : vector<8x16xi32>
    %c2147483647_i32_171 = arith.constant 2147483647 : i32
    %518 = vector.broadcast %c2147483647_i32_171 : i32 to vector<8x16xi32>
    %519 = arith.xori %515, %518 : vector<8x16xi32>
    %520 = arith.select %517, %515, %519 : vector<8x16xi1>, vector<8x16xi32>
    %c8_i32_172 = arith.constant 8 : i32
    %521 = vector.broadcast %c8_i32_172 : i32 to vector<8x16xi32>
    %522 = arith.addi %520, %521 : vector<8x16xi32>
    %c-16_i32_173 = arith.constant -16 : i32
    %523 = vector.broadcast %c-16_i32_173 : i32 to vector<8x16xi32>
    %524 = arith.andi %522, %523 : vector<8x16xi32>
    %c15_i32_174 = arith.constant 15 : i32
    %525 = vector.broadcast %c15_i32_174 : i32 to vector<8x16xi32>
    %526 = arith.subi %525, %5 : vector<8x16xi32>
    %527 = arith.ori %524, %526 : vector<8x16xi32>
    %cst_175 = arith.constant dense<-2147483648> : vector<8xi32>
    %528 = vector.multi_reduction <maxsi>, %527, %cst_175 [1] : vector<8x16xi32> to vector<8xi32>
    %529 = vector.shape_cast %528 : vector<8xi32> to vector<8x1xi32>
    %c15_i32_176 = arith.constant 15 : i32
    %530 = vector.broadcast %c15_i32_176 : i32 to vector<8x1xi32>
    %531 = arith.andi %529, %530 : vector<8x1xi32>
    %c15_i32_177 = arith.constant 15 : i32
    %532 = vector.broadcast %c15_i32_177 : i32 to vector<8x1xi32>
    %533 = arith.subi %532, %531 : vector<8x1xi32>
    %c-16_i32_178 = arith.constant -16 : i32
    %534 = vector.broadcast %c-16_i32_178 : i32 to vector<8x1xi32>
    %535 = arith.andi %529, %534 : vector<8x1xi32>
    %c0_i32_179 = arith.constant 0 : i32
    %536 = vector.broadcast %c0_i32_179 : i32 to vector<8x1xi32>
    %537 = arith.cmpi sge, %535, %536 : vector<8x1xi32>
    %c2147483647_i32_180 = arith.constant 2147483647 : i32
    %538 = vector.broadcast %c2147483647_i32_180 : i32 to vector<8x1xi32>
    %539 = arith.xori %535, %538 : vector<8x1xi32>
    %540 = arith.select %537, %535, %539 : vector<8x1xi1>, vector<8x1xi32>
    %541 = tpu.bitcast %540 : vector<8x1xi32> -> vector<8x1xf32>
    %542 = vector.broadcast %529 : vector<8x1xi32> to vector<8x16xi32>
    %543 = arith.cmpi eq, %527, %542 : vector<8x16xi32>
    %c-2147483648_i32_181 = arith.constant -2147483648 : i32
    %544 = vector.broadcast %c-2147483648_i32_181 : i32 to vector<8x16xi32>
    %545 = arith.select %543, %544, %527 : vector<8x16xi1>, vector<8x16xi32>
    %cst_182 = arith.constant dense<-2147483648> : vector<8xi32>
    %546 = vector.multi_reduction <maxsi>, %545, %cst_182 [1] : vector<8x16xi32> to vector<8xi32>
    %547 = vector.shape_cast %546 : vector<8xi32> to vector<8x1xi32>
    %c15_i32_183 = arith.constant 15 : i32
    %548 = vector.broadcast %c15_i32_183 : i32 to vector<8x1xi32>
    %549 = arith.andi %547, %548 : vector<8x1xi32>
    %c15_i32_184 = arith.constant 15 : i32
    %550 = vector.broadcast %c15_i32_184 : i32 to vector<8x1xi32>
    %551 = arith.subi %550, %549 : vector<8x1xi32>
    %c-16_i32_185 = arith.constant -16 : i32
    %552 = vector.broadcast %c-16_i32_185 : i32 to vector<8x1xi32>
    %553 = arith.andi %547, %552 : vector<8x1xi32>
    %c0_i32_186 = arith.constant 0 : i32
    %554 = vector.broadcast %c0_i32_186 : i32 to vector<8x1xi32>
    %555 = arith.cmpi sge, %553, %554 : vector<8x1xi32>
    %c2147483647_i32_187 = arith.constant 2147483647 : i32
    %556 = vector.broadcast %c2147483647_i32_187 : i32 to vector<8x1xi32>
    %557 = arith.xori %553, %556 : vector<8x1xi32>
    %558 = arith.select %555, %553, %557 : vector<8x1xi1>, vector<8x1xi32>
    %559 = tpu.bitcast %558 : vector<8x1xi32> -> vector<8x1xf32>
    %560 = vector.broadcast %547 : vector<8x1xi32> to vector<8x16xi32>
    %561 = arith.cmpi eq, %545, %560 : vector<8x16xi32>
    %c-2147483648_i32_188 = arith.constant -2147483648 : i32
    %562 = vector.broadcast %c-2147483648_i32_188 : i32 to vector<8x16xi32>
    %563 = arith.select %561, %562, %545 : vector<8x16xi1>, vector<8x16xi32>
    %cst_189 = arith.constant dense<-2147483648> : vector<8xi32>
    %564 = vector.multi_reduction <maxsi>, %563, %cst_189 [1] : vector<8x16xi32> to vector<8xi32>
    %565 = vector.shape_cast %564 : vector<8xi32> to vector<8x1xi32>
    %c15_i32_190 = arith.constant 15 : i32
    %566 = vector.broadcast %c15_i32_190 : i32 to vector<8x1xi32>
    %567 = arith.andi %565, %566 : vector<8x1xi32>
    %c15_i32_191 = arith.constant 15 : i32
    %568 = vector.broadcast %c15_i32_191 : i32 to vector<8x1xi32>
    %569 = arith.subi %568, %567 : vector<8x1xi32>
    %c-16_i32_192 = arith.constant -16 : i32
    %570 = vector.broadcast %c-16_i32_192 : i32 to vector<8x1xi32>
    %571 = arith.andi %565, %570 : vector<8x1xi32>
    %c0_i32_193 = arith.constant 0 : i32
    %572 = vector.broadcast %c0_i32_193 : i32 to vector<8x1xi32>
    %573 = arith.cmpi sge, %571, %572 : vector<8x1xi32>
    %c2147483647_i32_194 = arith.constant 2147483647 : i32
    %574 = vector.broadcast %c2147483647_i32_194 : i32 to vector<8x1xi32>
    %575 = arith.xori %571, %574 : vector<8x1xi32>
    %576 = arith.select %573, %571, %575 : vector<8x1xi1>, vector<8x1xi32>
    %577 = tpu.bitcast %576 : vector<8x1xi32> -> vector<8x1xf32>
    %578 = vector.broadcast %565 : vector<8x1xi32> to vector<8x16xi32>
    %579 = arith.cmpi eq, %563, %578 : vector<8x16xi32>
    %c-2147483648_i32_195 = arith.constant -2147483648 : i32
    %580 = vector.broadcast %c-2147483648_i32_195 : i32 to vector<8x16xi32>
    %581 = arith.select %579, %580, %563 : vector<8x16xi1>, vector<8x16xi32>
    %cst_196 = arith.constant dense<-2147483648> : vector<8xi32>
    %582 = vector.multi_reduction <maxsi>, %581, %cst_196 [1] : vector<8x16xi32> to vector<8xi32>
    %583 = vector.shape_cast %582 : vector<8xi32> to vector<8x1xi32>
    %c15_i32_197 = arith.constant 15 : i32
    %584 = vector.broadcast %c15_i32_197 : i32 to vector<8x1xi32>
    %585 = arith.andi %583, %584 : vector<8x1xi32>
    %c15_i32_198 = arith.constant 15 : i32
    %586 = vector.broadcast %c15_i32_198 : i32 to vector<8x1xi32>
    %587 = arith.subi %586, %585 : vector<8x1xi32>
    %c-16_i32_199 = arith.constant -16 : i32
    %588 = vector.broadcast %c-16_i32_199 : i32 to vector<8x1xi32>
    %589 = arith.andi %583, %588 : vector<8x1xi32>
    %c0_i32_200 = arith.constant 0 : i32
    %590 = vector.broadcast %c0_i32_200 : i32 to vector<8x1xi32>
    %591 = arith.cmpi sge, %589, %590 : vector<8x1xi32>
    %c2147483647_i32_201 = arith.constant 2147483647 : i32
    %592 = vector.broadcast %c2147483647_i32_201 : i32 to vector<8x1xi32>
    %593 = arith.xori %589, %592 : vector<8x1xi32>
    %594 = arith.select %591, %589, %593 : vector<8x1xi1>, vector<8x1xi32>
    %595 = tpu.bitcast %594 : vector<8x1xi32> -> vector<8x1xf32>
    %596 = vector.extract_strided_slice %4 {offsets = [0, 48], sizes = [8, 16], strides = [1, 1]} : vector<8x64xf32> to vector<8x16xf32>
    %cst_202 = arith.constant dense<0.000000e+00> : vector<8xf32>
    %597 = vector.multi_reduction <add>, %596, %cst_202 [1] : vector<8x16xf32> to vector<8xf32>
    %598 = vector.shape_cast %597 : vector<8xf32> to vector<8x1xf32>
    %cst_203 = arith.constant 1.600000e+01 : f32
    %599 = vector.broadcast %cst_203 : f32 to vector<8x1xf32>
    %600 = arith.divf %598, %599 : vector<8x1xf32>
    %601 = vector.broadcast %600 : vector<8x1xf32> to vector<8x16xf32>
    %602 = arith.subf %596, %601 : vector<8x16xf32>
    %603 = arith.mulf %602, %602 : vector<8x16xf32>
    %cst_204 = arith.constant dense<0.000000e+00> : vector<8xf32>
    %604 = vector.multi_reduction <add>, %603, %cst_204 [1] : vector<8x16xf32> to vector<8xf32>
    %605 = vector.shape_cast %604 : vector<8xf32> to vector<8x1xf32>
    %cst_205 = arith.constant 1.600000e+01 : f32
    %606 = vector.broadcast %cst_205 : f32 to vector<8x1xf32>
    %607 = arith.divf %605, %606 : vector<8x1xf32>
    %608 = vector.broadcast %600 : vector<8x1xf32> to vector<8x16xf32>
    %609 = arith.subf %596, %608 : vector<8x16xf32>
    %cst_206 = arith.constant 9.99999974E-6 : f32
    %610 = vector.broadcast %cst_206 : f32 to vector<8x1xf32>
    %611 = arith.addf %607, %610 : vector<8x1xf32>
    %612 = math.rsqrt %611 : vector<8x1xf32>
    %613 = vector.broadcast %612 : vector<8x1xf32> to vector<8x16xf32>
    %614 = arith.mulf %609, %613 : vector<8x16xf32>
    %615 = vector.broadcast %1 : vector<1x16xf32> to vector<8x16xf32>
    %616 = arith.mulf %614, %615 : vector<8x16xf32>
    %617 = vector.broadcast %2 : vector<1x16xf32> to vector<8x16xf32>
    %618 = arith.addf %616, %617 : vector<8x16xf32>
    %619 = arith.truncf %618 : vector<8x16xf32> to vector<8x16xbf16>
    %c3 = arith.constant 3 : index
    %c0_207 = arith.constant 0 : index
    %c0_208 = arith.constant 0 : index
    %620 = vector.load %arg5[%c3, %c0_207, %c0_208] : memref<4x16x16xbf16, #tpu.memory_space<vmem>>, vector<1x16x16xbf16>
    %621 = vector.shape_cast %620 : vector<1x16x16xbf16> to vector<16x16xbf16>
    %cst_209 = arith.constant dense<0.000000e+00> : vector<8x16xf32>
    %622 = tpu.matmul %619, %621, %cst_209 {dimension_numbers = #tpu.dot_dimension_numbers<[1], [0], [0], [1], [0, 0, 1, 1], [], []>} : vector<8x16xbf16>, vector<16x16xbf16>, vector<8x16xf32> -> vector<8x16xf32>
    %623 = tpu.bitcast %622 : vector<8x16xf32> -> vector<8x16xi32>
    %c0_i32_210 = arith.constant 0 : i32
    %624 = vector.broadcast %c0_i32_210 : i32 to vector<8x16xi32>
    %625 = arith.cmpi sge, %623, %624 : vector<8x16xi32>
    %c2147483647_i32_211 = arith.constant 2147483647 : i32
    %626 = vector.broadcast %c2147483647_i32_211 : i32 to vector<8x16xi32>
    %627 = arith.xori %623, %626 : vector<8x16xi32>
    %628 = arith.select %625, %623, %627 : vector<8x16xi1>, vector<8x16xi32>
    %c8_i32_212 = arith.constant 8 : i32
    %629 = vector.broadcast %c8_i32_212 : i32 to vector<8x16xi32>
    %630 = arith.addi %628, %629 : vector<8x16xi32>
    %c-16_i32_213 = arith.constant -16 : i32
    %631 = vector.broadcast %c-16_i32_213 : i32 to vector<8x16xi32>
    %632 = arith.andi %630, %631 : vector<8x16xi32>
    %c15_i32_214 = arith.constant 15 : i32
    %633 = vector.broadcast %c15_i32_214 : i32 to vector<8x16xi32>
    %634 = arith.subi %633, %5 : vector<8x16xi32>
    %635 = arith.ori %632, %634 : vector<8x16xi32>
    %cst_215 = arith.constant dense<-2147483648> : vector<8xi32>
    %636 = vector.multi_reduction <maxsi>, %635, %cst_215 [1] : vector<8x16xi32> to vector<8xi32>
    %637 = vector.shape_cast %636 : vector<8xi32> to vector<8x1xi32>
    %c15_i32_216 = arith.constant 15 : i32
    %638 = vector.broadcast %c15_i32_216 : i32 to vector<8x1xi32>
    %639 = arith.andi %637, %638 : vector<8x1xi32>
    %c15_i32_217 = arith.constant 15 : i32
    %640 = vector.broadcast %c15_i32_217 : i32 to vector<8x1xi32>
    %641 = arith.subi %640, %639 : vector<8x1xi32>
    %c-16_i32_218 = arith.constant -16 : i32
    %642 = vector.broadcast %c-16_i32_218 : i32 to vector<8x1xi32>
    %643 = arith.andi %637, %642 : vector<8x1xi32>
    %c0_i32_219 = arith.constant 0 : i32
    %644 = vector.broadcast %c0_i32_219 : i32 to vector<8x1xi32>
    %645 = arith.cmpi sge, %643, %644 : vector<8x1xi32>
    %c2147483647_i32_220 = arith.constant 2147483647 : i32
    %646 = vector.broadcast %c2147483647_i32_220 : i32 to vector<8x1xi32>
    %647 = arith.xori %643, %646 : vector<8x1xi32>
    %648 = arith.select %645, %643, %647 : vector<8x1xi1>, vector<8x1xi32>
    %649 = tpu.bitcast %648 : vector<8x1xi32> -> vector<8x1xf32>
    %650 = vector.broadcast %637 : vector<8x1xi32> to vector<8x16xi32>
    %651 = arith.cmpi eq, %635, %650 : vector<8x16xi32>
    %c-2147483648_i32_221 = arith.constant -2147483648 : i32
    %652 = vector.broadcast %c-2147483648_i32_221 : i32 to vector<8x16xi32>
    %653 = arith.select %651, %652, %635 : vector<8x16xi1>, vector<8x16xi32>
    %cst_222 = arith.constant dense<-2147483648> : vector<8xi32>
    %654 = vector.multi_reduction <maxsi>, %653, %cst_222 [1] : vector<8x16xi32> to vector<8xi32>
    %655 = vector.shape_cast %654 : vector<8xi32> to vector<8x1xi32>
    %c15_i32_223 = arith.constant 15 : i32
    %656 = vector.broadcast %c15_i32_223 : i32 to vector<8x1xi32>
    %657 = arith.andi %655, %656 : vector<8x1xi32>
    %c15_i32_224 = arith.constant 15 : i32
    %658 = vector.broadcast %c15_i32_224 : i32 to vector<8x1xi32>
    %659 = arith.subi %658, %657 : vector<8x1xi32>
    %c-16_i32_225 = arith.constant -16 : i32
    %660 = vector.broadcast %c-16_i32_225 : i32 to vector<8x1xi32>
    %661 = arith.andi %655, %660 : vector<8x1xi32>
    %c0_i32_226 = arith.constant 0 : i32
    %662 = vector.broadcast %c0_i32_226 : i32 to vector<8x1xi32>
    %663 = arith.cmpi sge, %661, %662 : vector<8x1xi32>
    %c2147483647_i32_227 = arith.constant 2147483647 : i32
    %664 = vector.broadcast %c2147483647_i32_227 : i32 to vector<8x1xi32>
    %665 = arith.xori %661, %664 : vector<8x1xi32>
    %666 = arith.select %663, %661, %665 : vector<8x1xi1>, vector<8x1xi32>
    %667 = tpu.bitcast %666 : vector<8x1xi32> -> vector<8x1xf32>
    %668 = vector.broadcast %655 : vector<8x1xi32> to vector<8x16xi32>
    %669 = arith.cmpi eq, %653, %668 : vector<8x16xi32>
    %c-2147483648_i32_228 = arith.constant -2147483648 : i32
    %670 = vector.broadcast %c-2147483648_i32_228 : i32 to vector<8x16xi32>
    %671 = arith.select %669, %670, %653 : vector<8x16xi1>, vector<8x16xi32>
    %cst_229 = arith.constant dense<-2147483648> : vector<8xi32>
    %672 = vector.multi_reduction <maxsi>, %671, %cst_229 [1] : vector<8x16xi32> to vector<8xi32>
    %673 = vector.shape_cast %672 : vector<8xi32> to vector<8x1xi32>
    %c15_i32_230 = arith.constant 15 : i32
    %674 = vector.broadcast %c15_i32_230 : i32 to vector<8x1xi32>
    %675 = arith.andi %673, %674 : vector<8x1xi32>
    %c15_i32_231 = arith.constant 15 : i32
    %676 = vector.broadcast %c15_i32_231 : i32 to vector<8x1xi32>
    %677 = arith.subi %676, %675 : vector<8x1xi32>
    %c-16_i32_232 = arith.constant -16 : i32
    %678 = vector.broadcast %c-16_i32_232 : i32 to vector<8x1xi32>
    %679 = arith.andi %673, %678 : vector<8x1xi32>
    %c0_i32_233 = arith.constant 0 : i32
    %680 = vector.broadcast %c0_i32_233 : i32 to vector<8x1xi32>
    %681 = arith.cmpi sge, %679, %680 : vector<8x1xi32>
    %c2147483647_i32_234 = arith.constant 2147483647 : i32
    %682 = vector.broadcast %c2147483647_i32_234 : i32 to vector<8x1xi32>
    %683 = arith.xori %679, %682 : vector<8x1xi32>
    %684 = arith.select %681, %679, %683 : vector<8x1xi1>, vector<8x1xi32>
    %685 = tpu.bitcast %684 : vector<8x1xi32> -> vector<8x1xf32>
    %686 = vector.broadcast %673 : vector<8x1xi32> to vector<8x16xi32>
    %687 = arith.cmpi eq, %671, %686 : vector<8x16xi32>
    %c-2147483648_i32_235 = arith.constant -2147483648 : i32
    %688 = vector.broadcast %c-2147483648_i32_235 : i32 to vector<8x16xi32>
    %689 = arith.select %687, %688, %671 : vector<8x16xi1>, vector<8x16xi32>
    %cst_236 = arith.constant dense<-2147483648> : vector<8xi32>
    %690 = vector.multi_reduction <maxsi>, %689, %cst_236 [1] : vector<8x16xi32> to vector<8xi32>
    %691 = vector.shape_cast %690 : vector<8xi32> to vector<8x1xi32>
    %c15_i32_237 = arith.constant 15 : i32
    %692 = vector.broadcast %c15_i32_237 : i32 to vector<8x1xi32>
    %693 = arith.andi %691, %692 : vector<8x1xi32>
    %c15_i32_238 = arith.constant 15 : i32
    %694 = vector.broadcast %c15_i32_238 : i32 to vector<8x1xi32>
    %695 = arith.subi %694, %693 : vector<8x1xi32>
    %c-16_i32_239 = arith.constant -16 : i32
    %696 = vector.broadcast %c-16_i32_239 : i32 to vector<8x1xi32>
    %697 = arith.andi %691, %696 : vector<8x1xi32>
    %c0_i32_240 = arith.constant 0 : i32
    %698 = vector.broadcast %c0_i32_240 : i32 to vector<8x1xi32>
    %699 = arith.cmpi sge, %697, %698 : vector<8x1xi32>
    %c2147483647_i32_241 = arith.constant 2147483647 : i32
    %700 = vector.broadcast %c2147483647_i32_241 : i32 to vector<8x1xi32>
    %701 = arith.xori %697, %700 : vector<8x1xi32>
    %702 = arith.select %699, %697, %701 : vector<8x1xi1>, vector<8x1xi32>
    %703 = tpu.bitcast %702 : vector<8x1xi32> -> vector<8x1xf32>
    %704 = tpu.concatenate %649, %667, %685, %703 in 1 : vector<8x1xf32>, vector<8x1xf32>, vector<8x1xf32>, vector<8x1xf32> -> vector<8x4xf32>
    %705 = tpu.concatenate %641, %659, %677, %695 in 1 : vector<8x1xi32>, vector<8x1xi32>, vector<8x1xi32>, vector<8x1xi32> -> vector<8x4xi32>
    %706 = tpu.concatenate %533, %551, %569, %587 in 1 : vector<8x1xi32>, vector<8x1xi32>, vector<8x1xi32>, vector<8x1xi32> -> vector<8x4xi32>
    %707 = vector.broadcast %541 : vector<8x1xf32> to vector<8x4xf32>
    %708 = arith.addf %707, %704 : vector<8x4xf32>
    %709 = vector.broadcast %559 : vector<8x1xf32> to vector<8x4xf32>
    %710 = arith.addf %709, %704 : vector<8x4xf32>
    %711 = vector.broadcast %577 : vector<8x1xf32> to vector<8x4xf32>
    %712 = arith.addf %711, %704 : vector<8x4xf32>
    %713 = vector.broadcast %595 : vector<8x1xf32> to vector<8x4xf32>
    %714 = arith.addf %713, %704 : vector<8x4xf32>
    %715 = tpu.concatenate %708, %710, %712, %714 in 1 : vector<8x4xf32>, vector<8x4xf32>, vector<8x4xf32>, vector<8x4xf32> -> vector<8x16xf32>
    %716 = tpu.bitcast %715 : vector<8x16xf32> -> vector<8x16xi32>
    %c0_i32_242 = arith.constant 0 : i32
    %717 = vector.broadcast %c0_i32_242 : i32 to vector<8x16xi32>
    %718 = arith.cmpi sge, %716, %717 : vector<8x16xi32>
    %c2147483647_i32_243 = arith.constant 2147483647 : i32
    %719 = vector.broadcast %c2147483647_i32_243 : i32 to vector<8x16xi32>
    %720 = arith.xori %716, %719 : vector<8x16xi32>
    %721 = arith.select %718, %716, %720 : vector<8x16xi1>, vector<8x16xi32>
    %c8_i32_244 = arith.constant 8 : i32
    %722 = vector.broadcast %c8_i32_244 : i32 to vector<8x16xi32>
    %723 = arith.addi %721, %722 : vector<8x16xi32>
    %c-16_i32_245 = arith.constant -16 : i32
    %724 = vector.broadcast %c-16_i32_245 : i32 to vector<8x16xi32>
    %725 = arith.andi %723, %724 : vector<8x16xi32>
    %c15_i32_246 = arith.constant 15 : i32
    %726 = vector.broadcast %c15_i32_246 : i32 to vector<8x16xi32>
    %727 = arith.subi %726, %7 : vector<8x16xi32>
    %728 = arith.ori %725, %727 : vector<8x16xi32>
    %cst_247 = arith.constant dense<-2147483648> : vector<8xi32>
    %729 = vector.multi_reduction <maxsi>, %728, %cst_247 [1] : vector<8x16xi32> to vector<8xi32>
    %730 = vector.shape_cast %729 : vector<8xi32> to vector<8x1xi32>
    %c15_i32_248 = arith.constant 15 : i32
    %731 = vector.broadcast %c15_i32_248 : i32 to vector<8x1xi32>
    %732 = arith.andi %730, %731 : vector<8x1xi32>
    %c15_i32_249 = arith.constant 15 : i32
    %733 = vector.broadcast %c15_i32_249 : i32 to vector<8x1xi32>
    %734 = arith.subi %733, %732 : vector<8x1xi32>
    %c-16_i32_250 = arith.constant -16 : i32
    %735 = vector.broadcast %c-16_i32_250 : i32 to vector<8x1xi32>
    %736 = arith.andi %730, %735 : vector<8x1xi32>
    %c0_i32_251 = arith.constant 0 : i32
    %737 = vector.broadcast %c0_i32_251 : i32 to vector<8x1xi32>
    %738 = arith.cmpi sge, %736, %737 : vector<8x1xi32>
    %c2147483647_i32_252 = arith.constant 2147483647 : i32
    %739 = vector.broadcast %c2147483647_i32_252 : i32 to vector<8x1xi32>
    %740 = arith.xori %736, %739 : vector<8x1xi32>
    %741 = arith.select %738, %736, %740 : vector<8x1xi1>, vector<8x1xi32>
    %742 = tpu.bitcast %741 : vector<8x1xi32> -> vector<8x1xf32>
    %743 = vector.broadcast %730 : vector<8x1xi32> to vector<8x16xi32>
    %744 = arith.cmpi eq, %728, %743 : vector<8x16xi32>
    %c-2147483648_i32_253 = arith.constant -2147483648 : i32
    %745 = vector.broadcast %c-2147483648_i32_253 : i32 to vector<8x16xi32>
    %746 = arith.select %744, %745, %728 : vector<8x16xi1>, vector<8x16xi32>
    %cst_254 = arith.constant dense<-2147483648> : vector<8xi32>
    %747 = vector.multi_reduction <maxsi>, %746, %cst_254 [1] : vector<8x16xi32> to vector<8xi32>
    %748 = vector.shape_cast %747 : vector<8xi32> to vector<8x1xi32>
    %c15_i32_255 = arith.constant 15 : i32
    %749 = vector.broadcast %c15_i32_255 : i32 to vector<8x1xi32>
    %750 = arith.andi %748, %749 : vector<8x1xi32>
    %c15_i32_256 = arith.constant 15 : i32
    %751 = vector.broadcast %c15_i32_256 : i32 to vector<8x1xi32>
    %752 = arith.subi %751, %750 : vector<8x1xi32>
    %c-16_i32_257 = arith.constant -16 : i32
    %753 = vector.broadcast %c-16_i32_257 : i32 to vector<8x1xi32>
    %754 = arith.andi %748, %753 : vector<8x1xi32>
    %c0_i32_258 = arith.constant 0 : i32
    %755 = vector.broadcast %c0_i32_258 : i32 to vector<8x1xi32>
    %756 = arith.cmpi sge, %754, %755 : vector<8x1xi32>
    %c2147483647_i32_259 = arith.constant 2147483647 : i32
    %757 = vector.broadcast %c2147483647_i32_259 : i32 to vector<8x1xi32>
    %758 = arith.xori %754, %757 : vector<8x1xi32>
    %759 = arith.select %756, %754, %758 : vector<8x1xi1>, vector<8x1xi32>
    %760 = tpu.bitcast %759 : vector<8x1xi32> -> vector<8x1xf32>
    %761 = vector.broadcast %748 : vector<8x1xi32> to vector<8x16xi32>
    %762 = arith.cmpi eq, %746, %761 : vector<8x16xi32>
    %c-2147483648_i32_260 = arith.constant -2147483648 : i32
    %763 = vector.broadcast %c-2147483648_i32_260 : i32 to vector<8x16xi32>
    %764 = arith.select %762, %763, %746 : vector<8x16xi1>, vector<8x16xi32>
    %cst_261 = arith.constant dense<-2147483648> : vector<8xi32>
    %765 = vector.multi_reduction <maxsi>, %764, %cst_261 [1] : vector<8x16xi32> to vector<8xi32>
    %766 = vector.shape_cast %765 : vector<8xi32> to vector<8x1xi32>
    %c15_i32_262 = arith.constant 15 : i32
    %767 = vector.broadcast %c15_i32_262 : i32 to vector<8x1xi32>
    %768 = arith.andi %766, %767 : vector<8x1xi32>
    %c15_i32_263 = arith.constant 15 : i32
    %769 = vector.broadcast %c15_i32_263 : i32 to vector<8x1xi32>
    %770 = arith.subi %769, %768 : vector<8x1xi32>
    %c-16_i32_264 = arith.constant -16 : i32
    %771 = vector.broadcast %c-16_i32_264 : i32 to vector<8x1xi32>
    %772 = arith.andi %766, %771 : vector<8x1xi32>
    %c0_i32_265 = arith.constant 0 : i32
    %773 = vector.broadcast %c0_i32_265 : i32 to vector<8x1xi32>
    %774 = arith.cmpi sge, %772, %773 : vector<8x1xi32>
    %c2147483647_i32_266 = arith.constant 2147483647 : i32
    %775 = vector.broadcast %c2147483647_i32_266 : i32 to vector<8x1xi32>
    %776 = arith.xori %772, %775 : vector<8x1xi32>
    %777 = arith.select %774, %772, %776 : vector<8x1xi1>, vector<8x1xi32>
    %778 = tpu.bitcast %777 : vector<8x1xi32> -> vector<8x1xf32>
    %779 = vector.broadcast %766 : vector<8x1xi32> to vector<8x16xi32>
    %780 = arith.cmpi eq, %764, %779 : vector<8x16xi32>
    %c-2147483648_i32_267 = arith.constant -2147483648 : i32
    %781 = vector.broadcast %c-2147483648_i32_267 : i32 to vector<8x16xi32>
    %782 = arith.select %780, %781, %764 : vector<8x16xi1>, vector<8x16xi32>
    %cst_268 = arith.constant dense<-2147483648> : vector<8xi32>
    %783 = vector.multi_reduction <maxsi>, %782, %cst_268 [1] : vector<8x16xi32> to vector<8xi32>
    %784 = vector.shape_cast %783 : vector<8xi32> to vector<8x1xi32>
    %c15_i32_269 = arith.constant 15 : i32
    %785 = vector.broadcast %c15_i32_269 : i32 to vector<8x1xi32>
    %786 = arith.andi %784, %785 : vector<8x1xi32>
    %c15_i32_270 = arith.constant 15 : i32
    %787 = vector.broadcast %c15_i32_270 : i32 to vector<8x1xi32>
    %788 = arith.subi %787, %786 : vector<8x1xi32>
    %c-16_i32_271 = arith.constant -16 : i32
    %789 = vector.broadcast %c-16_i32_271 : i32 to vector<8x1xi32>
    %790 = arith.andi %784, %789 : vector<8x1xi32>
    %c0_i32_272 = arith.constant 0 : i32
    %791 = vector.broadcast %c0_i32_272 : i32 to vector<8x1xi32>
    %792 = arith.cmpi sge, %790, %791 : vector<8x1xi32>
    %c2147483647_i32_273 = arith.constant 2147483647 : i32
    %793 = vector.broadcast %c2147483647_i32_273 : i32 to vector<8x1xi32>
    %794 = arith.xori %790, %793 : vector<8x1xi32>
    %795 = arith.select %792, %790, %794 : vector<8x1xi1>, vector<8x1xi32>
    %796 = tpu.bitcast %795 : vector<8x1xi32> -> vector<8x1xf32>
    %797 = arith.subf %742, %742 : vector<8x1xf32>
    %798 = math.exp %797 : vector<8x1xf32>
    %799 = arith.subf %760, %742 : vector<8x1xf32>
    %800 = math.exp %799 : vector<8x1xf32>
    %801 = arith.subf %778, %742 : vector<8x1xf32>
    %802 = math.exp %801 : vector<8x1xf32>
    %803 = arith.subf %796, %742 : vector<8x1xf32>
    %804 = math.exp %803 : vector<8x1xf32>
    %805 = arith.addf %798, %800 : vector<8x1xf32>
    %806 = arith.addf %805, %802 : vector<8x1xf32>
    %807 = arith.addf %806, %804 : vector<8x1xf32>
    %cst_274 = arith.constant 1.000000e+00 : f32
    %808 = vector.broadcast %cst_274 : f32 to vector<8x1xf32>
    %809 = arith.divf %808, %807 : vector<8x1xf32>
    %c4_i32_275 = arith.constant 4 : i32
    %810 = vector.broadcast %c4_i32_275 : i32 to vector<8x4xi32>
    %811 = arith.muli %6, %810 : vector<8x4xi32>
    %812 = vector.broadcast %734 : vector<8x1xi32> to vector<8x4xi32>
    %813 = arith.cmpi sge, %812, %811 : vector<8x4xi32>
    %c4_i32_276 = arith.constant 4 : i32
    %814 = vector.broadcast %c4_i32_276 : i32 to vector<8x4xi32>
    %815 = arith.muli %6, %814 : vector<8x4xi32>
    %c4_i32_277 = arith.constant 4 : i32
    %816 = vector.broadcast %c4_i32_277 : i32 to vector<8x4xi32>
    %817 = arith.addi %815, %816 : vector<8x4xi32>
    %818 = vector.broadcast %734 : vector<8x1xi32> to vector<8x4xi32>
    %819 = arith.cmpi slt, %818, %817 : vector<8x4xi32>
    %820 = arith.andi %813, %819 : vector<8x4xi1>
    %c0_i32_278 = arith.constant 0 : i32
    %821 = vector.broadcast %c0_i32_278 : i32 to vector<8x4xi32>
    %822 = arith.select %820, %706, %821 : vector<8x4xi1>, vector<8x4xi32>
    %cst_279 = arith.constant dense<-2147483648> : vector<8xi32>
    %823 = vector.multi_reduction <maxsi>, %822, %cst_279 [1] : vector<8x4xi32> to vector<8xi32>
    %824 = vector.shape_cast %823 : vector<8xi32> to vector<8x1xi32>
    %c0_i32_280 = arith.constant 0 : i32
    %825 = vector.broadcast %c0_i32_280 : i32 to vector<8x4xi32>
    %826 = arith.select %820, %6, %825 : vector<8x4xi1>, vector<8x4xi32>
    %cst_281 = arith.constant dense<-2147483648> : vector<8xi32>
    %827 = vector.multi_reduction <maxsi>, %826, %cst_281 [1] : vector<8x4xi32> to vector<8xi32>
    %828 = vector.shape_cast %827 : vector<8xi32> to vector<8x1xi32>
    %c4_i32_282 = arith.constant 4 : i32
    %829 = vector.broadcast %c4_i32_282 : i32 to vector<8x1xi32>
    %830 = arith.muli %828, %829 : vector<8x1xi32>
    %831 = arith.subi %734, %830 : vector<8x1xi32>
    %832 = vector.broadcast %831 : vector<8x1xi32> to vector<8x4xi32>
    %833 = arith.cmpi eq, %6, %832 : vector<8x4xi32>
    %c0_i32_283 = arith.constant 0 : i32
    %834 = vector.broadcast %c0_i32_283 : i32 to vector<8x4xi32>
    %835 = arith.select %833, %705, %834 : vector<8x4xi1>, vector<8x4xi32>
    %cst_284 = arith.constant dense<-2147483648> : vector<8xi32>
    %836 = vector.multi_reduction <maxsi>, %835, %cst_284 [1] : vector<8x4xi32> to vector<8xi32>
    %837 = vector.shape_cast %836 : vector<8xi32> to vector<8x1xi32>
    %c16_i32_285 = arith.constant 16 : i32
    %838 = vector.broadcast %c16_i32_285 : i32 to vector<8x1xi32>
    %839 = arith.muli %824, %838 : vector<8x1xi32>
    %840 = arith.addi %839, %837 : vector<8x1xi32>
    %841 = arith.mulf %798, %809 : vector<8x1xf32>
    %842 = vector.broadcast %840 : vector<8x1xi32> to vector<8x256xi32>
    %843 = arith.cmpi eq, %8, %842 : vector<8x256xi32>
    %cst_286 = arith.constant 0.000000e+00 : f32
    %844 = vector.shape_cast %841 : vector<8x1xf32> to vector<8x1xf32>
    %845 = vector.broadcast %844 : vector<8x1xf32> to vector<8x256xf32>
    %846 = vector.broadcast %cst_286 : f32 to vector<8x256xf32>
    %847 = arith.select %843, %845, %846 : vector<8x256xi1>, vector<8x256xf32>
    %848 = arith.addf %487, %847 : vector<8x256xf32>
    %c4_i32_287 = arith.constant 4 : i32
    %849 = vector.broadcast %c4_i32_287 : i32 to vector<8x4xi32>
    %850 = arith.muli %6, %849 : vector<8x4xi32>
    %851 = vector.broadcast %752 : vector<8x1xi32> to vector<8x4xi32>
    %852 = arith.cmpi sge, %851, %850 : vector<8x4xi32>
    %c4_i32_288 = arith.constant 4 : i32
    %853 = vector.broadcast %c4_i32_288 : i32 to vector<8x4xi32>
    %854 = arith.muli %6, %853 : vector<8x4xi32>
    %c4_i32_289 = arith.constant 4 : i32
    %855 = vector.broadcast %c4_i32_289 : i32 to vector<8x4xi32>
    %856 = arith.addi %854, %855 : vector<8x4xi32>
    %857 = vector.broadcast %752 : vector<8x1xi32> to vector<8x4xi32>
    %858 = arith.cmpi slt, %857, %856 : vector<8x4xi32>
    %859 = arith.andi %852, %858 : vector<8x4xi1>
    %c0_i32_290 = arith.constant 0 : i32
    %860 = vector.broadcast %c0_i32_290 : i32 to vector<8x4xi32>
    %861 = arith.select %859, %706, %860 : vector<8x4xi1>, vector<8x4xi32>
    %cst_291 = arith.constant dense<-2147483648> : vector<8xi32>
    %862 = vector.multi_reduction <maxsi>, %861, %cst_291 [1] : vector<8x4xi32> to vector<8xi32>
    %863 = vector.shape_cast %862 : vector<8xi32> to vector<8x1xi32>
    %c0_i32_292 = arith.constant 0 : i32
    %864 = vector.broadcast %c0_i32_292 : i32 to vector<8x4xi32>
    %865 = arith.select %859, %6, %864 : vector<8x4xi1>, vector<8x4xi32>
    %cst_293 = arith.constant dense<-2147483648> : vector<8xi32>
    %866 = vector.multi_reduction <maxsi>, %865, %cst_293 [1] : vector<8x4xi32> to vector<8xi32>
    %867 = vector.shape_cast %866 : vector<8xi32> to vector<8x1xi32>
    %c4_i32_294 = arith.constant 4 : i32
    %868 = vector.broadcast %c4_i32_294 : i32 to vector<8x1xi32>
    %869 = arith.muli %867, %868 : vector<8x1xi32>
    %870 = arith.subi %752, %869 : vector<8x1xi32>
    %871 = vector.broadcast %870 : vector<8x1xi32> to vector<8x4xi32>
    %872 = arith.cmpi eq, %6, %871 : vector<8x4xi32>
    %c0_i32_295 = arith.constant 0 : i32
    %873 = vector.broadcast %c0_i32_295 : i32 to vector<8x4xi32>
    %874 = arith.select %872, %705, %873 : vector<8x4xi1>, vector<8x4xi32>
    %cst_296 = arith.constant dense<-2147483648> : vector<8xi32>
    %875 = vector.multi_reduction <maxsi>, %874, %cst_296 [1] : vector<8x4xi32> to vector<8xi32>
    %876 = vector.shape_cast %875 : vector<8xi32> to vector<8x1xi32>
    %c16_i32_297 = arith.constant 16 : i32
    %877 = vector.broadcast %c16_i32_297 : i32 to vector<8x1xi32>
    %878 = arith.muli %863, %877 : vector<8x1xi32>
    %879 = arith.addi %878, %876 : vector<8x1xi32>
    %880 = arith.mulf %800, %809 : vector<8x1xf32>
    %881 = vector.broadcast %879 : vector<8x1xi32> to vector<8x256xi32>
    %882 = arith.cmpi eq, %8, %881 : vector<8x256xi32>
    %cst_298 = arith.constant 0.000000e+00 : f32
    %883 = vector.shape_cast %880 : vector<8x1xf32> to vector<8x1xf32>
    %884 = vector.broadcast %883 : vector<8x1xf32> to vector<8x256xf32>
    %885 = vector.broadcast %cst_298 : f32 to vector<8x256xf32>
    %886 = arith.select %882, %884, %885 : vector<8x256xi1>, vector<8x256xf32>
    %887 = arith.addf %848, %886 : vector<8x256xf32>
    %c4_i32_299 = arith.constant 4 : i32
    %888 = vector.broadcast %c4_i32_299 : i32 to vector<8x4xi32>
    %889 = arith.muli %6, %888 : vector<8x4xi32>
    %890 = vector.broadcast %770 : vector<8x1xi32> to vector<8x4xi32>
    %891 = arith.cmpi sge, %890, %889 : vector<8x4xi32>
    %c4_i32_300 = arith.constant 4 : i32
    %892 = vector.broadcast %c4_i32_300 : i32 to vector<8x4xi32>
    %893 = arith.muli %6, %892 : vector<8x4xi32>
    %c4_i32_301 = arith.constant 4 : i32
    %894 = vector.broadcast %c4_i32_301 : i32 to vector<8x4xi32>
    %895 = arith.addi %893, %894 : vector<8x4xi32>
    %896 = vector.broadcast %770 : vector<8x1xi32> to vector<8x4xi32>
    %897 = arith.cmpi slt, %896, %895 : vector<8x4xi32>
    %898 = arith.andi %891, %897 : vector<8x4xi1>
    %c0_i32_302 = arith.constant 0 : i32
    %899 = vector.broadcast %c0_i32_302 : i32 to vector<8x4xi32>
    %900 = arith.select %898, %706, %899 : vector<8x4xi1>, vector<8x4xi32>
    %cst_303 = arith.constant dense<-2147483648> : vector<8xi32>
    %901 = vector.multi_reduction <maxsi>, %900, %cst_303 [1] : vector<8x4xi32> to vector<8xi32>
    %902 = vector.shape_cast %901 : vector<8xi32> to vector<8x1xi32>
    %c0_i32_304 = arith.constant 0 : i32
    %903 = vector.broadcast %c0_i32_304 : i32 to vector<8x4xi32>
    %904 = arith.select %898, %6, %903 : vector<8x4xi1>, vector<8x4xi32>
    %cst_305 = arith.constant dense<-2147483648> : vector<8xi32>
    %905 = vector.multi_reduction <maxsi>, %904, %cst_305 [1] : vector<8x4xi32> to vector<8xi32>
    %906 = vector.shape_cast %905 : vector<8xi32> to vector<8x1xi32>
    %c4_i32_306 = arith.constant 4 : i32
    %907 = vector.broadcast %c4_i32_306 : i32 to vector<8x1xi32>
    %908 = arith.muli %906, %907 : vector<8x1xi32>
    %909 = arith.subi %770, %908 : vector<8x1xi32>
    %910 = vector.broadcast %909 : vector<8x1xi32> to vector<8x4xi32>
    %911 = arith.cmpi eq, %6, %910 : vector<8x4xi32>
    %c0_i32_307 = arith.constant 0 : i32
    %912 = vector.broadcast %c0_i32_307 : i32 to vector<8x4xi32>
    %913 = arith.select %911, %705, %912 : vector<8x4xi1>, vector<8x4xi32>
    %cst_308 = arith.constant dense<-2147483648> : vector<8xi32>
    %914 = vector.multi_reduction <maxsi>, %913, %cst_308 [1] : vector<8x4xi32> to vector<8xi32>
    %915 = vector.shape_cast %914 : vector<8xi32> to vector<8x1xi32>
    %c16_i32_309 = arith.constant 16 : i32
    %916 = vector.broadcast %c16_i32_309 : i32 to vector<8x1xi32>
    %917 = arith.muli %902, %916 : vector<8x1xi32>
    %918 = arith.addi %917, %915 : vector<8x1xi32>
    %919 = arith.mulf %802, %809 : vector<8x1xf32>
    %920 = vector.broadcast %918 : vector<8x1xi32> to vector<8x256xi32>
    %921 = arith.cmpi eq, %8, %920 : vector<8x256xi32>
    %cst_310 = arith.constant 0.000000e+00 : f32
    %922 = vector.shape_cast %919 : vector<8x1xf32> to vector<8x1xf32>
    %923 = vector.broadcast %922 : vector<8x1xf32> to vector<8x256xf32>
    %924 = vector.broadcast %cst_310 : f32 to vector<8x256xf32>
    %925 = arith.select %921, %923, %924 : vector<8x256xi1>, vector<8x256xf32>
    %926 = arith.addf %887, %925 : vector<8x256xf32>
    %c4_i32_311 = arith.constant 4 : i32
    %927 = vector.broadcast %c4_i32_311 : i32 to vector<8x4xi32>
    %928 = arith.muli %6, %927 : vector<8x4xi32>
    %929 = vector.broadcast %788 : vector<8x1xi32> to vector<8x4xi32>
    %930 = arith.cmpi sge, %929, %928 : vector<8x4xi32>
    %c4_i32_312 = arith.constant 4 : i32
    %931 = vector.broadcast %c4_i32_312 : i32 to vector<8x4xi32>
    %932 = arith.muli %6, %931 : vector<8x4xi32>
    %c4_i32_313 = arith.constant 4 : i32
    %933 = vector.broadcast %c4_i32_313 : i32 to vector<8x4xi32>
    %934 = arith.addi %932, %933 : vector<8x4xi32>
    %935 = vector.broadcast %788 : vector<8x1xi32> to vector<8x4xi32>
    %936 = arith.cmpi slt, %935, %934 : vector<8x4xi32>
    %937 = arith.andi %930, %936 : vector<8x4xi1>
    %c0_i32_314 = arith.constant 0 : i32
    %938 = vector.broadcast %c0_i32_314 : i32 to vector<8x4xi32>
    %939 = arith.select %937, %706, %938 : vector<8x4xi1>, vector<8x4xi32>
    %cst_315 = arith.constant dense<-2147483648> : vector<8xi32>
    %940 = vector.multi_reduction <maxsi>, %939, %cst_315 [1] : vector<8x4xi32> to vector<8xi32>
    %941 = vector.shape_cast %940 : vector<8xi32> to vector<8x1xi32>
    %c0_i32_316 = arith.constant 0 : i32
    %942 = vector.broadcast %c0_i32_316 : i32 to vector<8x4xi32>
    %943 = arith.select %937, %6, %942 : vector<8x4xi1>, vector<8x4xi32>
    %cst_317 = arith.constant dense<-2147483648> : vector<8xi32>
    %944 = vector.multi_reduction <maxsi>, %943, %cst_317 [1] : vector<8x4xi32> to vector<8xi32>
    %945 = vector.shape_cast %944 : vector<8xi32> to vector<8x1xi32>
    %c4_i32_318 = arith.constant 4 : i32
    %946 = vector.broadcast %c4_i32_318 : i32 to vector<8x1xi32>
    %947 = arith.muli %945, %946 : vector<8x1xi32>
    %948 = arith.subi %788, %947 : vector<8x1xi32>
    %949 = vector.broadcast %948 : vector<8x1xi32> to vector<8x4xi32>
    %950 = arith.cmpi eq, %6, %949 : vector<8x4xi32>
    %c0_i32_319 = arith.constant 0 : i32
    %951 = vector.broadcast %c0_i32_319 : i32 to vector<8x4xi32>
    %952 = arith.select %950, %705, %951 : vector<8x4xi1>, vector<8x4xi32>
    %cst_320 = arith.constant dense<-2147483648> : vector<8xi32>
    %953 = vector.multi_reduction <maxsi>, %952, %cst_320 [1] : vector<8x4xi32> to vector<8xi32>
    %954 = vector.shape_cast %953 : vector<8xi32> to vector<8x1xi32>
    %c16_i32_321 = arith.constant 16 : i32
    %955 = vector.broadcast %c16_i32_321 : i32 to vector<8x1xi32>
    %956 = arith.muli %941, %955 : vector<8x1xi32>
    %957 = arith.addi %956, %954 : vector<8x1xi32>
    %958 = arith.mulf %804, %809 : vector<8x1xf32>
    %959 = vector.broadcast %957 : vector<8x1xi32> to vector<8x256xi32>
    %960 = arith.cmpi eq, %8, %959 : vector<8x256xi32>
    %cst_322 = arith.constant 0.000000e+00 : f32
    %961 = vector.shape_cast %958 : vector<8x1xf32> to vector<8x1xf32>
    %962 = vector.broadcast %961 : vector<8x1xf32> to vector<8x256xf32>
    %963 = vector.broadcast %cst_322 : f32 to vector<8x256xf32>
    %964 = arith.select %960, %962, %963 : vector<8x256xi1>, vector<8x256xf32>
    %965 = arith.addf %926, %964 : vector<8x256xf32>
    %c0_323 = arith.constant 0 : index
    %c0_324 = arith.constant 0 : index
    %966 = vector.load %arg6[%c0_323, %c0_324] : memref<256x32xf32, #tpu.memory_space<vmem>>, vector<256x32xf32>
    %cst_325 = arith.constant dense<0.000000e+00> : vector<8x32xf32>
    %967 = tpu.matmul %965, %966, %cst_325 {dimension_numbers = #tpu.dot_dimension_numbers<[1], [0], [0], [1], [0, 0, 1, 1], [], []>} : vector<8x256xf32>, vector<256x32xf32>, vector<8x32xf32> -> vector<8x32xf32>
    %c0_326 = arith.constant 0 : index
    %c0_327 = arith.constant 0 : index
    %968 = vector.load %arg7[%c0_326, %c0_327] : memref<8x32xf32, #tpu.memory_space<vmem>>, vector<8x32xf32>
    tpu.vector_store %arg7[%c0_326, %c0_327], %967 {strides = array<i32>} : memref<8x32xf32, #tpu.memory_space<vmem>>, vector<8x32xf32>,
    return
  }
  func.func @transform_0(%arg0: i32) -> (i32, i32) {
    %c0_i32 = arith.constant 0 : i32
    %c0_i32_0 = arith.constant 0 : i32
    return %arg0, %c0_i32 : i32, i32
  }
  func.func @transform_1(%arg0: i32) -> (i32, i32) {
    %c0_i32 = arith.constant 0 : i32
    %c0_i32_0 = arith.constant 0 : i32
    %c0_i32_1 = arith.constant 0 : i32
    return %c0_i32, %c0_i32_0 : i32, i32
  }
  func.func @transform_2(%arg0: i32) -> (i32, i32) {
    %c0_i32 = arith.constant 0 : i32
    %c0_i32_0 = arith.constant 0 : i32
    %c0_i32_1 = arith.constant 0 : i32
    return %c0_i32, %c0_i32_0 : i32, i32
  }
  func.func @transform_3(%arg0: i32) -> (i32, i32) {
    %c0_i32 = arith.constant 0 : i32
    %c0_i32_0 = arith.constant 0 : i32
    %c0_i32_1 = arith.constant 0 : i32
    return %c0_i32, %c0_i32_0 : i32, i32
  }
  func.func @transform_4(%arg0: i32) -> (i32, i32, i32) {
    %c0_i32 = arith.constant 0 : i32
    %c0_i32_0 = arith.constant 0 : i32
    %c0_i32_1 = arith.constant 0 : i32
    %c0_i32_2 = arith.constant 0 : i32
    return %c0_i32, %c0_i32_0, %c0_i32_1 : i32, i32, i32
  }
  func.func @transform_5(%arg0: i32) -> (i32, i32) {
    %c0_i32 = arith.constant 0 : i32
    %c0_i32_0 = arith.constant 0 : i32
    %c0_i32_1 = arith.constant 0 : i32
    return %c0_i32, %c0_i32_0 : i32, i32
  }
  func.func @transform_6(%arg0: i32) -> (i32, i32) {
    %c0_i32 = arith.constant 0 : i32
    %c0_i32_0 = arith.constant 0 : i32
    return %arg0, %c0_i32 : i32, i32
  }
}

module attributes {stable_mosaic.version = 11 : i64} {
  func.func @pkm_fused_kernel(%arg0: i32, %arg1: memref<8x32xbf16, #tpu.memory_space<vmem>>, %arg2: memref<32x64xbf16, #tpu.memory_space<vmem>>, %arg3: memref<1x16xf32, #tpu.memory_space<vmem>>, %arg4: memref<1x16xf32, #tpu.memory_space<vmem>>, %arg5: memref<4x16x16xbf16, #tpu.memory_space<vmem>>, %arg6: memref<256x32xf32, #tpu.memory_space<vmem>>, %arg7: memref<8x32xf32, #tpu.memory_space<vmem>>) attributes {dimension_semantics = [#tpu.dimension_semantics<parallel>], iteration_bounds = array<i64: 2>, scalar_prefetch = 0 : i64, scratch_operands = 0 : i64, tpu.core_type = #tpu.core_type<tc>, window_params = [{transform_indices = @transform_0, window_bounds = array<i64: 8, 32>}, {pipeline_mode = #tpu.pipeline_mode<synchronous>, transform_indices = @transform_1, window_bounds = array<i64: 32, 64>}, {pipeline_mode = #tpu.pipeline_mode<synchronous>, transform_indices = @transform_2, window_bounds = array<i64: 1, 16>}, {pipeline_mode = #tpu.pipeline_mode<synchronous>, transform_indices = @transform_3, window_bounds = array<i64: 1, 16>}, {pipeline_mode = #tpu.pipeline_mode<synchronous>, transform_indices = @transform_4, window_bounds = array<i64: 4, 16, 16>}, {pipeline_mode = #tpu.pipeline_mode<synchronous>, transform_indices = @transform_5, window_bounds = array<i64: 256, 32>}, {transform_indices = @transform_6, window_bounds = array<i64: 8, 32>}]} {
    %c0 = arith.constant 0 : index
    %c0_0 = arith.constant 0 : index
    %0 = vector.load %arg1[%c0, %c0_0] : memref<8x32xbf16, #tpu.memory_space<vmem>>, vector<8x32xbf16>
    %c0_1 = arith.constant 0 : index
    %c0_2 = arith.constant 0 : index
    %1 = vector.load %arg3[%c0_1, %c0_2] : memref<1x16xf32, #tpu.memory_space<vmem>>, vector<1x16xf32>
    %c0_3 = arith.constant 0 : index
    %c0_4 = arith.constant 0 : index
    %2 = vector.load %arg4[%c0_3, %c0_4] : memref<1x16xf32, #tpu.memory_space<vmem>>, vector<1x16xf32>
    %c0_5 = arith.constant 0 : index
    %c0_6 = arith.constant 0 : index
    %3 = vector.load %arg2[%c0_5, %c0_6] : memref<32x64xbf16, #tpu.memory_space<vmem>>, vector<32x64xbf16>
    %cst = arith.constant dense<0.000000e+00> : vector<8x64xf32>
    %4 = tpu.matmul %0, %3, %cst {dimension_numbers = #tpu.dot_dimension_numbers<[1], [0], [0], [1], [0, 0, 1, 1], [], []>} : vector<8x32xbf16>, vector<32x64xbf16>, vector<8x64xf32> -> vector<8x64xf32>
    %5 = tpu.iota {dimensions = array<i32: 1>} : vector<8x16xi32>
    %6 = tpu.iota {dimensions = array<i32: 1>} : vector<8x4xi32>
    %7 = tpu.iota {dimensions = array<i32: 1>} : vector<8x16xi32>
    %8 = tpu.iota {dimensions = array<i32: 1>} : vector<8x256xi32>
    %cst_7 = arith.constant 0.000000e+00 : f32
    %9 = vector.broadcast %cst_7 : f32 to vector<8x256xf32>
    %10 = vector.extract_strided_slice %4 {offsets = [0, 0], sizes = [8, 16], strides = [1, 1]} : vector<8x64xf32> to vector<8x16xf32>
    %cst_8 = arith.constant dense<0.000000e+00> : vector<8xf32>
    %11 = vector.multi_reduction <add>, %10, %cst_8 [1] : vector<8x16xf32> to vector<8xf32>
    %12 = vector.shape_cast %11 : vector<8xf32> to vector<8x1xf32>
    %cst_9 = arith.constant 1.600000e+01 : f32
    %13 = vector.broadcast %cst_9 : f32 to vector<8x1xf32>
    %14 = arith.divf %12, %13 : vector<8x1xf32>
    %15 = vector.broadcast %14 : vector<8x1xf32> to vector<8x16xf32>
    %16 = arith.subf %10, %15 : vector<8x16xf32>
    %17 = arith.mulf %16, %16 : vector<8x16xf32>
    %cst_10 = arith.constant dense<0.000000e+00> : vector<8xf32>
    %18 = vector.multi_reduction <add>, %17, %cst_10 [1] : vector<8x16xf32> to vector<8xf32>
    %19 = vector.shape_cast %18 : vector<8xf32> to vector<8x1xf32>
    %cst_11 = arith.constant 1.600000e+01 : f32
    %20 = vector.broadcast %cst_11 : f32 to vector<8x1xf32>
    %21 = arith.divf %19, %20 : vector<8x1xf32>
    %22 = vector.broadcast %14 : vector<8x1xf32> to vector<8x16xf32>
    %23 = arith.subf %10, %22 : vector<8x16xf32>
    %cst_12 = arith.constant 9.99999974E-6 : f32
    %24 = vector.broadcast %cst_12 : f32 to vector<8x1xf32>
    %25 = arith.addf %21, %24 : vector<8x1xf32>
    %26 = math.rsqrt %25 : vector<8x1xf32>
    %27 = vector.broadcast %26 : vector<8x1xf32> to vector<8x16xf32>
    %28 = arith.mulf %23, %27 : vector<8x16xf32>
    %29 = vector.broadcast %1 : vector<1x16xf32> to vector<8x16xf32>
    %30 = arith.mulf %28, %29 : vector<8x16xf32>
    %31 = vector.broadcast %2 : vector<1x16xf32> to vector<8x16xf32>
    %32 = arith.addf %30, %31 : vector<8x16xf32>
    %33 = arith.truncf %32 : vector<8x16xf32> to vector<8x16xbf16>
    %c0_13 = arith.constant 0 : index
    %c0_14 = arith.constant 0 : index
    %c0_15 = arith.constant 0 : index
    %34 = vector.load %arg5[%c0_13, %c0_14, %c0_15] : memref<4x16x16xbf16, #tpu.memory_space<vmem>>, vector<1x16x16xbf16>
    %35 = vector.shape_cast %34 : vector<1x16x16xbf16> to vector<16x16xbf16>
    %cst_16 = arith.constant dense<0.000000e+00> : vector<8x16xf32>
    %36 = tpu.matmul %33, %35, %cst_16 {dimension_numbers = #tpu.dot_dimension_numbers<[1], [0], [0], [1], [0, 0, 1, 1], [], []>} : vector<8x16xbf16>, vector<16x16xbf16>, vector<8x16xf32> -> vector<8x16xf32>
    %37 = tpu.bitcast %36 : vector<8x16xf32> -> vector<8x16xi32>
    %c0_i32 = arith.constant 0 : i32
    %38 = vector.broadcast %c0_i32 : i32 to vector<8x16xi32>
    %39 = arith.cmpi sge, %37, %38 : vector<8x16xi32>
    %c2147483647_i32 = arith.constant 2147483647 : i32
    %40 = vector.broadcast %c2147483647_i32 : i32 to vector<8x16xi32>
    %41 = arith.xori %37, %40 : vector<8x16xi32>
    %42 = arith.select %39, %37, %41 : vector<8x16xi1>, vector<8x16xi32>
    %c8_i32 = arith.constant 8 : i32
    %43 = vector.broadcast %c8_i32 : i32 to vector<8x16xi32>
    %44 = arith.addi %42, %43 : vector<8x16xi32>
    %c-16_i32 = arith.constant -16 : i32
    %45 = vector.broadcast %c-16_i32 : i32 to vector<8x16xi32>
    %46 = arith.andi %44, %45 : vector<8x16xi32>
    %c15_i32 = arith.constant 15 : i32
    %47 = vector.broadcast %c15_i32 : i32 to vector<8x16xi32>
    %48 = arith.subi %47, %5 : vector<8x16xi32>
    %49 = arith.ori %46, %48 : vector<8x16xi32>
    %cst_17 = arith.constant dense<-2147483648> : vector<8xi32>
    %50 = vector.multi_reduction <maxsi>, %49, %cst_17 [1] : vector<8x16xi32> to vector<8xi32>
    %51 = vector.shape_cast %50 : vector<8xi32> to vector<8x1xi32>
    %c15_i32_18 = arith.constant 15 : i32
    %52 = vector.broadcast %c15_i32_18 : i32 to vector<8x1xi32>
    %53 = arith.andi %51, %52 : vector<8x1xi32>
    %c15_i32_19 = arith.constant 15 : i32
    %54 = vector.broadcast %c15_i32_19 : i32 to vector<8x1xi32>
    %55 = arith.subi %54, %53 : vector<8x1xi32>
    %c-16_i32_20 = arith.constant -16 : i32
    %56 = vector.broadcast %c-16_i32_20 : i32 to vector<8x1xi32>
    %57 = arith.andi %51, %56 : vector<8x1xi32>
    %c0_i32_21 = arith.constant 0 : i32
    %58 = vector.broadcast %c0_i32_21 : i32 to vector<8x1xi32>
    %59 = arith.cmpi sge, %57, %58 : vector<8x1xi32>
    %c2147483647_i32_22 = arith.constant 2147483647 : i32
    %60 = vector.broadcast %c2147483647_i32_22 : i32 to vector<8x1xi32>
    %61 = arith.xori %57, %60 : vector<8x1xi32>
    %62 = arith.select %59, %57, %61 : vector<8x1xi1>, vector<8x1xi32>
    %63 = tpu.bitcast %62 : vector<8x1xi32> -> vector<8x1xf32>
    %64 = vector.broadcast %51 : vector<8x1xi32> to vector<8x16xi32>
    %65 = arith.cmpi eq, %49, %64 : vector<8x16xi32>
    %c-2147483648_i32 = arith.constant -2147483648 : i32
    %66 = vector.broadcast %c-2147483648_i32 : i32 to vector<8x16xi32>
    %67 = arith.select %65, %66, %49 : vector<8x16xi1>, vector<8x16xi32>
    %cst_23 = arith.constant dense<-2147483648> : vector<8xi32>
    %68 = vector.multi_reduction <maxsi>, %67, %cst_23 [1] : vector<8x16xi32> to vector<8xi32>
    %69 = vector.shape_cast %68 : vector<8xi32> to vector<8x1xi32>
    %c15_i32_24 = arith.constant 15 : i32
    %70 = vector.broadcast %c15_i32_24 : i32 to vector<8x1xi32>
    %71 = arith.andi %69, %70 : vector<8x1xi32>
    %c15_i32_25 = arith.constant 15 : i32
    %72 = vector.broadcast %c15_i32_25 : i32 to vector<8x1xi32>
    %73 = arith.subi %72, %71 : vector<8x1xi32>
    %c-16_i32_26 = arith.constant -16 : i32
    %74 = vector.broadcast %c-16_i32_26 : i32 to vector<8x1xi32>
    %75 = arith.andi %69, %74 : vector<8x1xi32>
    %c0_i32_27 = arith.constant 0 : i32
    %76 = vector.broadcast %c0_i32_27 : i32 to vector<8x1xi32>
    %77 = arith.cmpi sge, %75, %76 : vector<8x1xi32>
    %c2147483647_i32_28 = arith.constant 2147483647 : i32
    %78 = vector.broadcast %c2147483647_i32_28 : i32 to vector<8x1xi32>
    %79 = arith.xori %75, %78 : vector<8x1xi32>
    %80 = arith.select %77, %75, %79 : vector<8x1xi1>, vector<8x1xi32>
    %81 = tpu.bitcast %80 : vector<8x1xi32> -> vector<8x1xf32>
    %82 = vector.broadcast %69 : vector<8x1xi32> to vector<8x16xi32>
    %83 = arith.cmpi eq, %67, %82 : vector<8x16xi32>
    %c-2147483648_i32_29 = arith.constant -2147483648 : i32
    %84 = vector.broadcast %c-2147483648_i32_29 : i32 to vector<8x16xi32>
    %85 = arith.select %83, %84, %67 : vector<8x16xi1>, vector<8x16xi32>
    %cst_30 = arith.constant dense<-2147483648> : vector<8xi32>
    %86 = vector.multi_reduction <maxsi>, %85, %cst_30 [1] : vector<8x16xi32> to vector<8xi32>
    %87 = vector.shape_cast %86 : vector<8xi32> to vector<8x1xi32>
    %c15_i32_31 = arith.constant 15 : i32
    %88 = vector.broadcast %c15_i32_31 : i32 to vector<8x1xi32>
    %89 = arith.andi %87, %88 : vector<8x1xi32>
    %c15_i32_32 = arith.constant 15 : i32
    %90 = vector.broadcast %c15_i32_32 : i32 to vector<8x1xi32>
    %91 = arith.subi %90, %89 : vector<8x1xi32>
    %c-16_i32_33 = arith.constant -16 : i32
    %92 = vector.broadcast %c-16_i32_33 : i32 to vector<8x1xi32>
    %93 = arith.andi %87, %92 : vector<8x1xi32>
    %c0_i32_34 = arith.constant 0 : i32
    %94 = vector.broadcast %c0_i32_34 : i32 to vector<8x1xi32>
    %95 = arith.cmpi sge, %93, %94 : vector<8x1xi32>
    %c2147483647_i32_35 = arith.constant 2147483647 : i32
    %96 = vector.broadcast %c2147483647_i32_35 : i32 to vector<8x1xi32>
    %97 = arith.xori %93, %96 : vector<8x1xi32>
    %98 = arith.select %95, %93, %97 : vector<8x1xi1>, vector<8x1xi32>
    %99 = tpu.bitcast %98 : vector<8x1xi32> -> vector<8x1xf32>
    %100 = vector.broadcast %87 : vector<8x1xi32> to vector<8x16xi32>
    %101 = arith.cmpi eq, %85, %100 : vector<8x16xi32>
    %c-2147483648_i32_36 = arith.constant -2147483648 : i32
    %102 = vector.broadcast %c-2147483648_i32_36 : i32 to vector<8x16xi32>
    %103 = arith.select %101, %102, %85 : vector<8x16xi1>, vector<8x16xi32>
    %cst_37 = arith.constant dense<-2147483648> : vector<8xi32>
    %104 = vector.multi_reduction <maxsi>, %103, %cst_37 [1] : vector<8x16xi32> to vector<8xi32>
    %105 = vector.shape_cast %104 : vector<8xi32> to vector<8x1xi32>
    %c15_i32_38 = arith.constant 15 : i32
    %106 = vector.broadcast %c15_i32_38 : i32 to vector<8x1xi32>
    %107 = arith.andi %105, %106 : vector<8x1xi32>
    %c15_i32_39 = arith.constant 15 : i32
    %108 = vector.broadcast %c15_i32_39 : i32 to vector<8x1xi32>
    %109 = arith.subi %108, %107 : vector<8x1xi32>
    %c-16_i32_40 = arith.constant -16 : i32
    %110 = vector.broadcast %c-16_i32_40 : i32 to vector<8x1xi32>
    %111 = arith.andi %105, %110 : vector<8x1xi32>
    %c0_i32_41 = arith.constant 0 : i32
    %112 = vector.broadcast %c0_i32_41 : i32 to vector<8x1xi32>
    %113 = arith.cmpi sge, %111, %112 : vector<8x1xi32>
    %c2147483647_i32_42 = arith.constant 2147483647 : i32
    %114 = vector.broadcast %c2147483647_i32_42 : i32 to vector<8x1xi32>
    %115 = arith.xori %111, %114 : vector<8x1xi32>
    %116 = arith.select %113, %111, %115 : vector<8x1xi1>, vector<8x1xi32>
    %117 = tpu.bitcast %116 : vector<8x1xi32> -> vector<8x1xf32>
    %118 = vector.extract_strided_slice %4 {offsets = [0, 32], sizes = [8, 16], strides = [1, 1]} : vector<8x64xf32> to vector<8x16xf32>
    %cst_43 = arith.constant dense<0.000000e+00> : vector<8xf32>
    %119 = vector.multi_reduction <add>, %118, %cst_43 [1] : vector<8x16xf32> to vector<8xf32>
    %120 = vector.shape_cast %119 : vector<8xf32> to vector<8x1xf32>
    %cst_44 = arith.constant 1.600000e+01 : f32
    %121 = vector.broadcast %cst_44 : f32 to vector<8x1xf32>
    %122 = arith.divf %120, %121 : vector<8x1xf32>
    %123 = vector.broadcast %122 : vector<8x1xf32> to vector<8x16xf32>
    %124 = arith.subf %118, %123 : vector<8x16xf32>
    %125 = arith.mulf %124, %124 : vector<8x16xf32>
    %cst_45 = arith.constant dense<0.000000e+00> : vector<8xf32>
    %126 = vector.multi_reduction <add>, %125, %cst_45 [1] : vector<8x16xf32> to vector<8xf32>
    %127 = vector.shape_cast %126 : vector<8xf32> to vector<8x1xf32>
    %cst_46 = arith.constant 1.600000e+01 : f32
    %128 = vector.broadcast %cst_46 : f32 to vector<8x1xf32>
    %129 = arith.divf %127, %128 : vector<8x1xf32>
    %130 = vector.broadcast %122 : vector<8x1xf32> to vector<8x16xf32>
    %131 = arith.subf %118, %130 : vector<8x16xf32>
    %cst_47 = arith.constant 9.99999974E-6 : f32
    %132 = vector.broadcast %cst_47 : f32 to vector<8x1xf32>
    %133 = arith.addf %129, %132 : vector<8x1xf32>
    %134 = math.rsqrt %133 : vector<8x1xf32>
    %135 = vector.broadcast %134 : vector<8x1xf32> to vector<8x16xf32>
    %136 = arith.mulf %131, %135 : vector<8x16xf32>
    %137 = vector.broadcast %1 : vector<1x16xf32> to vector<8x16xf32>
    %138 = arith.mulf %136, %137 : vector<8x16xf32>
    %139 = vector.broadcast %2 : vector<1x16xf32> to vector<8x16xf32>
    %140 = arith.addf %138, %139 : vector<8x16xf32>
    %141 = arith.truncf %140 : vector<8x16xf32> to vector<8x16xbf16>
    %c2 = arith.constant 2 : index
    %c0_48 = arith.constant 0 : index
    %c0_49 = arith.constant 0 : index
    %142 = vector.load %arg5[%c2, %c0_48, %c0_49] : memref<4x16x16xbf16, #tpu.memory_space<vmem>>, vector<1x16x16xbf16>
    %143 = vector.shape_cast %142 : vector<1x16x16xbf16> to vector<16x16xbf16>
    %cst_50 = arith.constant dense<0.000000e+00> : vector<8x16xf32>
    %144 = tpu.matmul %141, %143, %cst_50 {dimension_numbers = #tpu.dot_dimension_numbers<[1], [0], [0], [1], [0, 0, 1, 1], [], []>} : vector<8x16xbf16>, vector<16x16xbf16>, vector<8x16xf32> -> vector<8x16xf32>
    %145 = tpu.bitcast %144 : vector<8x16xf32> -> vector<8x16xi32>
    %c0_i32_51 = arith.constant 0 : i32
    %146 = vector.broadcast %c0_i32_51 : i32 to vector<8x16xi32>
    %147 = arith.cmpi sge, %145, %146 : vector<8x16xi32>
    %c2147483647_i32_52 = arith.constant 2147483647 : i32
    %148 = vector.broadcast %c2147483647_i32_52 : i32 to vector<8x16xi32>
    %149 = arith.xori %145, %148 : vector<8x16xi32>
    %150 = arith.select %147, %145, %149 : vector<8x16xi1>, vector<8x16xi32>
    %c8_i32_53 = arith.constant 8 : i32
    %151 = vector.broadcast %c8_i32_53 : i32 to vector<8x16xi32>
    %152 = arith.addi %150, %151 : vector<8x16xi32>
    %c-16_i32_54 = arith.constant -16 : i32
    %153 = vector.broadcast %c-16_i32_54 : i32 to vector<8x16xi32>
    %154 = arith.andi %152, %153 : vector<8x16xi32>
    %c15_i32_55 = arith.constant 15 : i32
    %155 = vector.broadcast %c15_i32_55 : i32 to vector<8x16xi32>
    %156 = arith.subi %155, %5 : vector<8x16xi32>
    %157 = arith.ori %154, %156 : vector<8x16xi32>
    %cst_56 = arith.constant dense<-2147483648> : vector<8xi32>
    %158 = vector.multi_reduction <maxsi>, %157, %cst_56 [1] : vector<8x16xi32> to vector<8xi32>
    %159 = vector.shape_cast %158 : vector<8xi32> to vector<8x1xi32>
    %c15_i32_57 = arith.constant 15 : i32
    %160 = vector.broadcast %c15_i32_57 : i32 to vector<8x1xi32>
    %161 = arith.andi %159, %160 : vector<8x1xi32>
    %c15_i32_58 = arith.constant 15 : i32
    %162 = vector.broadcast %c15_i32_58 : i32 to vector<8x1xi32>
    %163 = arith.subi %162, %161 : vector<8x1xi32>
    %c-16_i32_59 = arith.constant -16 : i32
    %164 = vector.broadcast %c-16_i32_59 : i32 to vector<8x1xi32>
    %165 = arith.andi %159, %164 : vector<8x1xi32>
    %c0_i32_60 = arith.constant 0 : i32
    %166 = vector.broadcast %c0_i32_60 : i32 to vector<8x1xi32>
    %167 = arith.cmpi sge, %165, %166 : vector<8x1xi32>
    %c2147483647_i32_61 = arith.constant 2147483647 : i32
    %168 = vector.broadcast %c2147483647_i32_61 : i32 to vector<8x1xi32>
    %169 = arith.xori %165, %168 : vector<8x1xi32>
    %170 = arith.select %167, %165, %169 : vector<8x1xi1>, vector<8x1xi32>
    %171 = tpu.bitcast %170 : vector<8x1xi32> -> vector<8x1xf32>
    %172 = vector.broadcast %159 : vector<8x1xi32> to vector<8x16xi32>
    %173 = arith.cmpi eq, %157, %172 : vector<8x16xi32>
    %c-2147483648_i32_62 = arith.constant -2147483648 : i32
    %174 = vector.broadcast %c-2147483648_i32_62 : i32 to vector<8x16xi32>
    %175 = arith.select %173, %174, %157 : vector<8x16xi1>, vector<8x16xi32>
    %cst_63 = arith.constant dense<-2147483648> : vector<8xi32>
    %176 = vector.multi_reduction <maxsi>, %175, %cst_63 [1] : vector<8x16xi32> to vector<8xi32>
    %177 = vector.shape_cast %176 : vector<8xi32> to vector<8x1xi32>
    %c15_i32_64 = arith.constant 15 : i32
    %178 = vector.broadcast %c15_i32_64 : i32 to vector<8x1xi32>
    %179 = arith.andi %177, %178 : vector<8x1xi32>
    %c15_i32_65 = arith.constant 15 : i32
    %180 = vector.broadcast %c15_i32_65 : i32 to vector<8x1xi32>
    %181 = arith.subi %180, %179 : vector<8x1xi32>
    %c-16_i32_66 = arith.constant -16 : i32
    %182 = vector.broadcast %c-16_i32_66 : i32 to vector<8x1xi32>
    %183 = arith.andi %177, %182 : vector<8x1xi32>
    %c0_i32_67 = arith.constant 0 : i32
    %184 = vector.broadcast %c0_i32_67 : i32 to vector<8x1xi32>
    %185 = arith.cmpi sge, %183, %184 : vector<8x1xi32>
    %c2147483647_i32_68 = arith.constant 2147483647 : i32
    %186 = vector.broadcast %c2147483647_i32_68 : i32 to vector<8x1xi32>
    %187 = arith.xori %183, %186 : vector<8x1xi32>
    %188 = arith.select %185, %183, %187 : vector<8x1xi1>, vector<8x1xi32>
    %189 = tpu.bitcast %188 : vector<8x1xi32> -> vector<8x1xf32>
    %190 = vector.broadcast %177 : vector<8x1xi32> to vector<8x16xi32>
    %191 = arith.cmpi eq, %175, %190 : vector<8x16xi32>
    %c-2147483648_i32_69 = arith.constant -2147483648 : i32
    %192 = vector.broadcast %c-2147483648_i32_69 : i32 to vector<8x16xi32>
    %193 = arith.select %191, %192, %175 : vector<8x16xi1>, vector<8x16xi32>
    %cst_70 = arith.constant dense<-2147483648> : vector<8xi32>
    %194 = vector.multi_reduction <maxsi>, %193, %cst_70 [1] : vector<8x16xi32> to vector<8xi32>
    %195 = vector.shape_cast %194 : vector<8xi32> to vector<8x1xi32>
    %c15_i32_71 = arith.constant 15 : i32
    %196 = vector.broadcast %c15_i32_71 : i32 to vector<8x1xi32>
    %197 = arith.andi %195, %196 : vector<8x1xi32>
    %c15_i32_72 = arith.constant 15 : i32
    %198 = vector.broadcast %c15_i32_72 : i32 to vector<8x1xi32>
    %199 = arith.subi %198, %197 : vector<8x1xi32>
    %c-16_i32_73 = arith.constant -16 : i32
    %200 = vector.broadcast %c-16_i32_73 : i32 to vector<8x1xi32>
    %201 = arith.andi %195, %200 : vector<8x1xi32>
    %c0_i32_74 = arith.constant 0 : i32
    %202 = vector.broadcast %c0_i32_74 : i32 to vector<8x1xi32>
    %203 = arith.cmpi sge, %201, %202 : vector<8x1xi32>
    %c2147483647_i32_75 = arith.constant 2147483647 : i32
    %204 = vector.broadcast %c2147483647_i32_75 : i32 to vector<8x1xi32>
    %205 = arith.xori %201, %204 : vector<8x1xi32>
    %206 = arith.select %203, %201, %205 : vector<8x1xi1>, vector<8x1xi32>
    %207 = tpu.bitcast %206 : vector<8x1xi32> -> vector<8x1xf32>
    %208 = vector.broadcast %195 : vector<8x1xi32> to vector<8x16xi32>
    %209 = arith.cmpi eq, %193, %208 : vector<8x16xi32>
    %c-2147483648_i32_76 = arith.constant -2147483648 : i32
    %210 = vector.broadcast %c-2147483648_i32_76 : i32 to vector<8x16xi32>
    %211 = arith.select %209, %210, %193 : vector<8x16xi1>, vector<8x16xi32>
    %cst_77 = arith.constant dense<-2147483648> : vector<8xi32>
    %212 = vector.multi_reduction <maxsi>, %211, %cst_77 [1] : vector<8x16xi32> to vector<8xi32>
    %213 = vector.shape_cast %212 : vector<8xi32> to vector<8x1xi32>
    %c15_i32_78 = arith.constant 15 : i32
    %214 = vector.broadcast %c15_i32_78 : i32 to vector<8x1xi32>
    %215 = arith.andi %213, %214 : vector<8x1xi32>
    %c15_i32_79 = arith.constant 15 : i32
    %216 = vector.broadcast %c15_i32_79 : i32 to vector<8x1xi32>
    %217 = arith.subi %216, %215 : vector<8x1xi32>
    %c-16_i32_80 = arith.constant -16 : i32
    %218 = vector.broadcast %c-16_i32_80 : i32 to vector<8x1xi32>
    %219 = arith.andi %213, %218 : vector<8x1xi32>
    %c0_i32_81 = arith.constant 0 : i32
    %220 = vector.broadcast %c0_i32_81 : i32 to vector<8x1xi32>
    %221 = arith.cmpi sge, %219, %220 : vector<8x1xi32>
    %c2147483647_i32_82 = arith.constant 2147483647 : i32
    %222 = vector.broadcast %c2147483647_i32_82 : i32 to vector<8x1xi32>
    %223 = arith.xori %219, %222 : vector<8x1xi32>
    %224 = arith.select %221, %219, %223 : vector<8x1xi1>, vector<8x1xi32>
    %225 = tpu.bitcast %224 : vector<8x1xi32> -> vector<8x1xf32>
    %226 = tpu.concatenate %171, %189, %207, %225 in 1 : vector<8x1xf32>, vector<8x1xf32>, vector<8x1xf32>, vector<8x1xf32> -> vector<8x4xf32>
    %227 = tpu.concatenate %163, %181, %199, %217 in 1 : vector<8x1xi32>, vector<8x1xi32>, vector<8x1xi32>, vector<8x1xi32> -> vector<8x4xi32>
    %228 = tpu.concatenate %55, %73, %91, %109 in 1 : vector<8x1xi32>, vector<8x1xi32>, vector<8x1xi32>, vector<8x1xi32> -> vector<8x4xi32>
    %229 = vector.broadcast %63 : vector<8x1xf32> to vector<8x4xf32>
    %230 = arith.addf %229, %226 : vector<8x4xf32>
    %231 = vector.broadcast %81 : vector<8x1xf32> to vector<8x4xf32>
    %232 = arith.addf %231, %226 : vector<8x4xf32>
    %233 = vector.broadcast %99 : vector<8x1xf32> to vector<8x4xf32>
    %234 = arith.addf %233, %226 : vector<8x4xf32>
    %235 = vector.broadcast %117 : vector<8x1xf32> to vector<8x4xf32>
    %236 = arith.addf %235, %226 : vector<8x4xf32>
    %237 = tpu.concatenate %230, %232, %234, %236 in 1 : vector<8x4xf32>, vector<8x4xf32>, vector<8x4xf32>, vector<8x4xf32> -> vector<8x16xf32>
    %238 = tpu.bitcast %237 : vector<8x16xf32> -> vector<8x16xi32>
    %c0_i32_83 = arith.constant 0 : i32
    %239 = vector.broadcast %c0_i32_83 : i32 to vector<8x16xi32>
    %240 = arith.cmpi sge, %238, %239 : vector<8x16xi32>
    %c2147483647_i32_84 = arith.constant 2147483647 : i32
    %241 = vector.broadcast %c2147483647_i32_84 : i32 to vector<8x16xi32>
    %242 = arith.xori %238, %241 : vector<8x16xi32>
    %243 = arith.select %240, %238, %242 : vector<8x16xi1>, vector<8x16xi32>
    %c8_i32_85 = arith.constant 8 : i32
    %244 = vector.broadcast %c8_i32_85 : i32 to vector<8x16xi32>
    %245 = arith.addi %243, %244 : vector<8x16xi32>
    %c-16_i32_86 = arith.constant -16 : i32
    %246 = vector.broadcast %c-16_i32_86 : i32 to vector<8x16xi32>
    %247 = arith.andi %245, %246 : vector<8x16xi32>
    %c15_i32_87 = arith.constant 15 : i32
    %248 = vector.broadcast %c15_i32_87 : i32 to vector<8x16xi32>
    %249 = arith.subi %248, %7 : vector<8x16xi32>
    %250 = arith.ori %247, %249 : vector<8x16xi32>
    %cst_88 = arith.constant dense<-2147483648> : vector<8xi32>
    %251 = vector.multi_reduction <maxsi>, %250, %cst_88 [1] : vector<8x16xi32> to vector<8xi32>
    %252 = vector.shape_cast %251 : vector<8xi32> to vector<8x1xi32>
    %c15_i32_89 = arith.constant 15 : i32
    %253 = vector.broadcast %c15_i32_89 : i32 to vector<8x1xi32>
    %254 = arith.andi %252, %253 : vector<8x1xi32>
    %c15_i32_90 = arith.constant 15 : i32
    %255 = vector.broadcast %c15_i32_90 : i32 to vector<8x1xi32>
    %256 = arith.subi %255, %254 : vector<8x1xi32>
    %c-16_i32_91 = arith.constant -16 : i32
    %257 = vector.broadcast %c-16_i32_91 : i32 to vector<8x1xi32>
    %258 = arith.andi %252, %257 : vector<8x1xi32>
    %c0_i32_92 = arith.constant 0 : i32
    %259 = vector.broadcast %c0_i32_92 : i32 to vector<8x1xi32>
    %260 = arith.cmpi sge, %258, %259 : vector<8x1xi32>
    %c2147483647_i32_93 = arith.constant 2147483647 : i32
    %261 = vector.broadcast %c2147483647_i32_93 : i32 to vector<8x1xi32>
    %262 = arith.xori %258, %261 : vector<8x1xi32>
    %263 = arith.select %260, %258, %262 : vector<8x1xi1>, vector<8x1xi32>
    %264 = tpu.bitcast %263 : vector<8x1xi32> -> vector<8x1xf32>
    %265 = vector.broadcast %252 : vector<8x1xi32> to vector<8x16xi32>
    %266 = arith.cmpi eq, %250, %265 : vector<8x16xi32>
    %c-2147483648_i32_94 = arith.constant -2147483648 : i32
    %267 = vector.broadcast %c-2147483648_i32_94 : i32 to vector<8x16xi32>
    %268 = arith.select %266, %267, %250 : vector<8x16xi1>, vector<8x16xi32>
    %cst_95 = arith.constant dense<-2147483648> : vector<8xi32>
    %269 = vector.multi_reduction <maxsi>, %268, %cst_95 [1] : vector<8x16xi32> to vector<8xi32>
    %270 = vector.shape_cast %269 : vector<8xi32> to vector<8x1xi32>
    %c15_i32_96 = arith.constant 15 : i32
    %271 = vector.broadcast %c15_i32_96 : i32 to vector<8x1xi32>
    %272 = arith.andi %270, %271 : vector<8x1xi32>
    %c15_i32_97 = arith.constant 15 : i32
    %273 = vector.broadcast %c15_i32_97 : i32 to vector<8x1xi32>
    %274 = arith.subi %273, %272 : vector<8x1xi32>
    %c-16_i32_98 = arith.constant -16 : i32
    %275 = vector.broadcast %c-16_i32_98 : i32 to vector<8x1xi32>
    %276 = arith.andi %270, %275 : vector<8x1xi32>
    %c0_i32_99 = arith.constant 0 : i32
    %277 = vector.broadcast %c0_i32_99 : i32 to vector<8x1xi32>
    %278 = arith.cmpi sge, %276, %277 : vector<8x1xi32>
    %c2147483647_i32_100 = arith.constant 2147483647 : i32
    %279 = vector.broadcast %c2147483647_i32_100 : i32 to vector<8x1xi32>
    %280 = arith.xori %276, %279 : vector<8x1xi32>
    %281 = arith.select %278, %276, %280 : vector<8x1xi1>, vector<8x1xi32>
    %282 = tpu.bitcast %281 : vector<8x1xi32> -> vector<8x1xf32>
    %283 = vector.broadcast %270 : vector<8x1xi32> to vector<8x16xi32>
    %284 = arith.cmpi eq, %268, %283 : vector<8x16xi32>
    %c-2147483648_i32_101 = arith.constant -2147483648 : i32
    %285 = vector.broadcast %c-2147483648_i32_101 : i32 to vector<8x16xi32>
    %286 = arith.select %284, %285, %268 : vector<8x16xi1>, vector<8x16xi32>
    %cst_102 = arith.constant dense<-2147483648> : vector<8xi32>
    %287 = vector.multi_reduction <maxsi>, %286, %cst_102 [1] : vector<8x16xi32> to vector<8xi32>
    %288 = vector.shape_cast %287 : vector<8xi32> to vector<8x1xi32>
    %c15_i32_103 = arith.constant 15 : i32
    %289 = vector.broadcast %c15_i32_103 : i32 to vector<8x1xi32>
    %290 = arith.andi %288, %289 : vector<8x1xi32>
    %c15_i32_104 = arith.constant 15 : i32
    %291 = vector.broadcast %c15_i32_104 : i32 to vector<8x1xi32>
    %292 = arith.subi %291, %290 : vector<8x1xi32>
    %c-16_i32_105 = arith.constant -16 : i32
    %293 = vector.broadcast %c-16_i32_105 : i32 to vector<8x1xi32>
    %294 = arith.andi %288, %293 : vector<8x1xi32>
    %c0_i32_106 = arith.constant 0 : i32
    %295 = vector.broadcast %c0_i32_106 : i32 to vector<8x1xi32>
    %296 = arith.cmpi sge, %294, %295 : vector<8x1xi32>
    %c2147483647_i32_107 = arith.constant 2147483647 : i32
    %297 = vector.broadcast %c2147483647_i32_107 : i32 to vector<8x1xi32>
    %298 = arith.xori %294, %297 : vector<8x1xi32>
    %299 = arith.select %296, %294, %298 : vector<8x1xi1>, vector<8x1xi32>
    %300 = tpu.bitcast %299 : vector<8x1xi32> -> vector<8x1xf32>
    %301 = vector.broadcast %288 : vector<8x1xi32> to vector<8x16xi32>
    %302 = arith.cmpi eq, %286, %301 : vector<8x16xi32>
    %c-2147483648_i32_108 = arith.constant -2147483648 : i32
    %303 = vector.broadcast %c-2147483648_i32_108 : i32 to vector<8x16xi32>
    %304 = arith.select %302, %303, %286 : vector<8x16xi1>, vector<8x16xi32>
    %cst_109 = arith.constant dense<-2147483648> : vector<8xi32>
    %305 = vector.multi_reduction <maxsi>, %304, %cst_109 [1] : vector<8x16xi32> to vector<8xi32>
    %306 = vector.shape_cast %305 : vector<8xi32> to vector<8x1xi32>
    %c15_i32_110 = arith.constant 15 : i32
    %307 = vector.broadcast %c15_i32_110 : i32 to vector<8x1xi32>
    %308 = arith.andi %306, %307 : vector<8x1xi32>
    %c15_i32_111 = arith.constant 15 : i32
    %309 = vector.broadcast %c15_i32_111 : i32 to vector<8x1xi32>
    %310 = arith.subi %309, %308 : vector<8x1xi32>
    %c-16_i32_112 = arith.constant -16 : i32
    %311 = vector.broadcast %c-16_i32_112 : i32 to vector<8x1xi32>
    %312 = arith.andi %306, %311 : vector<8x1xi32>
    %c0_i32_113 = arith.constant 0 : i32
    %313 = vector.broadcast %c0_i32_113 : i32 to vector<8x1xi32>
    %314 = arith.cmpi sge, %312, %313 : vector<8x1xi32>
    %c2147483647_i32_114 = arith.constant 2147483647 : i32
    %315 = vector.broadcast %c2147483647_i32_114 : i32 to vector<8x1xi32>
    %316 = arith.xori %312, %315 : vector<8x1xi32>
    %317 = arith.select %314, %312, %316 : vector<8x1xi1>, vector<8x1xi32>
    %318 = tpu.bitcast %317 : vector<8x1xi32> -> vector<8x1xf32>
    %319 = arith.subf %264, %264 : vector<8x1xf32>
    %320 = math.exp %319 : vector<8x1xf32>
    %321 = arith.subf %282, %264 : vector<8x1xf32>
    %322 = math.exp %321 : vector<8x1xf32>
    %323 = arith.subf %300, %264 : vector<8x1xf32>
    %324 = math.exp %323 : vector<8x1xf32>
    %325 = arith.subf %318, %264 : vector<8x1xf32>
    %326 = math.exp %325 : vector<8x1xf32>
    %327 = arith.addf %320, %322 : vector<8x1xf32>
    %328 = arith.addf %327, %324 : vector<8x1xf32>
    %329 = arith.addf %328, %326 : vector<8x1xf32>
    %cst_115 = arith.constant 1.000000e+00 : f32
    %330 = vector.broadcast %cst_115 : f32 to vector<8x1xf32>
    %331 = arith.divf %330, %329 : vector<8x1xf32>
    %c4_i32 = arith.constant 4 : i32
    %332 = vector.broadcast %c4_i32 : i32 to vector<8x4xi32>
    %333 = arith.muli %6, %332 : vector<8x4xi32>
    %334 = vector.broadcast %256 : vector<8x1xi32> to vector<8x4xi32>
    %335 = arith.cmpi sge, %334, %333 : vector<8x4xi32>
    %c4_i32_116 = arith.constant 4 : i32
    %336 = vector.broadcast %c4_i32_116 : i32 to vector<8x4xi32>
    %337 = arith.muli %6, %336 : vector<8x4xi32>
    %c4_i32_117 = arith.constant 4 : i32
    %338 = vector.broadcast %c4_i32_117 : i32 to vector<8x4xi32>
    %339 = arith.addi %337, %338 : vector<8x4xi32>
    %340 = vector.broadcast %256 : vector<8x1xi32> to vector<8x4xi32>
    %341 = arith.cmpi slt, %340, %339 : vector<8x4xi32>
    %342 = arith.andi %335, %341 : vector<8x4xi1>
    %c0_i32_118 = arith.constant 0 : i32
    %343 = vector.broadcast %c0_i32_118 : i32 to vector<8x4xi32>
    %344 = arith.select %342, %228, %343 : vector<8x4xi1>, vector<8x4xi32>
    %cst_119 = arith.constant dense<-2147483648> : vector<8xi32>
    %345 = vector.multi_reduction <maxsi>, %344, %cst_119 [1] : vector<8x4xi32> to vector<8xi32>
    %346 = vector.shape_cast %345 : vector<8xi32> to vector<8x1xi32>
    %c0_i32_120 = arith.constant 0 : i32
    %347 = vector.broadcast %c0_i32_120 : i32 to vector<8x4xi32>
    %348 = arith.select %342, %6, %347 : vector<8x4xi1>, vector<8x4xi32>
    %cst_121 = arith.constant dense<-2147483648> : vector<8xi32>
    %349 = vector.multi_reduction <maxsi>, %348, %cst_121 [1] : vector<8x4xi32> to vector<8xi32>
    %350 = vector.shape_cast %349 : vector<8xi32> to vector<8x1xi32>
    %c4_i32_122 = arith.constant 4 : i32
    %351 = vector.broadcast %c4_i32_122 : i32 to vector<8x1xi32>
    %352 = arith.muli %350, %351 : vector<8x1xi32>
    %353 = arith.subi %256, %352 : vector<8x1xi32>
    %354 = vector.broadcast %353 : vector<8x1xi32> to vector<8x4xi32>
    %355 = arith.cmpi eq, %6, %354 : vector<8x4xi32>
    %c0_i32_123 = arith.constant 0 : i32
    %356 = vector.broadcast %c0_i32_123 : i32 to vector<8x4xi32>
    %357 = arith.select %355, %227, %356 : vector<8x4xi1>, vector<8x4xi32>
    %cst_124 = arith.constant dense<-2147483648> : vector<8xi32>
    %358 = vector.multi_reduction <maxsi>, %357, %cst_124 [1] : vector<8x4xi32> to vector<8xi32>
    %359 = vector.shape_cast %358 : vector<8xi32> to vector<8x1xi32>
    %c16_i32 = arith.constant 16 : i32
    %360 = vector.broadcast %c16_i32 : i32 to vector<8x1xi32>
    %361 = arith.muli %346, %360 : vector<8x1xi32>
    %362 = arith.addi %361, %359 : vector<8x1xi32>
    %363 = arith.mulf %320, %331 : vector<8x1xf32>
    %364 = vector.broadcast %362 : vector<8x1xi32> to vector<8x256xi32>
    %365 = arith.cmpi eq, %8, %364 : vector<8x256xi32>
    %cst_125 = arith.constant 0.000000e+00 : f32
    %366 = vector.shape_cast %363 : vector<8x1xf32> to vector<8x1xf32>
    %367 = vector.broadcast %366 : vector<8x1xf32> to vector<8x256xf32>
    %368 = vector.broadcast %cst_125 : f32 to vector<8x256xf32>
    %369 = arith.select %365, %367, %368 : vector<8x256xi1>, vector<8x256xf32>
    %370 = arith.addf %9, %369 : vector<8x256xf32>
    %c4_i32_126 = arith.constant 4 : i32
    %371 = vector.broadcast %c4_i32_126 : i32 to vector<8x4xi32>
    %372 = arith.muli %6, %371 : vector<8x4xi32>
    %373 = vector.broadcast %274 : vector<8x1xi32> to vector<8x4xi32>
    %374 = arith.cmpi sge, %373, %372 : vector<8x4xi32>
    %c4_i32_127 = arith.constant 4 : i32
    %375 = vector.broadcast %c4_i32_127 : i32 to vector<8x4xi32>
    %376 = arith.muli %6, %375 : vector<8x4xi32>
    %c4_i32_128 = arith.constant 4 : i32
    %377 = vector.broadcast %c4_i32_128 : i32 to vector<8x4xi32>
    %378 = arith.addi %376, %377 : vector<8x4xi32>
    %379 = vector.broadcast %274 : vector<8x1xi32> to vector<8x4xi32>
    %380 = arith.cmpi slt, %379, %378 : vector<8x4xi32>
    %381 = arith.andi %374, %380 : vector<8x4xi1>
    %c0_i32_129 = arith.constant 0 : i32
    %382 = vector.broadcast %c0_i32_129 : i32 to vector<8x4xi32>
    %383 = arith.select %381, %228, %382 : vector<8x4xi1>, vector<8x4xi32>
    %cst_130 = arith.constant dense<-2147483648> : vector<8xi32>
    %384 = vector.multi_reduction <maxsi>, %383, %cst_130 [1] : vector<8x4xi32> to vector<8xi32>
    %385 = vector.shape_cast %384 : vector<8xi32> to vector<8x1xi32>
    %c0_i32_131 = arith.constant 0 : i32
    %386 = vector.broadcast %c0_i32_131 : i32 to vector<8x4xi32>
    %387 = arith.select %381, %6, %386 : vector<8x4xi1>, vector<8x4xi32>
    %cst_132 = arith.constant dense<-2147483648> : vector<8xi32>
    %388 = vector.multi_reduction <maxsi>, %387, %cst_132 [1] : vector<8x4xi32> to vector<8xi32>
    %389 = vector.shape_cast %388 : vector<8xi32> to vector<8x1xi32>
    %c4_i32_133 = arith.constant 4 : i32
    %390 = vector.broadcast %c4_i32_133 : i32 to vector<8x1xi32>
    %391 = arith.muli %389, %390 : vector<8x1xi32>
    %392 = arith.subi %274, %391 : vector<8x1xi32>
    %393 = vector.broadcast %392 : vector<8x1xi32> to vector<8x4xi32>
    %394 = arith.cmpi eq, %6, %393 : vector<8x4xi32>
    %c0_i32_134 = arith.constant 0 : i32
    %395 = vector.broadcast %c0_i32_134 : i32 to vector<8x4xi32>
    %396 = arith.select %394, %227, %395 : vector<8x4xi1>, vector<8x4xi32>
    %cst_135 = arith.constant dense<-2147483648> : vector<8xi32>
    %397 = vector.multi_reduction <maxsi>, %396, %cst_135 [1] : vector<8x4xi32> to vector<8xi32>
    %398 = vector.shape_cast %397 : vector<8xi32> to vector<8x1xi32>
    %c16_i32_136 = arith.constant 16 : i32
    %399 = vector.broadcast %c16_i32_136 : i32 to vector<8x1xi32>
    %400 = arith.muli %385, %399 : vector<8x1xi32>
    %401 = arith.addi %400, %398 : vector<8x1xi32>
    %402 = arith.mulf %322, %331 : vector<8x1xf32>
    %403 = vector.broadcast %401 : vector<8x1xi32> to vector<8x256xi32>
    %404 = arith.cmpi eq, %8, %403 : vector<8x256xi32>
    %cst_137 = arith.constant 0.000000e+00 : f32
    %405 = vector.shape_cast %402 : vector<8x1xf32> to vector<8x1xf32>
    %406 = vector.broadcast %405 : vector<8x1xf32> to vector<8x256xf32>
    %407 = vector.broadcast %cst_137 : f32 to vector<8x256xf32>
    %408 = arith.select %404, %406, %407 : vector<8x256xi1>, vector<8x256xf32>
    %409 = arith.addf %370, %408 : vector<8x256xf32>
    %c4_i32_138 = arith.constant 4 : i32
    %410 = vector.broadcast %c4_i32_138 : i32 to vector<8x4xi32>
    %411 = arith.muli %6, %410 : vector<8x4xi32>
    %412 = vector.broadcast %292 : vector<8x1xi32> to vector<8x4xi32>
    %413 = arith.cmpi sge, %412, %411 : vector<8x4xi32>
    %c4_i32_139 = arith.constant 4 : i32
    %414 = vector.broadcast %c4_i32_139 : i32 to vector<8x4xi32>
    %415 = arith.muli %6, %414 : vector<8x4xi32>
    %c4_i32_140 = arith.constant 4 : i32
    %416 = vector.broadcast %c4_i32_140 : i32 to vector<8x4xi32>
    %417 = arith.addi %415, %416 : vector<8x4xi32>
    %418 = vector.broadcast %292 : vector<8x1xi32> to vector<8x4xi32>
    %419 = arith.cmpi slt, %418, %417 : vector<8x4xi32>
    %420 = arith.andi %413, %419 : vector<8x4xi1>
    %c0_i32_141 = arith.constant 0 : i32
    %421 = vector.broadcast %c0_i32_141 : i32 to vector<8x4xi32>
    %422 = arith.select %420, %228, %421 : vector<8x4xi1>, vector<8x4xi32>
    %cst_142 = arith.constant dense<-2147483648> : vector<8xi32>
    %423 = vector.multi_reduction <maxsi>, %422, %cst_142 [1] : vector<8x4xi32> to vector<8xi32>
    %424 = vector.shape_cast %423 : vector<8xi32> to vector<8x1xi32>
    %c0_i32_143 = arith.constant 0 : i32
    %425 = vector.broadcast %c0_i32_143 : i32 to vector<8x4xi32>
    %426 = arith.select %420, %6, %425 : vector<8x4xi1>, vector<8x4xi32>
    %cst_144 = arith.constant dense<-2147483648> : vector<8xi32>
    %427 = vector.multi_reduction <maxsi>, %426, %cst_144 [1] : vector<8x4xi32> to vector<8xi32>
    %428 = vector.shape_cast %427 : vector<8xi32> to vector<8x1xi32>
    %c4_i32_145 = arith.constant 4 : i32
    %429 = vector.broadcast %c4_i32_145 : i32 to vector<8x1xi32>
    %430 = arith.muli %428, %429 : vector<8x1xi32>
    %431 = arith.subi %292, %430 : vector<8x1xi32>
    %432 = vector.broadcast %431 : vector<8x1xi32> to vector<8x4xi32>
    %433 = arith.cmpi eq, %6, %432 : vector<8x4xi32>
    %c0_i32_146 = arith.constant 0 : i32
    %434 = vector.broadcast %c0_i32_146 : i32 to vector<8x4xi32>
    %435 = arith.select %433, %227, %434 : vector<8x4xi1>, vector<8x4xi32>
    %cst_147 = arith.constant dense<-2147483648> : vector<8xi32>
    %436 = vector.multi_reduction <maxsi>, %435, %cst_147 [1] : vector<8x4xi32> to vector<8xi32>
    %437 = vector.shape_cast %436 : vector<8xi32> to vector<8x1xi32>
    %c16_i32_148 = arith.constant 16 : i32
    %438 = vector.broadcast %c16_i32_148 : i32 to vector<8x1xi32>
    %439 = arith.muli %424, %438 : vector<8x1xi32>
    %440 = arith.addi %439, %437 : vector<8x1xi32>
    %441 = arith.mulf %324, %331 : vector<8x1xf32>
    %442 = vector.broadcast %440 : vector<8x1xi32> to vector<8x256xi32>
    %443 = arith.cmpi eq, %8, %442 : vector<8x256xi32>
    %cst_149 = arith.constant 0.000000e+00 : f32
    %444 = vector.shape_cast %441 : vector<8x1xf32> to vector<8x1xf32>
    %445 = vector.broadcast %444 : vector<8x1xf32> to vector<8x256xf32>
    %446 = vector.broadcast %cst_149 : f32 to vector<8x256xf32>
    %447 = arith.select %443, %445, %446 : vector<8x256xi1>, vector<8x256xf32>
    %448 = arith.addf %409, %447 : vector<8x256xf32>
    %c4_i32_150 = arith.constant 4 : i32
    %449 = vector.broadcast %c4_i32_150 : i32 to vector<8x4xi32>
    %450 = arith.muli %6, %449 : vector<8x4xi32>
    %451 = vector.broadcast %310 : vector<8x1xi32> to vector<8x4xi32>
    %452 = arith.cmpi sge, %451, %450 : vector<8x4xi32>
    %c4_i32_151 = arith.constant 4 : i32
    %453 = vector.broadcast %c4_i32_151 : i32 to vector<8x4xi32>
    %454 = arith.muli %6, %453 : vector<8x4xi32>
    %c4_i32_152 = arith.constant 4 : i32
    %455 = vector.broadcast %c4_i32_152 : i32 to vector<8x4xi32>
    %456 = arith.addi %454, %455 : vector<8x4xi32>
    %457 = vector.broadcast %310 : vector<8x1xi32> to vector<8x4xi32>
    %458 = arith.cmpi slt, %457, %456 : vector<8x4xi32>
    %459 = arith.andi %452, %458 : vector<8x4xi1>
    %c0_i32_153 = arith.constant 0 : i32
    %460 = vector.broadcast %c0_i32_153 : i32 to vector<8x4xi32>
    %461 = arith.select %459, %228, %460 : vector<8x4xi1>, vector<8x4xi32>
    %cst_154 = arith.constant dense<-2147483648> : vector<8xi32>
    %462 = vector.multi_reduction <maxsi>, %461, %cst_154 [1] : vector<8x4xi32> to vector<8xi32>
    %463 = vector.shape_cast %462 : vector<8xi32> to vector<8x1xi32>
    %c0_i32_155 = arith.constant 0 : i32
    %464 = vector.broadcast %c0_i32_155 : i32 to vector<8x4xi32>
    %465 = arith.select %459, %6, %464 : vector<8x4xi1>, vector<8x4xi32>
    %cst_156 = arith.constant dense<-2147483648> : vector<8xi32>
    %466 = vector.multi_reduction <maxsi>, %465, %cst_156 [1] : vector<8x4xi32> to vector<8xi32>
    %467 = vector.shape_cast %466 : vector<8xi32> to vector<8x1xi32>
    %c4_i32_157 = arith.constant 4 : i32
    %468 = vector.broadcast %c4_i32_157 : i32 to vector<8x1xi32>
    %469 = arith.muli %467, %468 : vector<8x1xi32>
    %470 = arith.subi %310, %469 : vector<8x1xi32>
    %471 = vector.broadcast %470 : vector<8x1xi32> to vector<8x4xi32>
    %472 = arith.cmpi eq, %6, %471 : vector<8x4xi32>
    %c0_i32_158 = arith.constant 0 : i32
    %473 = vector.broadcast %c0_i32_158 : i32 to vector<8x4xi32>
    %474 = arith.select %472, %227, %473 : vector<8x4xi1>, vector<8x4xi32>
    %cst_159 = arith.constant dense<-2147483648> : vector<8xi32>
    %475 = vector.multi_reduction <maxsi>, %474, %cst_159 [1] : vector<8x4xi32> to vector<8xi32>
    %476 = vector.shape_cast %475 : vector<8xi32> to vector<8x1xi32>
    %c16_i32_160 = arith.constant 16 : i32
    %477 = vector.broadcast %c16_i32_160 : i32 to vector<8x1xi32>
    %478 = arith.muli %463, %477 : vector<8x1xi32>
    %479 = arith.addi %478, %476 : vector<8x1xi32>
    %480 = arith.mulf %326, %331 : vector<8x1xf32>
    %481 = vector.broadcast %479 : vector<8x1xi32> to vector<8x256xi32>
    %482 = arith.cmpi eq, %8, %481 : vector<8x256xi32>
    %cst_161 = arith.constant 0.000000e+00 : f32
    %483 = vector.shape_cast %480 : vector<8x1xf32> to vector<8x1xf32>
    %484 = vector.broadcast %483 : vector<8x1xf32> to vector<8x256xf32>
    %485 = vector.broadcast %cst_161 : f32 to vector<8x256xf32>
    %486 = arith.select %482, %484, %485 : vector<8x256xi1>, vector<8x256xf32>
    %487 = arith.addf %448, %486 : vector<8x256xf32>
    %488 = vector.extract_strided_slice %4 {offsets = [0, 16], sizes = [8, 16], strides = [1, 1]} : vector<8x64xf32> to vector<8x16xf32>
    %cst_162 = arith.constant dense<0.000000e+00> : vector<8xf32>
    %489 = vector.multi_reduction <add>, %488, %cst_162 [1] : vector<8x16xf32> to vector<8xf32>
    %490 = vector.shape_cast %489 : vector<8xf32> to vector<8x1xf32>
    %cst_163 = arith.constant 1.600000e+01 : f32
    %491 = vector.broadcast %cst_163 : f32 to vector<8x1xf32>
    %492 = arith.divf %490, %491 : vector<8x1xf32>
    %493 = vector.broadcast %492 : vector<8x1xf32> to vector<8x16xf32>
    %494 = arith.subf %488, %493 : vector<8x16xf32>
    %495 = arith.mulf %494, %494 : vector<8x16xf32>
    %cst_164 = arith.constant dense<0.000000e+00> : vector<8xf32>
    %496 = vector.multi_reduction <add>, %495, %cst_164 [1] : vector<8x16xf32> to vector<8xf32>
    %497 = vector.shape_cast %496 : vector<8xf32> to vector<8x1xf32>
    %cst_165 = arith.constant 1.600000e+01 : f32
    %498 = vector.broadcast %cst_165 : f32 to vector<8x1xf32>
    %499 = arith.divf %497, %498 : vector<8x1xf32>
    %500 = vector.broadcast %492 : vector<8x1xf32> to vector<8x16xf32>
    %501 = arith.subf %488, %500 : vector<8x16xf32>
    %cst_166 = arith.constant 9.99999974E-6 : f32
    %502 = vector.broadcast %cst_166 : f32 to vector<8x1xf32>
    %503 = arith.addf %499, %502 : vector<8x1xf32>
    %504 = math.rsqrt %503 : vector<8x1xf32>
    %505 = vector.broadcast %504 : vector<8x1xf32> to vector<8x16xf32>
    %506 = arith.mulf %501, %505 : vector<8x16xf32>
    %507 = vector.broadcast %1 : vector<1x16xf32> to vector<8x16xf32>
    %508 = arith.mulf %506, %507 : vector<8x16xf32>
    %509 = vector.broadcast %2 : vector<1x16xf32> to vector<8x16xf32>
    %510 = arith.addf %508, %509 : vector<8x16xf32>
    %511 = arith.truncf %510 : vector<8x16xf32> to vector<8x16xbf16>
    %c1 = arith.constant 1 : index
    %c0_167 = arith.constant 0 : index
    %c0_168 = arith.constant 0 : index
    %512 = vector.load %arg5[%c1, %c0_167, %c0_168] : memref<4x16x16xbf16, #tpu.memory_space<vmem>>, vector<1x16x16xbf16>
    %513 = vector.shape_cast %512 : vector<1x16x16xbf16> to vector<16x16xbf16>
    %cst_169 = arith.constant dense<0.000000e+00> : vector<8x16xf32>
    %514 = tpu.matmul %511, %513, %cst_169 {dimension_numbers = #tpu.dot_dimension_numbers<[1], [0], [0], [1], [0, 0, 1, 1], [], []>} : vector<8x16xbf16>, vector<16x16xbf16>, vector<8x16xf32> -> vector<8x16xf32>
    %515 = tpu.bitcast %514 : vector<8x16xf32> -> vector<8x16xi32>
    %c0_i32_170 = arith.constant 0 : i32
    %516 = vector.broadcast %c0_i32_170 : i32 to vector<8x16xi32>
    %517 = arith.cmpi sge, %515, %516 : vector<8x16xi32>
    %c2147483647_i32_171 = arith.constant 2147483647 : i32
    %518 = vector.broadcast %c2147483647_i32_171 : i32 to vector<8x16xi32>
    %519 = arith.xori %515, %518 : vector<8x16xi32>
    %520 = arith.select %517, %515, %519 : vector<8x16xi1>, vector<8x16xi32>
    %c8_i32_172 = arith.constant 8 : i32
    %521 = vector.broadcast %c8_i32_172 : i32 to vector<8x16xi32>
    %522 = arith.addi %520, %521 : vector<8x16xi32>
    %c-16_i32_173 = arith.constant -16 : i32
    %523 = vector.broadcast %c-16_i32_173 : i32 to vector<8x16xi32>
    %524 = arith.andi %522, %523 : vector<8x16xi32>
    %c15_i32_174 = arith.constant 15 : i32
    %525 = vector.broadcast %c15_i32_174 : i32 to vector<8x16xi32>
    %526 = arith.subi %525, %5 : vector<8x16xi32>
    %527 = arith.ori %524, %526 : vector<8x16xi32>
    %cst_175 = arith.constant dense<-2147483648> : vector<8xi32>
    %528 = vector.multi_reduction <maxsi>, %527, %cst_175 [1] : vector<8x16xi32> to vector<8xi32>
    %529 = vector.shape_cast %528 : vector<8xi32> to vector<8x1xi32>
    %c15_i32_176 = arith.constant 15 : i32
    %530 = vector.broadcast %c15_i32_176 : i32 to vector<8x1xi32>
    %531 = arith.andi %529, %530 : vector<8x1xi32>
    %c15_i32_177 = arith.constant 15 : i32
    %532 = vector.broadcast %c15_i32_177 : i32 to vector<8x1xi32>
    %533 = arith.subi %532, %531 : vector<8x1xi32>
    %c-16_i32_178 = arith.constant -16 : i32
    %534 = vector.broadcast %c-16_i32_178 : i32 to vector<8x1xi32>
    %535 = arith.andi %529, %534 : vector<8x1xi32>
    %c0_i32_179 = arith.constant 0 : i32
    %536 = vector.broadcast %c0_i32_179 : i32 to vector<8x1xi32>
    %537 = arith.cmpi sge, %535, %536 : vector<8x1xi32>
    %c2147483647_i32_180 = arith.constant 2147483647 : i32
    %538 = vector.broadcast %c2147483647_i32_180 : i32 to vector<8x1xi32>
    %539 = arith.xori %535, %538 : vector<8x1xi32>
    %540 = arith.select %537, %535, %539 : vector<8x1xi1>, vector<8x1xi32>
    %541 = tpu.bitcast %540 : vector<8x1xi32> -> vector<8x1xf32>
    %542 = vector.broadcast %529 : vector<8x1xi32> to vector<8x16xi32>
    %543 = arith.cmpi eq, %527, %542 : vector<8x16xi32>
    %c-2147483648_i32_181 = arith.constant -2147483648 : i32
    %544 = vector.broadcast %c-2147483648_i32_181 : i32 to vector<8x16xi32>
    %545 = arith.select %543, %544, %527 : vector<8x16xi1>, vector<8x16xi32>
    %cst_182 = arith.constant dense<-2147483648> : vector<8xi32>
    %546 = vector.multi_reduction <maxsi>, %545, %cst_182 [1] : vector<8x16xi32> to vector<8xi32>
    %547 = vector.shape_cast %546 : vector<8xi32> to vector<8x1xi32>
    %c15_i32_183 = arith.constant 15 : i32
    %548 = vector.broadcast %c15_i32_183 : i32 to vector<8x1xi32>
    %549 = arith.andi %547, %548 : vector<8x1xi32>
    %c15_i32_184 = arith.constant 15 : i32
    %550 = vector.broadcast %c15_i32_184 : i32 to vector<8x1xi32>
    %551 = arith.subi %550, %549 : vector<8x1xi32>
    %c-16_i32_185 = arith.constant -16 : i32
    %552 = vector.broadcast %c-16_i32_185 : i32 to vector<8x1xi32>
    %553 = arith.andi %547, %552 : vector<8x1xi32>
    %c0_i32_186 = arith.constant 0 : i32
    %554 = vector.broadcast %c0_i32_186 : i32 to vector<8x1xi32>
    %555 = arith.cmpi sge, %553, %554 : vector<8x1xi32>
    %c2147483647_i32_187 = arith.constant 2147483647 : i32
    %556 = vector.broadcast %c2147483647_i32_187 : i32 to vector<8x1xi32>
    %557 = arith.xori %553, %556 : vector<8x1xi32>
    %558 = arith.select %555, %553, %557 : vector<8x1xi1>, vector<8x1xi32>
    %559 = tpu.bitcast %558 : vector<8x1xi32> -> vector<8x1xf32>
    %560 = vector.broadcast %547 : vector<8x1xi32> to vector<8x16xi32>
    %561 = arith.cmpi eq, %545, %560 : vector<8x16xi32>
    %c-2147483648_i32_188 = arith.constant -2147483648 : i32
    %562 = vector.broadcast %c-2147483648_i32_188 : i32 to vector<8x16xi32>
    %563 = arith.select %561, %562, %545 : vector<8x16xi1>, vector<8x16xi32>
    %cst_189 = arith.constant dense<-2147483648> : vector<8xi32>
    %564 = vector.multi_reduction <maxsi>, %563, %cst_189 [1] : vector<8x16xi32> to vector<8xi32>
    %565 = vector.shape_cast %564 : vector<8xi32> to vector<8x1xi32>
    %c15_i32_190 = arith.constant 15 : i32
    %566 = vector.broadcast %c15_i32_190 : i32 to vector<8x1xi32>
    %567 = arith.andi %565, %566 : vector<8x1xi32>
    %c15_i32_191 = arith.constant 15 : i32
    %568 = vector.broadcast %c15_i32_191 : i32 to vector<8x1xi32>
    %569 = arith.subi %568, %567 : vector<8x1xi32>
    %c-16_i32_192 = arith.constant -16 : i32
    %570 = vector.broadcast %c-16_i32_192 : i32 to vector<8x1xi32>
    %571 = arith.andi %565, %570 : vector<8x1xi32>
    %c0_i32_193 = arith.constant 0 : i32
    %572 = vector.broadcast %c0_i32_193 : i32 to vector<8x1xi32>
    %573 = arith.cmpi sge, %571, %572 : vector<8x1xi32>
    %c2147483647_i32_194 = arith.constant 2147483647 : i32
    %574 = vector.broadcast %c2147483647_i32_194 : i32 to vector<8x1xi32>
    %575 = arith.xori %571, %574 : vector<8x1xi32>
    %576 = arith.select %573, %571, %575 : vector<8x1xi1>, vector<8x1xi32>
    %577 = tpu.bitcast %576 : vector<8x1xi32> -> vector<8x1xf32>
    %578 = vector.broadcast %565 : vector<8x1xi32> to vector<8x16xi32>
    %579 = arith.cmpi eq, %563, %578 : vector<8x16xi32>
    %c-2147483648_i32_195 = arith.constant -2147483648 : i32
    %580 = vector.broadcast %c-2147483648_i32_195 : i32 to vector<8x16xi32>
    %581 = arith.select %579, %580, %563 : vector<8x16xi1>, vector<8x16xi32>
    %cst_196 = arith.constant dense<-2147483648> : vector<8xi32>
    %582 = vector.multi_reduction <maxsi>, %581, %cst_196 [1] : vector<8x16xi32> to vector<8xi32>
    %583 = vector.shape_cast %582 : vector<8xi32> to vector<8x1xi32>
    %c15_i32_197 = arith.constant 15 : i32
    %584 = vector.broadcast %c15_i32_197 : i32 to vector<8x1xi32>
    %585 = arith.andi %583, %584 : vector<8x1xi32>
    %c15_i32_198 = arith.constant 15 : i32
    %586 = vector.broadcast %c15_i32_198 : i32 to vector<8x1xi32>
    %587 = arith.subi %586, %585 : vector<8x1xi32>
    %c-16_i32_199 = arith.constant -16 : i32
    %588 = vector.broadcast %c-16_i32_199 : i32 to vector<8x1xi32>
    %589 = arith.andi %583, %588 : vector<8x1xi32>
    %c0_i32_200 = arith.constant 0 : i32
    %590 = vector.broadcast %c0_i32_200 : i32 to vector<8x1xi32>
    %591 = arith.cmpi sge, %589, %590 : vector<8x1xi32>
    %c2147483647_i32_201 = arith.constant 2147483647 : i32
    %592 = vector.broadcast %c2147483647_i32_201 : i32 to vector<8x1xi32>
    %593 = arith.xori %589, %592 : vector<8x1xi32>
    %594 = arith.select %591, %589, %593 : vector<8x1xi1>, vector<8x1xi32>
    %595 = tpu.bitcast %594 : vector<8x1xi32> -> vector<8x1xf32>
    %596 = vector.extract_strided_slice %4 {offsets = [0, 48], sizes = [8, 16], strides = [1, 1]} : vector<8x64xf32> to vector<8x16xf32>
    %cst_202 = arith.constant dense<0.000000e+00> : vector<8xf32>
    %597 = vector.multi_reduction <add>, %596, %cst_202 [1] : vector<8x16xf32> to vector<8xf32>
    %598 = vector.shape_cast %597 : vector<8xf32> to vector<8x1xf32>
    %cst_203 = arith.constant 1.600000e+01 : f32
    %599 = vector.broadcast %cst_203 : f32 to vector<8x1xf32>
    %600 = arith.divf %598, %599 : vector<8x1xf32>
    %601 = vector.broadcast %600 : vector<8x1xf32> to vector<8x16xf32>
    %602 = arith.subf %596, %601 : vector<8x16xf32>
    %603 = arith.mulf %602, %602 : vector<8x16xf32>
    %cst_204 = arith.constant dense<0.000000e+00> : vector<8xf32>
    %604 = vector.multi_reduction <add>, %603, %cst_204 [1] : vector<8x16xf32> to vector<8xf32>
    %605 = vector.shape_cast %604 : vector<8xf32> to vector<8x1xf32>
    %cst_205 = arith.constant 1.600000e+01 : f32
    %606 = vector.broadcast %cst_205 : f32 to vector<8x1xf32>
    %607 = arith.divf %605, %606 : vector<8x1xf32>
    %608 = vector.broadcast %600 : vector<8x1xf32> to vector<8x16xf32>
    %609 = arith.subf %596, %608 : vector<8x16xf32>
    %cst_206 = arith.constant 9.99999974E-6 : f32
    %610 = vector.broadcast %cst_206 : f32 to vector<8x1xf32>
    %611 = arith.addf %607, %610 : vector<8x1xf32>
    %612 = math.rsqrt %611 : vector<8x1xf32>
    %613 = vector.broadcast %612 : vector<8x1xf32> to vector<8x16xf32>
    %614 = arith.mulf %609, %613 : vector<8x16xf32>
    %615 = vector.broadcast %1 : vector<1x16xf32> to vector<8x16xf32>
    %616 = arith.mulf %614, %615 : vector<8x16xf32>
    %617 = vector.broadcast %2 : vector<1x16xf32> to vector<8x16xf32>
    %618 = arith.addf %616, %617 : vector<8x16xf32>
    %619 = arith.truncf %618 : vector<8x16xf32> to vector<8x16xbf16>
    %c3 = arith.constant 3 : index
    %c0_207 = arith.constant 0 : index
    %c0_208 = arith.constant 0 : index
    %620 = vector.load %arg5[%c3, %c0_207, %c0_208] : memref<4x16x16xbf16, #tpu.memory_space<vmem>>, vector<1x16x16xbf16>
    %621 = vector.shape_cast %620 : vector<1x16x16xbf16> to vector<16x16xbf16>
    %cst_209 = arith.constant dense<0.000000e+00> : vector<8x16xf32>
    %622 = tpu.matmul %619, %621, %cst_209 {dimension_numbers = #tpu.dot_dimension_numbers<[1], [0], [0], [1], [0, 0, 1, 1], [], []>} : vector<8x16xbf16>, vector<16x16xbf16>, vector<8x16xf32> -> vector<8x16xf32>
    %623 = tpu.bitcast %622 : vector<8x16xf32> -> vector<8x16xi32>
    %c0_i32_210 = arith.constant 0 : i32
    %624 = vector.broadcast %c0_i32_210 : i32 to vector<8x16xi32>
    %625 = arith.cmpi sge, %623, %624 : vector<8x16xi32>
    %c2147483647_i32_211 = arith.constant 2147483647 : i32
    %626 = vector.broadcast %c2147483647_i32_211 : i32 to vector<8x16xi32>
    %627 = arith.xori %623, %626 : vector<8x16xi32>
    %628 = arith.select %625, %623, %627 : vector<8x16xi1>, vector<8x16xi32>
    %c8_i32_212 = arith.constant 8 : i32
    %629 = vector.broadcast %c8_i32_212 : i32 to vector<8x16xi32>
    %630 = arith.addi %628, %629 : vector<8x16xi32>
    %c-16_i32_213 = arith.constant -16 : i32
    %631 = vector.broadcast %c-16_i32_213 : i32 to vector<8x16xi32>
    %632 = arith.andi %630, %631 : vector<8x16xi32>
    %c15_i32_214 = arith.constant 15 : i32
    %633 = vector.broadcast %c15_i32_214 : i32 to vector<8x16xi32>
    %634 = arith.subi %633, %5 : vector<8x16xi32>
    %635 = arith.ori %632, %634 : vector<8x16xi32>
    %cst_215 = arith.constant dense<-2147483648> : vector<8xi32>
    %636 = vector.multi_reduction <maxsi>, %635, %cst_215 [1] : vector<8x16xi32> to vector<8xi32>
    %637 = vector.shape_cast %636 : vector<8xi32> to vector<8x1xi32>
    %c15_i32_216 = arith.constant 15 : i32
    %638 = vector.broadcast %c15_i32_216 : i32 to vector<8x1xi32>
    %639 = arith.andi %637, %638 : vector<8x1xi32>
    %c15_i32_217 = arith.constant 15 : i32
    %640 = vector.broadcast %c15_i32_217 : i32 to vector<8x1xi32>
    %641 = arith.subi %640, %639 : vector<8x1xi32>
    %c-16_i32_218 = arith.constant -16 : i32
    %642 = vector.broadcast %c-16_i32_218 : i32 to vector<8x1xi32>
    %643 = arith.andi %637, %642 : vector<8x1xi32>
    %c0_i32_219 = arith.constant 0 : i32
    %644 = vector.broadcast %c0_i32_219 : i32 to vector<8x1xi32>
    %645 = arith.cmpi sge, %643, %644 : vector<8x1xi32>
    %c2147483647_i32_220 = arith.constant 2147483647 : i32
    %646 = vector.broadcast %c2147483647_i32_220 : i32 to vector<8x1xi32>
    %647 = arith.xori %643, %646 : vector<8x1xi32>
    %648 = arith.select %645, %643, %647 : vector<8x1xi1>, vector<8x1xi32>
    %649 = tpu.bitcast %648 : vector<8x1xi32> -> vector<8x1xf32>
    %650 = vector.broadcast %637 : vector<8x1xi32> to vector<8x16xi32>
    %651 = arith.cmpi eq, %635, %650 : vector<8x16xi32>
    %c-2147483648_i32_221 = arith.constant -2147483648 : i32
    %652 = vector.broadcast %c-2147483648_i32_221 : i32 to vector<8x16xi32>
    %653 = arith.select %651, %652, %635 : vector<8x16xi1>, vector<8x16xi32>
    %cst_222 = arith.constant dense<-2147483648> : vector<8xi32>
    %654 = vector.multi_reduction <maxsi>, %653, %cst_222 [1] : vector<8x16xi32> to vector<8xi32>
    %655 = vector.shape_cast %654 : vector<8xi32> to vector<8x1xi32>
    %c15_i32_223 = arith.constant 15 : i32
    %656 = vector.broadcast %c15_i32_223 : i32 to vector<8x1xi32>
    %657 = arith.andi %655, %656 : vector<8x1xi32>
    %c15_i32_224 = arith.constant 15 : i32
    %658 = vector.broadcast %c15_i32_224 : i32 to vector<8x1xi32>
    %659 = arith.subi %658, %657 : vector<8x1xi32>
    %c-16_i32_225 = arith.constant -16 : i32
    %660 = vector.broadcast %c-16_i32_225 : i32 to vector<8x1xi32>
    %661 = arith.andi %655, %660 : vector<8x1xi32>
    %c0_i32_226 = arith.constant 0 : i32
    %662 = vector.broadcast %c0_i32_226 : i32 to vector<8x1xi32>
    %663 = arith.cmpi sge, %661, %662 : vector<8x1xi32>
    %c2147483647_i32_227 = arith.constant 2147483647 : i32
    %664 = vector.broadcast %c2147483647_i32_227 : i32 to vector<8x1xi32>
    %665 = arith.xori %661, %664 : vector<8x1xi32>
    %666 = arith.select %663, %661, %665 : vector<8x1xi1>, vector<8x1xi32>
    %667 = tpu.bitcast %666 : vector<8x1xi32> -> vector<8x1xf32>
    %668 = vector.broadcast %655 : vector<8x1xi32> to vector<8x16xi32>
    %669 = arith.cmpi eq, %653, %668 : vector<8x16xi32>
    %c-2147483648_i32_228 = arith.constant -2147483648 : i32
    %670 = vector.broadcast %c-2147483648_i32_228 : i32 to vector<8x16xi32>
    %671 = arith.select %669, %670, %653 : vector<8x16xi1>, vector<8x16xi32>
    %cst_229 = arith.constant dense<-2147483648> : vector<8xi32>
    %672 = vector.multi_reduction <maxsi>, %671, %cst_229 [1] : vector<8x16xi32> to vector<8xi32>
    %673 = vector.shape_cast %672 : vector<8xi32> to vector<8x1xi32>
    %c15_i32_230 = arith.constant 15 : i32
    %674 = vector.broadcast %c15_i32_230 : i32 to vector<8x1xi32>
    %675 = arith.andi %673, %674 : vector<8x1xi32>
    %c15_i32_231 = arith.constant 15 : i32
    %676 = vector.broadcast %c15_i32_231 : i32 to vector<8x1xi32>
    %677 = arith.subi %676, %675 : vector<8x1xi32>
    %c-16_i32_232 = arith.constant -16 : i32
    %678 = vector.broadcast %c-16_i32_232 : i32 to vector<8x1xi32>
    %679 = arith.andi %673, %678 : vector<8x1xi32>
    %c0_i32_233 = arith.constant 0 : i32
    %680 = vector.broadcast %c0_i32_233 : i32 to vector<8x1xi32>
    %681 = arith.cmpi sge, %679, %680 : vector<8x1xi32>
    %c2147483647_i32_234 = arith.constant 2147483647 : i32
    %682 = vector.broadcast %c2147483647_i32_234 : i32 to vector<8x1xi32>
    %683 = arith.xori %679, %682 : vector<8x1xi32>
    %684 = arith.select %681, %679, %683 : vector<8x1xi1>, vector<8x1xi32>
    %685 = tpu.bitcast %684 : vector<8x1xi32> -> vector<8x1xf32>
    %686 = vector.broadcast %673 : vector<8x1xi32> to vector<8x16xi32>
    %687 = arith.cmpi eq, %671, %686 : vector<8x16xi32>
    %c-2147483648_i32_235 = arith.constant -2147483648 : i32
    %688 = vector.broadcast %c-2147483648_i32_235 : i32 to vector<8x16xi32>
    %689 = arith.select %687, %688, %671 : vector<8x16xi1>, vector<8x16xi32>
    %cst_236 = arith.constant dense<-2147483648> : vector<8xi32>
    %690 = vector.multi_reduction <maxsi>, %689, %cst_236 [1] : vector<8x16xi32> to vector<8xi32>
    %691 = vector.shape_cast %690 : vector<8xi32> to vector<8x1xi32>
    %c15_i32_237 = arith.constant 15 : i32
    %692 = vector.broadcast %c15_i32_237 : i32 to vector<8x1xi32>
    %693 = arith.andi %691, %692 : vector<8x1xi32>
    %c15_i32_238 = arith.constant 15 : i32
    %694 = vector.broadcast %c15_i32_238 : i32 to vector<8x1xi32>
    %695 = arith.subi %694, %693 : vector<8x1xi32>
    %c-16_i32_239 = arith.constant -16 : i32
    %696 = vector.broadcast %c-16_i32_239 : i32 to vector<8x1xi32>
    %697 = arith.andi %691, %696 : vector<8x1xi32>
    %c0_i32_240 = arith.constant 0 : i32
    %698 = vector.broadcast %c0_i32_240 : i32 to vector<8x1xi32>
    %699 = arith.cmpi sge, %697, %698 : vector<8x1xi32>
    %c2147483647_i32_241 = arith.constant 2147483647 : i32
    %700 = vector.broadcast %c2147483647_i32_241 : i32 to vector<8x1xi32>
    %701 = arith.xori %697, %700 : vector<8x1xi32>
    %702 = arith.select %699, %697, %701 : vector<8x1xi1>, vector<8x1xi32>
    %703 = tpu.bitcast %702 : vector<8x1xi32> -> vector<8x1xf32>
    %704 = tpu.concatenate %649, %667, %685, %703 in 1 : vector<8x1xf32>, vector<8x1xf32>, vector<8x1xf32>, vector<8x1xf32> -> vector<8x4xf32>
    %705 = tpu.concatenate %641, %659, %677, %695 in 1 : vector<8x1xi32>, vector<8x1xi32>, vector<8x1xi32>, vector<8x1xi32> -> vector<8x4xi32>
    %706 = tpu.concatenate %533, %551, %569, %587 in 1 : vector<8x1xi32>, vector<8x1xi32>, vector<8x1xi32>, vector<8x1xi32> -> vector<8x4xi32>
    %707 = vector.broadcast %541 : vector<8x1xf32> to vector<8x4xf32>
    %708 = arith.addf %707, %704 : vector<8x4xf32>
    %709 = vector.broadcast %559 : vector<8x1xf32> to vector<8x4xf32>
    %710 = arith.addf %709, %704 : vector<8x4xf32>
    %711 = vector.broadcast %577 : vector<8x1xf32> to vector<8x4xf32>
    %712 = arith.addf %711, %704 : vector<8x4xf32>
    %713 = vector.broadcast %595 : vector<8x1xf32> to vector<8x4xf32>
    %714 = arith.addf %713, %704 : vector<8x4xf32>
    %715 = tpu.concatenate %708, %710, %712, %714 in 1 : vector<8x4xf32>, vector<8x4xf32>, vector<8x4xf32>, vector<8x4xf32> -> vector<8x16xf32>
    %716 = tpu.bitcast %715 : vector<8x16xf32> -> vector<8x16xi32>
    %c0_i32_242 = arith.constant 0 : i32
    %717 = vector.broadcast %c0_i32_242 : i32 to vector<8x16xi32>
    %718 = arith.cmpi sge, %716, %717 : vector<8x16xi32>
    %c2147483647_i32_243 = arith.constant 2147483647 : i32
    %719 = vector.broadcast %c2147483647_i32_243 : i32 to vector<8x16xi32>
    %720 = arith.xori %716, %719 : vector<8x16xi32>
    %721 = arith.select %718, %716, %720 : vector<8x16xi1>, vector<8x16xi32>
    %c8_i32_244 = arith.constant 8 : i32
    %722 = vector.broadcast %c8_i32_244 : i32 to vector<8x16xi32>
    %723 = arith.addi %721, %722 : vector<8x16xi32>
    %c-16_i32_245 = arith.constant -16 : i32
    %724 = vector.broadcast %c-16_i32_245 : i32 to vector<8x16xi32>
    %725 = arith.andi %723, %724 : vector<8x16xi32>
    %c15_i32_246 = arith.constant 15 : i32
    %726 = vector.broadcast %c15_i32_246 : i32 to vector<8x16xi32>
    %727 = arith.subi %726, %7 : vector<8x16xi32>
    %728 = arith.ori %725, %727 : vector<8x16xi32>
    %cst_247 = arith.constant dense<-2147483648> : vector<8xi32>
    %729 = vector.multi_reduction <maxsi>, %728, %cst_247 [1] : vector<8x16xi32> to vector<8xi32>
    %730 = vector.shape_cast %729 : vector<8xi32> to vector<8x1xi32>
    %c15_i32_248 = arith.constant 15 : i32
    %731 = vector.broadcast %c15_i32_248 : i32 to vector<8x1xi32>
    %732 = arith.andi %730, %731 : vector<8x1xi32>
    %c15_i32_249 = arith.constant 15 : i32
    %733 = vector.broadcast %c15_i32_249 : i32 to vector<8x1xi32>
    %734 = arith.subi %733, %732 : vector<8x1xi32>
    %c-16_i32_250 = arith.constant -16 : i32
    %735 = vector.broadcast %c-16_i32_250 : i32 to vector<8x1xi32>
    %736 = arith.andi %730, %735 : vector<8x1xi32>
    %c0_i32_251 = arith.constant 0 : i32
    %737 = vector.broadcast %c0_i32_251 : i32 to vector<8x1xi32>
    %738 = arith.cmpi sge, %736, %737 : vector<8x1xi32>
    %c2147483647_i32_252 = arith.constant 2147483647 : i32
    %739 = vector.broadcast %c2147483647_i32_252 : i32 to vector<8x1xi32>
    %740 = arith.xori %736, %739 : vector<8x1xi32>
    %741 = arith.select %738, %736, %740 : vector<8x1xi1>, vector<8x1xi32>
    %742 = tpu.bitcast %741 : vector<8x1xi32> -> vector<8x1xf32>
    %743 = vector.broadcast %730 : vector<8x1xi32> to vector<8x16xi32>
    %744 = arith.cmpi eq, %728, %743 : vector<8x16xi32>
    %c-2147483648_i32_253 = arith.constant -2147483648 : i32
    %745 = vector.broadcast %c-2147483648_i32_253 : i32 to vector<8x16xi32>
    %746 = arith.select %744, %745, %728 : vector<8x16xi1>, vector<8x16xi32>
    %cst_254 = arith.constant dense<-2147483648> : vector<8xi32>
    %747 = vector.multi_reduction <maxsi>, %746, %cst_254 [1] : vector<8x16xi32> to vector<8xi32>
    %748 = vector.shape_cast %747 : vector<8xi32> to vector<8x1xi32>
    %c15_i32_255 = arith.constant 15 : i32
    %749 = vector.broadcast %c15_i32_255 : i32 to vector<8x1xi32>
    %750 = arith.andi %748, %749 : vector<8x1xi32>
    %c15_i32_256 = arith.constant 15 : i32
    %751 = vector.broadcast %c15_i32_256 : i32 to vector<8x1xi32>
    %752 = arith.subi %751, %750 : vector<8x1xi32>
    %c-16_i32_257 = arith.constant -16 : i32
    %753 = vector.broadcast %c-16_i32_257 : i32 to vector<8x1xi32>
    %754 = arith.andi %748, %753 : vector<8x1xi32>
    %c0_i32_258 = arith.constant 0 : i32
    %755 = vector.broadcast %c0_i32_258 : i32 to vector<8x1xi32>
    %756 = arith.cmpi sge, %754, %755 : vector<8x1xi32>
    %c2147483647_i32_259 = arith.constant 2147483647 : i32
    %757 = vector.broadcast %c2147483647_i32_259 : i32 to vector<8x1xi32>
    %758 = arith.xori %754, %757 : vector<8x1xi32>
    %759 = arith.select %756, %754, %758 : vector<8x1xi1>, vector<8x1xi32>
    %760 = tpu.bitcast %759 : vector<8x1xi32> -> vector<8x1xf32>
    %761 = vector.broadcast %748 : vector<8x1xi32> to vector<8x16xi32>
    %762 = arith.cmpi eq, %746, %761 : vector<8x16xi32>
    %c-2147483648_i32_260 = arith.constant -2147483648 : i32
    %763 = vector.broadcast %c-2147483648_i32_260 : i32 to vector<8x16xi32>
    %764 = arith.select %762, %763, %746 : vector<8x16xi1>, vector<8x16xi32>
    %cst_261 = arith.constant dense<-2147483648> : vector<8xi32>
    %765 = vector.multi_reduction <maxsi>, %764, %cst_261 [1] : vector<8x16xi32> to vector<8xi32>
    %766 = vector.shape_cast %765 : vector<8xi32> to vector<8x1xi32>
    %c15_i32_262 = arith.constant 15 : i32
    %767 = vector.broadcast %c15_i32_262 : i32 to vector<8x1xi32>
    %768 = arith.andi %766, %767 : vector<8x1xi32>
    %c15_i32_263 = arith.constant 15 : i32
    %769 = vector.broadcast %c15_i32_263 : i32 to vector<8x1xi32>
    %770 = arith.subi %769, %768 : vector<8x1xi32>
    %c-16_i32_264 = arith.constant -16 : i32
    %771 = vector.broadcast %c-16_i32_264 : i32 to vector<8x1xi32>
    %772 = arith.andi %766, %771 : vector<8x1xi32>
    %c0_i32_265 = arith.constant 0 : i32
    %773 = vector.broadcast %c0_i32_265 : i32 to vector<8x1xi32>
    %774 = arith.cmpi sge, %772, %773 : vector<8x1xi32>
    %c2147483647_i32_266 = arith.constant 2147483647 : i32
    %775 = vector.broadcast %c2147483647_i32_266 : i32 to vector<8x1xi32>
    %776 = arith.xori %772, %775 : vector<8x1xi32>
    %777 = arith.select %774, %772, %776 : vector<8x1xi1>, vector<8x1xi32>
    %778 = tpu.bitcast %777 : vector<8x1xi32> -> vector<8x1xf32>
    %779 = vector.broadcast %766 : vector<8x1xi32> to vector<8x16xi32>
    %780 = arith.cmpi eq, %764, %779 : vector<8x16xi32>
    %c-2147483648_i32_267 = arith.constant -2147483648 : i32
    %781 = vector.broadcast %c-2147483648_i32_267 : i32 to vector<8x16xi32>
    %782 = arith.select %780, %781, %764 : vector<8x16xi1>, vector<8x16xi32>
    %cst_268 = arith.constant dense<-2147483648> : vector<8xi32>
    %783 = vector.multi_reduction <maxsi>, %782, %cst_268 [1] : vector<8x16xi32> to vector<8xi32>
    %784 = vector.shape_cast %783 : vector<8xi32> to vector<8x1xi32>
    %c15_i32_269 = arith.constant 15 : i32
    %785 = vector.broadcast %c15_i32_269 : i32 to vector<8x1xi32>
    %786 = arith.andi %784, %785 : vector<8x1xi32>
    %c15_i32_270 = arith.constant 15 : i32
    %787 = vector.broadcast %c15_i32_270 : i32 to vector<8x1xi32>
    %788 = arith.subi %787, %786 : vector<8x1xi32>
    %c-16_i32_271 = arith.constant -16 : i32
    %789 = vector.broadcast %c-16_i32_271 : i32 to vector<8x1xi32>
    %790 = arith.andi %784, %789 : vector<8x1xi32>
    %c0_i32_272 = arith.constant 0 : i32
    %791 = vector.broadcast %c0_i32_272 : i32 to vector<8x1xi32>
    %792 = arith.cmpi sge, %790, %791 : vector<8x1xi32>
    %c2147483647_i32_273 = arith.constant 2147483647 : i32
    %793 = vector.broadcast %c2147483647_i32_273 : i32 to vector<8x1xi32>
    %794 = arith.xori %790, %793 : vector<8x1xi32>
    %795 = arith.select %792, %790, %794 : vector<8x1xi1>, vector<8x1xi32>
    %796 = tpu.bitcast %795 : vector<8x1xi32> -> vector<8x1xf32>
    %797 = arith.subf %742, %742 : vector<8x1xf32>
    %798 = math.exp %797 : vector<8x1xf32>
    %799 = arith.subf %760, %742 : vector<8x1xf32>
    %800 = math.exp %799 : vector<8x1xf32>
    %801 = arith.subf %778, %742 : vector<8x1xf32>
    %802 = math.exp %801 : vector<8x1xf32>
    %803 = arith.subf %796, %742 : vector<8x1xf32>
    %804 = math.exp %803 : vector<8x1xf32>
    %805 = arith.addf %798, %800 : vector<8x1xf32>
    %806 = arith.addf %805, %802 : vector<8x1xf32>
    %807 = arith.addf %806, %804 : vector<8x1xf32>
    %cst_274 = arith.constant 1.000000e+00 : f32
    %808 = vector.broadcast %cst_274 : f32 to vector<8x1xf32>
    %809 = arith.divf %808, %807 : vector<8x1xf32>
    %c4_i32_275 = arith.constant 4 : i32
    %810 = vector.broadcast %c4_i32_275 : i32 to vector<8x4xi32>
    %811 = arith.muli %6, %810 : vector<8x4xi32>
    %812 = vector.broadcast %734 : vector<8x1xi32> to vector<8x4xi32>
    %813 = arith.cmpi sge, %812, %811 : vector<8x4xi32>
    %c4_i32_276 = arith.constant 4 : i32
    %814 = vector.broadcast %c4_i32_276 : i32 to vector<8x4xi32>
    %815 = arith.muli %6, %814 : vector<8x4xi32>
    %c4_i32_277 = arith.constant 4 : i32
    %816 = vector.broadcast %c4_i32_277 : i32 to vector<8x4xi32>
    %817 = arith.addi %815, %816 : vector<8x4xi32>
    %818 = vector.broadcast %734 : vector<8x1xi32> to vector<8x4xi32>
    %819 = arith.cmpi slt, %818, %817 : vector<8x4xi32>
    %820 = arith.andi %813, %819 : vector<8x4xi1>
    %c0_i32_278 = arith.constant 0 : i32
    %821 = vector.broadcast %c0_i32_278 : i32 to vector<8x4xi32>
    %822 = arith.select %820, %706, %821 : vector<8x4xi1>, vector<8x4xi32>
    %cst_279 = arith.constant dense<-2147483648> : vector<8xi32>
    %823 = vector.multi_reduction <maxsi>, %822, %cst_279 [1] : vector<8x4xi32> to vector<8xi32>
    %824 = vector.shape_cast %823 : vector<8xi32> to vector<8x1xi32>
    %c0_i32_280 = arith.constant 0 : i32
    %825 = vector.broadcast %c0_i32_280 : i32 to vector<8x4xi32>
    %826 = arith.select %820, %6, %825 : vector<8x4xi1>, vector<8x4xi32>
    %cst_281 = arith.constant dense<-2147483648> : vector<8xi32>
    %827 = vector.multi_reduction <maxsi>, %826, %cst_281 [1] : vector<8x4xi32> to vector<8xi32>
    %828 = vector.shape_cast %827 : vector<8xi32> to vector<8x1xi32>
    %c4_i32_282 = arith.constant 4 : i32
    %829 = vector.broadcast %c4_i32_282 : i32 to vector<8x1xi32>
    %830 = arith.muli %828, %829 : vector<8x1xi32>
    %831 = arith.subi %734, %830 : vector<8x1xi32>
    %832 = vector.broadcast %831 : vector<8x1xi32> to vector<8x4xi32>
    %833 = arith.cmpi eq, %6, %832 : vector<8x4xi32>
    %c0_i32_283 = arith.constant 0 : i32
    %834 = vector.broadcast %c0_i32_283 : i32 to vector<8x4xi32>
    %835 = arith.select %833, %705, %834 : vector<8x4xi1>, vector<8x4xi32>
    %cst_284 = arith.constant dense<-2147483648> : vector<8xi32>
    %836 = vector.multi_reduction <maxsi>, %835, %cst_284 [1] : vector<8x4xi32> to vector<8xi32>
    %837 = vector.shape_cast %836 : vector<8xi32> to vector<8x1xi32>
    %c16_i32_285 = arith.constant 16 : i32
    %838 = vector.broadcast %c16_i32_285 : i32 to vector<8x1xi32>
    %839 = arith.muli %824, %838 : vector<8x1xi32>
    %840 = arith.addi %839, %837 : vector<8x1xi32>
    %841 = arith.mulf %798, %809 : vector<8x1xf32>
    %842 = vector.broadcast %840 : vector<8x1xi32> to vector<8x256xi32>
    %843 = arith.cmpi eq, %8, %842 : vector<8x256xi32>
    %cst_286 = arith.constant 0.000000e+00 : f32
    %844 = vector.shape_cast %841 : vector<8x1xf32> to vector<8x1xf32>
    %845 = vector.broadcast %844 : vector<8x1xf32> to vector<8x256xf32>
    %846 = vector.broadcast %cst_286 : f32 to vector<8x256xf32>
    %847 = arith.select %843, %845, %846 : vector<8x256xi1>, vector<8x256xf32>
    %848 = arith.addf %487, %847 : vector<8x256xf32>
    %c4_i32_287 = arith.constant 4 : i32
    %849 = vector.broadcast %c4_i32_287 : i32 to vector<8x4xi32>
    %850 = arith.muli %6, %849 : vector<8x4xi32>
    %851 = vector.broadcast %752 : vector<8x1xi32> to vector<8x4xi32>
    %852 = arith.cmpi sge, %851, %850 : vector<8x4xi32>
    %c4_i32_288 = arith.constant 4 : i32
    %853 = vector.broadcast %c4_i32_288 : i32 to vector<8x4xi32>
    %854 = arith.muli %6, %853 : vector<8x4xi32>
    %c4_i32_289 = arith.constant 4 : i32
    %855 = vector.broadcast %c4_i32_289 : i32 to vector<8x4xi32>
    %856 = arith.addi %854, %855 : vector<8x4xi32>
    %857 = vector.broadcast %752 : vector<8x1xi32> to vector<8x4xi32>
    %858 = arith.cmpi slt, %857, %856 : vector<8x4xi32>
    %859 = arith.andi %852, %858 : vector<8x4xi1>
    %c0_i32_290 = arith.constant 0 : i32
    %860 = vector.broadcast %c0_i32_290 : i32 to vector<8x4xi32>
    %861 = arith.select %859, %706, %860 : vector<8x4xi1>, vector<8x4xi32>
    %cst_291 = arith.constant dense<-2147483648> : vector<8xi32>
    %862 = vector.multi_reduction <maxsi>, %861, %cst_291 [1] : vector<8x4xi32> to vector<8xi32>
    %863 = vector.shape_cast %862 : vector<8xi32> to vector<8x1xi32>
    %c0_i32_292 = arith.constant 0 : i32
    %864 = vector.broadcast %c0_i32_292 : i32 to vector<8x4xi32>
    %865 = arith.select %859, %6, %864 : vector<8x4xi1>, vector<8x4xi32>
    %cst_293 = arith.constant dense<-2147483648> : vector<8xi32>
    %866 = vector.multi_reduction <maxsi>, %865, %cst_293 [1] : vector<8x4xi32> to vector<8xi32>
    %867 = vector.shape_cast %866 : vector<8xi32> to vector<8x1xi32>
    %c4_i32_294 = arith.constant 4 : i32
    %868 = vector.broadcast %c4_i32_294 : i32 to vector<8x1xi32>
    %869 = arith.muli %867, %868 : vector<8x1xi32>
    %870 = arith.subi %752, %869 : vector<8x1xi32>
    %871 = vector.broadcast %870 : vector<8x1xi32> to vector<8x4xi32>
    %872 = arith.cmpi eq, %6, %871 : vector<8x4xi32>
    %c0_i32_295 = arith.constant 0 : i32
    %873 = vector.broadcast %c0_i32_295 : i32 to vector<8x4xi32>
    %874 = arith.select %872, %705, %873 : vector<8x4xi1>, vector<8x4xi32>
    %cst_296 = arith.constant dense<-2147483648> : vector<8xi32>
    %875 = vector.multi_reduction <maxsi>, %874, %cst_296 [1] : vector<8x4xi32> to vector<8xi32>
    %876 = vector.shape_cast %875 : vector<8xi32> to vector<8x1xi32>
    %c16_i32_297 = arith.constant 16 : i32
    %877 = vector.broadcast %c16_i32_297 : i32 to vector<8x1xi32>
    %878 = arith.muli %863, %877 : vector<8x1xi32>
    %879 = arith.addi %878, %876 : vector<8x1xi32>
    %880 = arith.mulf %800, %809 : vector<8x1xf32>
    %881 = vector.broadcast %879 : vector<8x1xi32> to vector<8x256xi32>
    %882 = arith.cmpi eq, %8, %881 : vector<8x256xi32>
    %cst_298 = arith.constant 0.000000e+00 : f32
    %883 = vector.shape_cast %880 : vector<8x1xf32> to vector<8x1xf32>
    %884 = vector.broadcast %883 : vector<8x1xf32> to vector<8x256xf32>
    %885 = vector.broadcast %cst_298 : f32 to vector<8x256xf32>
    %886 = arith.select %882, %884, %885 : vector<8x256xi1>, vector<8x256xf32>
    %887 = arith.addf %848, %886 : vector<8x256xf32>
    %c4_i32_299 = arith.constant 4 : i32
    %888 = vector.broadcast %c4_i32_299 : i32 to vector<8x4xi32>
    %889 = arith.muli %6, %888 : vector<8x4xi32>
    %890 = vector.broadcast %770 : vector<8x1xi32> to vector<8x4xi32>
    %891 = arith.cmpi sge, %890, %889 : vector<8x4xi32>
    %c4_i32_300 = arith.constant 4 : i32
    %892 = vector.broadcast %c4_i32_300 : i32 to vector<8x4xi32>
    %893 = arith.muli %6, %892 : vector<8x4xi32>
    %c4_i32_301 = arith.constant 4 : i32
    %894 = vector.broadcast %c4_i32_301 : i32 to vector<8x4xi32>
    %895 = arith.addi %893, %894 : vector<8x4xi32>
    %896 = vector.broadcast %770 : vector<8x1xi32> to vector<8x4xi32>
    %897 = arith.cmpi slt, %896, %895 : vector<8x4xi32>
    %898 = arith.andi %891, %897 : vector<8x4xi1>
    %c0_i32_302 = arith.constant 0 : i32
    %899 = vector.broadcast %c0_i32_302 : i32 to vector<8x4xi32>
    %900 = arith.select %898, %706, %899 : vector<8x4xi1>, vector<8x4xi32>
    %cst_303 = arith.constant dense<-2147483648> : vector<8xi32>
    %901 = vector.multi_reduction <maxsi>, %900, %cst_303 [1] : vector<8x4xi32> to vector<8xi32>
    %902 = vector.shape_cast %901 : vector<8xi32> to vector<8x1xi32>
    %c0_i32_304 = arith.constant 0 : i32
    %903 = vector.broadcast %c0_i32_304 : i32 to vector<8x4xi32>
    %904 = arith.select %898, %6, %903 : vector<8x4xi1>, vector<8x4xi32>
    %cst_305 = arith.constant dense<-2147483648> : vector<8xi32>
    %905 = vector.multi_reduction <maxsi>, %904, %cst_305 [1] : vector<8x4xi32> to vector<8xi32>
    %906 = vector.shape_cast %905 : vector<8xi32> to vector<8x1xi32>
    %c4_i32_306 = arith.constant 4 : i32
    %907 = vector.broadcast %c4_i32_306 : i32 to vector<8x1xi32>
    %908 = arith.muli %906, %907 : vector<8x1xi32>
    %909 = arith.subi %770, %908 : vector<8x1xi32>
    %910 = vector.broadcast %909 : vector<8x1xi32> to vector<8x4xi32>
    %911 = arith.cmpi eq, %6, %910 : vector<8x4xi32>
    %c0_i32_307 = arith.constant 0 : i32
    %912 = vector.broadcast %c0_i32_307 : i32 to vector<8x4xi32>
    %913 = arith.select %911, %705, %912 : vector<8x4xi1>, vector<8x4xi32>
    %cst_308 = arith.constant dense<-2147483648> : vector<8xi32>
    %914 = vector.multi_reduction <maxsi>, %913, %cst_308 [1] : vector<8x4xi32> to vector<8xi32>
    %915 = vector.shape_cast %914 : vector<8xi32> to vector<8x1xi32>
    %c16_i32_309 = arith.constant 16 : i32
    %916 = vector.broadcast %c16_i32_309 : i32 to vector<8x1xi32>
    %917 = arith.muli %902, %916 : vector<8x1xi32>
    %918 = arith.addi %917, %915 : vector<8x1xi32>
    %919 = arith.mulf %802, %809 : vector<8x1xf32>
    %920 = vector.broadcast %918 : vector<8x1xi32> to vector<8x256xi32>
    %921 = arith.cmpi eq, %8, %920 : vector<8x256xi32>
    %cst_310 = arith.constant 0.000000e+00 : f32
    %922 = vector.shape_cast %919 : vector<8x1xf32> to vector<8x1xf32>
    %923 = vector.broadcast %922 : vector<8x1xf32> to vector<8x256xf32>
    %924 = vector.broadcast %cst_310 : f32 to vector<8x256xf32>
    %925 = arith.select %921, %923, %924 : vector<8x256xi1>, vector<8x256xf32>
    %926 = arith.addf %887, %925 : vector<8x256xf32>
    %c4_i32_311 = arith.constant 4 : i32
    %927 = vector.broadcast %c4_i32_311 : i32 to vector<8x4xi32>
    %928 = arith.muli %6, %927 : vector<8x4xi32>
    %929 = vector.broadcast %788 : vector<8x1xi32> to vector<8x4xi32>
    %930 = arith.cmpi sge, %929, %928 : vector<8x4xi32>
    %c4_i32_312 = arith.constant 4 : i32
    %931 = vector.broadcast %c4_i32_312 : i32 to vector<8x4xi32>
    %932 = arith.muli %6, %931 : vector<8x4xi32>
    %c4_i32_313 = arith.constant 4 : i32
    %933 = vector.broadcast %c4_i32_313 : i32 to vector<8x4xi32>
    %934 = arith.addi %932, %933 : vector<8x4xi32>
    %935 = vector.broadcast %788 : vector<8x1xi32> to vector<8x4xi32>
    %936 = arith.cmpi slt, %935, %934 : vector<8x4xi32>
    %937 = arith.andi %930, %936 : vector<8x4xi1>
    %c0_i32_314 = arith.constant 0 : i32
    %938 = vector.broadcast %c0_i32_314 : i32 to vector<8x4xi32>
    %939 = arith.select %937, %706, %938 : vector<8x4xi1>, vector<8x4xi32>
    %cst_315 = arith.constant dense<-2147483648> : vector<8xi32>
    %940 = vector.multi_reduction <maxsi>, %939, %cst_315 [1] : vector<8x4xi32> to vector<8xi32>
    %941 = vector.shape_cast %940 : vector<8xi32> to vector<8x1xi32>
    %c0_i32_316 = arith.constant 0 : i32
    %942 = vector.broadcast %c0_i32_316 : i32 to vector<8x4xi32>
    %943 = arith.select %937, %6, %942 : vector<8x4xi1>, vector<8x4xi32>
    %cst_317 = arith.constant dense<-2147483648> : vector<8xi32>
    %944 = vector.multi_reduction <maxsi>, %943, %cst_317 [1] : vector<8x4xi32> to vector<8xi32>
    %945 = vector.shape_cast %944 : vector<8xi32> to vector<8x1xi32>
    %c4_i32_318 = arith.constant 4 : i32
    %946 = vector.broadcast %c4_i32_318 : i32 to vector<8x1xi32>
    %947 = arith.muli %945, %946 : vector<8x1xi32>
    %948 = arith.subi %788, %947 : vector<8x1xi32>
    %949 = vector.broadcast %948 : vector<8x1xi32> to vector<8x4xi32>
    %950 = arith.cmpi eq, %6, %949 : vector<8x4xi32>
    %c0_i32_319 = arith.constant 0 : i32
    %951 = vector.broadcast %c0_i32_319 : i32 to vector<8x4xi32>
    %952 = arith.select %950, %705, %951 : vector<8x4xi1>, vector<8x4xi32>
    %cst_320 = arith.constant dense<-2147483648> : vector<8xi32>
    %953 = vector.multi_reduction <maxsi>, %952, %cst_320 [1] : vector<8x4xi32> to vector<8xi32>
    %954 = vector.shape_cast %953 : vector<8xi32> to vector<8x1xi32>
    %c16_i32_321 = arith.constant 16 : i32
    %955 = vector.broadcast %c16_i32_321 : i32 to vector<8x1xi32>
    %956 = arith.muli %941, %955 : vector<8x1xi32>
    %957 = arith.addi %956, %954 : vector<8x1xi32>
    %958 = arith.mulf %804, %809 : vector<8x1xf32>
    %959 = vector.broadcast %957 : vector<8x1xi32> to vector<8x256xi32>
    %960 = arith.cmpi eq, %8, %959 : vector<8x256xi32>
    %cst_322 = arith.constant 0.000000e+00 : f32
    %961 = vector.shape_cast %958 : vector<8x1xf32> to vector<8x1xf32>
    %962 = vector.broadcast %961 : vector<8x1xf32> to vector<8x256xf32>
    %963 = vector.broadcast %cst_322 : f32 to vector<8x256xf32>
    %964 = arith.select %960, %962, %963 : vector<8x256xi1>, vector<8x256xf32>
    %965 = arith.addf %926, %964 : vector<8x256xf32>
    %c0_323 = arith.constant 0 : index
    %c0_324 = arith.constant 0 : index
    %966 = vector.load %arg6[%c0_323, %c0_324] : memref<256x32xf32, #tpu.memory_space<vmem>>, vector<256x32xf32>
    %cst_325 = arith.constant dense<0.000000e+00> : vector<8x32xf32>
    %967 = tpu.matmul %965, %966, %cst_325 {dimension_numbers = #tpu.dot_dimension_numbers<[1], [0], [0], [1], [0, 0, 1, 1], [], []>} : vector<8x256xf32>, vector<256x32xf32>, vector<8x32xf32> -> vector<8x32xf32>
    %c0_326 = arith.constant 0 : index
    %c0_327 = arith.constant 0 : index
    %968 = vector.load %arg7[%c0_326, %c0_327] : memref<8x32xf32, #tpu.memory_space<vmem>>, vector<8x32xf32>
    tpu.vector_store %arg7[%c0_326, %c0_327], %967 {strides = array<i32>} : memref<8x32xf32, #tpu.memory_space<vmem>>, vector<8x32xf32>,
    return
  }
  func.func @transform_0(%arg0: i32) -> (i32, i32) {
    %c0_i32 = arith.constant 0 : i32
    %c0_i32_0 = arith.constant 0 : i32
    return %arg0, %c0_i32 : i32, i32
  }
  func.func @transform_1(%arg0: i32) -> (i32, i32) {
    %c0_i32 = arith.constant 0 : i32
    %c0_i32_0 = arith.constant 0 : i32
    %c0_i32_1 = arith.constant 0 : i32
    return %c0_i32, %c0_i32_0 : i32, i32
  }
  func.func @transform_2(%arg0: i32) -> (i32, i32) {
    %c0_i32 = arith.constant 0 : i32
    %c0_i32_0 = arith.constant 0 : i32
    %c0_i32_1 = arith.constant 0 : i32
    return %c0_i32, %c0_i32_0 : i32, i32
  }
  func.func @transform_3(%arg0: i32) -> (i32, i32) {
    %c0_i32 = arith.constant 0 : i32
    %c0_i32_0 = arith.constant 0 : i32
    %c0_i32_1 = arith.constant 0 : i32
    return %c0_i32, %c0_i32_0 : i32, i32
  }
  func.func @transform_4(%arg0: i32) -> (i32, i32, i32) {
    %c0_i32 = arith.constant 0 : i32
    %c0_i32_0 = arith.constant 0 : i32
    %c0_i32_1 = arith.constant 0 : i32
    %c0_i32_2 = arith.constant 0 : i32
    return %c0_i32, %c0_i32_0, %c0_i32_1 : i32, i32, i32
  }
  func.func @transform_5(%arg0: i32) -> (i32, i32) {
    %c0_i32 = arith.constant 0 : i32
    %c0_i32_0 = arith.constant 0 : i32
    %c0_i32_1 = arith.constant 0 : i32
    return %c0_i32, %c0_i32_0 : i32, i32
  }
  func.func @transform_6(%arg0: i32) -> (i32, i32) {
    %c0_i32 = arith.constant 0 : i32
    %c0_i32_0 = arith.constant 0 : i32
    return %arg0, %c0_i32 : i32, i32
  }
}

</mosaic_0001>

<bundles_post_ra>
// kernel: tpu_custom_call.1
= control target key start
LH: loop header
LB: loop body
LE: loop exit
PB: predicated region body
PF: predicated region fallthrough
CT: control target
= control target key end

     0   :  { %11 = vsyncpa [#allocation3], 0  ;;  %s3454_s0 = inlined_call_operand.vmem [shape: bf16[16,32], index: 0, kind: input, shape index: {}]   ;;  %s3455_s1 = inlined_call_operand.vmem [shape: bf16[32,64], index: 1, kind: input, shape index: {}]   ;;  %s3456_s2 = inlined_call_operand.vmem [shape: f32[1,16], index: 2, kind: input, shape index: {}]   ;;  %s3457_s3 = inlined_call_operand.vmem [shape: f32[1,16], index: 3, kind: input, shape index: {}]   ;;  %s3458_s4 = inlined_call_operand.vmem [shape: bf16[4,16,16], index: 4, kind: input, shape index: {}]   ;;  %s3459_s5 = inlined_call_operand.vmem [shape: f32[256,32], index: 5, kind: input, shape index: {}]   ;;  %s3460_s6 = inlined_call_operand.hbm [shape: f32[16,32], index: 6, kind: output, shape index: {}]  }
   0x1   :  { %13 = vsyncpa [#allocation3 + $0x1], 0  ;;  %s2367_s21 = smov 0   ;;  %s2369_s22 = smov 0  }
   0x2   :  { %s2371_s23 = smov 0   ;;  %s2373_s24 = smov 0  }
   0x3 LB: > { %s2388_s25 = sadd.s32 4294967295, %s2318_s24   ;;  %s2033_s26 = sadd.s32 4294967294, %s2318_s24   ;;  %s2318_s24 = sphi %s2373_s24, %s3482_s24   ;;  %s2314_s23 = sphi %s2371_s23, %s3481_s23   ;;  %s2310_s22 = sphi %s2369_s22, %s3480_s22   ;;  %s2306_s21 = sphi %s2367_s21, %s3479_s21  }
   0x4   : > { %s2392_s27 = sadd.s32 1, %s2318_s24   ;;  %s157_s28 = sadd.s32 1, %s2314_s23 }
   0x5   : > { %s154_s29 = ssub.s32 %s2318_s24, %s2392_s27  ;;  %p167_p0 = scmp.ne.s32.totalorder %s2314_s23, %s2310_s22 }
   0x6   : > { %p155_p1 = scmp.eq.s32.totalorder %s154_s29, 0  ;;  %p168_p2 = scmp.eq.s32.totalorder %s2388_s25, 1 }
   0x7   : > { %p173_p3 = scmp.ne.s32.totalorder %s2310_s22, %s2306_s21  ;;  %p174_p4 = scmp.eq.s32.totalorder %s2033_s26, 1 }
   0x8   : > { %s2403_s30 = scalar_select %p155_p1, %s2314_s23, %s157_s28  }
   0x9   : > { %p2405_p5 = por %p168_p2, %p167_p0  ;;  %p2409_p6 = por %p174_p4, %p173_p3 }
   0xa   : > { %p2036_p7 = scmp.ge.s32.totalorder %s2318_s24, 1  ;;  %p214_p8 = scmp.lt.s32.totalorder %s2318_s24, 3 }
   0xc   : > { %p215_p9 = pnand %p2036_p7, %p214_p8 }
   0xd   : > { %v2222_v0 = vld [vmem:[%s3455_s1] sm:$0xff] (!%p215_p9)   ;;  %v2320_v1 = vmov (!%p215_p9), 0.0   ;;  %v2223_v2 = vld [vmem:[%s3455_s1 + $0x8] sm:$0xff] (!%p215_p9)   ;;  %vm2321_vm0 = vmmov (!%p215_p9), 0   ;;  %p243_p10 = scmp.lt.s32.totalorder (!%p215_p9), %s2388_s25, 1  ;;  %vm267_vm1 = vcmask (!%p215_p9), 261120  }
   0xe   : > { %218 = sbr.rel (%p215_p9) target bundleno = 4484 (0x1184), region = 44  ;;  %2108 = vmatprep.subr.bf16.mxu1 (!%p215_p9), %v2320_v1  ;;  %2128 = vmatprep.subr.bf16.mxu0 (!%p215_p9), %v2320_v1  ;;  %s2322_s18 = smov (!%p215_p9), 112   ;;  %vm314_vm2 = vcmask (!%p215_p9), 130048   ;;  %v2458_v27 = vld [vmem:[%s3457_s3] ss:$0 sm:$0xff] (!%p215_p9)  ;;  %v2226_v52 = vld [vmem:[%s3458_s4 + $0x8] sm:$0xff] (!%p215_p9)  }
   0xf   : > { %2109 = vmatpush3.bf16.msra.mxu1 (!%p215_p9), %v2222_v0  ;;  %2112 = vmatprep.mubr.msk.bf16.mxu1 (!%p215_p9), %vm2321_vm0, %v2320_v1  ;;  %s2323_s19 = smov (!%p215_p9), 96   ;;  %s2324_s20 = smov (!%p215_p9), 80   ;;  %v2464_v28 = vld [vmem:[%s3456_s2] ss:$0 sm:$0xff] (!%p215_p9) }
  0x10   : > { %2110 = vmatprep.subr.bf16.mxu1 (!%p215_p9), %v2320_v1  ;;  %2130 = vmatprep.mubr.msk.bf16.mxu0 (!%p215_p9), %vm2321_vm0, %v2320_v1  ;;  %s2325_s29 = smov (!%p215_p9), 32   ;;  %s2326_s11 = smov (!%p215_p9), 48   ;;  %v2224_v40 = vld [vmem:[%s3458_s4] sm:$0xff] (!%p215_p9)  }
  0x11   : > { %s2327_s12 = smov (!%p215_p9), 16   ;;  %2129 = vmatpush3.bf16.msra.mxu0 (!%p215_p9), %v2226_v52  ;;  %s2328_s26 = smov (!%p215_p9), 8  }
  0x12   : > { %s2329_s28 = smov (!%p215_p9), 4   ;;  %s2059_s15 = sshll.u32 (!%p215_p9), %s2388_s25, 7 }
  0x13   : > { %2111 = vmatpush3.bf16.msra.mxu1 (!%p215_p9), %v2223_v2 }
  0x14   : > { %2116 = vmatprep.subr.bf16.mxu1 (!%p215_p9), %v2320_v1 }
  0x15   : > { %s244_s13 = scalar_select %p243_p10, %s2388_s25, 1 }
  0x16   : > { %s2331_s25 = smov [#allocation2]  }
  0x17   : > { %s2038_s14 = sshll.u32 %s244_s13, 2  ;;  %s240_s13 = sand.u32 1, %s2310_s22  }
  0x18   : > { %s246_s17 = scalar_lea.vmem %s3454_s0, %s2038_s14  ;;  %s2037_s14 = sshll.u32 %s240_s13, 3 }
  0x19   : > { %v248_v3 = vld [vmem:[%s246_s17] sm:$0xf]  ;;  %s242_s16 = scalar_lea.vmem [#allocation2], %s2037_s14 }
  0x1a   : > { %2113 = vmatmul.mubr.msk.bf16.vlgmr.msra.gmra.mrb[0].mxu1 %vm267_vm1, %v248_v3  ;;  %s1974_s17 = sshll.u32 %s242_s16, 4  ;;  %s3413_s17 = int_to_ptr.vmem [resolvable:$true] %s1974_s17 }
  0x1b   : > { %2118 = vmatprep.mubr.msk.bf16.mxu1 %vm2321_vm0, %v2320_v1  ;;  %2117 = vmatpush3.bf16.msra.mxu1 %v2224_v40 }
  0x1c   : > { %2122 = vmatprep.subr.bf16.mxu1 %v2320_v1 }
  0xed   : > { %v305_v4 = vpop.f32.mrb[0].mxu1 }
  0xee   : > { %1089 = vrot.lane.b32.xlu1 %v305_v4, %s2322_s18  ;;  %498 = vrot.lane.b32.xlu0 %v305_v4, %s2323_s19  ;;  %v2114_v5 = vpop.f32.mrb[1].mxu1  ;;  %v315_v26 = vsel %vm314_vm2, %v305_v4, 0.0 }
  0xef   : > { %v308_v6 = vpop.f32.mrb[2].mxu1 }
  0xf0   : > { %v2115_v7 = vpop.f32.mrb[3].mxu1 }
  0xf2   : > { %1274 = vrot.lane.b32.xlu0 %v305_v4, %s2324_s20 }
 0x160   : > { %v499_v8 = vpop.permute.xlu0 %498  ;;  %v1090_v12 = vpop.permute.xlu1 %1089 }
 0x161   : > { %v501_v9 = vsel %vm314_vm2, %v499_v8, 0.0  ;;  %v1092_v13 = vsel %vm314_vm2, %v1090_v12, 0.0 }
 0x162   : > { %502 = vadd.xlane.f32.xlu1 %v501_v9 }
 0x164   : > { %v1275_v10 = vpop.permute.xlu0 %1274 }
 0x165   : > { %v1277_v11 = vsel %vm314_vm2, %v1275_v10, 0.0 }
 0x166   : > { %1278 = vadd.xlane.f32.xlu0 %v1277_v11 }
 0x16a   : > { %1093 = vadd.xlane.f32.xlu0 %v1092_v13 }
 0x1ef   : > { %v503_v14 = vpop.xlane.xlu1 %502 }
 0x1f0   : > { %v504_v15 = vmul.f32 0.0625, %v503_v14 }
 0x1f2   : > { %v505_v16 = vsub.f32 %v305_v4, %v504_v15 }
 0x1f3   : > { %v1279_v17 = vpop.xlane.xlu0 %1278 }
 0x1f4   : > { %v1280_v18 = vmul.f32 0.0625, %v1279_v17  ;;  %v506_v19 = vmul.f32 %v505_v16, %v505_v16 }
 0x1f6   : > { %v2443_v20 = vsub.f32 %v305_v4, %v1280_v18  ;;  %508 = vrot.lane.b32.xlu1 %v506_v19, %s2323_s19  ;;  %v2227_v18 = vld [vmem:[%s3458_s4 + $0x18] sm:$0xff]  }
 0x1f7   : > { %v1094_v21 = vpop.xlane.xlu0 %1093 }
 0x1f8   : > { %v1095_v22 = vmul.f32 0.0625, %v1094_v21  ;;  %v1282_v23 = vmul.f32 %v2443_v20, %v2443_v20 }
 0x1fa   : > { %v2448_v24 = vsub.f32 %v305_v4, %v1095_v22  ;;  %1284 = vrot.lane.b32.xlu0 %v1282_v23, %s2324_s20  ;;  %v311_v22 = vlaneseq }
 0x1fc   : > { %v1097_v25 = vmul.f32 %v2448_v24, %v2448_v24  ;;  %v2504_v23 = vand.u32 127, %v311_v22 }
 0x1fe   : > { %1099 = vrot.lane.b32.xlu1 %v1097_v25, %s2322_s18 }
 0x222   : > { %316 = vadd.xlane.f32.xlu1 %v315_v26 }
 0x233   : > { %522 = vrot.lane.b32.xlu1 %v2458_v27, %s2325_s29 }
 0x237   : > { %1294 = vrot.lane.b32.xlu1 %v2464_v28, %s2326_s11 }
 0x268   : > { %v509_v29 = vpop.permute.xlu1 %508 }
 0x269   : > { %v511_v30 = vsel %vm314_vm2, %v509_v29, 0.0 }
 0x26a   : > { %512 = vadd.xlane.f32.xlu0 %v511_v30 }
 0x26c   : > { %v1285_v31 = vpop.permute.xlu0 %1284 }
 0x26d   : > { %v1287_v32 = vsel %vm314_vm2, %v1285_v31, 0.0  ;;  %v2507_v31 = vsub.s32 15, %v2504_v23 }
 0x26e   : > { %1288 = vadd.xlane.f32.xlu0 %v1287_v32 }
 0x270   : > { %v1100_v33 = vpop.permute.xlu1 %1099 }
 0x271   : > { %v1102_v34 = vsel %vm314_vm2, %v1100_v33, 0.0 }
 0x272   : > { %1103 = vadd.xlane.f32.xlu1 %v1102_v34 }
 0x283   : > { %1109 = vrot.lane.b32.xlu1 %v2464_v28, %s2327_s12 }
 0x284   : > { %518 = vrot.lane.b32.xlu0 %v2464_v28, %s2325_s29  ;;  %s2330_s29 = smov 12  }
 0x288   : > { %1298 = vrot.lane.b32.xlu0 %v2458_v27, %s2326_s11 }
 0x28c   : > { %1113 = vrot.lane.b32.xlu0 %v2458_v27, %s2327_s12 }
 0x2af   : > { %v317_v35 = vpop.xlane.xlu1 %316 }
 0x2b0   : > { %v319_v36 = vmul.f32 0.0625, %v317_v35 }
 0x2b2   : > { %v320_v37 = vsub.f32 %v305_v4, %v319_v36 }
 0x2b3   : > { %v523_v41 = vpop.permute.xlu1 %522 }
 0x2b4   : > { %v321_v38 = vmul.f32 %v320_v37, %v320_v37 }
 0x2b6   : > { %v322_v39 = vsel %vm314_vm2, %v321_v38, 0.0 }
 0x2b7   : > { %323 = vadd.xlane.f32.xlu1 %v322_v39  ;;  %v1295_v45 = vpop.permute.xlu1 %1294 }
 0x2f7   : > { %v513_v42 = vpop.xlane.xlu0 %512 }
 0x2f8   : > { %v514_v43 = vmul.f32 0.0625, %v513_v42 }
 0x2fa   : > { %v515_v44 = vadd.f32 1e-05, %v514_v43 }
 0x2fb   : > { %v1289_v46 = vpop.xlane.xlu0 %1288 }
 0x2fc   : > { %2228 = vrsqrt.f32 %v515_v44  ;;  %v1290_v47 = vmul.f32 0.0625, %v1289_v46 }
 0x2fe   : > { %v1291_v48 = vadd.f32 1e-05, %v1290_v47 }
 0x2ff   : > { %v1104_v49 = vpop.xlane.xlu1 %1103  ;;  %v519_v54 = vpop.permute.xlu0 %518 }
 0x300   : > { %2230 = vrsqrt.f32 %v1291_v48  ;;  %v1105_v50 = vmul.f32 0.0625, %v1104_v49 }
 0x302   : > { %v1106_v51 = vadd.f32 1e-05, %v1105_v50 }
 0x303   : > { %v1299_v58 = vpop.permute.xlu0 %1298  ;;  %v1110_v0 = vpop.permute.xlu1 %1109 }
 0x304   : > { %2232 = vrsqrt.f32 %v1106_v51 }
 0x306   : > { %v2229_v53 = vpop.eup %2228 }
 0x307   : > { %v517_v55 = vmul.f32 %v2229_v53, %v505_v16  ;;  %v1114_v4 = vpop.permute.xlu0 %1113  ;;  %v2225_v16 = vld [vmem:[%s3458_s4 + $0x10] sm:$0xff]  }
 0x309   : > { %v521_v56 = vmul.f32 %v519_v54, %v517_v55 }
 0x30a   : > { %v2231_v57 = vpop.eup %2230 }
 0x30b   : > { %v525_v59 = vadd.f32 %v523_v41, %v521_v56  ;;  %v1293_v60 = vmul.f32 %v2231_v57, %v2443_v20 }
 0x30d   : > { %v1297_v61 = vmul.f32 %v1295_v45, %v1293_v60  ;;  %v526_v62 = vpack.c.bf16 %v525_v59, %v525_v59 }
 0x30e   : > { %v2233_v63 = vpop.eup %2232 }
 0x30f   : > { %v1301_v2 = vadd.f32 %v1299_v58, %v1297_v61  ;;  %531 = vrot.lane.b32.xlu0 %v526_v62, %s2323_s19  ;;  %v1108_v3 = vmul.f32 %v2233_v63, %v2448_v24 }
 0x311   : > { %v1302_v5 = vpack.c.bf16 %v1301_v2, %v1301_v2  ;;  %v1112_v6 = vmul.f32 %v1110_v0, %v1108_v3 }
 0x313   : > { %v1116_v7 = vadd.f32 %v1114_v4, %v1112_v6  ;;  %1307 = vrot.lane.b32.xlu0 %v1302_v5, %s2324_s20  ;;  %s3411_s20 = scalar_lea.hbm %s3460_s6, %s2059_s15 }
 0x315   : > { %v1117_v8 = vpack.c.bf16 %v1116_v7, %v1116_v7 }
 0x317   : > { %1122 = vrot.lane.b32.xlu0 %v1117_v8, %s2322_s18 }
 0x344   : > { %v324_v9 = vpop.xlane.xlu1 %323 }
 0x345   : > { %v325_v10 = vmul.f32 0.0625, %v324_v9 }
 0x347   : > { %v326_v11 = vadd.f32 1e-05, %v325_v10 }
 0x349   : > { %2234 = vrsqrt.f32 %v326_v11 }
 0x353   : > { %v2235_v12 = vpop.eup %2234 }
 0x354   : > { %v328_v13 = vmul.f32 %v2235_v12, %v320_v37 }
 0x356   : > { %v335_v14 = vmul.f32 %v2464_v28, %v328_v13 }
 0x358   : > { %v342_v15 = vadd.f32 %v2458_v27, %v335_v14 }
 0x35a   : > { %v343_v17 = vpack.c.bf16 %v342_v15, %v342_v15 }
 0x35c   : > { %2119 = vmatmul.mubr.msk.bf16.vlgmr.msra.gmra.mrb[4].mxu1 %vm314_vm2, %v343_v17 }
 0x35d   : > { %2123 = vmatpush3.bf16.msra.mxu1 %v2225_v16  ;;  %2124 = vmatprep.mubr.msk.bf16.mxu1 %vm2321_vm0, %v2320_v1 }
 0x35e   : > { %2134 = vmatprep.subr.bf16.mxu1 %v2320_v1 }
 0x381   : > { %v532_v19 = vpop.permute.xlu0 %531 }
 0x382   : > { %2125 = vmatmul.mubr.msk.bf16.vlgmr.msra.gmra.mrb[8].mxu1 %vm314_vm2, %v532_v19 }
 0x383   : > { %2135 = vmatpush3.bf16.msra.mxu1 %v2227_v18  ;;  %2136 = vmatprep.mubr.msk.bf16.mxu1 %vm2321_vm0, %v2320_v1 }
 0x385   : > { %v1308_v20 = vpop.permute.xlu0 %1307 }
 0x389   : > { %v1123_v21 = vpop.permute.xlu0 %1122 }
 0x38a   : > { %2131 = vmatmul.mubr.msk.bf16.vlgmr.msra.gmra.mrb[0].mxu0 %vm314_vm2, %v1123_v21  ;;  %2137 = vmatmul.mubr.msk.bf16.vlgmr.msra.gmra.mrb[12].mxu1 %vm314_vm2, %v1308_v20 }
 0x42f   : > { %v389_v24 = vpop.f32.mrb[4].mxu1 }
 0x430   : > { %vm396_vm3 = vcmp.ge.s32.totalorder %v389_v24, 0  ;;  %v397_v25 = vxor.u32 2147483647, %v389_v24  ;;  %v2120_v26 = vpop.f32.mrb[5].mxu1 }
 0x431   : > { %v392_v27 = vpop.f32.mrb[6].mxu1 }
 0x432   : > { %v398_v28 = vsel %vm396_vm3, %v389_v24, %v397_v25  ;;  %v2121_v29 = vpop.f32.mrb[7].mxu1 }
 0x433   : > { %v399_v30 = vadd.s32 8, %v398_v28 }
 0x435   : > { %v400_v1 = vand.u32 4294967280, %v399_v30 }
 0x437   : > { %v2510_v32 = vor.u32 %v2507_v31, %v400_v1 }
 0x439   : > { %v403_v33 = vsel %vm314_vm2, %v2510_v32, 2147483648 }
 0x43a   : > { %v405_v34 = vshra.s32 %v403_v33, 16  ;;  %v404_v9 = vand.u32 65535, %v403_v33 }
 0x43c   : > { %v407_v35 = vcvt.s32.f32 %v405_v34  ;;  %v406_v11 = vcvt.s32.f32 %v404_v9 }
 0x43e   : > { %408 = vmax.xlane.f32.xlu1 %v407_v35 }
 0x455   : > { %v576_v36 = vpop.f32.mrb[8].mxu1 }
 0x456   : > { %vm583_vm4 = vcmp.ge.s32.totalorder %v576_v36, 0  ;;  %v584_v37 = vxor.u32 2147483647, %v576_v36  ;;  %v2126_v38 = vpop.f32.mrb[9].mxu1 }
 0x457   : > { %v579_v39 = vpop.f32.mrb[10].mxu1 }
 0x458   : > { %v585_v40 = vsel %vm583_vm4, %v576_v36, %v584_v37  ;;  %v2127_v41 = vpop.f32.mrb[11].mxu1 }
 0x459   : > { %v586_v42 = vadd.s32 8, %v585_v40 }
 0x45b   : > { %v587_v43 = vand.u32 4294967280, %v586_v42 }
 0x45d   : > { %v2515_v44 = vor.u32 %v587_v43, %v2507_v31  ;;  %v1167_v45 = vpop.f32.mrb[0].mxu0  ;;  %v1352_v46 = vpop.f32.mrb[12].mxu1 }
 0x45e   : > { %vm1174_vm5 = vcmp.ge.s32.totalorder %v1167_v45, 0  ;;  %v1175_v47 = vxor.u32 2147483647, %v1167_v45  ;;  %vm1359_vm6 = vcmp.ge.s32.totalorder %v1352_v46, 0  ;;  %v1360_v48 = vxor.u32 2147483647, %v1352_v46 }
 0x45f   : > { %v2132_v49 = vpop.f32.mrb[1].mxu0  ;;  %v2138_v50 = vpop.f32.mrb[13].mxu1  ;;  %v589_v51 = vsel %vm314_vm2, %v2515_v44, 2147483648 }
 0x460   : > { %v1176_v52 = vsel %vm1174_vm5, %v1167_v45, %v1175_v47  ;;  %v1361_v53 = vsel %vm1359_vm6, %v1352_v46, %v1360_v48  ;;  %v1170_v54 = vpop.f32.mrb[2].mxu0  ;;  %v1355_v55 = vpop.f32.mrb[14].mxu1  ;;  %v591_v56 = vshra.s32 %v589_v51, 16  ;;  %v590_v13 = vand.u32 65535, %v589_v51 }
 0x461   : > { %v1177_v57 = vadd.s32 8, %v1176_v52  ;;  %v1362_v58 = vadd.s32 8, %v1361_v53  ;;  %v2133_v59 = vpop.f32.mrb[3].mxu0  ;;  %v2139_v60 = vpop.f32.mrb[15].mxu1  ;;  %vm683_vm6 = vcmask 7168  }
 0x462   : > { %v593_v61 = vcvt.s32.f32 %v591_v56  ;;  %v592_v15 = vcvt.s32.f32 %v590_v13 }
 0x463   : > { %v1178_v62 = vand.u32 4294967280, %v1177_v57  ;;  %v1363_v63 = vand.u32 4294967280, %v1362_v58 }
 0x464   : > { %594 = vmax.xlane.f32.xlu0 %v593_v61 }
 0x465   : > { %v2520_v0 = vor.u32 %v1178_v62, %v2507_v31  ;;  %v2523_v2 = vor.u32 %v1363_v63, %v2507_v31 }
 0x467   : > { %v1365_v3 = vsel %vm314_vm2, %v2523_v2, 2147483648  ;;  %v1180_v4 = vsel %vm314_vm2, %v2520_v0, 2147483648 }
 0x468   : > { %v1367_v5 = vshra.s32 %v1365_v3, 16  ;;  %v1182_v7 = vshra.s32 %v1180_v4, 16  ;;  %v1366_v17 = vand.u32 65535, %v1365_v3  ;;  %v1181_v20 = vand.u32 65535, %v1180_v4 }
 0x46a   : > { %v1369_v6 = vcvt.s32.f32 %v1367_v5  ;;  %v1184_v8 = vcvt.s32.f32 %v1182_v7  ;;  %v1368_v19 = vcvt.s32.f32 %v1366_v17  ;;  %v1183_v24 = vcvt.s32.f32 %v1181_v20 }
 0x46c   : > { %1370 = vmax.xlane.f32.xlu1 %v1369_v6 }
 0x470   : > { %1185 = vmax.xlane.f32.xlu1 %v1184_v8 }
 0x4cb   : > { %v409_v10 = vpop.xlane.xlu1 %408 }
 0x4cc   : > { %vm410_vm7 = vcmp.eq.f32.partialorder %v407_v35, %v409_v10  ;;  %v415_v26 = vcvt.f32.s32 %v409_v10 }
 0x4cd   : > { %v411_v12 = vsel %vm410_vm7, %v406_v11, -inf }
 0x4ce   : > { %412 = vmax.xlane.f32.xlu1 %v411_v12  ;;  %v416_v28 = vshll.u32 %v415_v26, 16 }
 0x4f1   : > { %v595_v14 = vpop.xlane.xlu0 %594 }
 0x4f2   : > { %vm596_vm8 = vcmp.eq.f32.partialorder %v593_v61, %v595_v14  ;;  %v601_v36 = vcvt.f32.s32 %v595_v14 }
 0x4f3   : > { %v597_v16 = vsel %vm596_vm8, %v592_v15, -inf }
 0x4f4   : > { %598 = vmax.xlane.f32.xlu0 %v597_v16  ;;  %v602_v38 = vshll.u32 %v601_v36, 16 }
 0x4f9   : > { %v1371_v18 = vpop.xlane.xlu1 %1370 }
 0x4fa   : > { %vm1372_vm9 = vcmp.eq.f32.partialorder %v1369_v6, %v1371_v18  ;;  %v1377_v41 = vcvt.f32.s32 %v1371_v18 }
 0x4fb   : > { %v1373_v21 = vsel %vm1372_vm9, %v1368_v19, -inf }
 0x4fc   : > { %1374 = vmax.xlane.f32.xlu0 %v1373_v21  ;;  %v1378_v46 = vshll.u32 %v1377_v41, 16 }
 0x4fd   : > { %v1186_v22 = vpop.xlane.xlu1 %1185 }
 0x4fe   : > { %vm1187_vm10 = vcmp.eq.f32.partialorder %v1184_v8, %v1186_v22  ;;  %v1192_v47 = vcvt.f32.s32 %v1186_v22 }
 0x4ff   : > { %v1188_v25 = vsel %vm1187_vm10, %v1183_v24, -inf }
 0x500   : > { %1189 = vmax.xlane.f32.xlu1 %v1188_v25  ;;  %v1193_v52 = vshll.u32 %v1192_v47, 16 }
 0x55b   : > { %v413_v27 = vpop.xlane.xlu1 %412 }
 0x55c   : > { %v414_v29 = vcvt.f32.s32 %v413_v27 }
 0x55e   : > { %v2529_v30 = vadd.s32 %v416_v28, %v414_v29 }
 0x560   : > { %vm425_vm11 = vcmp.eq.s32.totalorder %v2510_v32, %v2529_v30  ;;  %v418_v19 = vand.u32 15, %v2529_v30 }
 0x561   : > { %v2534_v1 = vsel %vm425_vm11, 2147483648, %v2510_v32 }
 0x562   : > { %v427_v33 = vsel %vm314_vm2, %v2534_v1, 2147483648  ;;  %v419_v24 = vsub.s32 15, %v418_v19 }
 0x563   : > { %v429_v34 = vshra.s32 %v427_v33, 16  ;;  %v428_v62 = vand.u32 65535, %v427_v33 }
 0x565   : > { %v431_v35 = vcvt.s32.f32 %v429_v34 }
 0x567   : > { %432 = vmax.xlane.f32.xlu1 %v431_v35 }
 0x581   : > { %v599_v37 = vpop.xlane.xlu0 %598 }
 0x582   : > { %v600_v39 = vcvt.f32.s32 %v599_v37 }
 0x584   : > { %v2538_v40 = vadd.s32 %v602_v38, %v600_v39 }
 0x586   : > { %vm611_vm12 = vcmp.eq.s32.totalorder %v2515_v44, %v2538_v40  ;;  %v606_v34 = vand.u32 4294967280, %v2538_v40  ;;  %v604_v37 = vand.u32 15, %v2538_v40 }
 0x587   : > { %v2543_v42 = vsel %vm611_vm12, 2147483648, %v2515_v44 }
 0x588   : > { %v613_v32 = vsel %vm314_vm2, %v2543_v42, 2147483648  ;;  %v608_v39 = vxor.u32 2147483647, %v606_v34  ;;  %vm607_vm7 = vcmp.ge.s32.totalorder %v606_v34, 0 }
 0x589   : > { %v1375_v43 = vpop.xlane.xlu0 %1374  ;;  %v615_v45 = vshra.s32 %v613_v32, 16  ;;  %v614_v4 = vand.u32 65535, %v613_v32 }
 0x58a   : > { %v1376_v48 = vcvt.f32.s32 %v1375_v43  ;;  %v605_v43 = vsub.s32 15, %v604_v37 }
 0x58b   : > { %v617_v49 = vcvt.s32.f32 %v615_v45  ;;  %v616_v6 = vcvt.s32.f32 %v614_v4 }
 0x58c   : > { %v2547_v50 = vadd.s32 %v1378_v46, %v1376_v48 }
 0x58d   : > { %v1190_v51 = vpop.xlane.xlu1 %1189  ;;  %618 = vmax.xlane.f32.xlu0 %v617_v49 }
 0x58e   : > { %v1191_v53 = vcvt.f32.s32 %v1190_v51  ;;  %vm1387_vm13 = vcmp.eq.s32.totalorder %v2523_v2, %v2547_v50  ;;  %v609_v51 = vsel %vm607_vm7, %v606_v34, %v608_v39 }
 0x58f   : > { %v2552_v44 = vsel %vm1387_vm13, 2147483648, %v2523_v2  ;;  %v430_v2 = vcvt.s32.f32 %v428_v62  ;;  %v1380_v62 = vand.u32 15, %v2547_v50 }
 0x590   : > { %v2554_v54 = vadd.s32 %v1193_v52, %v1191_v53  ;;  %v1389_v55 = vsel %vm314_vm2, %v2552_v44, 2147483648  ;;  %v1382_v52 = vand.u32 4294967280, %v2547_v50 }
 0x591   : > { %v1391_v56 = vshra.s32 %v1389_v55, 16 }
 0x592   : > { %vm1202_vm14 = vcmp.eq.s32.totalorder %v2520_v0, %v2554_v54  ;;  %vm1383_vm11 = vcmp.ge.s32.totalorder %v1382_v52, 0 }
 0x593   : > { %v1393_v57 = vcvt.s32.f32 %v1391_v56  ;;  %v2561_v58 = vsel %vm1202_vm14, 2147483648, %v2520_v0  ;;  %v1390_v0 = vand.u32 65535, %v1389_v55 }
 0x594   : > { %v1204_v59 = vsel %vm314_vm2, %v2561_v58, 2147483648 }
 0x595   : > { %1394 = vmax.xlane.f32.xlu0 %v1393_v57  ;;  %v1206_v60 = vshra.s32 %v1204_v59, 16  ;;  %v1392_v9 = vcvt.s32.f32 %v1390_v0  ;;  %v1205_v10 = vand.u32 65535, %v1204_v59  ;;  %v1381_v0 = vsub.s32 15, %v1380_v62 }
 0x597   : > { %v1208_v61 = vcvt.s32.f32 %v1206_v60  ;;  %v1207_v13 = vcvt.s32.f32 %v1205_v10 }
 0x599   : > { %1209 = vmax.xlane.f32.xlu1 %v1208_v61 }
 0x5f4   : > { %v433_v63 = vpop.xlane.xlu1 %432 }
 0x5f5   : > { %vm434_vm15 = vcmp.eq.f32.partialorder %v431_v35, %v433_v63  ;;  %v439_v15 = vcvt.f32.s32 %v433_v63 }
 0x5f6   : > { %v435_v3 = vsel %vm434_vm15, %v430_v2, -inf  ;;  %v1384_v2 = vxor.u32 2147483647, %v1382_v52 }
 0x5f7   : > { %436 = vmax.xlane.f32.xlu1 %v435_v3  ;;  %v440_v17 = vshll.u32 %v439_v15, 16 }
 0x61a   : > { %v619_v5 = vpop.xlane.xlu0 %618 }
 0x61b   : > { %vm620_vm0 = vcmp.eq.f32.partialorder %v617_v49, %v619_v5  ;;  %v625_v33 = vcvt.f32.s32 %v619_v5 }
 0x61c   : > { %v621_v7 = vsel %vm620_vm0, %v616_v6, -inf }
 0x61d   : > { %622 = vmax.xlane.f32.xlu0 %v621_v7  ;;  %v626_v35 = vshll.u32 %v625_v33, 16 }
 0x622   : > { %v1395_v8 = vpop.xlane.xlu0 %1394 }
 0x623   : > { %vm1396_vm3 = vcmp.eq.f32.partialorder %v1393_v57, %v1395_v8  ;;  %v1401_v45 = vcvt.f32.s32 %v1395_v8  ;;  %v1195_v8 = vand.u32 15, %v2554_v54 }
 0x624   : > { %v1397_v11 = vsel %vm1396_vm3, %v1392_v9, -inf }
 0x625   : > { %1398 = vmax.xlane.f32.xlu0 %v1397_v11  ;;  %v1402_v59 = vshll.u32 %v1401_v45, 16 }
 0x626   : > { %v1210_v12 = vpop.xlane.xlu1 %1209 }
 0x627   : > { %vm1211_vm4 = vcmp.eq.f32.partialorder %v1208_v61, %v1210_v12  ;;  %v1216_v53 = vcvt.f32.s32 %v1210_v12 }
 0x628   : > { %v1212_v14 = vsel %vm1211_vm4, %v1207_v13, -inf  ;;  %v1385_v13 = vsel %vm1383_vm11, %v1382_v52, %v1384_v2 }
 0x629   : > { %1213 = vmax.xlane.f32.xlu1 %v1212_v14  ;;  %v1217_v3 = vshll.u32 %v1216_v53, 16 }
 0x684   : > { %v437_v16 = vpop.xlane.xlu1 %436 }
 0x685   : > { %v438_v18 = vcvt.f32.s32 %v437_v16 }
 0x687   : > { %v2566_v20 = vadd.s32 %v440_v17, %v438_v18  ;;  %v1196_v18 = vsub.s32 15, %v1195_v8 }
 0x689   : > { %v442_v21 = vand.u32 15, %v2566_v20  ;;  %vm449_vm5 = vcmp.eq.s32.totalorder %v2534_v1, %v2566_v20 }
 0x68a   : > { %v2572_v22 = vsel %vm449_vm5, 2147483648, %v2534_v1  ;;  %vm685_vm5 = vcmask 15360  }
 0x68b   : > { %v443_v25 = vsub.s32 15, %v442_v21  ;;  %v2576_v26 = vsel %vm314_vm2, %v2572_v22, 2147483648 }
 0x68c   : > { %v453_v27 = vshra.s32 %v2576_v26, 16 }
 0x68d   : > { %v2580_v28 = vsel %vm683_vm6, %v419_v24, %v443_v25 }
 0x68e   : > { %v2582_v29 = vcvt.s32.f32 %v453_v27 }
 0x690   : > { %456 = vmax.xlane.f32.xlu1 %v2582_v29 }
 0x6aa   : > { %v623_v1 = vpop.xlane.xlu0 %622 }
 0x6ab   : > { %v624_v36 = vcvt.f32.s32 %v623_v1  ;;  %v452_v1 = vand.u32 65535, %v2576_v26 }
 0x6ad   : > { %v627_v38 = vadd.s32 %v626_v35, %v624_v36  ;;  %v454_v36 = vcvt.s32.f32 %v452_v1 }
 0x6af   : > { %v628_v41 = vand.u32 15, %v627_v38  ;;  %v630_v32 = vand.u32 4294967280, %v627_v38  ;;  %vm635_vm8 = vcmp.eq.s32.totalorder %v2543_v42, %v627_v38 }
 0x6b0   : > { %v2589_v46 = vsel %vm635_vm8, 2147483648, %v2543_v42 }
 0x6b1   : > { %v629_v47 = vsub.s32 15, %v628_v41  ;;  %vm631_vm9 = vcmp.ge.s32.totalorder %v630_v32, 0  ;;  %v632_v48 = vxor.u32 2147483647, %v630_v32  ;;  %v637_v49 = vsel %vm314_vm2, %v2589_v46, 2147483648 }
 0x6b2   : > { %v639_v40 = vshra.s32 %v637_v49, 16  ;;  %v1399_v57 = vpop.xlane.xlu0 %1398 }
 0x6b3   : > { %v633_v55 = vsel %vm631_vm9, %v630_v32, %v632_v48  ;;  %v2595_v56 = vsel %vm683_vm6, %v605_v43, %v629_v47  ;;  %v1400_v60 = vcvt.f32.s32 %v1399_v57 }
 0x6b4   : > { %v641_v42 = vcvt.s32.f32 %v639_v40  ;;  %v2598_v61 = vsel %vm683_vm6, %v609_v51, %v633_v55 }
 0x6b5   : > { %v1403_v63 = vadd.s32 %v1402_v59, %v1400_v60 }
 0x6b6   : > { %642 = vmax.xlane.f32.xlu0 %v641_v42  ;;  %v1214_v4 = vpop.xlane.xlu1 %1213 }
 0x6b7   : > { %v1404_v5 = vand.u32 15, %v1403_v63  ;;  %v1406_v6 = vand.u32 4294967280, %v1403_v63  ;;  %v1215_v7 = vcvt.f32.s32 %v1214_v4  ;;  %vm1411_vm10 = vcmp.eq.s32.totalorder %v2552_v44, %v1403_v63 }
 0x6b8   : > { %v2604_v9 = vsel %vm1411_vm10, 2147483648, %v2552_v44 }
 0x6b9   : > { %v1405_v10 = vsub.s32 15, %v1404_v5  ;;  %vm1407_vm12 = vcmp.ge.s32.totalorder %v1406_v6, 0  ;;  %v1408_v50 = vxor.u32 2147483647, %v1406_v6  ;;  %v2606_v11 = vadd.s32 %v1217_v3, %v1215_v7 }
 0x6ba   : > { %v1413_v12 = vsel %vm314_vm2, %v2604_v9, 2147483648 }
 0x6bb   : > { %v1409_v14 = vsel %vm1407_vm12, %v1406_v6, %v1408_v50  ;;  %v2611_v15 = vsel %vm683_vm6, %v1381_v0, %v1405_v10  ;;  %v1219_v16 = vand.u32 15, %v2606_v11  ;;  %v1415_v17 = vshra.s32 %v1413_v12, 16 }
 0x6bc   : > { %vm1226_vm13 = vcmp.eq.s32.totalorder %v2561_v58, %v2606_v11  ;;  %v2617_v44 = vsel %vm683_vm6, %v1385_v13, %v1409_v14  ;;  %v1414_v32 = vand.u32 65535, %v1413_v12 }
 0x6bd   : > { %v1220_v19 = vsub.s32 15, %v1219_v16  ;;  %v2620_v21 = vsel %vm1226_vm13, 2147483648, %v2561_v58  ;;  %v1417_v24 = vcvt.s32.f32 %v1415_v17  ;;  %v638_v58 = vand.u32 65535, %v637_v49 }
 0x6be   : > { %v1228_v25 = vsel %vm314_vm2, %v2620_v21, 2147483648  ;;  %v1416_v47 = vcvt.s32.f32 %v1414_v32 }
 0x6bf   : > { %v2625_v27 = vsel %vm683_vm6, %v1196_v18, %v1220_v19  ;;  %v1230_v33 = vshra.s32 %v1228_v25, 16  ;;  %1418 = vmax.xlane.f32.xlu0 %v1417_v24  ;;  %v640_v39 = vcvt.s32.f32 %v638_v58  ;;  %v1229_v43 = vand.u32 65535, %v1228_v25 }
 0x6c1   : > { %v1232_v34 = vcvt.s32.f32 %v1230_v33  ;;  %v1231_v51 = vcvt.s32.f32 %v1229_v43 }
 0x6c3   : > { %1233 = vmax.xlane.f32.xlu1 %v1232_v34 }
 0x71d   : > { %v457_v35 = vpop.xlane.xlu1 %456 }
 0x71e   : > { %vm458_vm14 = vcmp.eq.f32.partialorder %v2582_v29, %v457_v35  ;;  %v463_v29 = vcvt.f32.s32 %v457_v35 }
 0x71f   : > { %v459_v37 = vsel %vm458_vm14, %v454_v36, -inf }
 0x720   : > { %460 = vmax.xlane.f32.xlu1 %v459_v37  ;;  %v464_v49 = vshll.u32 %v463_v29, 16 }
 0x743   : > { %v643_v38 = vpop.xlane.xlu0 %642 }
 0x744   : > { %vm644_vm15 = vcmp.eq.f32.partialorder %v641_v42, %v643_v38  ;;  %v649_v3 = vcvt.f32.s32 %v643_v38 }
 0x745   : > { %v645_v41 = vsel %vm644_vm15, %v640_v39, -inf  ;;  %vm687_vm15 = vcmask 23552  }
 0x746   : > { %646 = vmax.xlane.f32.xlu0 %v645_v41  ;;  %v650_v5 = vshll.u32 %v649_v3, 16 }
 0x74c   : > { %v1419_v45 = vpop.xlane.xlu0 %1418 }
 0x74d   : > { %vm1420_vm0 = vcmp.eq.f32.partialorder %v1417_v24, %v1419_v45 }
 0x74e   : > { %v1421_v48 = vsel %vm1420_vm0, %v1416_v47, -inf }
 0x74f   : > { %1422 = vmax.xlane.f32.xlu0 %v1421_v48 }
 0x750   : > { %v1234_v26 = vpop.xlane.xlu1 %1233 }
 0x751   : > { %vm1235_vm3 = vcmp.eq.f32.partialorder %v1232_v34, %v1234_v26  ;;  %v1240_v19 = vcvt.f32.s32 %v1234_v26 }
 0x752   : > { %v1236_v40 = vsel %vm1235_vm3, %v1231_v51, -inf }
 0x753   : > { %1237 = vmax.xlane.f32.xlu1 %v1236_v40  ;;  %v1241_v1 = vshll.u32 %v1240_v19, 16  ;;  %v444_v19 = vand.u32 4294967280, %v2566_v20 }
 0x7ad   : > { %v461_v52 = vpop.xlane.xlu1 %460 }
 0x7ae   : > { %v462_v53 = vcvt.f32.s32 %v461_v52 }
 0x7b0   : > { %v2629_v55 = vadd.s32 %v464_v49, %v462_v53 }
 0x7b2   : > { %v466_v57 = vand.u32 15, %v2629_v55  ;;  %vm473_vm4 = vcmp.eq.s32.totalorder %v2572_v22, %v2629_v55 }
 0x7b3   : > { %v474_v59 = vsel %vm473_vm4, 2147483648, %v2572_v22  ;;  %vm445_vm4 = vcmp.ge.s32.totalorder %v444_v19, 0 }
 0x7b4   : > { %v467_v60 = vsub.s32 15, %v466_v57  ;;  %v475_v42 = vsel %vm314_vm2, %v474_v59, 2147483648 }
 0x7b5   : > { %v477_v62 = vshra.s32 %v475_v42, 16 }
 0x7b6   : > { %v2638_v63 = vsel %vm685_vm5, %v2580_v28, %v467_v60  ;;  %v1425_v28 = vcvt.f32.s32 %v1419_v45 }
 0x7b7   : > { %v479_v2 = vcvt.s32.f32 %v477_v62 }
 0x7b9   : > { %480 = vmax.xlane.f32.xlu1 %v479_v2 }
 0x7d3   : > { %v647_v4 = vpop.xlane.xlu0 %646 }
 0x7d4   : > { %v648_v6 = vcvt.f32.s32 %v647_v4 }
 0x7d6   : > { %v651_v7 = vadd.s32 %v650_v5, %v648_v6 }
 0x7d8   : > { %v652_v0 = vand.u32 15, %v651_v7  ;;  %v654_v8 = vand.u32 4294967280, %v651_v7  ;;  %vm659_vm6 = vcmp.eq.s32.totalorder %v2589_v46, %v651_v7 }
 0x7d9   : > { %v660_v22 = vsel %vm659_vm6, 2147483648, %v2589_v46  ;;  %v1426_v46 = vshll.u32 %v1425_v28, 16 }
 0x7da   : > { %v653_v10 = vsub.s32 15, %v652_v0  ;;  %vm655_vm7 = vcmp.ge.s32.totalorder %v654_v8, 0  ;;  %v656_v50 = vxor.u32 2147483647, %v654_v8  ;;  %v661_v12 = vsel %vm314_vm2, %v660_v22, 2147483648 }
 0x7db   : > { %v663_v13 = vshra.s32 %v661_v12, 16  ;;  %v662_v57 = vand.u32 65535, %v661_v12 }
 0x7dc   : > { %v657_v14 = vsel %vm655_vm7, %v654_v8, %v656_v50  ;;  %v2645_v16 = vsel %vm685_vm5, %v2595_v56, %v653_v10  ;;  %v1423_v24 = vpop.xlane.xlu0 %1422 }
 0x7dd   : > { %v665_v17 = vcvt.s32.f32 %v663_v13  ;;  %v2649_v18 = vsel %vm685_vm5, %v2598_v61, %v657_v14  ;;  %v1424_v25 = vcvt.f32.s32 %v1423_v24  ;;  %v664_v60 = vcvt.s32.f32 %v662_v57 }
 0x7de   : > { %v420_v14 = vand.u32 4294967280, %v2529_v30 }
 0x7df   : > { %666 = vmax.xlane.f32.xlu0 %v665_v17  ;;  %v1427_v33 = vadd.s32 %v1426_v46, %v1424_v25  ;;  %v468_v25 = vand.u32 4294967280, %v2629_v55 }
 0x7e0   : > { %v1238_v34 = vpop.xlane.xlu1 %1237  ;;  %vm421_vm0 = vcmp.ge.s32.totalorder %v420_v14, 0 }
 0x7e1   : > { %v1239_v35 = vcvt.f32.s32 %v1238_v34  ;;  %v1428_v36 = vand.u32 15, %v1427_v33  ;;  %v1430_v37 = vand.u32 4294967280, %v1427_v33  ;;  %vm1435_vm8 = vcmp.eq.s32.totalorder %v2604_v9, %v1427_v33 }
 0x7e2   : > { %v1436_v58 = vsel %vm1435_vm8, 2147483648, %v2604_v9  ;;  %vm469_vm3 = vcmp.ge.s32.totalorder %v468_v25, 0 }
 0x7e3   : > { %v2652_v56 = vadd.s32 %v1241_v1, %v1239_v35  ;;  %v1429_v38 = vsub.s32 15, %v1428_v36  ;;  %vm1431_vm9 = vcmp.ge.s32.totalorder %v1430_v37, 0  ;;  %v1432_v61 = vxor.u32 2147483647, %v1430_v37 }
 0x7e4   : > { %v1437_v39 = vsel %vm314_vm2, %v1436_v58, 2147483648  ;;  %v422_v1 = vxor.u32 2147483647, %v420_v14 }
 0x7e5   : > { %v1243_v41 = vand.u32 15, %v2652_v56  ;;  %v1439_v32 = vshra.s32 %v1437_v39, 16  ;;  %vm1250_vm10 = vcmp.eq.s32.totalorder %v2620_v21, %v2652_v56  ;;  %v1433_v43 = vsel %vm1431_vm9, %v1430_v37, %v1432_v61 }
 0x7e6   : > { %v1251_v45 = vsel %vm1250_vm10, 2147483648, %v2620_v21  ;;  %v2662_v47 = vsel %vm685_vm5, %v2611_v15, %v1429_v38  ;;  %v2671_v29 = vsel %vm685_vm5, %v2617_v44, %v1433_v43  ;;  %v476_v21 = vand.u32 65535, %v475_v42 }
 0x7e7   : > { %v1244_v48 = vsub.s32 15, %v1243_v41  ;;  %v1441_v9 = vcvt.s32.f32 %v1439_v32  ;;  %v1252_v26 = vsel %vm314_vm2, %v1251_v45, 2147483648  ;;  %v446_v37 = vxor.u32 2147483647, %v444_v19 }
 0x7e8   : > { %v1254_v51 = vshra.s32 %v1252_v26, 16  ;;  %v478_v15 = vcvt.s32.f32 %v476_v21  ;;  %v1253_v3 = vand.u32 65535, %v1252_v26  ;;  %v423_v61 = vsel %vm421_vm0, %v420_v14, %v422_v1 }
 0x7e9   : > { %1442 = vmax.xlane.f32.xlu0 %v1441_v9  ;;  %v2667_v40 = vsel %vm685_vm5, %v2625_v27, %v1244_v48  ;;  %v1438_v27 = vand.u32 65535, %v1437_v39  ;;  %v1197_v39 = vand.u32 4294967280, %v2554_v54  ;;  %v447_v41 = vsel %vm445_vm4, %v444_v19, %v446_v37 }
 0x7ea   : > { %v1256_v52 = vcvt.s32.f32 %v1254_v51  ;;  %v1255_v42 = vcvt.s32.f32 %v1253_v3  ;;  %v1245_v54 = vand.u32 4294967280, %v2652_v56 }
 0x7eb   : > { %v1440_v5 = vcvt.s32.f32 %v1438_v27  ;;  %vm1198_vm7 = vcmp.ge.s32.totalorder %v1197_v39, 0 }
 0x7ec   : > { %1257 = vmax.xlane.f32.xlu1 %v1256_v52  ;;  %vm1246_vm8 = vcmp.ge.s32.totalorder %v1245_v54, 0 }
 0x846   : > { %v481_v49 = vpop.xlane.xlu1 %480 }
 0x847   : > { %vm482_vm11 = vcmp.eq.f32.partialorder %v479_v2, %v481_v49  ;;  %v487_v2 = vcvt.f32.s32 %v481_v49 }
 0x848   : > { %v483_v53 = vsel %vm482_vm11, %v478_v15, -inf  ;;  %v1221_v15 = vand.u32 4294967280, %v2606_v11 }
 0x849   : > { %484 = vmax.xlane.f32.xlu1 %v483_v53  ;;  %v488_v8 = vshll.u32 %v487_v2, 16 }
 0x84a   : > { %v1223_v11 = vxor.u32 2147483647, %v1221_v15  ;;  %vm1222_vm9 = vcmp.ge.s32.totalorder %v1221_v15, 0 }
 0x86c   : > { %v667_v59 = vpop.xlane.xlu0 %666 }
 0x86d   : > { %vm668_vm12 = vcmp.eq.f32.partialorder %v665_v17, %v667_v59  ;;  %v673_v13 = vcvt.f32.s32 %v667_v59  ;;  %v1199_v59 = vxor.u32 2147483647, %v1197_v39 }
 0x86e   : > { %v669_v62 = vsel %vm668_vm12, %v664_v60, -inf  ;;  %vm711_vm12 = vcmask 31744  }
 0x86f   : > { %670 = vmax.xlane.f32.xlu0 %v669_v62  ;;  %v674_v24 = vshll.u32 %v673_v13, 16 }
 0x876   : > { %v1443_v4 = vpop.xlane.xlu0 %1442 }
 0x877   : > { %vm1444_vm13 = vcmp.eq.f32.partialorder %v1441_v9, %v1443_v4  ;;  %v1449_v20 = vcvt.f32.s32 %v1443_v4  ;;  %v1247_v4 = vxor.u32 2147483647, %v1245_v54 }
 0x878   : > { %v1445_v44 = vsel %vm1444_vm13, %v1440_v5, -inf  ;;  %vm713_vm13 = vcmask 64512  }
 0x879   : > { %1446 = vmax.xlane.f32.xlu0 %v1445_v44  ;;  %v1258_v6 = vpop.xlane.xlu1 %1257  ;;  %v1450_v53 = vshll.u32 %v1449_v20, 16 }
 0x87a   : > { %vm1259_vm14 = vcmp.eq.f32.partialorder %v1256_v52, %v1258_v6  ;;  %v1264_v43 = vcvt.f32.s32 %v1258_v6 }
 0x87b   : > { %v1260_v7 = vsel %vm1259_vm14, %v1255_v42, -inf  ;;  %vm715_vm14 = vcmask 97280  }
 0x87c   : > { %1261 = vmax.xlane.f32.xlu1 %v1260_v7  ;;  %v1265_v60 = vshll.u32 %v1264_v43, 16  ;;  %v1200_v7 = vsel %vm1198_vm7, %v1197_v39, %v1199_v59 }
 0x8d6   : > { %v485_v0 = vpop.xlane.xlu1 %484 }
 0x8d7   : > { %v486_v22 = vcvt.f32.s32 %v485_v0 }
 0x8d9   : > { %v489_v10 = vadd.s32 %v488_v8, %v486_v22  ;;  %v1248_v8 = vsel %vm1246_vm8, %v1245_v54, %v1247_v4  ;;  %v1224_v22 = vsel %vm1222_vm9, %v1221_v15, %v1223_v11 }
 0x8db   : > { %v490_v50 = vand.u32 15, %v489_v10  ;;  %v492_v33 = vand.u32 4294967280, %v489_v10 }
 0x8dd   : > { %v491_v12 = vsub.s32 15, %v490_v50  ;;  %v494_v58 = vxor.u32 2147483647, %v492_v33  ;;  %vm493_vm6 = vcmp.ge.s32.totalorder %v492_v33, 0 }
 0x8df   : > { %v2675_v28 = vsel %vm687_vm15, %v2638_v63, %v491_v12  ;;  %v470_v63 = vxor.u32 2147483647, %v468_v25  ;;  %v495_v9 = vsel %vm493_vm6, %v492_v33, %v494_v58 }
 0x8e1   : > { %v471_v45 = vsel %vm469_vm3, %v468_v25, %v470_v63 }
 0x8fc   : > { %v671_v17 = vpop.xlane.xlu0 %670 }
 0x8fd   : > { %v672_v46 = vcvt.f32.s32 %v671_v17 }
 0x8ff   : > { %v675_v34 = vadd.s32 %v674_v24, %v672_v46 }
 0x901   : > { %v676_v35 = vand.u32 15, %v675_v34  ;;  %v678_v36 = vand.u32 4294967280, %v675_v34 }
 0x903   : > { %v677_v38 = vsub.s32 15, %v676_v35  ;;  %vm679_vm5 = vcmp.ge.s32.totalorder %v678_v36, 0  ;;  %v680_v30 = vxor.u32 2147483647, %v678_v36 }
 0x905   : > { %v681_v55 = vsel %vm679_vm5, %v678_v36, %v680_v30  ;;  %v2683_v32 = vsel %vm687_vm15, %v2645_v16, %v677_v38 }
 0x906   : > { %v688_v48 = vsel %vm687_vm15, %v2649_v18, %v681_v55  ;;  %v1447_v26 = vpop.xlane.xlu0 %1446 }
 0x907   : > { %v697_v51 = vadd.f32 %v688_v48, %v471_v45  ;;  %v696_v52 = vadd.f32 %v688_v48, %v447_v41  ;;  %v698_v21 = vadd.f32 %v688_v48, %v495_v9  ;;  %v695_v49 = vadd.f32 %v688_v48, %v423_v61 }
 0x908   : > { %v1448_v57 = vcvt.f32.s32 %v1447_v26 }
 0x909   : > { %704 = vrot.lane.b32.xlu1 %v697_v51, %s2328_s26  ;;  %700 = vrot.lane.b32.xlu0 %v696_v52, %s2329_s28  ;;  %v1262_v18 = vpop.xlane.xlu1 %1261 }
 0x90a   : > { %v1451_v16 = vadd.s32 %v1450_v53, %v1448_v57  ;;  %v1263_v62 = vcvt.f32.s32 %v1262_v18 }
 0x90c   : > { %v1452_v27 = vand.u32 15, %v1451_v16  ;;  %v1454_v3 = vand.u32 4294967280, %v1451_v16  ;;  %v1266_v5 = vadd.s32 %v1265_v60, %v1263_v62 }
 0x90d   : > { %708 = vrot.lane.b32.xlu1 %v698_v21, %s2330_s29 }
 0x90e   : > { %v1453_v56 = vsub.s32 15, %v1452_v27  ;;  %vm1455_vm10 = vcmp.ge.s32.totalorder %v1454_v3, 0  ;;  %v1456_v44 = vxor.u32 2147483647, %v1454_v3  ;;  %v1267_v6 = vand.u32 15, %v1266_v5 }
 0x90f   : > { %v1269_v42 = vand.u32 4294967280, %v1266_v5 }
 0x910   : > { %v1457_v2 = vsel %vm1455_vm10, %v1454_v3, %v1456_v44  ;;  %v2693_v0 = vsel %vm687_vm15, %v2662_v47, %v1453_v56  ;;  %v1268_v10 = vsub.s32 15, %v1267_v6 }
 0x911   : > { %v1271_v50 = vxor.u32 2147483647, %v1269_v42  ;;  %v1461_v12 = vsel %vm687_vm15, %v2671_v29, %v1457_v2  ;;  %vm1270_vm11 = vcmp.ge.s32.totalorder %v1269_v42, 0 }
 0x912   : > { %v1470_v13 = vadd.f32 %v1461_v12, %v1248_v8  ;;  %v1469_v14 = vadd.f32 %v1461_v12, %v1224_v22  ;;  %v1468_v17 = vadd.f32 %v1461_v12, %v1200_v7  ;;  %v2699_v19 = vsel %vm687_vm15, %v2667_v40, %v1268_v10 }
 0x913   : > { %v1272_v24 = vsel %vm1270_vm11, %v1269_v42, %v1271_v50  ;;  %v2716_v22 = vmul.u32 4, %v2504_v23 }
 0x914   : > { %1477 = vrot.lane.b32.xlu1 %v1470_v13, %s2328_s26  ;;  %1473 = vrot.lane.b32.xlu0 %v1469_v14, %s2329_s28  ;;  %v1471_v47 = vadd.f32 %v1461_v12, %v1272_v24  ;;  %s1961_s26 = scalar_lea.sflag [#allocation3], %s240_s13  ;;  %s2256_s28 = scalar_lea.vmem %s3413_s17, 128 }
 0x915   : > { %v2722_v14 = vadd.s32 4, %v2716_v22  ;;  %p2257_p11 = scmp.ne.s32.totalorder %s3413_s17, %s2256_s28 }
 0x917   : > { %p2258_p12 = pnand %p2257_p11, %p2405_p5 }
 0x918   : > { %1481 = vrot.lane.b32.xlu0 %v1471_v47, %s2330_s29  ;;  %s2260_s29 = sshll.u32 %s2331_s25, 4  ;;  %s2261_s29 = int_to_ptr.vmem [resolvable:$false] %s2260_s29 }
 0x919   : > { %p2259_p13 = pneg %p2258_p12  ;;  %s2262_s9 = scalar_lea.vmem %s2261_s29, 256 }
 0x91a   : > { %p2263_p0 = scmp.lt.s32.totalorder %s3413_s17, %s2261_s29  ;;  %p2264_p1 = scmp.lt.s32.totalorder %s2262_s9, %s2256_s28 }
 0x91c   : > { %p2265_p2 = por %p2264_p1, %p2263_p0 }
 0x91e   : > { %p2266_p3 = pnand %p2265_p2, %p2259_p13 }
 0x97b   : > { %v705_v46 = vpop.permute.xlu1 %704  ;;  %v701_v25 = vpop.permute.xlu0 %700 }
 0x97c   : > { %v712_v29 = vsel %vm711_vm12, %v695_v49, %v701_v25 }
 0x97d   : > { %v714_v34 = vsel %vm713_vm13, %v712_v29, %v705_v46 }
 0x97f   : > { %v709_v33 = vpop.permute.xlu1 %708 }
 0x980   : > { %v716_v1 = vsel %vm715_vm14, %v714_v34, %v709_v33 }
 0x981   : > { %vm718_vm15 = vcmp.ge.s32.totalorder %v716_v1, 0  ;;  %v719_v40 = vxor.u32 2147483647, %v716_v1 }
 0x983   : > { %v720_v35 = vsel %vm718_vm15, %v716_v1, %v719_v40 }
 0x984   : > { %v721_v36 = vadd.s32 8, %v720_v35 }
 0x986   : > { %v722_v37 = vand.u32 4294967280, %v721_v36  ;;  %v1474_v58 = vpop.permute.xlu0 %1473  ;;  %v1478_v63 = vpop.permute.xlu1 %1477 }
 0x987   : > { %v1484_v38 = vsel %vm711_vm12, %v1468_v17, %v1474_v58 }
 0x988   : > { %v723_v30 = vor.u32 %v722_v37, %v2507_v31  ;;  %v1485_v20 = vsel %vm713_vm13, %v1484_v38, %v1478_v63 }
 0x98a   : > { %v1482_v61 = vpop.permute.xlu0 %1481  ;;  %v724_v39 = vsel %vm314_vm2, %v723_v30, 2147483648 }
 0x98b   : > { %v1486_v55 = vsel %vm715_vm14, %v1485_v20, %v1482_v61  ;;  %v726_v41 = vshra.s32 %v724_v39, 16  ;;  %v725_v15 = vand.u32 65535, %v724_v39 }
 0x98c   : > { %vm1488_vm0 = vcmp.ge.s32.totalorder %v1486_v55, 0  ;;  %v1489_v43 = vxor.u32 2147483647, %v1486_v55 }
 0x98d   : > { %v728_v45 = vcvt.s32.f32 %v726_v41  ;;  %v727_v53 = vcvt.s32.f32 %v725_v15 }
 0x98e   : > { %v1490_v48 = vsel %vm1488_vm0, %v1486_v55, %v1489_v43 }
 0x98f   : > { %v1491_v9 = vadd.s32 8, %v1490_v48  ;;  %729 = vmax.xlane.f32.xlu1 %v728_v45 }
 0x991   : > { %v1492_v26 = vand.u32 4294967280, %v1491_v9 }
 0x993   : > { %v1493_v51 = vor.u32 %v1492_v26, %v2507_v31 }
 0x995   : > { %v1494_v52 = vsel %vm314_vm2, %v1493_v51, 2147483648 }
 0x996   : > { %v1496_v21 = vshra.s32 %v1494_v52, 16  ;;  %v1495_v16 = vand.u32 65535, %v1494_v52 }
 0x998   : > { %v1498_v49 = vcvt.s32.f32 %v1496_v21  ;;  %v1497_v59 = vcvt.s32.f32 %v1495_v16 }
 0x99a   : > { %1499 = vmax.xlane.f32.xlu0 %v1498_v49 }
 0xa1c   : > { %v730_v54 = vpop.xlane.xlu1 %729 }
 0xa1d   : > { %vm731_vm3 = vcmp.eq.f32.partialorder %v728_v45, %v730_v54  ;;  %v736_v62 = vcvt.f32.s32 %v730_v54 }
 0xa1e   : > { %v732_v57 = vsel %vm731_vm3, %v727_v53, -inf }
 0xa1f   : > { %733 = vmax.xlane.f32.xlu0 %v732_v57  ;;  %v737_v31 = vshll.u32 %v736_v62, 16 }
 0xa27   : > { %v1500_v18 = vpop.xlane.xlu0 %1499 }
 0xa28   : > { %vm1501_vm4 = vcmp.eq.f32.partialorder %v1498_v49, %v1500_v18  ;;  %v1506_v56 = vcvt.f32.s32 %v1500_v18 }
 0xa29   : > { %v1502_v60 = vsel %vm1501_vm4, %v1497_v59, -inf }
 0xa2a   : > { %1503 = vmax.xlane.f32.xlu1 %v1502_v60  ;;  %v1507_v7 = vshll.u32 %v1506_v56, 16 }
 0xaac   : > { %v734_v27 = vpop.xlane.xlu0 %733 }
 0xaad   : > { %v735_v3 = vcvt.f32.s32 %v734_v27 }
 0xaaf   : > { %v2711_v4 = vadd.s32 %v737_v31, %v735_v3 }
 0xab1   : > { %vm746_vm5 = vcmp.eq.s32.totalorder %v723_v30, %v2711_v4  ;;  %v741_v37 = vand.u32 4294967280, %v2711_v4 }
 0xab2   : > { %v747_v11 = vsel %vm746_vm5, 2147483648, %v723_v30 }
 0xab3   : > { %v748_v5 = vsel %vm314_vm2, %v747_v11, 2147483648  ;;  %v743_v63 = vxor.u32 2147483647, %v741_v37  ;;  %vm742_vm13 = vcmp.ge.s32.totalorder %v741_v37, 0 }
 0xab4   : > { %v750_v44 = vshra.s32 %v748_v5, 16  ;;  %v749_v25 = vand.u32 65535, %v748_v5 }
 0xab5   : > { %v2736_v61 = vsel %vm742_vm13, %v741_v37, %v743_v63 }
 0xab6   : > { %v752_v6 = vcvt.s32.f32 %v750_v44  ;;  %v751_v33 = vcvt.s32.f32 %v749_v25  ;;  %v818_v55 = vsub.f32 %v2736_v61, %v2736_v61 }
 0xab7   : > { %v1504_v42 = vpop.xlane.xlu1 %1503 }
 0xab8   : > { %v1505_v2 = vcvt.f32.s32 %v1504_v42  ;;  %753 = vmax.xlane.f32.xlu0 %v752_v6  ;;  %v819_v52 = vmul.f32 1.442695, %v818_v55 }
 0xaba   : > { %v1508_v8 = vadd.s32 %v1507_v7, %v1505_v2  ;;  %2236 = vpow2.f32 %v819_v52 }
 0xabc   : > { %v1509_v10 = vand.u32 15, %v1508_v8  ;;  %vm1516_vm6 = vcmp.eq.s32.totalorder %v1493_v51, %v1508_v8  ;;  %v1511_v41 = vand.u32 4294967280, %v1508_v8 }
 0xabd   : > { %v1517_v50 = vsel %vm1516_vm6, 2147483648, %v1493_v51 }
 0xabe   : > { %v2718_v12 = vsub.s32 15, %v1509_v10  ;;  %v1518_v13 = vsel %vm314_vm2, %v1517_v50, 2147483648  ;;  %v1513_v21 = vxor.u32 2147483647, %v1511_v41  ;;  %vm1512_vm0 = vcmp.ge.s32.totalorder %v1511_v41, 0 }
 0xabf   : > { %v1520_v17 = vshra.s32 %v1518_v13, 16  ;;  %v1519_v1 = vand.u32 65535, %v1518_v13 }
 0xac0   : > { %vm1605_vm7 = vcmp.ge.s32.totalorder %v2718_v12, %v2716_v22  ;;  %vm1606_vm8 = vcmp.lt.s32.totalorder %v2718_v12, %v2722_v14  ;;  %v2749_v59 = vsel %vm1512_vm0, %v1511_v41, %v1513_v21 }
 0xac1   : > { %v1522_v24 = vcvt.s32.f32 %v1520_v17  ;;  %vm2728_vm9 = vmand %vm1605_vm7, %vm1606_vm8  ;;  %v1521_v35 = vcvt.s32.f32 %v1519_v1  ;;  %v1588_v62 = vsub.f32 %v2749_v59, %v2749_v59 }
 0xac2   : > { %v1608_v46 = vsel %vm2728_vm9, %v2699_v19, 0 }
 0xac3   : > { %1523 = vmax.xlane.f32.xlu1 %v1522_v24 }
 0xb45   : > { %v754_v29 = vpop.xlane.xlu0 %753 }
 0xb46   : > { %vm755_vm10 = vcmp.eq.f32.partialorder %v752_v6, %v754_v29  ;;  %v760_v58 = vcvt.f32.s32 %v754_v29  ;;  %v1589_v6 = vmul.f32 1.442695, %v1588_v62 }
 0xb47   : > { %v756_v34 = vsel %vm755_vm10, %v751_v33, -inf }
 0xb48   : > { %757 = vmax.xlane.f32.xlu0 %v756_v34  ;;  %v761_v30 = vshll.u32 %v760_v58, 16 }
 0xb50   : > { %v1524_v40 = vpop.xlane.xlu1 %1523 }
 0xb51   : > { %vm1525_vm11 = vcmp.eq.f32.partialorder %v1522_v24, %v1524_v40  ;;  %v1530_v26 = vcvt.f32.s32 %v1524_v40 }
 0xb52   : > { %v1526_v36 = vsel %vm1525_vm11, %v1521_v35, -inf }
 0xb53   : > { %1527 = vmax.xlane.f32.xlu1 %v1526_v36  ;;  %v1531_v57 = vshll.u32 %v1530_v26, 16 }
 0xbd5   : > { %v758_v38 = vpop.xlane.xlu0 %757 }
 0xbd6   : > { %v759_v20 = vcvt.f32.s32 %v758_v38 }
 0xbd8   : > { %v2738_v39 = vadd.s32 %v761_v30, %v759_v20 }
 0xbda   : > { %v765_v43 = vand.u32 4294967280, %v2738_v39  ;;  %vm770_vm14 = vcmp.eq.s32.totalorder %v747_v11, %v2738_v39 }
 0xbdb   : > { %v2744_v45 = vsel %vm770_vm14, 2147483648, %v747_v11 }
 0xbdc   : > { %vm766_vm15 = vcmp.ge.s32.totalorder %v765_v43, 0  ;;  %v767_v48 = vxor.u32 2147483647, %v765_v43  ;;  %v772_v9 = vsel %vm314_vm2, %v2744_v45, 2147483648 }
 0xbdd   : > { %v774_v51 = vshra.s32 %v772_v9, 16  ;;  %v773_v34 = vand.u32 65535, %v772_v9 }
 0xbde   : > { %v768_v49 = vsel %vm766_vm15, %v765_v43, %v767_v48 }
 0xbdf   : > { %v821_v15 = vsub.f32 %v768_v49, %v2736_v61  ;;  %v776_v54 = vcvt.s32.f32 %v774_v51  ;;  %v775_v40 = vcvt.s32.f32 %v773_v34 }
 0xbe0   : > { %v1528_v53 = vpop.xlane.xlu1 %1527 }
 0xbe1   : > { %v822_v16 = vmul.f32 1.442695, %v821_v15  ;;  %v1529_v18 = vcvt.f32.s32 %v1528_v53  ;;  %777 = vmax.xlane.f32.xlu0 %v776_v54 }
 0xbe3   : > { %2238 = vpow2.f32 %v822_v16  ;;  %v1532_v60 = vadd.s32 %v1531_v57, %v1529_v18 }
 0xbe4   : > { %2240 = vpow2.f32 %v1589_v6 }
 0xbe5   : > { %v1533_v27 = vand.u32 15, %v1532_v60  ;;  %v1535_v31 = vand.u32 4294967280, %v1532_v60  ;;  %vm1540_vm3 = vcmp.eq.s32.totalorder %v1517_v50, %v1532_v60 }
 0xbe6   : > { %v1541_v3 = vsel %vm1540_vm3, 2147483648, %v1517_v50  ;;  %v2768_v50 = vpop.eup %2236 }
 0xbe7   : > { %v2753_v11 = vsub.s32 15, %v1533_v27  ;;  %vm1536_vm4 = vcmp.ge.s32.totalorder %v1535_v31, 0  ;;  %v1537_v5 = vxor.u32 2147483647, %v1535_v31  ;;  %v1542_v56 = vsel %vm314_vm2, %v1541_v3, 2147483648 }
 0xbe8   : > { %v1544_v44 = vshra.s32 %v1542_v56, 16  ;;  %v1543_v36 = vand.u32 65535, %v1542_v56 }
 0xbe9   : > { %v1538_v42 = vsel %vm1536_vm4, %v1535_v31, %v1537_v5  ;;  %vm1668_vm5 = vcmp.ge.s32.totalorder %v2753_v11, %v2716_v22  ;;  %vm1669_vm6 = vcmp.lt.s32.totalorder %v2753_v11, %v2722_v14 }
 0xbea   : > { %v1591_v7 = vsub.f32 %v1538_v42, %v2749_v59  ;;  %v1546_v2 = vcvt.s32.f32 %v1544_v44  ;;  %vm2761_vm7 = vmand %vm1668_vm5, %vm1669_vm6  ;;  %v1545_v58 = vcvt.s32.f32 %v1543_v36 }
 0xbeb   : > { %v1671_v10 = vsel %vm2761_vm7, %v2699_v19, 0 }
 0xbec   : > { %v1592_v13 = vmul.f32 1.442695, %v1591_v7  ;;  %1547 = vmax.xlane.f32.xlu1 %v1546_v2 }
 0xbed   : > { %v2770_v17 = vpop.eup %2238 }
 0xbee   : > { %v830_v24 = vadd.f32 %v2770_v17, %v2768_v50  ;;  %2242 = vpow2.f32 %v1592_v13  ;;  %v2774_v25 = vpop.eup %2240 }
 0xbf8   : > { %v2776_v29 = vpop.eup %2242 }
 0xbf9   : > { %v1600_v33 = vadd.f32 %v2776_v29, %v2774_v25 }
 0xc6e   : > { %v778_v1 = vpop.xlane.xlu0 %777 }
 0xc6f   : > { %vm779_vm8 = vcmp.eq.f32.partialorder %v776_v54, %v778_v1  ;;  %v784_v38 = vcvt.f32.s32 %v778_v1 }
 0xc70   : > { %v780_v35 = vsel %vm779_vm8, %v775_v40, -inf }
 0xc71   : > { %781 = vmax.xlane.f32.xlu0 %v780_v35  ;;  %v785_v20 = vshll.u32 %v784_v38, 16  ;;  %v739_v35 = vand.u32 15, %v2711_v4 }
 0xc73   : > { %v2810_v36 = vsub.s32 15, %v739_v35 }
 0xc75   : > { %vm838_vm5 = vcmp.lt.s32.totalorder %v2810_v36, %v2722_v14 }
 0xc79   : > { %v1548_v37 = vpop.xlane.xlu1 %1547 }
 0xc7a   : > { %vm1549_vm10 = vcmp.eq.f32.partialorder %v1546_v2, %v1548_v37  ;;  %v1554_v51 = vcvt.f32.s32 %v1548_v37 }
 0xc7b   : > { %v1550_v63 = vsel %vm1549_vm10, %v1545_v58, -inf }
 0xc7c   : > { %1551 = vmax.xlane.f32.xlu1 %v1550_v63  ;;  %v1555_v53 = vshll.u32 %v1554_v51, 16  ;;  %v1624_v51 = vsel %vm2728_vm9, %v2504_v23, 0 }
 0xcfe   : > { %v782_v30 = vpop.xlane.xlu0 %781 }
 0xcff   : > { %v783_v55 = vcvt.f32.s32 %v782_v30 }
 0xd01   : > { %v786_v41 = vadd.s32 %v785_v20, %v783_v55 }
 0xd03   : > { %v789_v43 = vand.u32 4294967280, %v786_v41  ;;  %vm794_vm11 = vcmp.eq.s32.totalorder %v2744_v45, %v786_v41  ;;  %v787_v37 = vand.u32 15, %v786_v41 }
 0xd04   : > { %v795_v48 = vsel %vm794_vm11, 2147483648, %v2744_v45 }
 0xd05   : > { %vm790_vm13 = vcmp.ge.s32.totalorder %v789_v43, 0  ;;  %v791_v9 = vxor.u32 2147483647, %v789_v43  ;;  %v796_v26 = vsel %vm314_vm2, %v795_v48, 2147483648  ;;  %v2812_v58 = vsub.s32 15, %v787_v37 }
 0xd06   : > { %v798_v52 = vshra.s32 %v796_v26, 16  ;;  %v797_v38 = vand.u32 65535, %v796_v26  ;;  %v3029_v26 = vsel %vm711_vm12, %v1608_v46, 2147483648 }
 0xd07   : > { %v792_v21 = vsel %vm790_vm13, %v789_v43, %v791_v9  ;;  %vm963_vm8 = vcmp.ge.s32.totalorder %v2812_v58, %v2716_v22  ;;  %vm964_vm10 = vcmp.lt.s32.totalorder %v2812_v58, %v2722_v14 }
 0xd08   : > { %v824_v49 = vsub.f32 %v792_v21, %v2736_v61  ;;  %v800_v15 = vcvt.s32.f32 %v798_v52  ;;  %vm2832_vm11 = vmand %vm963_vm8, %vm964_vm10  ;;  %v799_v41 = vcvt.s32.f32 %v797_v38 }
 0xd09   : > { %v1552_v54 = vpop.xlane.xlu1 %1551  ;;  %v982_v20 = vsel %vm2832_vm11, %v2504_v23, 0 }
 0xd0a   : > { %v825_v57 = vmul.f32 1.442695, %v824_v49  ;;  %v1553_v16 = vcvt.f32.s32 %v1552_v54  ;;  %801 = vmax.xlane.f32.xlu0 %v800_v15  ;;  %v983_v9 = vsel %vm711_vm12, %v982_v20, 2147483648 }
 0xd0b   : > { %v985_v21 = vshra.s32 %v983_v9, 16 }
 0xd0c   : > { %2244 = vpow2.f32 %v825_v57  ;;  %v1556_v18 = vadd.s32 %v1555_v53, %v1553_v16 }
 0xd0d   : > { %v987_v57 = vcvt.s32.f32 %v985_v21 }
 0xd0e   : > { %v1557_v60 = vand.u32 15, %v1556_v18  ;;  %v1559_v62 = vand.u32 4294967280, %v1556_v18  ;;  %vm1564_vm14 = vcmp.eq.s32.totalorder %v1541_v3, %v1556_v18 }
 0xd0f   : > { %v1565_v45 = vsel %vm1564_vm14, 2147483648, %v1541_v3 }
 0xd10   : > { %v2784_v27 = vsub.s32 15, %v1557_v60  ;;  %vm1560_vm15 = vcmp.ge.s32.totalorder %v1559_v62, 0  ;;  %v1561_v31 = vxor.u32 2147483647, %v1559_v62  ;;  %v1566_v5 = vsel %vm314_vm2, %v1565_v45, 2147483648 }
 0xd11   : > { %v1568_v56 = vshra.s32 %v1566_v5, 16  ;;  %vm836_vm2 = vcmp.ge.s32.totalorder %v2810_v36, %v2716_v22  ;;  %v1567_v54 = vand.u32 65535, %v1566_v5 }
 0xd12   : > { %v1562_v44 = vsel %vm1560_vm15, %v1559_v62, %v1561_v31  ;;  %vm1731_vm0 = vcmp.ge.s32.totalorder %v2784_v27, %v2716_v22  ;;  %vm1732_vm3 = vcmp.lt.s32.totalorder %v2784_v27, %v2722_v14  ;;  %vm2819_vm6 = vmand %vm836_vm2, %vm838_vm5 }
 0xd13   : > { %v1594_v6 = vsub.f32 %v1562_v44, %v2749_v59  ;;  %v1570_v42 = vcvt.s32.f32 %v1568_v56  ;;  %vm2792_vm4 = vmand %vm1731_vm0, %vm1732_vm3  ;;  %v856_v4 = vsel %vm2819_vm6, %v2504_v23, 0  ;;  %v1569_v45 = vcvt.s32.f32 %v1567_v54 }
 0xd14   : > { %v1734_v3 = vsel %vm2792_vm4, %v2699_v19, 0  ;;  %v1750_v53 = vsel %vm2792_vm4, %v2504_v23, 0 }
 0xd15   : > { %v1595_v2 = vmul.f32 1.442695, %v1594_v6  ;;  %1571 = vmax.xlane.f32.xlu1 %v1570_v42  ;;  %v2863_v60 = vsel %vm711_vm12, %v1750_v53, 2147483648 }
 0xd16   : > { %v2799_v13 = vpop.eup %2244  ;;  %v1753_v44 = vshra.s32 %v2863_v60, 16 }
 0xd17   : > { %2246 = vpow2.f32 %v1595_v2  ;;  %v2802_v34 = vadd.f32 %v2799_v13, %v830_v24  ;;  %v763_v24 = vand.u32 15, %v2738_v39  ;;  %v857_v39 = vsel %vm711_vm12, %v856_v4, 2147483648 }
 0xd18   : > { %v859_v43 = vshra.s32 %v857_v39, 16  ;;  %v2869_v2 = vcvt.s32.f32 %v1753_v44 }
 0xd1a   : > { %v861_v52 = vcvt.s32.f32 %v859_v43  ;;  %v984_v43 = vand.u32 65535, %v983_v9 }
 0xd21   : > { %v2804_v1 = vpop.eup %2246 }
 0xd22   : > { %v2807_v40 = vadd.f32 %v2804_v1, %v1600_v33  ;;  %v2830_v33 = vsub.s32 15, %v763_v24  ;;  %v858_v24 = vand.u32 65535, %v857_v39 }
 0xd24   : > { %vm900_vm13 = vcmp.ge.s32.totalorder %v2830_v33, %v2716_v22  ;;  %vm901_vm14 = vcmp.lt.s32.totalorder %v2830_v33, %v2722_v14 }
 0xd25   : > { %vm2845_vm0 = vmand %vm900_vm13, %vm901_vm14 }
 0xd26   : > { %v919_v49 = vsel %vm2845_vm0, %v2504_v23, 0 }
 0xd27   : > { %v2860_v16 = vsel %vm711_vm12, %v919_v49, 2147483648 }
 0xd28   : > { %v922_v31 = vshra.s32 %v2860_v16, 16 }
 0xd2a   : > { %v2867_v6 = vcvt.s32.f32 %v922_v31 }
 0xd97   : > { %v802_v55 = vpop.xlane.xlu0 %801 }
 0xd98   : > { %vm803_vm15 = vcmp.eq.f32.partialorder %v800_v15, %v802_v55  ;;  %v1625_v15 = vsel %vm711_vm12, %v1624_v51, 2147483648  ;;  %v808_v35 = vcvt.f32.s32 %v802_v55 }
 0xd99   : > { %v804_v48 = vsel %vm803_vm15, %v799_v41, -inf  ;;  %v1627_v18 = vshra.s32 %v1625_v15, 16  ;;  %v860_v41 = vcvt.s32.f32 %v858_v24  ;;  %v1626_v55 = vand.u32 65535, %v1625_v15 }
 0xd9a   : > { %805 = vmax.xlane.f32.xlu0 %v804_v48  ;;  %v1687_v15 = vsel %vm2761_vm7, %v2504_v23, 0 }
 0xd9b   : > { %v1629_v5 = vcvt.s32.f32 %v1627_v18  ;;  %v986_v18 = vcvt.s32.f32 %v984_v43  ;;  %v1628_v31 = vcvt.s32.f32 %v1626_v55 }
 0xd9e   : > { %862 = vmax.xlane.f32.xlu0 %v861_v52 }
 0xda2   : > { %v1572_v62 = vpop.xlane.xlu1 %1571  ;;  %988 = vmax.xlane.f32.xlu0 %v987_v57 }
 0xda3   : > { %vm1573_vm3 = vcmp.eq.f32.partialorder %v1570_v42, %v1572_v62  ;;  %v809_v42 = vshll.u32 %v808_v35, 16  ;;  %v1578_v53 = vcvt.f32.s32 %v1572_v62 }
 0xda4   : > { %v1574_v56 = vsel %vm1573_vm3, %v1569_v45, -inf }
 0xda5   : > { %1575 = vmax.xlane.f32.xlu1 %v1574_v56 }
 0xda6   : > { %1630 = vmax.xlane.f32.xlu0 %v1629_v5 }
 0xda9   : > { %925 = vmax.xlane.f32.xlu1 %v2867_v6 }
 0xdaa   : > { %1756 = vmax.xlane.f32.xlu0 %v2869_v2 }
 0xe27   : > { %v806_v37 = vpop.xlane.xlu0 %805 }
 0xe28   : > { %v807_v4 = vcvt.f32.s32 %v806_v37 }
 0xe2a   : > { %v810_v38 = vadd.s32 %v809_v42, %v807_v4  ;;  %v1752_v4 = vand.u32 65535, %v2863_v60 }
 0xe2b   : > { %v2873_v20 = vpop.xlane.xlu0 %862 }
 0xe2c   : > { %v811_v48 = vand.u32 15, %v810_v38  ;;  %v813_v51 = vand.u32 4294967280, %v810_v38  ;;  %vm864_vm2 = vcmp.eq.f32.partialorder %v861_v52, %v2873_v20  ;;  %v2907_v38 = vsel %vm711_vm12, %v1687_v15, 2147483648 }
 0xe2d   : > { %v865_v21 = vsel %vm864_vm2, %v860_v41, -inf  ;;  %v1690_v60 = vshra.s32 %v2907_v38, 16  ;;  %v1754_v55 = vcvt.s32.f32 %v1752_v4  ;;  %v921_v4 = vand.u32 65535, %v2860_v16 }
 0xe2e   : > { %v2876_v49 = vsub.s32 15, %v811_v48  ;;  %vm814_vm5 = vcmp.ge.s32.totalorder %v813_v51, 0  ;;  %v815_v54 = vxor.u32 2147483647, %v813_v51  ;;  %866 = vmax.xlane.f32.xlu0 %v865_v21 }
 0xe2f   : > { %v2878_v39 = vpop.xlane.xlu0 %988  ;;  %v2924_v15 = vcvt.s32.f32 %v1690_v60 }
 0xe30   : > { %v816_v45 = vsel %vm814_vm5, %v813_v51, %v815_v54  ;;  %vm990_vm8 = vcmp.eq.f32.partialorder %v987_v57, %v2878_v39  ;;  %vm1026_vm10 = vcmp.ge.s32.totalorder %v2876_v49, %v2716_v22  ;;  %vm1027_vm13 = vcmp.lt.s32.totalorder %v2876_v49, %v2722_v14 }
 0xe31   : > { %v827_v9 = vsub.f32 %v816_v45, %v2736_v61  ;;  %v991_v52 = vsel %vm990_vm8, %v986_v18, -inf  ;;  %vm2889_vm14 = vmand %vm1026_vm10, %vm1027_vm13  ;;  %v840_v57 = vsel %vm2819_vm6, %v2675_v28, 0  ;;  %v1579_v61 = vshll.u32 %v1578_v53, 16 }
 0xe32   : > { %v1576_v62 = vpop.xlane.xlu1 %1575  ;;  %992 = vmax.xlane.f32.xlu0 %v991_v52  ;;  %v1045_v24 = vsel %vm2889_vm14, %v2504_v23, 0  ;;  %v2911_v48 = vsel %vm711_vm12, %v840_v57, 2147483648  ;;  %v1029_v30 = vsel %vm2889_vm14, %v2675_v28, 0 }
 0xe33   : > { %v828_v44 = vmul.f32 1.442695, %v827_v9  ;;  %v1577_v35 = vcvt.f32.s32 %v1576_v62  ;;  %v2896_v37 = vpop.xlane.xlu0 %1630  ;;  %v2903_v42 = vsel %vm711_vm12, %v1045_v24, 2147483648  ;;  %v843_v45 = vshra.s32 %v2911_v48, 16 }
 0xe34   : > { %vm1632_vm15 = vcmp.eq.f32.partialorder %v1629_v5, %v2896_v37  ;;  %v1048_v43 = vshra.s32 %v2903_v42, 16 }
 0xe35   : > { %2248 = vpow2.f32 %v828_v44  ;;  %v1580_v63 = vadd.s32 %v1579_v61, %v1577_v35  ;;  %v1633_v41 = vsel %vm1632_vm15, %v1628_v31, -inf  ;;  %v2936_v31 = vcvt.s32.f32 %v843_v45 }
 0xe36   : > { %1634 = vmax.xlane.f32.xlu0 %v1633_v41  ;;  %v2915_v54 = vcvt.s32.f32 %v1048_v43  ;;  %v2950_v24 = vpop.xlane.xlu1 %925  ;;  %v923_v41 = vcvt.s32.f32 %v921_v4 }
 0xe37   : > { %v1581_v51 = vand.u32 15, %v1580_v63  ;;  %v1583_v21 = vand.u32 4294967280, %v1580_v63  ;;  %v2913_v5 = vpop.xlane.xlu0 %1756  ;;  %vm927_vm10 = vcmp.eq.f32.partialorder %v2867_v6, %v2950_v24 }
 0xe38   : > { %vm1758_vm6 = vcmp.eq.f32.partialorder %v2869_v2, %v2913_v5  ;;  %1051 = vmax.xlane.f32.xlu1 %v2915_v54  ;;  %v928_v43 = vsel %vm927_vm10, %v923_v41, -inf  ;;  %v1689_v41 = vand.u32 65535, %v2907_v38 }
 0xe39   : > { %v2920_v53 = vsub.s32 15, %v1581_v51  ;;  %vm1584_vm3 = vcmp.ge.s32.totalorder %v1583_v21, 0  ;;  %v1585_v18 = vxor.u32 2147483647, %v1583_v21  ;;  %v1759_v9 = vsel %vm1758_vm6, %v1754_v55, -inf }
 0xe3a   : > { %1760 = vmax.xlane.f32.xlu0 %v1759_v9  ;;  %v1691_v56 = vcvt.s32.f32 %v1689_v41 }
 0xe3b   : > { %v1586_v52 = vsel %vm1584_vm3, %v1583_v21, %v1585_v18  ;;  %vm1794_vm2 = vcmp.ge.s32.totalorder %v2920_v53, %v2716_v22  ;;  %vm1795_vm5 = vcmp.lt.s32.totalorder %v2920_v53, %v2722_v14 }
 0xe3c   : > { %v1597_v2 = vsub.f32 %v1586_v52, %v2749_v59  ;;  %vm2931_vm8 = vmand %vm1794_vm2, %vm1795_vm5  ;;  %1693 = vmax.xlane.f32.xlu1 %v2924_v15 }
 0xe3d   : > { %v1797_v57 = vsel %vm2931_vm8, %v2699_v19, 0  ;;  %v1813_v22 = vsel %vm2931_vm8, %v2504_v23, 0 }
 0xe3e   : > { %v1598_v61 = vmul.f32 1.442695, %v1597_v2  ;;  %v2945_v14 = vsel %vm711_vm12, %v1813_v22, 2147483648  ;;  %846 = vmax.xlane.f32.xlu0 %v2936_v31 }
 0xe3f   : > { %v2249_v59 = vpop.eup %2248  ;;  %v1816_v44 = vshra.s32 %v2945_v14, 16 }
 0xe40   : > { %v832_v35 = vadd.f32 %v2249_v59, %v2802_v34  ;;  %2250 = vpow2.f32 %v1598_v61 }
 0xe41   : > { %v2953_v63 = vcvt.s32.f32 %v1816_v44 }
 0xe42   : > { %2252 = vrcp.f32 %v832_v35 }
 0xe43   : > { %1819 = vmax.xlane.f32.xlu1 %v2953_v63 }
 0xe47   : > { %929 = vmax.xlane.f32.xlu1 %v928_v43 }
 0xe4a   : > { %v2251_v51 = vpop.eup %2250 }
 0xe4b   : > { %v1602_v21 = vadd.f32 %v2251_v51, %v2807_v40 }
 0xe4c   : > { %v2253_v34 = vpop.eup %2252 }
 0xe4d   : > { %2254 = vrcp.f32 %v1602_v21  ;;  %v2960_v60 = vmul.f32 %v2253_v34, %v2768_v50  ;;  %v2963_v16 = vmul.f32 %v2253_v34, %v2770_v17  ;;  %v2966_v55 = vmul.f32 %v2253_v34, %v2799_v13 }
 0xe4e   : > { %v2968_v18 = vmul.f32 %v2253_v34, %v2249_v59  ;;  %v869_v17 = vcvt.f32.s32 %v2873_v20 }
 0xe50   : > { %v870_v2 = vshll.u32 %v869_v17, 16 }
 0xe57   : > { %v2255_v6 = vpop.eup %2254 }
 0xe58   : > { %v2971_v45 = vmul.f32 %v2255_v6, %v2774_v25  ;;  %v2974_v9 = vmul.f32 %v2255_v6, %v2776_v29  ;;  %v2977_v40 = vmul.f32 %v2255_v6, %v2804_v1  ;;  %v2979_v50 = vmul.f32 %v2255_v6, %v2251_v51 }
 0xe59   : > { %v1047_v25 = vand.u32 65535, %v2903_v42  ;;  %v966_v29 = vsel %vm2832_vm11, %v2675_v28, 0  ;;  %v995_v42 = vcvt.f32.s32 %v2878_v39  ;;  %v903_v39 = vsel %vm2845_vm0, %v2675_v28, 0 }
 0xe5a   : > { %v3022_v28 = vsel %vm711_vm12, %v903_v39, 2147483648 }
 0xe5b   : > { %v1049_v20 = vcvt.s32.f32 %v1047_v25  ;;  %v906_v46 = vshra.s32 %v3022_v28, 16 }
 0xebb   : > { %v867_v52 = vpop.xlane.xlu0 %866 }
 0xebc   : > { %v868_v13 = vcvt.f32.s32 %v867_v52  ;;  %v3014_v52 = vsel %vm711_vm12, %v1029_v30, 2147483648 }
 0xebe   : > { %v871_v22 = vadd.s32 %v870_v2, %v868_v13  ;;  %v1637_v2 = vcvt.f32.s32 %v2896_v37 }
 0xebf   : > { %v993_v44 = vpop.xlane.xlu0 %992 }
 0xec0   : > { %v872_v61 = vmul.u32 4, %v871_v22  ;;  %v994_v21 = vcvt.f32.s32 %v993_v44  ;;  %v1815_v22 = vand.u32 65535, %v2945_v14  ;;  %v1638_v25 = vshll.u32 %v1637_v2, 16 }
 0xec1   : > { %v1611_v14 = vshra.s32 %v3029_v26, 16 }
 0xec2   : > { %v873_v59 = vsub.s32 %v2810_v36, %v872_v61  ;;  %v2996_v36 = vsel %vm711_vm12, %v966_v29, 2147483648  ;;  %v932_v29 = vcvt.f32.s32 %v2950_v24  ;;  %v1817_v44 = vcvt.s32.f32 %v1815_v22 }
 0xec3   : > { %v969_v38 = vshra.s32 %v2996_v36, 16  ;;  %v1635_v6 = vpop.xlane.xlu0 %1634  ;;  %v3054_v8 = vcvt.s32.f32 %v1611_v14 }
 0xec4   : > { %vm874_vm13 = vcmp.eq.s32.totalorder %v2504_v23, %v873_v59  ;;  %v1636_v37 = vcvt.f32.s32 %v1635_v6 }
 0xec5   : > { %v875_v1 = vsel %vm874_vm13, %v2683_v32, 0  ;;  %v2989_v35 = vpop.xlane.xlu1 %1051  ;;  %v3031_v59 = vcvt.s32.f32 %v969_v38 }
 0xec6   : > { %v2992_v4 = vsel %vm711_vm12, %v875_v1, 2147483648  ;;  %vm1053_vm11 = vcmp.eq.f32.partialorder %v2915_v54, %v2989_v35  ;;  %v996_v54 = vshll.u32 %v995_v42, 16  ;;  %v3045_v1 = vsel %vm711_vm12, %v1671_v10, 2147483648 }
 0xec7   : > { %v878_v43 = vshra.s32 %v2992_v4, 16  ;;  %v1054_v51 = vsel %vm1053_vm11, %v1049_v20, -inf  ;;  %v1639_v41 = vadd.s32 %v1638_v25, %v1636_v37  ;;  %v933_v10 = vshll.u32 %v932_v29, 16  ;;  %v1761_v7 = vpop.xlane.xlu0 %1760 }
 0xec8   : > { %1055 = vmax.xlane.f32.xlu1 %v1054_v51  ;;  %v997_v61 = vadd.s32 %v996_v54, %v994_v21  ;;  %v1674_v51 = vshra.s32 %v3045_v1, 16 }
 0xec9   : > { %v3005_v34 = vcvt.s32.f32 %v878_v43  ;;  %v3011_v17 = vpop.xlane.xlu1 %1693  ;;  %v3052_v43 = vcvt.s32.f32 %v906_v46  ;;  %v1640_v38 = vmul.u32 4, %v1639_v41 }
 0xeca   : > { %vm1695_vm14 = vcmp.eq.f32.partialorder %v2924_v15, %v3011_v17  ;;  %v1032_v15 = vshra.s32 %v3014_v52, 16  ;;  %v998_v20 = vmul.u32 4, %v997_v61 }
 0xecb   : > { %881 = vmax.xlane.f32.xlu0 %v3005_v34  ;;  %v1696_v13 = vsel %vm1695_vm14, %v1691_v56, -inf  ;;  %v3067_v56 = vcvt.s32.f32 %v1674_v51  ;;  %v1641_v54 = vsub.s32 %v2718_v12, %v1640_v38  ;;  %v3096_v37 = vpop.xlane.xlu0 %846  ;;  %v1058_v51 = vcvt.f32.s32 %v2989_v35 }
 0xecc   : > { %1697 = vmax.xlane.f32.xlu1 %v1696_v13  ;;  %v3049_v42 = vcvt.s32.f32 %v1032_v15  ;;  %v999_v21 = vsub.s32 %v2812_v58, %v998_v20  ;;  %vm848_vm15 = vcmp.eq.f32.partialorder %v2936_v31, %v3096_v37  ;;  %v1763_v31 = vcvt.f32.s32 %v2913_v5 }
 0xecd   : > { %vm1642_vm4 = vcmp.eq.s32.totalorder %v2504_v23, %v1641_v54  ;;  %v1700_v54 = vcvt.f32.s32 %v3011_v17 }
 0xece   : > { %vm1000_vm7 = vcmp.eq.s32.totalorder %v2504_v23, %v999_v21  ;;  %v1643_v25 = vsel %vm1642_vm4, %v2693_v0, 0  ;;  %v877_v21 = vand.u32 65535, %v2992_v4  ;;  %v1764_v38 = vshll.u32 %v1763_v31, 16 }
 0xecf   : > { %972 = vmax.xlane.f32.xlu0 %v3031_v59  ;;  %v1001_v22 = vsel %vm1000_vm7, %v2683_v32, 0  ;;  %v3109_v46 = vsel %vm711_vm12, %v1643_v25, 2147483648 }
 0xed0   : > { %v3037_v47 = vpop.xlane.xlu1 %1819 }
 0xed1   : > { %vm1821_vm9 = vcmp.eq.f32.partialorder %v2953_v63, %v3037_v47  ;;  %v3063_v63 = vsel %vm711_vm12, %v1734_v3, 2147483648  ;;  %v3077_v3 = vsel %vm711_vm12, %v1797_v57, 2147483648  ;;  %v842_v57 = vand.u32 65535, %v2911_v48 }
 0xed2   : > { %v1822_v24 = vsel %vm1821_vm9, %v1817_v44, -inf  ;;  %v1737_v58 = vshra.s32 %v3063_v63, 16  ;;  %v1800_v61 = vshra.s32 %v3077_v3, 16 }
 0xed3   : > { %1823 = vmax.xlane.f32.xlu1 %v1822_v24  ;;  %1035 = vmax.xlane.f32.xlu0 %v3049_v42  ;;  %v844_v48 = vcvt.s32.f32 %v842_v57  ;;  %v1646_v24 = vshra.s32 %v3109_v46, 16 }
 0xed4   : > { %v930_v30 = vpop.xlane.xlu1 %929  ;;  %v3083_v12 = vcvt.s32.f32 %v1737_v58  ;;  %v3100_v14 = vcvt.s32.f32 %v1800_v61  ;;  %v968_v61 = vand.u32 65535, %v2996_v36 }
 0xed5   : > { %v931_v39 = vcvt.f32.s32 %v930_v30  ;;  %v849_v41 = vsel %vm848_vm15, %v844_v48, -inf  ;;  %v3116_v30 = vcvt.s32.f32 %v1646_v24  ;;  %v1826_v48 = vcvt.f32.s32 %v3037_v47 }
 0xed6   : > { %v970_v17 = vcvt.s32.f32 %v968_v61 }
 0xed7   : > { %v934_v6 = vadd.s32 %v933_v10, %v931_v39  ;;  %909 = vmax.xlane.f32.xlu1 %v3052_v43  ;;  %1614 = vmax.xlane.f32.xlu0 %v3054_v8  ;;  %v1762_v10 = vcvt.f32.s32 %v1761_v7  ;;  %v1701_v7 = vshll.u32 %v1700_v54, 16  ;;  %v1827_v47 = vshll.u32 %v1826_v48, 16 }
 0xed9   : > { %v935_v2 = vmul.u32 4, %v934_v6  ;;  %v1059_v6 = vshll.u32 %v1058_v51, 16  ;;  %v1765_v58 = vadd.s32 %v1764_v38, %v1762_v10 }
 0xedb   : > { %v936_v13 = vsub.s32 %v2830_v33, %v935_v2  ;;  %1677 = vmax.xlane.f32.xlu0 %v3067_v56  ;;  %v3093_v33 = vsel %vm711_vm12, %v1001_v22, 2147483648  ;;  %v879_v22 = vcvt.s32.f32 %v877_v21 }
 0xedc   : > { %v1004_v44 = vshra.s32 %v3093_v33, 16 }
 0xedd   : > { %vm937_vm0 = vcmp.eq.s32.totalorder %v2504_v23, %v936_v13 }
 0xede   : > { %v938_v62 = vsel %vm937_vm0, %v2683_v32, 0  ;;  %v3112_v20 = vcvt.s32.f32 %v1004_v44  ;;  %v1031_v44 = vand.u32 65535, %v3014_v52  ;;  %v1610_v52 = vand.u32 65535, %v3029_v26 }
 0xedf   : > { %1740 = vmax.xlane.f32.xlu0 %v3083_v12  ;;  %v3090_v19 = vsel %vm711_vm12, %v938_v62, 2147483648 }
 0xee0   : > { %v941_v15 = vshra.s32 %v3090_v19, 16  ;;  %v1033_v21 = vcvt.s32.f32 %v1031_v44  ;;  %v1612_v54 = vcvt.s32.f32 %v1610_v52 }
 0xee2   : > { %v3102_v29 = vcvt.s32.f32 %v941_v15  ;;  %v1766_v15 = vmul.u32 4, %v1765_v58 }
 0xee3   : > { %1803 = vmax.xlane.f32.xlu0 %v3100_v14 }
 0xee4   : > { %944 = vmax.xlane.f32.xlu1 %v3102_v29  ;;  %v1767_v31 = vsub.s32 %v2784_v27, %v1766_v15 }
 0xee6   : > { %vm1768_vm10 = vcmp.eq.s32.totalorder %v2504_v23, %v1767_v31  ;;  %v905_v31 = vand.u32 65535, %v3022_v28  ;;  %v1003_v28 = vand.u32 65535, %v3093_v33  ;;  %v1873_v33 = vld [vmem:[%s3459_s5 + $0x80] sm:$0xff] }
 0xee7   : > { %850 = vmax.xlane.f32.xlu0 %v849_v41 }
 0xee8   : > { %1007 = vmax.xlane.f32.xlu1 %v3112_v20  ;;  %v907_v52 = vcvt.s32.f32 %v905_v31 }
 0xeec   : > { %1649 = vmax.xlane.f32.xlu1 %v3116_v30 }
 0xf55   : > { %v1056_v39 = vpop.xlane.xlu1 %1055 }
 0xf56   : > { %v1057_v2 = vcvt.f32.s32 %v1056_v39 }
 0xf58   : > { %v3123_v13 = vpop.xlane.xlu0 %881  ;;  %v1060_v62 = vadd.s32 %v1059_v6, %v1057_v2 }
 0xf59   : > { %vm883_vm6 = vcmp.eq.f32.partialorder %v3005_v34, %v3123_v13  ;;  %v1698_v5 = vpop.xlane.xlu1 %1697 }
 0xf5a   : > { %v884_v35 = vsel %vm883_vm6, %v879_v22, -inf  ;;  %v1061_v4 = vmul.u32 4, %v1060_v62  ;;  %v1699_v57 = vcvt.f32.s32 %v1698_v5  ;;  %v1769_v62 = vsel %vm1768_vm10, %v2693_v0, 0 }
 0xf5b   : > { %885 = vmax.xlane.f32.xlu0 %v884_v35  ;;  %v1736_v35 = vand.u32 65535, %v3063_v63 }
 0xf5c   : > { %v3128_v25 = vpop.xlane.xlu0 %972  ;;  %v1062_v36 = vsub.s32 %v2876_v49, %v1061_v4  ;;  %v1702_v41 = vadd.s32 %v1701_v7, %v1699_v57  ;;  %v3171_v4 = vsel %vm711_vm12, %v1769_v62, 2147483648  ;;  %v1860_v62 = vld [vmem:[%s3459_s5 + $0x18] sm:$0xff] }
 0xf5d   : > { %vm974_vm3 = vcmp.eq.f32.partialorder %v3031_v59, %v3128_v25  ;;  %v1738_v63 = vcvt.s32.f32 %v1736_v35  ;;  %v1772_v44 = vshra.s32 %v3171_v4, 16  ;;  %v1878_v35 = vld [vmem:[%s3459_s5 + $0xa8] sm:$0xff] }
 0xf5e   : > { %v975_v34 = vsel %vm974_vm3, %v970_v17, -inf  ;;  %v1703_v24 = vmul.u32 4, %v1702_v41  ;;  %vm1063_vm2 = vcmp.eq.s32.totalorder %v2504_v23, %v1062_v36  ;;  %v1799_v17 = vand.u32 65535, %v3077_v3 }
 0xf5f   : > { %976 = vmax.xlane.f32.xlu0 %v975_v34  ;;  %v1064_v27 = vsel %vm1063_vm2, %v2683_v32, 0  ;;  %v3193_v3 = vcvt.s32.f32 %v1772_v44 }
 0xf60   : > { %v1824_v51 = vpop.xlane.xlu1 %1823  ;;  %v3137_v10 = vpop.xlane.xlu0 %1035  ;;  %v1704_v49 = vsub.s32 %v2753_v11, %v1703_v24  ;;  %v1673_v11 = vand.u32 65535, %v3045_v1  ;;  %v3156_v22 = vsel %vm711_vm12, %v1064_v27, 2147483648  ;;  %v1801_v34 = vcvt.s32.f32 %v1799_v17 }
 0xf61   : > { %v1825_v38 = vcvt.f32.s32 %v1824_v51  ;;  %vm1037_vm5 = vcmp.eq.f32.partialorder %v3049_v42, %v3137_v10  ;;  %v1067_v7 = vshra.s32 %v3156_v22, 16 }
 0xf62   : > { %v1038_v59 = vsel %vm1037_vm5, %v1033_v21, -inf  ;;  %vm1705_vm8 = vcmp.eq.s32.totalorder %v2504_v23, %v1704_v49  ;;  %v1675_v1 = vcvt.s32.f32 %v1673_v11  ;;  %v1875_v11 = vld [vmem:[%s3459_s5 + $0x90] sm:$0xff] }
 0xf63   : > { %v1828_v39 = vadd.s32 %v1827_v47, %v1825_v38  ;;  %1039 = vmax.xlane.f32.xlu0 %v1038_v59  ;;  %v1706_v26 = vsel %vm1705_vm8, %v2693_v0, 0 }
 0xf64   : > { %v3146_v6 = vpop.xlane.xlu0 %1614  ;;  %v3153_v58 = vsel %vm711_vm12, %v1706_v26, 2147483648 }
 0xf65   : > { %v1829_v2 = vmul.u32 4, %v1828_v39  ;;  %vm1616_vm13 = vcmp.eq.f32.partialorder %v3054_v8, %v3146_v6  ;;  %v1709_v61 = vshra.s32 %v3153_v58, 16  ;;  %v1005_v39 = vcvt.s32.f32 %v1003_v28 }
 0xf66   : > { %v1617_v42 = vsel %vm1616_vm13, %v1612_v54, -inf }
 0xf67   : > { %v1830_v32 = vsub.s32 %v2920_v53, %v1829_v2  ;;  %1618 = vmax.xlane.f32.xlu0 %v1617_v42  ;;  %v3167_v8 = vcvt.s32.f32 %v1709_v61  ;;  %v1876_v2 = vld [vmem:[%s3459_s5 + $0x98] sm:$0xff]  ;;  %v1859_v61 = vld [vmem:[%s3459_s5 + $0x10] sm:$0xff] }
 0xf68   : > { %v3161_v5 = vpop.xlane.xlu0 %1677 }
 0xf69   : > { %vm1831_vm11 = vcmp.eq.s32.totalorder %v2504_v23, %v1830_v32  ;;  %vm1679_vm14 = vcmp.eq.f32.partialorder %v3067_v56, %v3161_v5  ;;  %1712 = vmax.xlane.f32.xlu1 %v3167_v8  ;;  %v3180_v56 = vcvt.s32.f32 %v1067_v7  ;;  %v2144_v32 = vpack.c.bf16 %v1876_v2, %v1875_v11 }
 0xf6a   : > { %v1680_v53 = vsel %vm1679_vm14, %v1675_v1, -inf  ;;  %v1832_v57 = vsel %vm1831_vm11, %v2693_v0, 0  ;;  %v3187_v0 = vpop.xlane.xlu1 %909  ;;  %v1877_v1 = vld [vmem:[%s3459_s5 + $0xa0] sm:$0xff]  ;;  %v2146_v7 = vpack.c.bf16 %v1860_v62, %v1859_v61  ;;  %v979_v2 = vcvt.f32.s32 %v3128_v25 }
 0xf6b   : > { %1681 = vmax.xlane.f32.xlu0 %v1680_v53  ;;  %v3184_v36 = vsel %vm711_vm12, %v1832_v57, 2147483648  ;;  %vm911_vm12 = vcmp.eq.f32.partialorder %v3052_v43, %v3187_v0  ;;  %v2148_v53 = vpack.c.bf16 %v1878_v35, %v1877_v1  ;;  %v1861_v61 = vld [vmem:[%s3459_s5 + $0x20] sm:$0xff] }
 0xf6c   : > { %v3175_v15 = vpop.xlane.xlu0 %1740  ;;  %v912_v49 = vsel %vm911_vm12, %v907_v52, -inf  ;;  %v3251_v52 = vadd.s32 128, %v2504_v23  ;;  %v980_v35 = vshll.u32 %v979_v2, 16 }
 0xf6d   : > { %vm1742_vm9 = vcmp.eq.f32.partialorder %v3083_v12, %v3175_v15  ;;  %1070 = vmax.xlane.f32.xlu1 %v3180_v56  ;;  %v1835_v12 = vshra.s32 %v3184_v36, 16 }
 0xf6e   : > { %v1743_v48 = vsel %vm1742_vm9, %v1738_v63, -inf  ;;  %v853_v63 = vcvt.f32.s32 %v3096_v37 }
 0xf6f   : > { %1744 = vmax.xlane.f32.xlu0 %v1743_v48  ;;  %v3200_v21 = vcvt.s32.f32 %v1835_v12  ;;  %v888_v48 = vcvt.f32.s32 %v3123_v13  ;;  %v1708_v13 = vand.u32 65535, %v3153_v58 }
 0xf70   : > { %v3189_v41 = vpop.xlane.xlu0 %1803  ;;  %v854_v44 = vshll.u32 %v853_v63, 16 }
 0xf71   : > { %vm1805_vm7 = vcmp.eq.f32.partialorder %v3100_v14, %v3189_v41  ;;  %1775 = vmax.xlane.f32.xlu1 %v3193_v3  ;;  %v3198_v51 = vpop.xlane.xlu1 %944  ;;  %v940_v14 = vand.u32 65535, %v3090_v19  ;;  %v1645_v19 = vand.u32 65535, %v3109_v46  ;;  %v1857_v46 = vld [vmem:[%s3459_s5] sm:$0xff] }
 0xf72   : > { %v1806_v24 = vsel %vm1805_vm7, %v1801_v34, -inf  ;;  %vm946_vm4 = vcmp.eq.f32.partialorder %v3102_v29, %v3198_v51 }
 0xf73   : > { %1807 = vmax.xlane.f32.xlu0 %v1806_v24  ;;  %v942_v38 = vcvt.s32.f32 %v940_v14  ;;  %v1647_v29 = vcvt.s32.f32 %v1645_v19  ;;  %v889_v24 = vshll.u32 %v888_v48, 16  ;;  %v1066_v19 = vand.u32 65535, %v3156_v22 }
 0xf74   : > { %v851_v57 = vpop.xlane.xlu0 %850  ;;  %v1834_v22 = vand.u32 65535, %v3184_v36 }
 0xf75   : > { %1838 = vmax.xlane.f32.xlu1 %v3200_v21  ;;  %v3206_v47 = vpop.xlane.xlu1 %1007  ;;  %v947_v59 = vsel %vm946_vm4, %v942_v38, -inf  ;;  %v852_v17 = vcvt.f32.s32 %v851_v57  ;;  %v1880_v57 = vld [vmem:[%s3459_s5 + $0xb8] sm:$0xff] }
 0xf76   : > { %vm1009_vm0 = vcmp.eq.f32.partialorder %v3112_v20, %v3206_v47  ;;  %v1874_v20 = vld [vmem:[%s3459_s5 + $0x88] sm:$0xff] }
 0xf77   : > { %v1010_v27 = vsel %vm1009_vm0, %v1005_v39, -inf  ;;  %v2140_v26 = vpack.c.bf16 %v1874_v20, %v1873_v33  ;;  %v855_v34 = vadd.s32 %v854_v44, %v852_v17  ;;  %v1710_v39 = vcvt.s32.f32 %v1708_v13 }
 0xf78   : > { %v1771_v33 = vand.u32 65535, %v3171_v4  ;;  %v916_v4 = vcvt.f32.s32 %v3187_v0  ;;  %v1862_v0 = vld [vmem:[%s3459_s5 + $0x28] sm:$0xff]  ;;  %v1014_v17 = vcvt.f32.s32 %v3206_v47 }
 0xf79   : > { %913 = vmax.xlane.f32.xlu1 %v912_v49  ;;  %v3213_v43 = vpop.xlane.xlu1 %1649  ;;  %2141 = vmatprep.subr.bf16.mxu0 %v2140_v26  ;;  %v891_v14 = vmul.u32 16, %v855_v34  ;;  %v2150_v62 = vpack.c.bf16 %v1862_v0, %v1861_v61  ;;  %v1864_v34 = vld [vmem:[%s3459_s5 + $0x38] sm:$0xff] }
 0xf7a   : > { %vm1651_vm15 = vcmp.eq.f32.partialorder %v3116_v30, %v3213_v43  ;;  %v1858_v30 = vld [vmem:[%s3459_s5 + $0x8] sm:$0xff]  ;;  %v1656_v13 = vcvt.f32.s32 %v3213_v43 }
 0xf7b   : > { %v1652_v54 = vsel %vm1651_vm15, %v1647_v29, -inf  ;;  %v2142_v42 = vpack.c.bf16 %v1858_v30, %v1857_v46  ;;  %v1773_v46 = vcvt.s32.f32 %v1771_v33  ;;  %v1836_v30 = vcvt.s32.f32 %v1834_v22  ;;  %v1866_v43 = vld [vmem:[%s3459_s5 + $0x48] sm:$0xff] }
 0xf7d   : > { %948 = vmax.xlane.f32.xlu1 %v947_v59  ;;  %2143 = vmatpush3.bf16.msra.mxu0 %v2142_v42  ;;  %v917_v42 = vshll.u32 %v916_v4, 16  ;;  %v1657_v4 = vshll.u32 %v1656_v13, 16 }
 0xf7e   : > { %2145 = vmatprep.subr.bf16.mxu0 %v2144_v32 }
 0xf81   : > { %1011 = vmax.xlane.f32.xlu1 %v1010_v27  ;;  %2147 = vmatpush3.bf16.msra.mxu0 %v2146_v7  ;;  %v1621_v7 = vcvt.f32.s32 %v3146_v6  ;;  %v1863_v6 = vld [vmem:[%s3459_s5 + $0x30] sm:$0xff] }
 0xf82   : > { %2149 = vmatprep.subr.bf16.mxu0 %v2148_v53 }
 0xf85   : > { %1653 = vmax.xlane.f32.xlu1 %v1652_v54  ;;  %v1068_v54 = vcvt.s32.f32 %v1066_v19  ;;  %2151 = vmatpush3.bf16.msra.mxu0 %v2150_v62  ;;  %v1882_v19 = vld [vmem:[%s3459_s5 + $0xc8] sm:$0xff]  ;;  %v1868_v62 = vld [vmem:[%s3459_s5 + $0x58] sm:$0xff] }
 0xfe8   : > { %v886_v12 = vpop.xlane.xlu0 %885 }
 0xfe9   : > { %v887_v31 = vcvt.f32.s32 %v886_v12 }
 0xfeb   : > { %v890_v49 = vadd.s32 %v889_v24, %v887_v31  ;;  %v2154_v24 = vpack.c.bf16 %v1864_v34, %v1863_v6 }
 0xfec   : > { %v977_v58 = vpop.xlane.xlu0 %976 }
 0xfed   : > { %v892_v28 = vadd.s32 %v891_v14, %v890_v49 }
 0xfef   : > { %vm894_vm6 = vcmp.eq.s32.totalorder %v2504_v23, %v892_v28  ;;  %vm895_vm3 = vcmp.eq.s32.totalorder %v3251_v52, %v892_v28  ;;  %v1622_v28 = vshll.u32 %v1621_v7, 16 }
 0xff0   : > { %v3256_v37 = vsel %vm894_vm6, %v2960_v60, 0.0  ;;  %v3259_v38 = vsel %vm895_vm3, %v2960_v60, 0.0 }
 0xff6   : > { %v3262_v59 = vpop.xlane.xlu1 %1712 }
 0xff7   : > { %vm1714_vm2 = vcmp.eq.f32.partialorder %v3167_v8, %v3262_v59 }
 0xff8   : > { %v1715_v27 = vsel %vm1714_vm2, %v1710_v39, -inf  ;;  %v1881_v39 = vld [vmem:[%s3459_s5 + $0xc0] sm:$0xff] }
 0xff9   : > { %1716 = vmax.xlane.f32.xlu1 %v1715_v27  ;;  %v1015_v27 = vshll.u32 %v1014_v17, 16 }
 0xffa   : > { %v3267_v29 = vpop.xlane.xlu1 %1070 }
 0xffb   : > { %vm1072_vm5 = vcmp.eq.f32.partialorder %v3180_v56, %v3267_v29  ;;  %v3282_v56 = vpop.xlane.xlu0 %1039 }
 0xffc   : > { %v1073_v60 = vsel %vm1072_vm5, %v1068_v54, -inf }
 0xffd   : > { %1074 = vmax.xlane.f32.xlu1 %v1073_v60  ;;  %v2156_v60 = vpack.c.bf16 %v1882_v19, %v1881_v39  ;;  %v1042_v19 = vcvt.f32.s32 %v3137_v10 }
 0xffe   : > { %v3272_v20 = vpop.xlane.xlu1 %1775 }
 0xfff   : > { %vm1777_vm8 = vcmp.eq.f32.partialorder %v3193_v3, %v3272_v20  ;;  %v951_v3 = vcvt.f32.s32 %v3198_v51  ;;  %v1619_v25 = vpop.xlane.xlu0 %1618  ;;  %v1879_v51 = vld [vmem:[%s3459_s5 + $0xb0] sm:$0xff] }
0x1000   : > { %v1778_v8 = vsel %vm1777_vm8, %v1773_v46, -inf  ;;  %v2152_v48 = vpack.c.bf16 %v1880_v57, %v1879_v51  ;;  %v1620_v31 = vcvt.f32.s32 %v1619_v25  ;;  %v1886_v51 = vld [vmem:[%s3459_s5 + $0xe8] sm:$0xff] }
0x1001   : > { %1779 = vmax.xlane.f32.xlu1 %v1778_v8  ;;  %v952_v63 = vshll.u32 %v951_v3, 16  ;;  %v1884_v3 = vld [vmem:[%s3459_s5 + $0xd8] sm:$0xff] }
0x1002   : > { %v3277_v26 = vpop.xlane.xlu1 %1838  ;;  %2153 = vmatprep.subr.bf16.mxu0 %v2152_v48  ;;  %v1623_v8 = vadd.s32 %v1622_v28, %v1620_v31  ;;  %v1870_v48 = vld [vmem:[%s3459_s5 + $0x68] sm:$0xff]  ;;  %v1888_v31 = vld [vmem:[%s3459_s5 + $0xf8] sm:$0xff] }
0x1003   : > { %vm1840_vm10 = vcmp.eq.f32.partialorder %v3200_v21, %v3277_v26  ;;  %v978_v21 = vcvt.f32.s32 %v977_v58  ;;  %2155 = vmatpush3.bf16.msra.mxu0 %v2154_v24  ;;  %v1865_v58 = vld [vmem:[%s3459_s5 + $0x40] sm:$0xff]  ;;  %v1887_v24 = vld [vmem:[%s3459_s5 + $0xf0] sm:$0xff]  ;;  %v1872_v28 = vld [vmem:[%s3459_s5 + $0x78] sm:$0xff]  ;;  %v1682_v13 = vpop.xlane.xlu0 %1681 }
0x1004   : > { %v1841_v11 = vsel %vm1840_vm10, %v1836_v30, -inf  ;;  %v2158_v22 = vpack.c.bf16 %v1866_v43, %v1865_v58  ;;  %2157 = vmatprep.subr.bf16.mxu0 %v2156_v60  ;;  %v1659_v7 = vmul.u32 16, %v1623_v8  ;;  %v1683_v39 = vcvt.f32.s32 %v1682_v13 }
0x1005   : > { %1842 = vmax.xlane.f32.xlu1 %v1841_v11  ;;  %v981_v12 = vadd.s32 %v980_v35, %v978_v21  ;;  %v1041_v60 = vcvt.f32.s32 %v3282_v56  ;;  %v1043_v43 = vshll.u32 %v1042_v19, 16  ;;  %v1782_v56 = vcvt.f32.s32 %v3272_v20 }
0x1006   : > { %v914_v36 = vpop.xlane.xlu1 %913 }
0x1007   : > { %v915_v32 = vcvt.f32.s32 %v914_v36  ;;  %v1017_v46 = vmul.u32 16, %v981_v12  ;;  %2159 = vmatpush3.bf16.msra.mxu0 %v2158_v22 }
0x1009   : > { %v918_v1 = vadd.s32 %v917_v42, %v915_v32  ;;  %v1883_v42 = vld [vmem:[%s3459_s5 + $0xd0] sm:$0xff] }
0x100a   : > { %v949_v53 = vpop.xlane.xlu1 %948 }
0x100b   : > { %v950_v44 = vcvt.f32.s32 %v949_v53  ;;  %v954_v14 = vmul.u32 16, %v918_v1  ;;  %v2160_v1 = vpack.c.bf16 %v1884_v3, %v1883_v42  ;;  %v1885_v53 = vld [vmem:[%s3459_s5 + $0xe0] sm:$0xff] }
0x100d   : > { %v953_v49 = vadd.s32 %v952_v63, %v950_v44  ;;  %2161 = vmatprep.subr.bf16.mxu0 %v2160_v1  ;;  %v2164_v44 = vpack.c.bf16 %v1886_v51, %v1885_v53  ;;  %v1845_v1 = vcvt.f32.s32 %v3277_v26 }
0x100e   : > { %v1012_v47 = vpop.xlane.xlu1 %1011 }
0x100f   : > { %v955_v54 = vadd.s32 %v954_v14, %v953_v49  ;;  %v1013_v33 = vcvt.f32.s32 %v1012_v47  ;;  %v1871_v14 = vld [vmem:[%s3459_s5 + $0x70] sm:$0xff]  ;;  %v2168_v49 = vpack.c.bf16 %v1888_v31, %v1887_v24  ;;  %v1684_v47 = vcvt.f32.s32 %v3161_v5 }
0x1011   : > { %vm957_vm13 = vcmp.eq.s32.totalorder %v2504_v23, %v955_v54  ;;  %vm958_vm11 = vcmp.eq.s32.totalorder %v3251_v52, %v955_v54  ;;  %v1016_v30 = vadd.s32 %v1015_v27, %v1013_v33  ;;  %v1685_v27 = vshll.u32 %v1684_v47, 16  ;;  %v1745_v33 = vpop.xlane.xlu0 %1744 }
0x1012   : > { %v959_v11 = vsel %vm957_vm13, %v2963_v16, 0.0  ;;  %v960_v2 = vsel %vm958_vm11, %v2963_v16, 0.0  ;;  %v1654_v36 = vpop.xlane.xlu1 %1653  ;;  %v1867_v16 = vld [vmem:[%s3459_s5 + $0x50] sm:$0xff]  ;;  %v1719_v54 = vcvt.f32.s32 %v3262_v59  ;;  %v1810_v59 = vcvt.f32.s32 %v3189_v41 }
0x1013   : > { %v961_v32 = vadd.f32 %v959_v11, %v3256_v37  ;;  %v962_v61 = vadd.f32 %v960_v2, %v3259_v38  ;;  %v1018_v0 = vadd.s32 %v1017_v46, %v1016_v30  ;;  %v1655_v21 = vcvt.f32.s32 %v1654_v36 }
0x1014   : > { %v2162_v35 = vpack.c.bf16 %v1868_v62, %v1867_v16  ;;  %v1686_v58 = vadd.s32 %v1685_v27, %v1683_v39  ;;  %v1747_v46 = vcvt.f32.s32 %v3175_v15  ;;  %v1720_v8 = vshll.u32 %v1719_v54, 16 }
0x1015   : > { %vm1020_vm14 = vcmp.eq.s32.totalorder %v2504_v23, %v1018_v0  ;;  %vm1021_vm9 = vcmp.eq.s32.totalorder %v3251_v52, %v1018_v0  ;;  %v1658_v37 = vadd.s32 %v1657_v4, %v1655_v21  ;;  %v1077_v30 = vcvt.f32.s32 %v3267_v29  ;;  %v1808_v36 = vpop.xlane.xlu0 %1807 }
0x1016   : > { %v1022_v38 = vsel %vm1020_vm14, %v2966_v55, 0.0  ;;  %v1023_v25 = vsel %vm1021_vm9, %v2966_v55, 0.0  ;;  %2163 = vmatpush3.bf16.msra.mxu0 %v2162_v35  ;;  %v1869_v55 = vld [vmem:[%s3459_s5 + $0x60] sm:$0xff]  ;;  %v1044_v11 = vadd.s32 %v1043_v43, %v1041_v60  ;;  %v1722_v5 = vmul.u32 16, %v1686_v58 }
0x1017   : > { %v3347_v57 = vadd.f32 %v1022_v38, %v961_v32  ;;  %v3349_v63 = vadd.f32 %v1023_v25, %v962_v61  ;;  %v1660_v17 = vadd.s32 %v1659_v7, %v1658_v37  ;;  %v2166_v6 = vpack.c.bf16 %v1870_v48, %v1869_v55  ;;  %2165 = vmatprep.subr.bf16.mxu0 %v2164_v44 }
0x1018   : > { %v1746_v2 = vcvt.f32.s32 %v1745_v33  ;;  %v1748_v42 = vshll.u32 %v1747_v46, 16  ;;  %v1078_v32 = vshll.u32 %v1077_v30, 16  ;;  %v1080_v15 = vmul.u32 16, %v1044_v11 }
0x1019   : > { %vm1662_vm7 = vcmp.eq.s32.totalorder %v2504_v23, %v1660_v17  ;;  %vm1663_vm12 = vcmp.eq.s32.totalorder %v3251_v52, %v1660_v17  ;;  %v1809_v21 = vcvt.f32.s32 %v1808_v36  ;;  %v1811_v62 = vshll.u32 %v1810_v59, 16 }
0x101a   : > { %v3360_v34 = vsel %vm1662_vm7, %v2971_v45, 0.0  ;;  %v3363_v12 = vsel %vm1663_vm12, %v2971_v45, 0.0  ;;  %2167 = vmatpush3.bf16.msra.mxu0 %v2166_v6  ;;  %v2170_v45 = vpack.c.bf16 %v1872_v28, %v1871_v14  ;;  %v1749_v16 = vadd.s32 %v1748_v42, %v1746_v2 }
0x101b   : > { %2169 = vmatprep.subr.bf16.mxu0 %v2168_v49  ;;  %v1783_v37 = vshll.u32 %v1782_v56, 16  ;;  %v1812_v25 = vadd.s32 %v1811_v62, %v1809_v21  ;;  %v1846_v17 = vshll.u32 %v1845_v1, 16 }
0x101c   : > { %v1785_v53 = vmul.u32 16, %v1749_v16 }
0x101d   : > { %v1848_v31 = vmul.u32 16, %v1812_v25 }
0x101e   : > { %2171 = vmatpush3.bf16.msra.mxu0 %v2170_v45 }
0x1086   : > { %v1717_v22 = vpop.xlane.xlu1 %1716 }
0x1087   : > { %v1718_v4 = vcvt.f32.s32 %v1717_v22 }
0x1089   : > { %v1721_v10 = vadd.s32 %v1720_v8, %v1718_v4 }
0x108a   : > { %v1075_v3 = vpop.xlane.xlu1 %1074 }
0x108b   : > { %v1723_v61 = vadd.s32 %v1722_v5, %v1721_v10  ;;  %v1076_v0 = vcvt.f32.s32 %v1075_v3 }
0x108d   : > { %vm1725_vm4 = vcmp.eq.s32.totalorder %v2504_v23, %v1723_v61  ;;  %vm1726_vm0 = vcmp.eq.s32.totalorder %v3251_v52, %v1723_v61  ;;  %v1079_v29 = vadd.s32 %v1078_v32, %v1076_v0 }
0x108e   : > { %v1727_v35 = vsel %vm1725_vm4, %v2974_v9, 0.0  ;;  %v1728_v41 = vsel %vm1726_vm0, %v2974_v9, 0.0  ;;  %v1780_v7 = vpop.xlane.xlu1 %1779 }
0x108f   : > { %v1081_v20 = vadd.s32 %v1080_v15, %v1079_v29  ;;  %v1781_v38 = vcvt.f32.s32 %v1780_v7 }
0x1091   : > { %vm1083_vm15 = vcmp.eq.s32.totalorder %v2504_v23, %v1081_v20  ;;  %vm1084_vm6 = vcmp.eq.s32.totalorder %v3251_v52, %v1081_v20  ;;  %v1784_v51 = vadd.s32 %v1783_v37, %v1781_v38 }
0x1092   : > { %v1085_v44 = vsel %vm1083_vm15, %v2968_v18, 0.0  ;;  %v1086_v26 = vsel %vm1084_vm6, %v2968_v18, 0.0  ;;  %v1843_v55 = vpop.xlane.xlu1 %1842 }
0x1093   : > { %v1087_v48 = vadd.f32 %v1085_v44, %v3347_v57  ;;  %v1088_v9 = vadd.f32 %v1086_v26, %v3349_v63  ;;  %v1786_v6 = vadd.s32 %v1785_v53, %v1784_v51  ;;  %v1844_v24 = vcvt.f32.s32 %v1843_v55 }
0x1095   : > { %v1666_v14 = vadd.f32 %v3360_v34, %v1087_v48  ;;  %vm1788_vm3 = vcmp.eq.s32.totalorder %v2504_v23, %v1786_v6  ;;  %vm1789_vm2 = vcmp.eq.s32.totalorder %v3251_v52, %v1786_v6  ;;  %v1847_v49 = vadd.s32 %v1846_v17, %v1844_v24 }
0x1096   : > { %v1790_v28 = vsel %vm1788_vm3, %v2977_v40, 0.0  ;;  %v1667_v18 = vadd.f32 %v3363_v12, %v1088_v9  ;;  %v1791_v45 = vsel %vm1789_vm2, %v2977_v40, 0.0 }
0x1097   : > { %v1729_v57 = vadd.f32 %v1727_v35, %v1666_v14  ;;  %v1849_v63 = vadd.s32 %v1848_v31, %v1847_v49 }
0x1098   : > { %v1730_v13 = vadd.f32 %v1728_v41, %v1667_v18 }
0x1099   : > { %v1792_v47 = vadd.f32 %v1790_v28, %v1729_v57  ;;  %vm1851_vm5 = vcmp.eq.s32.totalorder %v2504_v23, %v1849_v63  ;;  %vm1852_vm8 = vcmp.eq.s32.totalorder %v3251_v52, %v1849_v63 }
0x109a   : > { %v1853_v34 = vsel %vm1851_vm5, %v2979_v50, 0.0  ;;  %v1793_v39 = vadd.f32 %v1791_v45, %v1730_v13  ;;  %v1854_v19 = vsel %vm1852_vm8, %v2979_v50, 0.0 }
0x109b   : > { %v1855_v27 = vadd.f32 %v1853_v34, %v1792_v47 }
0x109c   : > { %v1856_v54 = vadd.f32 %v1854_v19, %v1793_v39 }
0x109e   : > { %1953 = vmatprep.mubr.f32.mxu0 %v1856_v54 }
0x109f   : > { %1954 = vmatmul.mubr.f32.vlgmr.msra.gmra.mrb[4].mxu0 %v1855_v27 }
0x1172   : > { %v2105_v40 = vpop.f32.mrb[4].mxu0 }
0x1173   : > { %v2106_v12 = vpop.f32.mrb[5].mxu0 }
0x1174   : > { %v2107_v23 = vadd.f32 %v2106_v12, %v2105_v40 }
0x1176   : > { %1959 = vst.msk [vmem:[%s242_s16] sm:$0xff] %vm267_vm1, %v2107_v23 }
0x1177   : > { %2269 = shalt.err (!%p2266_p3)
}
0x1178   : > { %s2270_s10 = scalar_lea.hbm %s3411_s20, 128  ;;  %s2274_s13 = scalar_lea.hbm %s3460_s6, 256 }
0x1179   : > { %p2271_p4 = scmp.ne.s32.totalorder %s3411_s20, %s2270_s10  ;;  %p2275_p9 = scmp.lt.u32.totalorder %s3411_s20, %s3460_s6 }
0x117a   : > { %p2276_p10 = scmp.lt.u32.totalorder %s2274_s13, %s2270_s10  ;;  %p2278_p12 = scmp.lt.u32.totalorder %s2270_s10, %s3411_s20 }
0x117b   : > { %p2272_p7 = pnand %p2271_p4, %p2405_p5 }
0x117c   : > { %p2277_p11 = por %p2276_p10, %p2275_p9 }
0x117d   : > { %p2273_p8 = pneg %p2272_p7 }
0x117e   : > { %p2279_p13 = por %p2278_p12, %p2277_p11 }
0x1180   : > { %p2280_p0 = pnand %p2279_p13, %p2273_p8 }
0x1182   : > { %2283 = shalt.err (!%p2280_p0)
}
0x1183   : > { %2172 = dma.vmem_to_hbm [thread:$0]  (%p2405_p5), %s3413_s17, 128, %s3411_s20, %s1961_s26  }
0x1184 PF: > { %p2178_p1 = scmp.ge.s32.totalorder %s2318_s24, 2  ;;  %s1986_s16 = sand.u32 1, %s2306_s21  }
0x1185   : > { %s1987_s19 = scalar_lea.sflag [#allocation3], %s1986_s16 }
0x1186   : > { %p2175_p2 = pnand %p2178_p1, %p2409_p6 }
0x1188   : > { %2301 = dma.done.wait (!%p2175_p2), %s1987_s19, 128  }
0x1189   : > { %2303 = vsyncadd (!%p2175_p2), %s1987_s19, 4294967168  ;;  %p16_p3 = scmp.ge.s32.totalorder %s2392_s27, 4   ;;  %s3479_s21 = smov %s2310_s22 }
0x118a   : > { %s3480_s22 = smov %s2314_s23  ;;  %s3481_s23 = smov %s2403_s30 }
0x118b   : > { %s3482_s24 = smov %s2392_s27  ;;  %18 = sbr.rel (!%p16_p3) target bundleno = 3 (0x3), region = 82 }
0x1192   :  { %1992 = vsyncpa [#allocation3], 1 }
0x1193   :  { %1994 = vsyncpa [#allocation3 + $0x1], 1 }

// kernel: tpu_custom_call.1
= control target key start
LH: loop header
LB: loop body
LE: loop exit
PB: predicated region body
PF: predicated region fallthrough
CT: control target
= control target key end

     0   :  { %11 = vsyncpa [#allocation3], 0  ;;  %s3454_s0 = inlined_call_operand.vmem [shape: bf16[16,32], index: 0, kind: input, shape index: {}]   ;;  %s3455_s1 = inlined_call_operand.vmem [shape: bf16[32,64], index: 1, kind: input, shape index: {}]   ;;  %s3456_s2 = inlined_call_operand.vmem [shape: f32[1,16], index: 2, kind: input, shape index: {}]   ;;  %s3457_s3 = inlined_call_operand.vmem [shape: f32[1,16], index: 3, kind: input, shape index: {}]   ;;  %s3458_s4 = inlined_call_operand.vmem [shape: bf16[4,16,16], index: 4, kind: input, shape index: {}]   ;;  %s3459_s5 = inlined_call_operand.vmem [shape: f32[256,32], index: 5, kind: input, shape index: {}]   ;;  %s3460_s6 = inlined_call_operand.hbm [shape: f32[16,32], index: 6, kind: output, shape index: {}]  }
   0x1   :  { %13 = vsyncpa [#allocation3 + $0x1], 0  ;;  %s2367_s21 = smov 0   ;;  %s2369_s22 = smov 0  }
   0x2   :  { %s2371_s23 = smov 0   ;;  %s2373_s24 = smov 0  }
   0x3 LB: > { %s2388_s25 = sadd.s32 4294967295, %s2318_s24   ;;  %s2033_s26 = sadd.s32 4294967294, %s2318_s24   ;;  %s2318_s24 = sphi %s2373_s24, %s3482_s24   ;;  %s2314_s23 = sphi %s2371_s23, %s3481_s23   ;;  %s2310_s22 = sphi %s2369_s22, %s3480_s22   ;;  %s2306_s21 = sphi %s2367_s21, %s3479_s21  }
   0x4   : > { %s2392_s27 = sadd.s32 1, %s2318_s24   ;;  %s157_s28 = sadd.s32 1, %s2314_s23 }
   0x5   : > { %s154_s29 = ssub.s32 %s2318_s24, %s2392_s27  ;;  %p167_p0 = scmp.ne.s32.totalorder %s2314_s23, %s2310_s22 }
   0x6   : > { %p155_p1 = scmp.eq.s32.totalorder %s154_s29, 0  ;;  %p168_p2 = scmp.eq.s32.totalorder %s2388_s25, 1 }
   0x7   : > { %p173_p3 = scmp.ne.s32.totalorder %s2310_s22, %s2306_s21  ;;  %p174_p4 = scmp.eq.s32.totalorder %s2033_s26, 1 }
   0x8   : > { %s2403_s30 = scalar_select %p155_p1, %s2314_s23, %s157_s28  }
   0x9   : > { %p2405_p5 = por %p168_p2, %p167_p0  ;;  %p2409_p6 = por %p174_p4, %p173_p3 }
   0xa   : > { %p2036_p7 = scmp.ge.s32.totalorder %s2318_s24, 1  ;;  %p214_p8 = scmp.lt.s32.totalorder %s2318_s24, 3 }
   0xc   : > { %p215_p9 = pnand %p2036_p7, %p214_p8 }
   0xd   : > { %v2222_v0 = vld [vmem:[%s3455_s1] sm:$0xff] (!%p215_p9)   ;;  %v2320_v1 = vmov (!%p215_p9), 0.0   ;;  %v2223_v2 = vld [vmem:[%s3455_s1 + $0x8] sm:$0xff] (!%p215_p9)   ;;  %vm2321_vm0 = vmmov (!%p215_p9), 0   ;;  %p243_p10 = scmp.lt.s32.totalorder (!%p215_p9), %s2388_s25, 1  ;;  %vm267_vm1 = vcmask (!%p215_p9), 261120  }
   0xe   : > { %218 = sbr.rel (%p215_p9) target bundleno = 4484 (0x1184), region = 44  ;;  %2108 = vmatprep.subr.bf16.mxu1 (!%p215_p9), %v2320_v1  ;;  %2128 = vmatprep.subr.bf16.mxu0 (!%p215_p9), %v2320_v1  ;;  %s2322_s18 = smov (!%p215_p9), 112   ;;  %vm314_vm2 = vcmask (!%p215_p9), 130048   ;;  %v2458_v27 = vld [vmem:[%s3457_s3] ss:$0 sm:$0xff] (!%p215_p9)  ;;  %v2226_v52 = vld [vmem:[%s3458_s4 + $0x8] sm:$0xff] (!%p215_p9)  }
   0xf   : > { %2109 = vmatpush3.bf16.msra.mxu1 (!%p215_p9), %v2222_v0  ;;  %2112 = vmatprep.mubr.msk.bf16.mxu1 (!%p215_p9), %vm2321_vm0, %v2320_v1  ;;  %s2323_s19 = smov (!%p215_p9), 96   ;;  %s2324_s20 = smov (!%p215_p9), 80   ;;  %v2464_v28 = vld [vmem:[%s3456_s2] ss:$0 sm:$0xff] (!%p215_p9) }
  0x10   : > { %2110 = vmatprep.subr.bf16.mxu1 (!%p215_p9), %v2320_v1  ;;  %2130 = vmatprep.mubr.msk.bf16.mxu0 (!%p215_p9), %vm2321_vm0, %v2320_v1  ;;  %s2325_s29 = smov (!%p215_p9), 32   ;;  %s2326_s11 = smov (!%p215_p9), 48   ;;  %v2224_v40 = vld [vmem:[%s3458_s4] sm:$0xff] (!%p215_p9)  }
  0x11   : > { %s2327_s12 = smov (!%p215_p9), 16   ;;  %2129 = vmatpush3.bf16.msra.mxu0 (!%p215_p9), %v2226_v52  ;;  %s2328_s26 = smov (!%p215_p9), 8  }
  0x12   : > { %s2329_s28 = smov (!%p215_p9), 4   ;;  %s2059_s15 = sshll.u32 (!%p215_p9), %s2388_s25, 7 }
  0x13   : > { %2111 = vmatpush3.bf16.msra.mxu1 (!%p215_p9), %v2223_v2 }
  0x14   : > { %2116 = vmatprep.subr.bf16.mxu1 (!%p215_p9), %v2320_v1 }
  0x15   : > { %s244_s13 = scalar_select %p243_p10, %s2388_s25, 1 }
  0x16   : > { %s2331_s25 = smov [#allocation2]  }
  0x17   : > { %s2038_s14 = sshll.u32 %s244_s13, 2  ;;  %s240_s13 = sand.u32 1, %s2310_s22  }
  0x18   : > { %s246_s17 = scalar_lea.vmem %s3454_s0, %s2038_s14  ;;  %s2037_s14 = sshll.u32 %s240_s13, 3 }
  0x19   : > { %v248_v3 = vld [vmem:[%s246_s17] sm:$0xf]  ;;  %s242_s16 = scalar_lea.vmem [#allocation2], %s2037_s14 }
  0x1a   : > { %2113 = vmatmul.mubr.msk.bf16.vlgmr.msra.gmra.mrb[0].mxu1 %vm267_vm1, %v248_v3  ;;  %s1974_s17 = sshll.u32 %s242_s16, 4  ;;  %s3413_s17 = int_to_ptr.vmem [resolvable:$true] %s1974_s17 }
  0x1b   : > { %2118 = vmatprep.mubr.msk.bf16.mxu1 %vm2321_vm0, %v2320_v1  ;;  %2117 = vmatpush3.bf16.msra.mxu1 %v2224_v40 }
  0x1c   : > { %2122 = vmatprep.subr.bf16.mxu1 %v2320_v1 }
  0xed   : > { %v305_v4 = vpop.f32.mrb[0].mxu1 }
  0xee   : > { %1089 = vrot.lane.b32.xlu1 %v305_v4, %s2322_s18  ;;  %498 = vrot.lane.b32.xlu0 %v305_v4, %s2323_s19  ;;  %v2114_v5 = vpop.f32.mrb[1].mxu1  ;;  %v315_v26 = vsel %vm314_vm2, %v305_v4, 0.0 }
  0xef   : > { %v308_v6 = vpop.f32.mrb[2].mxu1 }
  0xf0   : > { %v2115_v7 = vpop.f32.mrb[3].mxu1 }
  0xf2   : > { %1274 = vrot.lane.b32.xlu0 %v305_v4, %s2324_s20 }
 0x160   : > { %v499_v8 = vpop.permute.xlu0 %498  ;;  %v1090_v12 = vpop.permute.xlu1 %1089 }
 0x161   : > { %v501_v9 = vsel %vm314_vm2, %v499_v8, 0.0  ;;  %v1092_v13 = vsel %vm314_vm2, %v1090_v12, 0.0 }
 0x162   : > { %502 = vadd.xlane.f32.xlu1 %v501_v9 }
 0x164   : > { %v1275_v10 = vpop.permute.xlu0 %1274 }
 0x165   : > { %v1277_v11 = vsel %vm314_vm2, %v1275_v10, 0.0 }
 0x166   : > { %1278 = vadd.xlane.f32.xlu0 %v1277_v11 }
 0x16a   : > { %1093 = vadd.xlane.f32.xlu0 %v1092_v13 }
 0x1ef   : > { %v503_v14 = vpop.xlane.xlu1 %502 }
 0x1f0   : > { %v504_v15 = vmul.f32 0.0625, %v503_v14 }
 0x1f2   : > { %v505_v16 = vsub.f32 %v305_v4, %v504_v15 }
 0x1f3   : > { %v1279_v17 = vpop.xlane.xlu0 %1278 }
 0x1f4   : > { %v1280_v18 = vmul.f32 0.0625, %v1279_v17  ;;  %v506_v19 = vmul.f32 %v505_v16, %v505_v16 }
 0x1f6   : > { %v2443_v20 = vsub.f32 %v305_v4, %v1280_v18  ;;  %508 = vrot.lane.b32.xlu1 %v506_v19, %s2323_s19  ;;  %v2227_v18 = vld [vmem:[%s3458_s4 + $0x18] sm:$0xff]  }
 0x1f7   : > { %v1094_v21 = vpop.xlane.xlu0 %1093 }
 0x1f8   : > { %v1095_v22 = vmul.f32 0.0625, %v1094_v21  ;;  %v1282_v23 = vmul.f32 %v2443_v20, %v2443_v20 }
 0x1fa   : > { %v2448_v24 = vsub.f32 %v305_v4, %v1095_v22  ;;  %1284 = vrot.lane.b32.xlu0 %v1282_v23, %s2324_s20  ;;  %v311_v22 = vlaneseq }
 0x1fc   : > { %v1097_v25 = vmul.f32 %v2448_v24, %v2448_v24  ;;  %v2504_v23 = vand.u32 127, %v311_v22 }
 0x1fe   : > { %1099 = vrot.lane.b32.xlu1 %v1097_v25, %s2322_s18 }
 0x222   : > { %316 = vadd.xlane.f32.xlu1 %v315_v26 }
 0x233   : > { %522 = vrot.lane.b32.xlu1 %v2458_v27, %s2325_s29 }
 0x237   : > { %1294 = vrot.lane.b32.xlu1 %v2464_v28, %s2326_s11 }
 0x268   : > { %v509_v29 = vpop.permute.xlu1 %508 }
 0x269   : > { %v511_v30 = vsel %vm314_vm2, %v509_v29, 0.0 }
 0x26a   : > { %512 = vadd.xlane.f32.xlu0 %v511_v30 }
 0x26c   : > { %v1285_v31 = vpop.permute.xlu0 %1284 }
 0x26d   : > { %v1287_v32 = vsel %vm314_vm2, %v1285_v31, 0.0  ;;  %v2507_v31 = vsub.s32 15, %v2504_v23 }
 0x26e   : > { %1288 = vadd.xlane.f32.xlu0 %v1287_v32 }
 0x270   : > { %v1100_v33 = vpop.permute.xlu1 %1099 }
 0x271   : > { %v1102_v34 = vsel %vm314_vm2, %v1100_v33, 0.0 }
 0x272   : > { %1103 = vadd.xlane.f32.xlu1 %v1102_v34 }
 0x283   : > { %1109 = vrot.lane.b32.xlu1 %v2464_v28, %s2327_s12 }
 0x284   : > { %518 = vrot.lane.b32.xlu0 %v2464_v28, %s2325_s29  ;;  %s2330_s29 = smov 12  }
 0x288   : > { %1298 = vrot.lane.b32.xlu0 %v2458_v27, %s2326_s11 }
 0x28c   : > { %1113 = vrot.lane.b32.xlu0 %v2458_v27, %s2327_s12 }
 0x2af   : > { %v317_v35 = vpop.xlane.xlu1 %316 }
 0x2b0   : > { %v319_v36 = vmul.f32 0.0625, %v317_v35 }
 0x2b2   : > { %v320_v37 = vsub.f32 %v305_v4, %v319_v36 }
 0x2b3   : > { %v523_v41 = vpop.permute.xlu1 %522 }
 0x2b4   : > { %v321_v38 = vmul.f32 %v320_v37, %v320_v37 }
 0x2b6   : > { %v322_v39 = vsel %vm314_vm2, %v321_v38, 0.0 }
 0x2b7   : > { %323 = vadd.xlane.f32.xlu1 %v322_v39  ;;  %v1295_v45 = vpop.permute.xlu1 %1294 }
 0x2f7   : > { %v513_v42 = vpop.xlane.xlu0 %512 }
 0x2f8   : > { %v514_v43 = vmul.f32 0.0625, %v513_v42 }
 0x2fa   : > { %v515_v44 = vadd.f32 1e-05, %v514_v43 }
 0x2fb   : > { %v1289_v46 = vpop.xlane.xlu0 %1288 }
 0x2fc   : > { %2228 = vrsqrt.f32 %v515_v44  ;;  %v1290_v47 = vmul.f32 0.0625, %v1289_v46 }
 0x2fe   : > { %v1291_v48 = vadd.f32 1e-05, %v1290_v47 }
 0x2ff   : > { %v1104_v49 = vpop.xlane.xlu1 %1103  ;;  %v519_v54 = vpop.permute.xlu0 %518 }
 0x300   : > { %2230 = vrsqrt.f32 %v1291_v48  ;;  %v1105_v50 = vmul.f32 0.0625, %v1104_v49 }
 0x302   : > { %v1106_v51 = vadd.f32 1e-05, %v1105_v50 }
 0x303   : > { %v1299_v58 = vpop.permute.xlu0 %1298  ;;  %v1110_v0 = vpop.permute.xlu1 %1109 }
 0x304   : > { %2232 = vrsqrt.f32 %v1106_v51 }
 0x306   : > { %v2229_v53 = vpop.eup %2228 }
 0x307   : > { %v517_v55 = vmul.f32 %v2229_v53, %v505_v16  ;;  %v1114_v4 = vpop.permute.xlu0 %1113  ;;  %v2225_v16 = vld [vmem:[%s3458_s4 + $0x10] sm:$0xff]  }
 0x309   : > { %v521_v56 = vmul.f32 %v519_v54, %v517_v55 }
 0x30a   : > { %v2231_v57 = vpop.eup %2230 }
 0x30b   : > { %v525_v59 = vadd.f32 %v523_v41, %v521_v56  ;;  %v1293_v60 = vmul.f32 %v2231_v57, %v2443_v20 }
 0x30d   : > { %v1297_v61 = vmul.f32 %v1295_v45, %v1293_v60  ;;  %v526_v62 = vpack.c.bf16 %v525_v59, %v525_v59 }
 0x30e   : > { %v2233_v63 = vpop.eup %2232 }
 0x30f   : > { %v1301_v2 = vadd.f32 %v1299_v58, %v1297_v61  ;;  %531 = vrot.lane.b32.xlu0 %v526_v62, %s2323_s19  ;;  %v1108_v3 = vmul.f32 %v2233_v63, %v2448_v24 }
 0x311   : > { %v1302_v5 = vpack.c.bf16 %v1301_v2, %v1301_v2  ;;  %v1112_v6 = vmul.f32 %v1110_v0, %v1108_v3 }
 0x313   : > { %v1116_v7 = vadd.f32 %v1114_v4, %v1112_v6  ;;  %1307 = vrot.lane.b32.xlu0 %v1302_v5, %s2324_s20  ;;  %s3411_s20 = scalar_lea.hbm %s3460_s6, %s2059_s15 }
 0x315   : > { %v1117_v8 = vpack.c.bf16 %v1116_v7, %v1116_v7 }
 0x317   : > { %1122 = vrot.lane.b32.xlu0 %v1117_v8, %s2322_s18 }
 0x344   : > { %v324_v9 = vpop.xlane.xlu1 %323 }
 0x345   : > { %v325_v10 = vmul.f32 0.0625, %v324_v9 }
 0x347   : > { %v326_v11 = vadd.f32 1e-05, %v325_v10 }
 0x349   : > { %2234 = vrsqrt.f32 %v326_v11 }
 0x353   : > { %v2235_v12 = vpop.eup %2234 }
 0x354   : > { %v328_v13 = vmul.f32 %v2235_v12, %v320_v37 }
 0x356   : > { %v335_v14 = vmul.f32 %v2464_v28, %v328_v13 }
 0x358   : > { %v342_v15 = vadd.f32 %v2458_v27, %v335_v14 }
 0x35a   : > { %v343_v17 = vpack.c.bf16 %v342_v15, %v342_v15 }
 0x35c   : > { %2119 = vmatmul.mubr.msk.bf16.vlgmr.msra.gmra.mrb[4].mxu1 %vm314_vm2, %v343_v17 }
 0x35d   : > { %2123 = vmatpush3.bf16.msra.mxu1 %v2225_v16  ;;  %2124 = vmatprep.mubr.msk.bf16.mxu1 %vm2321_vm0, %v2320_v1 }
 0x35e   : > { %2134 = vmatprep.subr.bf16.mxu1 %v2320_v1 }
 0x381   : > { %v532_v19 = vpop.permute.xlu0 %531 }
 0x382   : > { %2125 = vmatmul.mubr.msk.bf16.vlgmr.msra.gmra.mrb[8].mxu1 %vm314_vm2, %v532_v19 }
 0x383   : > { %2135 = vmatpush3.bf16.msra.mxu1 %v2227_v18  ;;  %2136 = vmatprep.mubr.msk.bf16.mxu1 %vm2321_vm0, %v2320_v1 }
 0x385   : > { %v1308_v20 = vpop.permute.xlu0 %1307 }
 0x389   : > { %v1123_v21 = vpop.permute.xlu0 %1122 }
 0x38a   : > { %2131 = vmatmul.mubr.msk.bf16.vlgmr.msra.gmra.mrb[0].mxu0 %vm314_vm2, %v1123_v21  ;;  %2137 = vmatmul.mubr.msk.bf16.vlgmr.msra.gmra.mrb[12].mxu1 %vm314_vm2, %v1308_v20 }
 0x42f   : > { %v389_v24 = vpop.f32.mrb[4].mxu1 }
 0x430   : > { %vm396_vm3 = vcmp.ge.s32.totalorder %v389_v24, 0  ;;  %v397_v25 = vxor.u32 2147483647, %v389_v24  ;;  %v2120_v26 = vpop.f32.mrb[5].mxu1 }
 0x431   : > { %v392_v27 = vpop.f32.mrb[6].mxu1 }
 0x432   : > { %v398_v28 = vsel %vm396_vm3, %v389_v24, %v397_v25  ;;  %v2121_v29 = vpop.f32.mrb[7].mxu1 }
 0x433   : > { %v399_v30 = vadd.s32 8, %v398_v28 }
 0x435   : > { %v400_v1 = vand.u32 4294967280, %v399_v30 }
 0x437   : > { %v2510_v32 = vor.u32 %v2507_v31, %v400_v1 }
 0x439   : > { %v403_v33 = vsel %vm314_vm2, %v2510_v32, 2147483648 }
 0x43a   : > { %v405_v34 = vshra.s32 %v403_v33, 16  ;;  %v404_v9 = vand.u32 65535, %v403_v33 }
 0x43c   : > { %v407_v35 = vcvt.s32.f32 %v405_v34  ;;  %v406_v11 = vcvt.s32.f32 %v404_v9 }
 0x43e   : > { %408 = vmax.xlane.f32.xlu1 %v407_v35 }
 0x455   : > { %v576_v36 = vpop.f32.mrb[8].mxu1 }
 0x456   : > { %vm583_vm4 = vcmp.ge.s32.totalorder %v576_v36, 0  ;;  %v584_v37 = vxor.u32 2147483647, %v576_v36  ;;  %v2126_v38 = vpop.f32.mrb[9].mxu1 }
 0x457   : > { %v579_v39 = vpop.f32.mrb[10].mxu1 }
 0x458   : > { %v585_v40 = vsel %vm583_vm4, %v576_v36, %v584_v37  ;;  %v2127_v41 = vpop.f32.mrb[11].mxu1 }
 0x459   : > { %v586_v42 = vadd.s32 8, %v585_v40 }
 0x45b   : > { %v587_v43 = vand.u32 4294967280, %v586_v42 }
 0x45d   : > { %v2515_v44 = vor.u32 %v587_v43, %v2507_v31  ;;  %v1167_v45 = vpop.f32.mrb[0].mxu0  ;;  %v1352_v46 = vpop.f32.mrb[12].mxu1 }
 0x45e   : > { %vm1174_vm5 = vcmp.ge.s32.totalorder %v1167_v45, 0  ;;  %v1175_v47 = vxor.u32 2147483647, %v1167_v45  ;;  %vm1359_vm6 = vcmp.ge.s32.totalorder %v1352_v46, 0  ;;  %v1360_v48 = vxor.u32 2147483647, %v1352_v46 }
 0x45f   : > { %v2132_v49 = vpop.f32.mrb[1].mxu0  ;;  %v2138_v50 = vpop.f32.mrb[13].mxu1  ;;  %v589_v51 = vsel %vm314_vm2, %v2515_v44, 2147483648 }
 0x460   : > { %v1176_v52 = vsel %vm1174_vm5, %v1167_v45, %v1175_v47  ;;  %v1361_v53 = vsel %vm1359_vm6, %v1352_v46, %v1360_v48  ;;  %v1170_v54 = vpop.f32.mrb[2].mxu0  ;;  %v1355_v55 = vpop.f32.mrb[14].mxu1  ;;  %v591_v56 = vshra.s32 %v589_v51, 16  ;;  %v590_v13 = vand.u32 65535, %v589_v51 }
 0x461   : > { %v1177_v57 = vadd.s32 8, %v1176_v52  ;;  %v1362_v58 = vadd.s32 8, %v1361_v53  ;;  %v2133_v59 = vpop.f32.mrb[3].mxu0  ;;  %v2139_v60 = vpop.f32.mrb[15].mxu1  ;;  %vm683_vm6 = vcmask 7168  }
 0x462   : > { %v593_v61 = vcvt.s32.f32 %v591_v56  ;;  %v592_v15 = vcvt.s32.f32 %v590_v13 }
 0x463   : > { %v1178_v62 = vand.u32 4294967280, %v1177_v57  ;;  %v1363_v63 = vand.u32 4294967280, %v1362_v58 }
 0x464   : > { %594 = vmax.xlane.f32.xlu0 %v593_v61 }
 0x465   : > { %v2520_v0 = vor.u32 %v1178_v62, %v2507_v31  ;;  %v2523_v2 = vor.u32 %v1363_v63, %v2507_v31 }
 0x467   : > { %v1365_v3 = vsel %vm314_vm2, %v2523_v2, 2147483648  ;;  %v1180_v4 = vsel %vm314_vm2, %v2520_v0, 2147483648 }
 0x468   : > { %v1367_v5 = vshra.s32 %v1365_v3, 16  ;;  %v1182_v7 = vshra.s32 %v1180_v4, 16  ;;  %v1366_v17 = vand.u32 65535, %v1365_v3  ;;  %v1181_v20 = vand.u32 65535, %v1180_v4 }
 0x46a   : > { %v1369_v6 = vcvt.s32.f32 %v1367_v5  ;;  %v1184_v8 = vcvt.s32.f32 %v1182_v7  ;;  %v1368_v19 = vcvt.s32.f32 %v1366_v17  ;;  %v1183_v24 = vcvt.s32.f32 %v1181_v20 }
 0x46c   : > { %1370 = vmax.xlane.f32.xlu1 %v1369_v6 }
 0x470   : > { %1185 = vmax.xlane.f32.xlu1 %v1184_v8 }
 0x4cb   : > { %v409_v10 = vpop.xlane.xlu1 %408 }
 0x4cc   : > { %vm410_vm7 = vcmp.eq.f32.partialorder %v407_v35, %v409_v10  ;;  %v415_v26 = vcvt.f32.s32 %v409_v10 }
 0x4cd   : > { %v411_v12 = vsel %vm410_vm7, %v406_v11, -inf }
 0x4ce   : > { %412 = vmax.xlane.f32.xlu1 %v411_v12  ;;  %v416_v28 = vshll.u32 %v415_v26, 16 }
 0x4f1   : > { %v595_v14 = vpop.xlane.xlu0 %594 }
 0x4f2   : > { %vm596_vm8 = vcmp.eq.f32.partialorder %v593_v61, %v595_v14  ;;  %v601_v36 = vcvt.f32.s32 %v595_v14 }
 0x4f3   : > { %v597_v16 = vsel %vm596_vm8, %v592_v15, -inf }
 0x4f4   : > { %598 = vmax.xlane.f32.xlu0 %v597_v16  ;;  %v602_v38 = vshll.u32 %v601_v36, 16 }
 0x4f9   : > { %v1371_v18 = vpop.xlane.xlu1 %1370 }
 0x4fa   : > { %vm1372_vm9 = vcmp.eq.f32.partialorder %v1369_v6, %v1371_v18  ;;  %v1377_v41 = vcvt.f32.s32 %v1371_v18 }
 0x4fb   : > { %v1373_v21 = vsel %vm1372_vm9, %v1368_v19, -inf }
 0x4fc   : > { %1374 = vmax.xlane.f32.xlu0 %v1373_v21  ;;  %v1378_v46 = vshll.u32 %v1377_v41, 16 }
 0x4fd   : > { %v1186_v22 = vpop.xlane.xlu1 %1185 }
 0x4fe   : > { %vm1187_vm10 = vcmp.eq.f32.partialorder %v1184_v8, %v1186_v22  ;;  %v1192_v47 = vcvt.f32.s32 %v1186_v22 }
 0x4ff   : > { %v1188_v25 = vsel %vm1187_vm10, %v1183_v24, -inf }
 0x500   : > { %1189 = vmax.xlane.f32.xlu1 %v1188_v25  ;;  %v1193_v52 = vshll.u32 %v1192_v47, 16 }
 0x55b   : > { %v413_v27 = vpop.xlane.xlu1 %412 }
 0x55c   : > { %v414_v29 = vcvt.f32.s32 %v413_v27 }
 0x55e   : > { %v2529_v30 = vadd.s32 %v416_v28, %v414_v29 }
 0x560   : > { %vm425_vm11 = vcmp.eq.s32.totalorder %v2510_v32, %v2529_v30  ;;  %v418_v19 = vand.u32 15, %v2529_v30 }
 0x561   : > { %v2534_v1 = vsel %vm425_vm11, 2147483648, %v2510_v32 }
 0x562   : > { %v427_v33 = vsel %vm314_vm2, %v2534_v1, 2147483648  ;;  %v419_v24 = vsub.s32 15, %v418_v19 }
 0x563   : > { %v429_v34 = vshra.s32 %v427_v33, 16  ;;  %v428_v62 = vand.u32 65535, %v427_v33 }
 0x565   : > { %v431_v35 = vcvt.s32.f32 %v429_v34 }
 0x567   : > { %432 = vmax.xlane.f32.xlu1 %v431_v35 }
 0x581   : > { %v599_v37 = vpop.xlane.xlu0 %598 }
 0x582   : > { %v600_v39 = vcvt.f32.s32 %v599_v37 }
 0x584   : > { %v2538_v40 = vadd.s32 %v602_v38, %v600_v39 }
 0x586   : > { %vm611_vm12 = vcmp.eq.s32.totalorder %v2515_v44, %v2538_v40  ;;  %v606_v34 = vand.u32 4294967280, %v2538_v40  ;;  %v604_v37 = vand.u32 15, %v2538_v40 }
 0x587   : > { %v2543_v42 = vsel %vm611_vm12, 2147483648, %v2515_v44 }
 0x588   : > { %v613_v32 = vsel %vm314_vm2, %v2543_v42, 2147483648  ;;  %v608_v39 = vxor.u32 2147483647, %v606_v34  ;;  %vm607_vm7 = vcmp.ge.s32.totalorder %v606_v34, 0 }
 0x589   : > { %v1375_v43 = vpop.xlane.xlu0 %1374  ;;  %v615_v45 = vshra.s32 %v613_v32, 16  ;;  %v614_v4 = vand.u32 65535, %v613_v32 }
 0x58a   : > { %v1376_v48 = vcvt.f32.s32 %v1375_v43  ;;  %v605_v43 = vsub.s32 15, %v604_v37 }
 0x58b   : > { %v617_v49 = vcvt.s32.f32 %v615_v45  ;;  %v616_v6 = vcvt.s32.f32 %v614_v4 }
 0x58c   : > { %v2547_v50 = vadd.s32 %v1378_v46, %v1376_v48 }
 0x58d   : > { %v1190_v51 = vpop.xlane.xlu1 %1189  ;;  %618 = vmax.xlane.f32.xlu0 %v617_v49 }
 0x58e   : > { %v1191_v53 = vcvt.f32.s32 %v1190_v51  ;;  %vm1387_vm13 = vcmp.eq.s32.totalorder %v2523_v2, %v2547_v50  ;;  %v609_v51 = vsel %vm607_vm7, %v606_v34, %v608_v39 }
 0x58f   : > { %v2552_v44 = vsel %vm1387_vm13, 2147483648, %v2523_v2  ;;  %v430_v2 = vcvt.s32.f32 %v428_v62  ;;  %v1380_v62 = vand.u32 15, %v2547_v50 }
 0x590   : > { %v2554_v54 = vadd.s32 %v1193_v52, %v1191_v53  ;;  %v1389_v55 = vsel %vm314_vm2, %v2552_v44, 2147483648  ;;  %v1382_v52 = vand.u32 4294967280, %v2547_v50 }
 0x591   : > { %v1391_v56 = vshra.s32 %v1389_v55, 16 }
 0x592   : > { %vm1202_vm14 = vcmp.eq.s32.totalorder %v2520_v0, %v2554_v54  ;;  %vm1383_vm11 = vcmp.ge.s32.totalorder %v1382_v52, 0 }
 0x593   : > { %v1393_v57 = vcvt.s32.f32 %v1391_v56  ;;  %v2561_v58 = vsel %vm1202_vm14, 2147483648, %v2520_v0  ;;  %v1390_v0 = vand.u32 65535, %v1389_v55 }
 0x594   : > { %v1204_v59 = vsel %vm314_vm2, %v2561_v58, 2147483648 }
 0x595   : > { %1394 = vmax.xlane.f32.xlu0 %v1393_v57  ;;  %v1206_v60 = vshra.s32 %v1204_v59, 16  ;;  %v1392_v9 = vcvt.s32.f32 %v1390_v0  ;;  %v1205_v10 = vand.u32 65535, %v1204_v59  ;;  %v1381_v0 = vsub.s32 15, %v1380_v62 }
 0x597   : > { %v1208_v61 = vcvt.s32.f32 %v1206_v60  ;;  %v1207_v13 = vcvt.s32.f32 %v1205_v10 }
 0x599   : > { %1209 = vmax.xlane.f32.xlu1 %v1208_v61 }
 0x5f4   : > { %v433_v63 = vpop.xlane.xlu1 %432 }
 0x5f5   : > { %vm434_vm15 = vcmp.eq.f32.partialorder %v431_v35, %v433_v63  ;;  %v439_v15 = vcvt.f32.s32 %v433_v63 }
 0x5f6   : > { %v435_v3 = vsel %vm434_vm15, %v430_v2, -inf  ;;  %v1384_v2 = vxor.u32 2147483647, %v1382_v52 }
 0x5f7   : > { %436 = vmax.xlane.f32.xlu1 %v435_v3  ;;  %v440_v17 = vshll.u32 %v439_v15, 16 }
 0x61a   : > { %v619_v5 = vpop.xlane.xlu0 %618 }
 0x61b   : > { %vm620_vm0 = vcmp.eq.f32.partialorder %v617_v49, %v619_v5  ;;  %v625_v33 = vcvt.f32.s32 %v619_v5 }
 0x61c   : > { %v621_v7 = vsel %vm620_vm0, %v616_v6, -inf }
 0x61d   : > { %622 = vmax.xlane.f32.xlu0 %v621_v7  ;;  %v626_v35 = vshll.u32 %v625_v33, 16 }
 0x622   : > { %v1395_v8 = vpop.xlane.xlu0 %1394 }
 0x623   : > { %vm1396_vm3 = vcmp.eq.f32.partialorder %v1393_v57, %v1395_v8  ;;  %v1401_v45 = vcvt.f32.s32 %v1395_v8  ;;  %v1195_v8 = vand.u32 15, %v2554_v54 }
 0x624   : > { %v1397_v11 = vsel %vm1396_vm3, %v1392_v9, -inf }
 0x625   : > { %1398 = vmax.xlane.f32.xlu0 %v1397_v11  ;;  %v1402_v59 = vshll.u32 %v1401_v45, 16 }
 0x626   : > { %v1210_v12 = vpop.xlane.xlu1 %1209 }
 0x627   : > { %vm1211_vm4 = vcmp.eq.f32.partialorder %v1208_v61, %v1210_v12  ;;  %v1216_v53 = vcvt.f32.s32 %v1210_v12 }
 0x628   : > { %v1212_v14 = vsel %vm1211_vm4, %v1207_v13, -inf  ;;  %v1385_v13 = vsel %vm1383_vm11, %v1382_v52, %v1384_v2 }
 0x629   : > { %1213 = vmax.xlane.f32.xlu1 %v1212_v14  ;;  %v1217_v3 = vshll.u32 %v1216_v53, 16 }
 0x684   : > { %v437_v16 = vpop.xlane.xlu1 %436 }
 0x685   : > { %v438_v18 = vcvt.f32.s32 %v437_v16 }
 0x687   : > { %v2566_v20 = vadd.s32 %v440_v17, %v438_v18  ;;  %v1196_v18 = vsub.s32 15, %v1195_v8 }
 0x689   : > { %v442_v21 = vand.u32 15, %v2566_v20  ;;  %vm449_vm5 = vcmp.eq.s32.totalorder %v2534_v1, %v2566_v20 }
 0x68a   : > { %v2572_v22 = vsel %vm449_vm5, 2147483648, %v2534_v1  ;;  %vm685_vm5 = vcmask 15360  }
 0x68b   : > { %v443_v25 = vsub.s32 15, %v442_v21  ;;  %v2576_v26 = vsel %vm314_vm2, %v2572_v22, 2147483648 }
 0x68c   : > { %v453_v27 = vshra.s32 %v2576_v26, 16 }
 0x68d   : > { %v2580_v28 = vsel %vm683_vm6, %v419_v24, %v443_v25 }
 0x68e   : > { %v2582_v29 = vcvt.s32.f32 %v453_v27 }
 0x690   : > { %456 = vmax.xlane.f32.xlu1 %v2582_v29 }
 0x6aa   : > { %v623_v1 = vpop.xlane.xlu0 %622 }
 0x6ab   : > { %v624_v36 = vcvt.f32.s32 %v623_v1  ;;  %v452_v1 = vand.u32 65535, %v2576_v26 }
 0x6ad   : > { %v627_v38 = vadd.s32 %v626_v35, %v624_v36  ;;  %v454_v36 = vcvt.s32.f32 %v452_v1 }
 0x6af   : > { %v628_v41 = vand.u32 15, %v627_v38  ;;  %v630_v32 = vand.u32 4294967280, %v627_v38  ;;  %vm635_vm8 = vcmp.eq.s32.totalorder %v2543_v42, %v627_v38 }
 0x6b0   : > { %v2589_v46 = vsel %vm635_vm8, 2147483648, %v2543_v42 }
 0x6b1   : > { %v629_v47 = vsub.s32 15, %v628_v41  ;;  %vm631_vm9 = vcmp.ge.s32.totalorder %v630_v32, 0  ;;  %v632_v48 = vxor.u32 2147483647, %v630_v32  ;;  %v637_v49 = vsel %vm314_vm2, %v2589_v46, 2147483648 }
 0x6b2   : > { %v639_v40 = vshra.s32 %v637_v49, 16  ;;  %v1399_v57 = vpop.xlane.xlu0 %1398 }
 0x6b3   : > { %v633_v55 = vsel %vm631_vm9, %v630_v32, %v632_v48  ;;  %v2595_v56 = vsel %vm683_vm6, %v605_v43, %v629_v47  ;;  %v1400_v60 = vcvt.f32.s32 %v1399_v57 }
 0x6b4   : > { %v641_v42 = vcvt.s32.f32 %v639_v40  ;;  %v2598_v61 = vsel %vm683_vm6, %v609_v51, %v633_v55 }
 0x6b5   : > { %v1403_v63 = vadd.s32 %v1402_v59, %v1400_v60 }
 0x6b6   : > { %642 = vmax.xlane.f32.xlu0 %v641_v42  ;;  %v1214_v4 = vpop.xlane.xlu1 %1213 }
 0x6b7   : > { %v1404_v5 = vand.u32 15, %v1403_v63  ;;  %v1406_v6 = vand.u32 4294967280, %v1403_v63  ;;  %v1215_v7 = vcvt.f32.s32 %v1214_v4  ;;  %vm1411_vm10 = vcmp.eq.s32.totalorder %v2552_v44, %v1403_v63 }
 0x6b8   : > { %v2604_v9 = vsel %vm1411_vm10, 2147483648, %v2552_v44 }
 0x6b9   : > { %v1405_v10 = vsub.s32 15, %v1404_v5  ;;  %vm1407_vm12 = vcmp.ge.s32.totalorder %v1406_v6, 0  ;;  %v1408_v50 = vxor.u32 2147483647, %v1406_v6  ;;  %v2606_v11 = vadd.s32 %v1217_v3, %v1215_v7 }
 0x6ba   : > { %v1413_v12 = vsel %vm314_vm2, %v2604_v9, 2147483648 }
 0x6bb   : > { %v1409_v14 = vsel %vm1407_vm12, %v1406_v6, %v1408_v50  ;;  %v2611_v15 = vsel %vm683_vm6, %v1381_v0, %v1405_v10  ;;  %v1219_v16 = vand.u32 15, %v2606_v11  ;;  %v1415_v17 = vshra.s32 %v1413_v12, 16 }
 0x6bc   : > { %vm1226_vm13 = vcmp.eq.s32.totalorder %v2561_v58, %v2606_v11  ;;  %v2617_v44 = vsel %vm683_vm6, %v1385_v13, %v1409_v14  ;;  %v1414_v32 = vand.u32 65535, %v1413_v12 }
 0x6bd   : > { %v1220_v19 = vsub.s32 15, %v1219_v16  ;;  %v2620_v21 = vsel %vm1226_vm13, 2147483648, %v2561_v58  ;;  %v1417_v24 = vcvt.s32.f32 %v1415_v17  ;;  %v638_v58 = vand.u32 65535, %v637_v49 }
 0x6be   : > { %v1228_v25 = vsel %vm314_vm2, %v2620_v21, 2147483648  ;;  %v1416_v47 = vcvt.s32.f32 %v1414_v32 }
 0x6bf   : > { %v2625_v27 = vsel %vm683_vm6, %v1196_v18, %v1220_v19  ;;  %v1230_v33 = vshra.s32 %v1228_v25, 16  ;;  %1418 = vmax.xlane.f32.xlu0 %v1417_v24  ;;  %v640_v39 = vcvt.s32.f32 %v638_v58  ;;  %v1229_v43 = vand.u32 65535, %v1228_v25 }
 0x6c1   : > { %v1232_v34 = vcvt.s32.f32 %v1230_v33  ;;  %v1231_v51 = vcvt.s32.f32 %v1229_v43 }
 0x6c3   : > { %1233 = vmax.xlane.f32.xlu1 %v1232_v34 }
 0x71d   : > { %v457_v35 = vpop.xlane.xlu1 %456 }
 0x71e   : > { %vm458_vm14 = vcmp.eq.f32.partialorder %v2582_v29, %v457_v35  ;;  %v463_v29 = vcvt.f32.s32 %v457_v35 }
 0x71f   : > { %v459_v37 = vsel %vm458_vm14, %v454_v36, -inf }
 0x720   : > { %460 = vmax.xlane.f32.xlu1 %v459_v37  ;;  %v464_v49 = vshll.u32 %v463_v29, 16 }
 0x743   : > { %v643_v38 = vpop.xlane.xlu0 %642 }
 0x744   : > { %vm644_vm15 = vcmp.eq.f32.partialorder %v641_v42, %v643_v38  ;;  %v649_v3 = vcvt.f32.s32 %v643_v38 }
 0x745   : > { %v645_v41 = vsel %vm644_vm15, %v640_v39, -inf  ;;  %vm687_vm15 = vcmask 23552  }
 0x746   : > { %646 = vmax.xlane.f32.xlu0 %v645_v41  ;;  %v650_v5 = vshll.u32 %v649_v3, 16 }
 0x74c   : > { %v1419_v45 = vpop.xlane.xlu0 %1418 }
 0x74d   : > { %vm1420_vm0 = vcmp.eq.f32.partialorder %v1417_v24, %v1419_v45 }
 0x74e   : > { %v1421_v48 = vsel %vm1420_vm0, %v1416_v47, -inf }
 0x74f   : > { %1422 = vmax.xlane.f32.xlu0 %v1421_v48 }
 0x750   : > { %v1234_v26 = vpop.xlane.xlu1 %1233 }
 0x751   : > { %vm1235_vm3 = vcmp.eq.f32.partialorder %v1232_v34, %v1234_v26  ;;  %v1240_v19 = vcvt.f32.s32 %v1234_v26 }
 0x752   : > { %v1236_v40 = vsel %vm1235_vm3, %v1231_v51, -inf }
 0x753   : > { %1237 = vmax.xlane.f32.xlu1 %v1236_v40  ;;  %v1241_v1 = vshll.u32 %v1240_v19, 16  ;;  %v444_v19 = vand.u32 4294967280, %v2566_v20 }
 0x7ad   : > { %v461_v52 = vpop.xlane.xlu1 %460 }
 0x7ae   : > { %v462_v53 = vcvt.f32.s32 %v461_v52 }
 0x7b0   : > { %v2629_v55 = vadd.s32 %v464_v49, %v462_v53 }
 0x7b2   : > { %v466_v57 = vand.u32 15, %v2629_v55  ;;  %vm473_vm4 = vcmp.eq.s32.totalorder %v2572_v22, %v2629_v55 }
 0x7b3   : > { %v474_v59 = vsel %vm473_vm4, 2147483648, %v2572_v22  ;;  %vm445_vm4 = vcmp.ge.s32.totalorder %v444_v19, 0 }
 0x7b4   : > { %v467_v60 = vsub.s32 15, %v466_v57  ;;  %v475_v42 = vsel %vm314_vm2, %v474_v59, 2147483648 }
 0x7b5   : > { %v477_v62 = vshra.s32 %v475_v42, 16 }
 0x7b6   : > { %v2638_v63 = vsel %vm685_vm5, %v2580_v28, %v467_v60  ;;  %v1425_v28 = vcvt.f32.s32 %v1419_v45 }
 0x7b7   : > { %v479_v2 = vcvt.s32.f32 %v477_v62 }
 0x7b9   : > { %480 = vmax.xlane.f32.xlu1 %v479_v2 }
 0x7d3   : > { %v647_v4 = vpop.xlane.xlu0 %646 }
 0x7d4   : > { %v648_v6 = vcvt.f32.s32 %v647_v4 }
 0x7d6   : > { %v651_v7 = vadd.s32 %v650_v5, %v648_v6 }
 0x7d8   : > { %v652_v0 = vand.u32 15, %v651_v7  ;;  %v654_v8 = vand.u32 4294967280, %v651_v7  ;;  %vm659_vm6 = vcmp.eq.s32.totalorder %v2589_v46, %v651_v7 }
 0x7d9   : > { %v660_v22 = vsel %vm659_vm6, 2147483648, %v2589_v46  ;;  %v1426_v46 = vshll.u32 %v1425_v28, 16 }
 0x7da   : > { %v653_v10 = vsub.s32 15, %v652_v0  ;;  %vm655_vm7 = vcmp.ge.s32.totalorder %v654_v8, 0  ;;  %v656_v50 = vxor.u32 2147483647, %v654_v8  ;;  %v661_v12 = vsel %vm314_vm2, %v660_v22, 2147483648 }
 0x7db   : > { %v663_v13 = vshra.s32 %v661_v12, 16  ;;  %v662_v57 = vand.u32 65535, %v661_v12 }
 0x7dc   : > { %v657_v14 = vsel %vm655_vm7, %v654_v8, %v656_v50  ;;  %v2645_v16 = vsel %vm685_vm5, %v2595_v56, %v653_v10  ;;  %v1423_v24 = vpop.xlane.xlu0 %1422 }
 0x7dd   : > { %v665_v17 = vcvt.s32.f32 %v663_v13  ;;  %v2649_v18 = vsel %vm685_vm5, %v2598_v61, %v657_v14  ;;  %v1424_v25 = vcvt.f32.s32 %v1423_v24  ;;  %v664_v60 = vcvt.s32.f32 %v662_v57 }
 0x7de   : > { %v420_v14 = vand.u32 4294967280, %v2529_v30 }
 0x7df   : > { %666 = vmax.xlane.f32.xlu0 %v665_v17  ;;  %v1427_v33 = vadd.s32 %v1426_v46, %v1424_v25  ;;  %v468_v25 = vand.u32 4294967280, %v2629_v55 }
 0x7e0   : > { %v1238_v34 = vpop.xlane.xlu1 %1237  ;;  %vm421_vm0 = vcmp.ge.s32.totalorder %v420_v14, 0 }
 0x7e1   : > { %v1239_v35 = vcvt.f32.s32 %v1238_v34  ;;  %v1428_v36 = vand.u32 15, %v1427_v33  ;;  %v1430_v37 = vand.u32 4294967280, %v1427_v33  ;;  %vm1435_vm8 = vcmp.eq.s32.totalorder %v2604_v9, %v1427_v33 }
 0x7e2   : > { %v1436_v58 = vsel %vm1435_vm8, 2147483648, %v2604_v9  ;;  %vm469_vm3 = vcmp.ge.s32.totalorder %v468_v25, 0 }
 0x7e3   : > { %v2652_v56 = vadd.s32 %v1241_v1, %v1239_v35  ;;  %v1429_v38 = vsub.s32 15, %v1428_v36  ;;  %vm1431_vm9 = vcmp.ge.s32.totalorder %v1430_v37, 0  ;;  %v1432_v61 = vxor.u32 2147483647, %v1430_v37 }
 0x7e4   : > { %v1437_v39 = vsel %vm314_vm2, %v1436_v58, 2147483648  ;;  %v422_v1 = vxor.u32 2147483647, %v420_v14 }
 0x7e5   : > { %v1243_v41 = vand.u32 15, %v2652_v56  ;;  %v1439_v32 = vshra.s32 %v1437_v39, 16  ;;  %vm1250_vm10 = vcmp.eq.s32.totalorder %v2620_v21, %v2652_v56  ;;  %v1433_v43 = vsel %vm1431_vm9, %v1430_v37, %v1432_v61 }
 0x7e6   : > { %v1251_v45 = vsel %vm1250_vm10, 2147483648, %v2620_v21  ;;  %v2662_v47 = vsel %vm685_vm5, %v2611_v15, %v1429_v38  ;;  %v2671_v29 = vsel %vm685_vm5, %v2617_v44, %v1433_v43  ;;  %v476_v21 = vand.u32 65535, %v475_v42 }
 0x7e7   : > { %v1244_v48 = vsub.s32 15, %v1243_v41  ;;  %v1441_v9 = vcvt.s32.f32 %v1439_v32  ;;  %v1252_v26 = vsel %vm314_vm2, %v1251_v45, 2147483648  ;;  %v446_v37 = vxor.u32 2147483647, %v444_v19 }
 0x7e8   : > { %v1254_v51 = vshra.s32 %v1252_v26, 16  ;;  %v478_v15 = vcvt.s32.f32 %v476_v21  ;;  %v1253_v3 = vand.u32 65535, %v1252_v26  ;;  %v423_v61 = vsel %vm421_vm0, %v420_v14, %v422_v1 }
 0x7e9   : > { %1442 = vmax.xlane.f32.xlu0 %v1441_v9  ;;  %v2667_v40 = vsel %vm685_vm5, %v2625_v27, %v1244_v48  ;;  %v1438_v27 = vand.u32 65535, %v1437_v39  ;;  %v1197_v39 = vand.u32 4294967280, %v2554_v54  ;;  %v447_v41 = vsel %vm445_vm4, %v444_v19, %v446_v37 }
 0x7ea   : > { %v1256_v52 = vcvt.s32.f32 %v1254_v51  ;;  %v1255_v42 = vcvt.s32.f32 %v1253_v3  ;;  %v1245_v54 = vand.u32 4294967280, %v2652_v56 }
 0x7eb   : > { %v1440_v5 = vcvt.s32.f32 %v1438_v27  ;;  %vm1198_vm7 = vcmp.ge.s32.totalorder %v1197_v39, 0 }
 0x7ec   : > { %1257 = vmax.xlane.f32.xlu1 %v1256_v52  ;;  %vm1246_vm8 = vcmp.ge.s32.totalorder %v1245_v54, 0 }
 0x846   : > { %v481_v49 = vpop.xlane.xlu1 %480 }
 0x847   : > { %vm482_vm11 = vcmp.eq.f32.partialorder %v479_v2, %v481_v49  ;;  %v487_v2 = vcvt.f32.s32 %v481_v49 }
 0x848   : > { %v483_v53 = vsel %vm482_vm11, %v478_v15, -inf  ;;  %v1221_v15 = vand.u32 4294967280, %v2606_v11 }
 0x849   : > { %484 = vmax.xlane.f32.xlu1 %v483_v53  ;;  %v488_v8 = vshll.u32 %v487_v2, 16 }
 0x84a   : > { %v1223_v11 = vxor.u32 2147483647, %v1221_v15  ;;  %vm1222_vm9 = vcmp.ge.s32.totalorder %v1221_v15, 0 }
 0x86c   : > { %v667_v59 = vpop.xlane.xlu0 %666 }
 0x86d   : > { %vm668_vm12 = vcmp.eq.f32.partialorder %v665_v17, %v667_v59  ;;  %v673_v13 = vcvt.f32.s32 %v667_v59  ;;  %v1199_v59 = vxor.u32 2147483647, %v1197_v39 }
 0x86e   : > { %v669_v62 = vsel %vm668_vm12, %v664_v60, -inf  ;;  %vm711_vm12 = vcmask 31744  }
 0x86f   : > { %670 = vmax.xlane.f32.xlu0 %v669_v62  ;;  %v674_v24 = vshll.u32 %v673_v13, 16 }
 0x876   : > { %v1443_v4 = vpop.xlane.xlu0 %1442 }
 0x877   : > { %vm1444_vm13 = vcmp.eq.f32.partialorder %v1441_v9, %v1443_v4  ;;  %v1449_v20 = vcvt.f32.s32 %v1443_v4  ;;  %v1247_v4 = vxor.u32 2147483647, %v1245_v54 }
 0x878   : > { %v1445_v44 = vsel %vm1444_vm13, %v1440_v5, -inf  ;;  %vm713_vm13 = vcmask 64512  }
 0x879   : > { %1446 = vmax.xlane.f32.xlu0 %v1445_v44  ;;  %v1258_v6 = vpop.xlane.xlu1 %1257  ;;  %v1450_v53 = vshll.u32 %v1449_v20, 16 }
 0x87a   : > { %vm1259_vm14 = vcmp.eq.f32.partialorder %v1256_v52, %v1258_v6  ;;  %v1264_v43 = vcvt.f32.s32 %v1258_v6 }
 0x87b   : > { %v1260_v7 = vsel %vm1259_vm14, %v1255_v42, -inf  ;;  %vm715_vm14 = vcmask 97280  }
 0x87c   : > { %1261 = vmax.xlane.f32.xlu1 %v1260_v7  ;;  %v1265_v60 = vshll.u32 %v1264_v43, 16  ;;  %v1200_v7 = vsel %vm1198_vm7, %v1197_v39, %v1199_v59 }
 0x8d6   : > { %v485_v0 = vpop.xlane.xlu1 %484 }
 0x8d7   : > { %v486_v22 = vcvt.f32.s32 %v485_v0 }
 0x8d9   : > { %v489_v10 = vadd.s32 %v488_v8, %v486_v22  ;;  %v1248_v8 = vsel %vm1246_vm8, %v1245_v54, %v1247_v4  ;;  %v1224_v22 = vsel %vm1222_vm9, %v1221_v15, %v1223_v11 }
 0x8db   : > { %v490_v50 = vand.u32 15, %v489_v10  ;;  %v492_v33 = vand.u32 4294967280, %v489_v10 }
 0x8dd   : > { %v491_v12 = vsub.s32 15, %v490_v50  ;;  %v494_v58 = vxor.u32 2147483647, %v492_v33  ;;  %vm493_vm6 = vcmp.ge.s32.totalorder %v492_v33, 0 }
 0x8df   : > { %v2675_v28 = vsel %vm687_vm15, %v2638_v63, %v491_v12  ;;  %v470_v63 = vxor.u32 2147483647, %v468_v25  ;;  %v495_v9 = vsel %vm493_vm6, %v492_v33, %v494_v58 }
 0x8e1   : > { %v471_v45 = vsel %vm469_vm3, %v468_v25, %v470_v63 }
 0x8fc   : > { %v671_v17 = vpop.xlane.xlu0 %670 }
 0x8fd   : > { %v672_v46 = vcvt.f32.s32 %v671_v17 }
 0x8ff   : > { %v675_v34 = vadd.s32 %v674_v24, %v672_v46 }
 0x901   : > { %v676_v35 = vand.u32 15, %v675_v34  ;;  %v678_v36 = vand.u32 4294967280, %v675_v34 }
 0x903   : > { %v677_v38 = vsub.s32 15, %v676_v35  ;;  %vm679_vm5 = vcmp.ge.s32.totalorder %v678_v36, 0  ;;  %v680_v30 = vxor.u32 2147483647, %v678_v36 }
 0x905   : > { %v681_v55 = vsel %vm679_vm5, %v678_v36, %v680_v30  ;;  %v2683_v32 = vsel %vm687_vm15, %v2645_v16, %v677_v38 }
 0x906   : > { %v688_v48 = vsel %vm687_vm15, %v2649_v18, %v681_v55  ;;  %v1447_v26 = vpop.xlane.xlu0 %1446 }
 0x907   : > { %v697_v51 = vadd.f32 %v688_v48, %v471_v45  ;;  %v696_v52 = vadd.f32 %v688_v48, %v447_v41  ;;  %v698_v21 = vadd.f32 %v688_v48, %v495_v9  ;;  %v695_v49 = vadd.f32 %v688_v48, %v423_v61 }
 0x908   : > { %v1448_v57 = vcvt.f32.s32 %v1447_v26 }
 0x909   : > { %704 = vrot.lane.b32.xlu1 %v697_v51, %s2328_s26  ;;  %700 = vrot.lane.b32.xlu0 %v696_v52, %s2329_s28  ;;  %v1262_v18 = vpop.xlane.xlu1 %1261 }
 0x90a   : > { %v1451_v16 = vadd.s32 %v1450_v53, %v1448_v57  ;;  %v1263_v62 = vcvt.f32.s32 %v1262_v18 }
 0x90c   : > { %v1452_v27 = vand.u32 15, %v1451_v16  ;;  %v1454_v3 = vand.u32 4294967280, %v1451_v16  ;;  %v1266_v5 = vadd.s32 %v1265_v60, %v1263_v62 }
 0x90d   : > { %708 = vrot.lane.b32.xlu1 %v698_v21, %s2330_s29 }
 0x90e   : > { %v1453_v56 = vsub.s32 15, %v1452_v27  ;;  %vm1455_vm10 = vcmp.ge.s32.totalorder %v1454_v3, 0  ;;  %v1456_v44 = vxor.u32 2147483647, %v1454_v3  ;;  %v1267_v6 = vand.u32 15, %v1266_v5 }
 0x90f   : > { %v1269_v42 = vand.u32 4294967280, %v1266_v5 }
 0x910   : > { %v1457_v2 = vsel %vm1455_vm10, %v1454_v3, %v1456_v44  ;;  %v2693_v0 = vsel %vm687_vm15, %v2662_v47, %v1453_v56  ;;  %v1268_v10 = vsub.s32 15, %v1267_v6 }
 0x911   : > { %v1271_v50 = vxor.u32 2147483647, %v1269_v42  ;;  %v1461_v12 = vsel %vm687_vm15, %v2671_v29, %v1457_v2  ;;  %vm1270_vm11 = vcmp.ge.s32.totalorder %v1269_v42, 0 }
 0x912   : > { %v1470_v13 = vadd.f32 %v1461_v12, %v1248_v8  ;;  %v1469_v14 = vadd.f32 %v1461_v12, %v1224_v22  ;;  %v1468_v17 = vadd.f32 %v1461_v12, %v1200_v7  ;;  %v2699_v19 = vsel %vm687_vm15, %v2667_v40, %v1268_v10 }
 0x913   : > { %v1272_v24 = vsel %vm1270_vm11, %v1269_v42, %v1271_v50  ;;  %v2716_v22 = vmul.u32 4, %v2504_v23 }
 0x914   : > { %1477 = vrot.lane.b32.xlu1 %v1470_v13, %s2328_s26  ;;  %1473 = vrot.lane.b32.xlu0 %v1469_v14, %s2329_s28  ;;  %v1471_v47 = vadd.f32 %v1461_v12, %v1272_v24  ;;  %s1961_s26 = scalar_lea.sflag [#allocation3], %s240_s13  ;;  %s2256_s28 = scalar_lea.vmem %s3413_s17, 128 }
 0x915   : > { %v2722_v14 = vadd.s32 4, %v2716_v22  ;;  %p2257_p11 = scmp.ne.s32.totalorder %s3413_s17, %s2256_s28 }
 0x917   : > { %p2258_p12 = pnand %p2257_p11, %p2405_p5 }
 0x918   : > { %1481 = vrot.lane.b32.xlu0 %v1471_v47, %s2330_s29  ;;  %s2260_s29 = sshll.u32 %s2331_s25, 4  ;;  %s2261_s29 = int_to_ptr.vmem [resolvable:$false] %s2260_s29 }
 0x919   : > { %p2259_p13 = pneg %p2258_p12  ;;  %s2262_s9 = scalar_lea.vmem %s2261_s29, 256 }
 0x91a   : > { %p2263_p0 = scmp.lt.s32.totalorder %s3413_s17, %s2261_s29  ;;  %p2264_p1 = scmp.lt.s32.totalorder %s2262_s9, %s2256_s28 }
 0x91c   : > { %p2265_p2 = por %p2264_p1, %p2263_p0 }
 0x91e   : > { %p2266_p3 = pnand %p2265_p2, %p2259_p13 }
 0x97b   : > { %v705_v46 = vpop.permute.xlu1 %704  ;;  %v701_v25 = vpop.permute.xlu0 %700 }
 0x97c   : > { %v712_v29 = vsel %vm711_vm12, %v695_v49, %v701_v25 }
 0x97d   : > { %v714_v34 = vsel %vm713_vm13, %v712_v29, %v705_v46 }
 0x97f   : > { %v709_v33 = vpop.permute.xlu1 %708 }
 0x980   : > { %v716_v1 = vsel %vm715_vm14, %v714_v34, %v709_v33 }
 0x981   : > { %vm718_vm15 = vcmp.ge.s32.totalorder %v716_v1, 0  ;;  %v719_v40 = vxor.u32 2147483647, %v716_v1 }
 0x983   : > { %v720_v35 = vsel %vm718_vm15, %v716_v1, %v719_v40 }
 0x984   : > { %v721_v36 = vadd.s32 8, %v720_v35 }
 0x986   : > { %v722_v37 = vand.u32 4294967280, %v721_v36  ;;  %v1474_v58 = vpop.permute.xlu0 %1473  ;;  %v1478_v63 = vpop.permute.xlu1 %1477 }
 0x987   : > { %v1484_v38 = vsel %vm711_vm12, %v1468_v17, %v1474_v58 }
 0x988   : > { %v723_v30 = vor.u32 %v722_v37, %v2507_v31  ;;  %v1485_v20 = vsel %vm713_vm13, %v1484_v38, %v1478_v63 }
 0x98a   : > { %v1482_v61 = vpop.permute.xlu0 %1481  ;;  %v724_v39 = vsel %vm314_vm2, %v723_v30, 2147483648 }
 0x98b   : > { %v1486_v55 = vsel %vm715_vm14, %v1485_v20, %v1482_v61  ;;  %v726_v41 = vshra.s32 %v724_v39, 16  ;;  %v725_v15 = vand.u32 65535, %v724_v39 }
 0x98c   : > { %vm1488_vm0 = vcmp.ge.s32.totalorder %v1486_v55, 0  ;;  %v1489_v43 = vxor.u32 2147483647, %v1486_v55 }
 0x98d   : > { %v728_v45 = vcvt.s32.f32 %v726_v41  ;;  %v727_v53 = vcvt.s32.f32 %v725_v15 }
 0x98e   : > { %v1490_v48 = vsel %vm1488_vm0, %v1486_v55, %v1489_v43 }
 0x98f   : > { %v1491_v9 = vadd.s32 8, %v1490_v48  ;;  %729 = vmax.xlane.f32.xlu1 %v728_v45 }
 0x991   : > { %v1492_v26 = vand.u32 4294967280, %v1491_v9 }
 0x993   : > { %v1493_v51 = vor.u32 %v1492_v26, %v2507_v31 }
 0x995   : > { %v1494_v52 = vsel %vm314_vm2, %v1493_v51, 2147483648 }
 0x996   : > { %v1496_v21 = vshra.s32 %v1494_v52, 16  ;;  %v1495_v16 = vand.u32 65535, %v1494_v52 }
 0x998   : > { %v1498_v49 = vcvt.s32.f32 %v1496_v21  ;;  %v1497_v59 = vcvt.s32.f32 %v1495_v16 }
 0x99a   : > { %1499 = vmax.xlane.f32.xlu0 %v1498_v49 }
 0xa1c   : > { %v730_v54 = vpop.xlane.xlu1 %729 }
 0xa1d   : > { %vm731_vm3 = vcmp.eq.f32.partialorder %v728_v45, %v730_v54  ;;  %v736_v62 = vcvt.f32.s32 %v730_v54 }
 0xa1e   : > { %v732_v57 = vsel %vm731_vm3, %v727_v53, -inf }
 0xa1f   : > { %733 = vmax.xlane.f32.xlu0 %v732_v57  ;;  %v737_v31 = vshll.u32 %v736_v62, 16 }
 0xa27   : > { %v1500_v18 = vpop.xlane.xlu0 %1499 }
 0xa28   : > { %vm1501_vm4 = vcmp.eq.f32.partialorder %v1498_v49, %v1500_v18  ;;  %v1506_v56 = vcvt.f32.s32 %v1500_v18 }
 0xa29   : > { %v1502_v60 = vsel %vm1501_vm4, %v1497_v59, -inf }
 0xa2a   : > { %1503 = vmax.xlane.f32.xlu1 %v1502_v60  ;;  %v1507_v7 = vshll.u32 %v1506_v56, 16 }
 0xaac   : > { %v734_v27 = vpop.xlane.xlu0 %733 }
 0xaad   : > { %v735_v3 = vcvt.f32.s32 %v734_v27 }
 0xaaf   : > { %v2711_v4 = vadd.s32 %v737_v31, %v735_v3 }
 0xab1   : > { %vm746_vm5 = vcmp.eq.s32.totalorder %v723_v30, %v2711_v4  ;;  %v741_v37 = vand.u32 4294967280, %v2711_v4 }
 0xab2   : > { %v747_v11 = vsel %vm746_vm5, 2147483648, %v723_v30 }
 0xab3   : > { %v748_v5 = vsel %vm314_vm2, %v747_v11, 2147483648  ;;  %v743_v63 = vxor.u32 2147483647, %v741_v37  ;;  %vm742_vm13 = vcmp.ge.s32.totalorder %v741_v37, 0 }
 0xab4   : > { %v750_v44 = vshra.s32 %v748_v5, 16  ;;  %v749_v25 = vand.u32 65535, %v748_v5 }
 0xab5   : > { %v2736_v61 = vsel %vm742_vm13, %v741_v37, %v743_v63 }
 0xab6   : > { %v752_v6 = vcvt.s32.f32 %v750_v44  ;;  %v751_v33 = vcvt.s32.f32 %v749_v25  ;;  %v818_v55 = vsub.f32 %v2736_v61, %v2736_v61 }
 0xab7   : > { %v1504_v42 = vpop.xlane.xlu1 %1503 }
 0xab8   : > { %v1505_v2 = vcvt.f32.s32 %v1504_v42  ;;  %753 = vmax.xlane.f32.xlu0 %v752_v6  ;;  %v819_v52 = vmul.f32 1.442695, %v818_v55 }
 0xaba   : > { %v1508_v8 = vadd.s32 %v1507_v7, %v1505_v2  ;;  %2236 = vpow2.f32 %v819_v52 }
 0xabc   : > { %v1509_v10 = vand.u32 15, %v1508_v8  ;;  %vm1516_vm6 = vcmp.eq.s32.totalorder %v1493_v51, %v1508_v8  ;;  %v1511_v41 = vand.u32 4294967280, %v1508_v8 }
 0xabd   : > { %v1517_v50 = vsel %vm1516_vm6, 2147483648, %v1493_v51 }
 0xabe   : > { %v2718_v12 = vsub.s32 15, %v1509_v10  ;;  %v1518_v13 = vsel %vm314_vm2, %v1517_v50, 2147483648  ;;  %v1513_v21 = vxor.u32 2147483647, %v1511_v41  ;;  %vm1512_vm0 = vcmp.ge.s32.totalorder %v1511_v41, 0 }
 0xabf   : > { %v1520_v17 = vshra.s32 %v1518_v13, 16  ;;  %v1519_v1 = vand.u32 65535, %v1518_v13 }
 0xac0   : > { %vm1605_vm7 = vcmp.ge.s32.totalorder %v2718_v12, %v2716_v22  ;;  %vm1606_vm8 = vcmp.lt.s32.totalorder %v2718_v12, %v2722_v14  ;;  %v2749_v59 = vsel %vm1512_vm0, %v1511_v41, %v1513_v21 }
 0xac1   : > { %v1522_v24 = vcvt.s32.f32 %v1520_v17  ;;  %vm2728_vm9 = vmand %vm1605_vm7, %vm1606_vm8  ;;  %v1521_v35 = vcvt.s32.f32 %v1519_v1  ;;  %v1588_v62 = vsub.f32 %v2749_v59, %v2749_v59 }
 0xac2   : > { %v1608_v46 = vsel %vm2728_vm9, %v2699_v19, 0 }
 0xac3   : > { %1523 = vmax.xlane.f32.xlu1 %v1522_v24 }
 0xb45   : > { %v754_v29 = vpop.xlane.xlu0 %753 }
 0xb46   : > { %vm755_vm10 = vcmp.eq.f32.partialorder %v752_v6, %v754_v29  ;;  %v760_v58 = vcvt.f32.s32 %v754_v29  ;;  %v1589_v6 = vmul.f32 1.442695, %v1588_v62 }
 0xb47   : > { %v756_v34 = vsel %vm755_vm10, %v751_v33, -inf }
 0xb48   : > { %757 = vmax.xlane.f32.xlu0 %v756_v34  ;;  %v761_v30 = vshll.u32 %v760_v58, 16 }
 0xb50   : > { %v1524_v40 = vpop.xlane.xlu1 %1523 }
 0xb51   : > { %vm1525_vm11 = vcmp.eq.f32.partialorder %v1522_v24, %v1524_v40  ;;  %v1530_v26 = vcvt.f32.s32 %v1524_v40 }
 0xb52   : > { %v1526_v36 = vsel %vm1525_vm11, %v1521_v35, -inf }
 0xb53   : > { %1527 = vmax.xlane.f32.xlu1 %v1526_v36  ;;  %v1531_v57 = vshll.u32 %v1530_v26, 16 }
 0xbd5   : > { %v758_v38 = vpop.xlane.xlu0 %757 }
 0xbd6   : > { %v759_v20 = vcvt.f32.s32 %v758_v38 }
 0xbd8   : > { %v2738_v39 = vadd.s32 %v761_v30, %v759_v20 }
 0xbda   : > { %v765_v43 = vand.u32 4294967280, %v2738_v39  ;;  %vm770_vm14 = vcmp.eq.s32.totalorder %v747_v11, %v2738_v39 }
 0xbdb   : > { %v2744_v45 = vsel %vm770_vm14, 2147483648, %v747_v11 }
 0xbdc   : > { %vm766_vm15 = vcmp.ge.s32.totalorder %v765_v43, 0  ;;  %v767_v48 = vxor.u32 2147483647, %v765_v43  ;;  %v772_v9 = vsel %vm314_vm2, %v2744_v45, 2147483648 }
 0xbdd   : > { %v774_v51 = vshra.s32 %v772_v9, 16  ;;  %v773_v34 = vand.u32 65535, %v772_v9 }
 0xbde   : > { %v768_v49 = vsel %vm766_vm15, %v765_v43, %v767_v48 }
 0xbdf   : > { %v821_v15 = vsub.f32 %v768_v49, %v2736_v61  ;;  %v776_v54 = vcvt.s32.f32 %v774_v51  ;;  %v775_v40 = vcvt.s32.f32 %v773_v34 }
 0xbe0   : > { %v1528_v53 = vpop.xlane.xlu1 %1527 }
 0xbe1   : > { %v822_v16 = vmul.f32 1.442695, %v821_v15  ;;  %v1529_v18 = vcvt.f32.s32 %v1528_v53  ;;  %777 = vmax.xlane.f32.xlu0 %v776_v54 }
 0xbe3   : > { %2238 = vpow2.f32 %v822_v16  ;;  %v1532_v60 = vadd.s32 %v1531_v57, %v1529_v18 }
 0xbe4   : > { %2240 = vpow2.f32 %v1589_v6 }
 0xbe5   : > { %v1533_v27 = vand.u32 15, %v1532_v60  ;;  %v1535_v31 = vand.u32 4294967280, %v1532_v60  ;;  %vm1540_vm3 = vcmp.eq.s32.totalorder %v1517_v50, %v1532_v60 }
 0xbe6   : > { %v1541_v3 = vsel %vm1540_vm3, 2147483648, %v1517_v50  ;;  %v2768_v50 = vpop.eup %2236 }
 0xbe7   : > { %v2753_v11 = vsub.s32 15, %v1533_v27  ;;  %vm1536_vm4 = vcmp.ge.s32.totalorder %v1535_v31, 0  ;;  %v1537_v5 = vxor.u32 2147483647, %v1535_v31  ;;  %v1542_v56 = vsel %vm314_vm2, %v1541_v3, 2147483648 }
 0xbe8   : > { %v1544_v44 = vshra.s32 %v1542_v56, 16  ;;  %v1543_v36 = vand.u32 65535, %v1542_v56 }
 0xbe9   : > { %v1538_v42 = vsel %vm1536_vm4, %v1535_v31, %v1537_v5  ;;  %vm1668_vm5 = vcmp.ge.s32.totalorder %v2753_v11, %v2716_v22  ;;  %vm1669_vm6 = vcmp.lt.s32.totalorder %v2753_v11, %v2722_v14 }
 0xbea   : > { %v1591_v7 = vsub.f32 %v1538_v42, %v2749_v59  ;;  %v1546_v2 = vcvt.s32.f32 %v1544_v44  ;;  %vm2761_vm7 = vmand %vm1668_vm5, %vm1669_vm6  ;;  %v1545_v58 = vcvt.s32.f32 %v1543_v36 }
 0xbeb   : > { %v1671_v10 = vsel %vm2761_vm7, %v2699_v19, 0 }
 0xbec   : > { %v1592_v13 = vmul.f32 1.442695, %v1591_v7  ;;  %1547 = vmax.xlane.f32.xlu1 %v1546_v2 }
 0xbed   : > { %v2770_v17 = vpop.eup %2238 }
 0xbee   : > { %v830_v24 = vadd.f32 %v2770_v17, %v2768_v50  ;;  %2242 = vpow2.f32 %v1592_v13  ;;  %v2774_v25 = vpop.eup %2240 }
 0xbf8   : > { %v2776_v29 = vpop.eup %2242 }
 0xbf9   : > { %v1600_v33 = vadd.f32 %v2776_v29, %v2774_v25 }
 0xc6e   : > { %v778_v1 = vpop.xlane.xlu0 %777 }
 0xc6f   : > { %vm779_vm8 = vcmp.eq.f32.partialorder %v776_v54, %v778_v1  ;;  %v784_v38 = vcvt.f32.s32 %v778_v1 }
 0xc70   : > { %v780_v35 = vsel %vm779_vm8, %v775_v40, -inf }
 0xc71   : > { %781 = vmax.xlane.f32.xlu0 %v780_v35  ;;  %v785_v20 = vshll.u32 %v784_v38, 16  ;;  %v739_v35 = vand.u32 15, %v2711_v4 }
 0xc73   : > { %v2810_v36 = vsub.s32 15, %v739_v35 }
 0xc75   : > { %vm838_vm5 = vcmp.lt.s32.totalorder %v2810_v36, %v2722_v14 }
 0xc79   : > { %v1548_v37 = vpop.xlane.xlu1 %1547 }
 0xc7a   : > { %vm1549_vm10 = vcmp.eq.f32.partialorder %v1546_v2, %v1548_v37  ;;  %v1554_v51 = vcvt.f32.s32 %v1548_v37 }
 0xc7b   : > { %v1550_v63 = vsel %vm1549_vm10, %v1545_v58, -inf }
 0xc7c   : > { %1551 = vmax.xlane.f32.xlu1 %v1550_v63  ;;  %v1555_v53 = vshll.u32 %v1554_v51, 16  ;;  %v1624_v51 = vsel %vm2728_vm9, %v2504_v23, 0 }
 0xcfe   : > { %v782_v30 = vpop.xlane.xlu0 %781 }
 0xcff   : > { %v783_v55 = vcvt.f32.s32 %v782_v30 }
 0xd01   : > { %v786_v41 = vadd.s32 %v785_v20, %v783_v55 }
 0xd03   : > { %v789_v43 = vand.u32 4294967280, %v786_v41  ;;  %vm794_vm11 = vcmp.eq.s32.totalorder %v2744_v45, %v786_v41  ;;  %v787_v37 = vand.u32 15, %v786_v41 }
 0xd04   : > { %v795_v48 = vsel %vm794_vm11, 2147483648, %v2744_v45 }
 0xd05   : > { %vm790_vm13 = vcmp.ge.s32.totalorder %v789_v43, 0  ;;  %v791_v9 = vxor.u32 2147483647, %v789_v43  ;;  %v796_v26 = vsel %vm314_vm2, %v795_v48, 2147483648  ;;  %v2812_v58 = vsub.s32 15, %v787_v37 }
 0xd06   : > { %v798_v52 = vshra.s32 %v796_v26, 16  ;;  %v797_v38 = vand.u32 65535, %v796_v26  ;;  %v3029_v26 = vsel %vm711_vm12, %v1608_v46, 2147483648 }
 0xd07   : > { %v792_v21 = vsel %vm790_vm13, %v789_v43, %v791_v9  ;;  %vm963_vm8 = vcmp.ge.s32.totalorder %v2812_v58, %v2716_v22  ;;  %vm964_vm10 = vcmp.lt.s32.totalorder %v2812_v58, %v2722_v14 }
 0xd08   : > { %v824_v49 = vsub.f32 %v792_v21, %v2736_v61  ;;  %v800_v15 = vcvt.s32.f32 %v798_v52  ;;  %vm2832_vm11 = vmand %vm963_vm8, %vm964_vm10  ;;  %v799_v41 = vcvt.s32.f32 %v797_v38 }
 0xd09   : > { %v1552_v54 = vpop.xlane.xlu1 %1551  ;;  %v982_v20 = vsel %vm2832_vm11, %v2504_v23, 0 }
 0xd0a   : > { %v825_v57 = vmul.f32 1.442695, %v824_v49  ;;  %v1553_v16 = vcvt.f32.s32 %v1552_v54  ;;  %801 = vmax.xlane.f32.xlu0 %v800_v15  ;;  %v983_v9 = vsel %vm711_vm12, %v982_v20, 2147483648 }
 0xd0b   : > { %v985_v21 = vshra.s32 %v983_v9, 16 }
 0xd0c   : > { %2244 = vpow2.f32 %v825_v57  ;;  %v1556_v18 = vadd.s32 %v1555_v53, %v1553_v16 }
 0xd0d   : > { %v987_v57 = vcvt.s32.f32 %v985_v21 }
 0xd0e   : > { %v1557_v60 = vand.u32 15, %v1556_v18  ;;  %v1559_v62 = vand.u32 4294967280, %v1556_v18  ;;  %vm1564_vm14 = vcmp.eq.s32.totalorder %v1541_v3, %v1556_v18 }
 0xd0f   : > { %v1565_v45 = vsel %vm1564_vm14, 2147483648, %v1541_v3 }
 0xd10   : > { %v2784_v27 = vsub.s32 15, %v1557_v60  ;;  %vm1560_vm15 = vcmp.ge.s32.totalorder %v1559_v62, 0  ;;  %v1561_v31 = vxor.u32 2147483647, %v1559_v62  ;;  %v1566_v5 = vsel %vm314_vm2, %v1565_v45, 2147483648 }
 0xd11   : > { %v1568_v56 = vshra.s32 %v1566_v5, 16  ;;  %vm836_vm2 = vcmp.ge.s32.totalorder %v2810_v36, %v2716_v22  ;;  %v1567_v54 = vand.u32 65535, %v1566_v5 }
 0xd12   : > { %v1562_v44 = vsel %vm1560_vm15, %v1559_v62, %v1561_v31  ;;  %vm1731_vm0 = vcmp.ge.s32.totalorder %v2784_v27, %v2716_v22  ;;  %vm1732_vm3 = vcmp.lt.s32.totalorder %v2784_v27, %v2722_v14  ;;  %vm2819_vm6 = vmand %vm836_vm2, %vm838_vm5 }
 0xd13   : > { %v1594_v6 = vsub.f32 %v1562_v44, %v2749_v59  ;;  %v1570_v42 = vcvt.s32.f32 %v1568_v56  ;;  %vm2792_vm4 = vmand %vm1731_vm0, %vm1732_vm3  ;;  %v856_v4 = vsel %vm2819_vm6, %v2504_v23, 0  ;;  %v1569_v45 = vcvt.s32.f32 %v1567_v54 }
 0xd14   : > { %v1734_v3 = vsel %vm2792_vm4, %v2699_v19, 0  ;;  %v1750_v53 = vsel %vm2792_vm4, %v2504_v23, 0 }
 0xd15   : > { %v1595_v2 = vmul.f32 1.442695, %v1594_v6  ;;  %1571 = vmax.xlane.f32.xlu1 %v1570_v42  ;;  %v2863_v60 = vsel %vm711_vm12, %v1750_v53, 2147483648 }
 0xd16   : > { %v2799_v13 = vpop.eup %2244  ;;  %v1753_v44 = vshra.s32 %v2863_v60, 16 }
 0xd17   : > { %2246 = vpow2.f32 %v1595_v2  ;;  %v2802_v34 = vadd.f32 %v2799_v13, %v830_v24  ;;  %v763_v24 = vand.u32 15, %v2738_v39  ;;  %v857_v39 = vsel %vm711_vm12, %v856_v4, 2147483648 }
 0xd18   : > { %v859_v43 = vshra.s32 %v857_v39, 16  ;;  %v2869_v2 = vcvt.s32.f32 %v1753_v44 }
 0xd1a   : > { %v861_v52 = vcvt.s32.f32 %v859_v43  ;;  %v984_v43 = vand.u32 65535, %v983_v9 }
 0xd21   : > { %v2804_v1 = vpop.eup %2246 }
 0xd22   : > { %v2807_v40 = vadd.f32 %v2804_v1, %v1600_v33  ;;  %v2830_v33 = vsub.s32 15, %v763_v24  ;;  %v858_v24 = vand.u32 65535, %v857_v39 }
 0xd24   : > { %vm900_vm13 = vcmp.ge.s32.totalorder %v2830_v33, %v2716_v22  ;;  %vm901_vm14 = vcmp.lt.s32.totalorder %v2830_v33, %v2722_v14 }
 0xd25   : > { %vm2845_vm0 = vmand %vm900_vm13, %vm901_vm14 }
 0xd26   : > { %v919_v49 = vsel %vm2845_vm0, %v2504_v23, 0 }
 0xd27   : > { %v2860_v16 = vsel %vm711_vm12, %v919_v49, 2147483648 }
 0xd28   : > { %v922_v31 = vshra.s32 %v2860_v16, 16 }
 0xd2a   : > { %v2867_v6 = vcvt.s32.f32 %v922_v31 }
 0xd97   : > { %v802_v55 = vpop.xlane.xlu0 %801 }
 0xd98   : > { %vm803_vm15 = vcmp.eq.f32.partialorder %v800_v15, %v802_v55  ;;  %v1625_v15 = vsel %vm711_vm12, %v1624_v51, 2147483648  ;;  %v808_v35 = vcvt.f32.s32 %v802_v55 }
 0xd99   : > { %v804_v48 = vsel %vm803_vm15, %v799_v41, -inf  ;;  %v1627_v18 = vshra.s32 %v1625_v15, 16  ;;  %v860_v41 = vcvt.s32.f32 %v858_v24  ;;  %v1626_v55 = vand.u32 65535, %v1625_v15 }
 0xd9a   : > { %805 = vmax.xlane.f32.xlu0 %v804_v48  ;;  %v1687_v15 = vsel %vm2761_vm7, %v2504_v23, 0 }
 0xd9b   : > { %v1629_v5 = vcvt.s32.f32 %v1627_v18  ;;  %v986_v18 = vcvt.s32.f32 %v984_v43  ;;  %v1628_v31 = vcvt.s32.f32 %v1626_v55 }
 0xd9e   : > { %862 = vmax.xlane.f32.xlu0 %v861_v52 }
 0xda2   : > { %v1572_v62 = vpop.xlane.xlu1 %1571  ;;  %988 = vmax.xlane.f32.xlu0 %v987_v57 }
 0xda3   : > { %vm1573_vm3 = vcmp.eq.f32.partialorder %v1570_v42, %v1572_v62  ;;  %v809_v42 = vshll.u32 %v808_v35, 16  ;;  %v1578_v53 = vcvt.f32.s32 %v1572_v62 }
 0xda4   : > { %v1574_v56 = vsel %vm1573_vm3, %v1569_v45, -inf }
 0xda5   : > { %1575 = vmax.xlane.f32.xlu1 %v1574_v56 }
 0xda6   : > { %1630 = vmax.xlane.f32.xlu0 %v1629_v5 }
 0xda9   : > { %925 = vmax.xlane.f32.xlu1 %v2867_v6 }
 0xdaa   : > { %1756 = vmax.xlane.f32.xlu0 %v2869_v2 }
 0xe27   : > { %v806_v37 = vpop.xlane.xlu0 %805 }
 0xe28   : > { %v807_v4 = vcvt.f32.s32 %v806_v37 }
 0xe2a   : > { %v810_v38 = vadd.s32 %v809_v42, %v807_v4  ;;  %v1752_v4 = vand.u32 65535, %v2863_v60 }
 0xe2b   : > { %v2873_v20 = vpop.xlane.xlu0 %862 }
 0xe2c   : > { %v811_v48 = vand.u32 15, %v810_v38  ;;  %v813_v51 = vand.u32 4294967280, %v810_v38  ;;  %vm864_vm2 = vcmp.eq.f32.partialorder %v861_v52, %v2873_v20  ;;  %v2907_v38 = vsel %vm711_vm12, %v1687_v15, 2147483648 }
 0xe2d   : > { %v865_v21 = vsel %vm864_vm2, %v860_v41, -inf  ;;  %v1690_v60 = vshra.s32 %v2907_v38, 16  ;;  %v1754_v55 = vcvt.s32.f32 %v1752_v4  ;;  %v921_v4 = vand.u32 65535, %v2860_v16 }
 0xe2e   : > { %v2876_v49 = vsub.s32 15, %v811_v48  ;;  %vm814_vm5 = vcmp.ge.s32.totalorder %v813_v51, 0  ;;  %v815_v54 = vxor.u32 2147483647, %v813_v51  ;;  %866 = vmax.xlane.f32.xlu0 %v865_v21 }
 0xe2f   : > { %v2878_v39 = vpop.xlane.xlu0 %988  ;;  %v2924_v15 = vcvt.s32.f32 %v1690_v60 }
 0xe30   : > { %v816_v45 = vsel %vm814_vm5, %v813_v51, %v815_v54  ;;  %vm990_vm8 = vcmp.eq.f32.partialorder %v987_v57, %v2878_v39  ;;  %vm1026_vm10 = vcmp.ge.s32.totalorder %v2876_v49, %v2716_v22  ;;  %vm1027_vm13 = vcmp.lt.s32.totalorder %v2876_v49, %v2722_v14 }
 0xe31   : > { %v827_v9 = vsub.f32 %v816_v45, %v2736_v61  ;;  %v991_v52 = vsel %vm990_vm8, %v986_v18, -inf  ;;  %vm2889_vm14 = vmand %vm1026_vm10, %vm1027_vm13  ;;  %v840_v57 = vsel %vm2819_vm6, %v2675_v28, 0  ;;  %v1579_v61 = vshll.u32 %v1578_v53, 16 }
 0xe32   : > { %v1576_v62 = vpop.xlane.xlu1 %1575  ;;  %992 = vmax.xlane.f32.xlu0 %v991_v52  ;;  %v1045_v24 = vsel %vm2889_vm14, %v2504_v23, 0  ;;  %v2911_v48 = vsel %vm711_vm12, %v840_v57, 2147483648  ;;  %v1029_v30 = vsel %vm2889_vm14, %v2675_v28, 0 }
 0xe33   : > { %v828_v44 = vmul.f32 1.442695, %v827_v9  ;;  %v1577_v35 = vcvt.f32.s32 %v1576_v62  ;;  %v2896_v37 = vpop.xlane.xlu0 %1630  ;;  %v2903_v42 = vsel %vm711_vm12, %v1045_v24, 2147483648  ;;  %v843_v45 = vshra.s32 %v2911_v48, 16 }
 0xe34   : > { %vm1632_vm15 = vcmp.eq.f32.partialorder %v1629_v5, %v2896_v37  ;;  %v1048_v43 = vshra.s32 %v2903_v42, 16 }
 0xe35   : > { %2248 = vpow2.f32 %v828_v44  ;;  %v1580_v63 = vadd.s32 %v1579_v61, %v1577_v35  ;;  %v1633_v41 = vsel %vm1632_vm15, %v1628_v31, -inf  ;;  %v2936_v31 = vcvt.s32.f32 %v843_v45 }
 0xe36   : > { %1634 = vmax.xlane.f32.xlu0 %v1633_v41  ;;  %v2915_v54 = vcvt.s32.f32 %v1048_v43  ;;  %v2950_v24 = vpop.xlane.xlu1 %925  ;;  %v923_v41 = vcvt.s32.f32 %v921_v4 }
 0xe37   : > { %v1581_v51 = vand.u32 15, %v1580_v63  ;;  %v1583_v21 = vand.u32 4294967280, %v1580_v63  ;;  %v2913_v5 = vpop.xlane.xlu0 %1756  ;;  %vm927_vm10 = vcmp.eq.f32.partialorder %v2867_v6, %v2950_v24 }
 0xe38   : > { %vm1758_vm6 = vcmp.eq.f32.partialorder %v2869_v2, %v2913_v5  ;;  %1051 = vmax.xlane.f32.xlu1 %v2915_v54  ;;  %v928_v43 = vsel %vm927_vm10, %v923_v41, -inf  ;;  %v1689_v41 = vand.u32 65535, %v2907_v38 }
 0xe39   : > { %v2920_v53 = vsub.s32 15, %v1581_v51  ;;  %vm1584_vm3 = vcmp.ge.s32.totalorder %v1583_v21, 0  ;;  %v1585_v18 = vxor.u32 2147483647, %v1583_v21  ;;  %v1759_v9 = vsel %vm1758_vm6, %v1754_v55, -inf }
 0xe3a   : > { %1760 = vmax.xlane.f32.xlu0 %v1759_v9  ;;  %v1691_v56 = vcvt.s32.f32 %v1689_v41 }
 0xe3b   : > { %v1586_v52 = vsel %vm1584_vm3, %v1583_v21, %v1585_v18  ;;  %vm1794_vm2 = vcmp.ge.s32.totalorder %v2920_v53, %v2716_v22  ;;  %vm1795_vm5 = vcmp.lt.s32.totalorder %v2920_v53, %v2722_v14 }
 0xe3c   : > { %v1597_v2 = vsub.f32 %v1586_v52, %v2749_v59  ;;  %vm2931_vm8 = vmand %vm1794_vm2, %vm1795_vm5  ;;  %1693 = vmax.xlane.f32.xlu1 %v2924_v15 }
 0xe3d   : > { %v1797_v57 = vsel %vm2931_vm8, %v2699_v19, 0  ;;  %v1813_v22 = vsel %vm2931_vm8, %v2504_v23, 0 }
 0xe3e   : > { %v1598_v61 = vmul.f32 1.442695, %v1597_v2  ;;  %v2945_v14 = vsel %vm711_vm12, %v1813_v22, 2147483648  ;;  %846 = vmax.xlane.f32.xlu0 %v2936_v31 }
 0xe3f   : > { %v2249_v59 = vpop.eup %2248  ;;  %v1816_v44 = vshra.s32 %v2945_v14, 16 }
 0xe40   : > { %v832_v35 = vadd.f32 %v2249_v59, %v2802_v34  ;;  %2250 = vpow2.f32 %v1598_v61 }
 0xe41   : > { %v2953_v63 = vcvt.s32.f32 %v1816_v44 }
 0xe42   : > { %2252 = vrcp.f32 %v832_v35 }
 0xe43   : > { %1819 = vmax.xlane.f32.xlu1 %v2953_v63 }
 0xe47   : > { %929 = vmax.xlane.f32.xlu1 %v928_v43 }
 0xe4a   : > { %v2251_v51 = vpop.eup %2250 }
 0xe4b   : > { %v1602_v21 = vadd.f32 %v2251_v51, %v2807_v40 }
 0xe4c   : > { %v2253_v34 = vpop.eup %2252 }
 0xe4d   : > { %2254 = vrcp.f32 %v1602_v21  ;;  %v2960_v60 = vmul.f32 %v2253_v34, %v2768_v50  ;;  %v2963_v16 = vmul.f32 %v2253_v34, %v2770_v17  ;;  %v2966_v55 = vmul.f32 %v2253_v34, %v2799_v13 }
 0xe4e   : > { %v2968_v18 = vmul.f32 %v2253_v34, %v2249_v59  ;;  %v869_v17 = vcvt.f32.s32 %v2873_v20 }
 0xe50   : > { %v870_v2 = vshll.u32 %v869_v17, 16 }
 0xe57   : > { %v2255_v6 = vpop.eup %2254 }
 0xe58   : > { %v2971_v45 = vmul.f32 %v2255_v6, %v2774_v25  ;;  %v2974_v9 = vmul.f32 %v2255_v6, %v2776_v29  ;;  %v2977_v40 = vmul.f32 %v2255_v6, %v2804_v1  ;;  %v2979_v50 = vmul.f32 %v2255_v6, %v2251_v51 }
 0xe59   : > { %v1047_v25 = vand.u32 65535, %v2903_v42  ;;  %v966_v29 = vsel %vm2832_vm11, %v2675_v28, 0  ;;  %v995_v42 = vcvt.f32.s32 %v2878_v39  ;;  %v903_v39 = vsel %vm2845_vm0, %v2675_v28, 0 }
 0xe5a   : > { %v3022_v28 = vsel %vm711_vm12, %v903_v39, 2147483648 }
 0xe5b   : > { %v1049_v20 = vcvt.s32.f32 %v1047_v25  ;;  %v906_v46 = vshra.s32 %v3022_v28, 16 }
 0xebb   : > { %v867_v52 = vpop.xlane.xlu0 %866 }
 0xebc   : > { %v868_v13 = vcvt.f32.s32 %v867_v52  ;;  %v3014_v52 = vsel %vm711_vm12, %v1029_v30, 2147483648 }
 0xebe   : > { %v871_v22 = vadd.s32 %v870_v2, %v868_v13  ;;  %v1637_v2 = vcvt.f32.s32 %v2896_v37 }
 0xebf   : > { %v993_v44 = vpop.xlane.xlu0 %992 }
 0xec0   : > { %v872_v61 = vmul.u32 4, %v871_v22  ;;  %v994_v21 = vcvt.f32.s32 %v993_v44  ;;  %v1815_v22 = vand.u32 65535, %v2945_v14  ;;  %v1638_v25 = vshll.u32 %v1637_v2, 16 }
 0xec1   : > { %v1611_v14 = vshra.s32 %v3029_v26, 16 }
 0xec2   : > { %v873_v59 = vsub.s32 %v2810_v36, %v872_v61  ;;  %v2996_v36 = vsel %vm711_vm12, %v966_v29, 2147483648  ;;  %v932_v29 = vcvt.f32.s32 %v2950_v24  ;;  %v1817_v44 = vcvt.s32.f32 %v1815_v22 }
 0xec3   : > { %v969_v38 = vshra.s32 %v2996_v36, 16  ;;  %v1635_v6 = vpop.xlane.xlu0 %1634  ;;  %v3054_v8 = vcvt.s32.f32 %v1611_v14 }
 0xec4   : > { %vm874_vm13 = vcmp.eq.s32.totalorder %v2504_v23, %v873_v59  ;;  %v1636_v37 = vcvt.f32.s32 %v1635_v6 }
 0xec5   : > { %v875_v1 = vsel %vm874_vm13, %v2683_v32, 0  ;;  %v2989_v35 = vpop.xlane.xlu1 %1051  ;;  %v3031_v59 = vcvt.s32.f32 %v969_v38 }
 0xec6   : > { %v2992_v4 = vsel %vm711_vm12, %v875_v1, 2147483648  ;;  %vm1053_vm11 = vcmp.eq.f32.partialorder %v2915_v54, %v2989_v35  ;;  %v996_v54 = vshll.u32 %v995_v42, 16  ;;  %v3045_v1 = vsel %vm711_vm12, %v1671_v10, 2147483648 }
 0xec7   : > { %v878_v43 = vshra.s32 %v2992_v4, 16  ;;  %v1054_v51 = vsel %vm1053_vm11, %v1049_v20, -inf  ;;  %v1639_v41 = vadd.s32 %v1638_v25, %v1636_v37  ;;  %v933_v10 = vshll.u32 %v932_v29, 16  ;;  %v1761_v7 = vpop.xlane.xlu0 %1760 }
 0xec8   : > { %1055 = vmax.xlane.f32.xlu1 %v1054_v51  ;;  %v997_v61 = vadd.s32 %v996_v54, %v994_v21  ;;  %v1674_v51 = vshra.s32 %v3045_v1, 16 }
 0xec9   : > { %v3005_v34 = vcvt.s32.f32 %v878_v43  ;;  %v3011_v17 = vpop.xlane.xlu1 %1693  ;;  %v3052_v43 = vcvt.s32.f32 %v906_v46  ;;  %v1640_v38 = vmul.u32 4, %v1639_v41 }
 0xeca   : > { %vm1695_vm14 = vcmp.eq.f32.partialorder %v2924_v15, %v3011_v17  ;;  %v1032_v15 = vshra.s32 %v3014_v52, 16  ;;  %v998_v20 = vmul.u32 4, %v997_v61 }
 0xecb   : > { %881 = vmax.xlane.f32.xlu0 %v3005_v34  ;;  %v1696_v13 = vsel %vm1695_vm14, %v1691_v56, -inf  ;;  %v3067_v56 = vcvt.s32.f32 %v1674_v51  ;;  %v1641_v54 = vsub.s32 %v2718_v12, %v1640_v38  ;;  %v3096_v37 = vpop.xlane.xlu0 %846  ;;  %v1058_v51 = vcvt.f32.s32 %v2989_v35 }
 0xecc   : > { %1697 = vmax.xlane.f32.xlu1 %v1696_v13  ;;  %v3049_v42 = vcvt.s32.f32 %v1032_v15  ;;  %v999_v21 = vsub.s32 %v2812_v58, %v998_v20  ;;  %vm848_vm15 = vcmp.eq.f32.partialorder %v2936_v31, %v3096_v37  ;;  %v1763_v31 = vcvt.f32.s32 %v2913_v5 }
 0xecd   : > { %vm1642_vm4 = vcmp.eq.s32.totalorder %v2504_v23, %v1641_v54  ;;  %v1700_v54 = vcvt.f32.s32 %v3011_v17 }
 0xece   : > { %vm1000_vm7 = vcmp.eq.s32.totalorder %v2504_v23, %v999_v21  ;;  %v1643_v25 = vsel %vm1642_vm4, %v2693_v0, 0  ;;  %v877_v21 = vand.u32 65535, %v2992_v4  ;;  %v1764_v38 = vshll.u32 %v1763_v31, 16 }
 0xecf   : > { %972 = vmax.xlane.f32.xlu0 %v3031_v59  ;;  %v1001_v22 = vsel %vm1000_vm7, %v2683_v32, 0  ;;  %v3109_v46 = vsel %vm711_vm12, %v1643_v25, 2147483648 }
 0xed0   : > { %v3037_v47 = vpop.xlane.xlu1 %1819 }
 0xed1   : > { %vm1821_vm9 = vcmp.eq.f32.partialorder %v2953_v63, %v3037_v47  ;;  %v3063_v63 = vsel %vm711_vm12, %v1734_v3, 2147483648  ;;  %v3077_v3 = vsel %vm711_vm12, %v1797_v57, 2147483648  ;;  %v842_v57 = vand.u32 65535, %v2911_v48 }
 0xed2   : > { %v1822_v24 = vsel %vm1821_vm9, %v1817_v44, -inf  ;;  %v1737_v58 = vshra.s32 %v3063_v63, 16  ;;  %v1800_v61 = vshra.s32 %v3077_v3, 16 }
 0xed3   : > { %1823 = vmax.xlane.f32.xlu1 %v1822_v24  ;;  %1035 = vmax.xlane.f32.xlu0 %v3049_v42  ;;  %v844_v48 = vcvt.s32.f32 %v842_v57  ;;  %v1646_v24 = vshra.s32 %v3109_v46, 16 }
 0xed4   : > { %v930_v30 = vpop.xlane.xlu1 %929  ;;  %v3083_v12 = vcvt.s32.f32 %v1737_v58  ;;  %v3100_v14 = vcvt.s32.f32 %v1800_v61  ;;  %v968_v61 = vand.u32 65535, %v2996_v36 }
 0xed5   : > { %v931_v39 = vcvt.f32.s32 %v930_v30  ;;  %v849_v41 = vsel %vm848_vm15, %v844_v48, -inf  ;;  %v3116_v30 = vcvt.s32.f32 %v1646_v24  ;;  %v1826_v48 = vcvt.f32.s32 %v3037_v47 }
 0xed6   : > { %v970_v17 = vcvt.s32.f32 %v968_v61 }
 0xed7   : > { %v934_v6 = vadd.s32 %v933_v10, %v931_v39  ;;  %909 = vmax.xlane.f32.xlu1 %v3052_v43  ;;  %1614 = vmax.xlane.f32.xlu0 %v3054_v8  ;;  %v1762_v10 = vcvt.f32.s32 %v1761_v7  ;;  %v1701_v7 = vshll.u32 %v1700_v54, 16  ;;  %v1827_v47 = vshll.u32 %v1826_v48, 16 }
 0xed9   : > { %v935_v2 = vmul.u32 4, %v934_v6  ;;  %v1059_v6 = vshll.u32 %v1058_v51, 16  ;;  %v1765_v58 = vadd.s32 %v1764_v38, %v1762_v10 }
 0xedb   : > { %v936_v13 = vsub.s32 %v2830_v33, %v935_v2  ;;  %1677 = vmax.xlane.f32.xlu0 %v3067_v56  ;;  %v3093_v33 = vsel %vm711_vm12, %v1001_v22, 2147483648  ;;  %v879_v22 = vcvt.s32.f32 %v877_v21 }
 0xedc   : > { %v1004_v44 = vshra.s32 %v3093_v33, 16 }
 0xedd   : > { %vm937_vm0 = vcmp.eq.s32.totalorder %v2504_v23, %v936_v13 }
 0xede   : > { %v938_v62 = vsel %vm937_vm0, %v2683_v32, 0  ;;  %v3112_v20 = vcvt.s32.f32 %v1004_v44  ;;  %v1031_v44 = vand.u32 65535, %v3014_v52  ;;  %v1610_v52 = vand.u32 65535, %v3029_v26 }
 0xedf   : > { %1740 = vmax.xlane.f32.xlu0 %v3083_v12  ;;  %v3090_v19 = vsel %vm711_vm12, %v938_v62, 2147483648 }
 0xee0   : > { %v941_v15 = vshra.s32 %v3090_v19, 16  ;;  %v1033_v21 = vcvt.s32.f32 %v1031_v44  ;;  %v1612_v54 = vcvt.s32.f32 %v1610_v52 }
 0xee2   : > { %v3102_v29 = vcvt.s32.f32 %v941_v15  ;;  %v1766_v15 = vmul.u32 4, %v1765_v58 }
 0xee3   : > { %1803 = vmax.xlane.f32.xlu0 %v3100_v14 }
 0xee4   : > { %944 = vmax.xlane.f32.xlu1 %v3102_v29  ;;  %v1767_v31 = vsub.s32 %v2784_v27, %v1766_v15 }
 0xee6   : > { %vm1768_vm10 = vcmp.eq.s32.totalorder %v2504_v23, %v1767_v31  ;;  %v905_v31 = vand.u32 65535, %v3022_v28  ;;  %v1003_v28 = vand.u32 65535, %v3093_v33  ;;  %v1873_v33 = vld [vmem:[%s3459_s5 + $0x80] sm:$0xff] }
 0xee7   : > { %850 = vmax.xlane.f32.xlu0 %v849_v41 }
 0xee8   : > { %1007 = vmax.xlane.f32.xlu1 %v3112_v20  ;;  %v907_v52 = vcvt.s32.f32 %v905_v31 }
 0xeec   : > { %1649 = vmax.xlane.f32.xlu1 %v3116_v30 }
 0xf55   : > { %v1056_v39 = vpop.xlane.xlu1 %1055 }
 0xf56   : > { %v1057_v2 = vcvt.f32.s32 %v1056_v39 }
 0xf58   : > { %v3123_v13 = vpop.xlane.xlu0 %881  ;;  %v1060_v62 = vadd.s32 %v1059_v6, %v1057_v2 }
 0xf59   : > { %vm883_vm6 = vcmp.eq.f32.partialorder %v3005_v34, %v3123_v13  ;;  %v1698_v5 = vpop.xlane.xlu1 %1697 }
 0xf5a   : > { %v884_v35 = vsel %vm883_vm6, %v879_v22, -inf  ;;  %v1061_v4 = vmul.u32 4, %v1060_v62  ;;  %v1699_v57 = vcvt.f32.s32 %v1698_v5  ;;  %v1769_v62 = vsel %vm1768_vm10, %v2693_v0, 0 }
 0xf5b   : > { %885 = vmax.xlane.f32.xlu0 %v884_v35  ;;  %v1736_v35 = vand.u32 65535, %v3063_v63 }
 0xf5c   : > { %v3128_v25 = vpop.xlane.xlu0 %972  ;;  %v1062_v36 = vsub.s32 %v2876_v49, %v1061_v4  ;;  %v1702_v41 = vadd.s32 %v1701_v7, %v1699_v57  ;;  %v3171_v4 = vsel %vm711_vm12, %v1769_v62, 2147483648  ;;  %v1860_v62 = vld [vmem:[%s3459_s5 + $0x18] sm:$0xff] }
 0xf5d   : > { %vm974_vm3 = vcmp.eq.f32.partialorder %v3031_v59, %v3128_v25  ;;  %v1738_v63 = vcvt.s32.f32 %v1736_v35  ;;  %v1772_v44 = vshra.s32 %v3171_v4, 16  ;;  %v1878_v35 = vld [vmem:[%s3459_s5 + $0xa8] sm:$0xff] }
 0xf5e   : > { %v975_v34 = vsel %vm974_vm3, %v970_v17, -inf  ;;  %v1703_v24 = vmul.u32 4, %v1702_v41  ;;  %vm1063_vm2 = vcmp.eq.s32.totalorder %v2504_v23, %v1062_v36  ;;  %v1799_v17 = vand.u32 65535, %v3077_v3 }
 0xf5f   : > { %976 = vmax.xlane.f32.xlu0 %v975_v34  ;;  %v1064_v27 = vsel %vm1063_vm2, %v2683_v32, 0  ;;  %v3193_v3 = vcvt.s32.f32 %v1772_v44 }
 0xf60   : > { %v1824_v51 = vpop.xlane.xlu1 %1823  ;;  %v3137_v10 = vpop.xlane.xlu0 %1035  ;;  %v1704_v49 = vsub.s32 %v2753_v11, %v1703_v24  ;;  %v1673_v11 = vand.u32 65535, %v3045_v1  ;;  %v3156_v22 = vsel %vm711_vm12, %v1064_v27, 2147483648  ;;  %v1801_v34 = vcvt.s32.f32 %v1799_v17 }
 0xf61   : > { %v1825_v38 = vcvt.f32.s32 %v1824_v51  ;;  %vm1037_vm5 = vcmp.eq.f32.partialorder %v3049_v42, %v3137_v10  ;;  %v1067_v7 = vshra.s32 %v3156_v22, 16 }
 0xf62   : > { %v1038_v59 = vsel %vm1037_vm5, %v1033_v21, -inf  ;;  %vm1705_vm8 = vcmp.eq.s32.totalorder %v2504_v23, %v1704_v49  ;;  %v1675_v1 = vcvt.s32.f32 %v1673_v11  ;;  %v1875_v11 = vld [vmem:[%s3459_s5 + $0x90] sm:$0xff] }
 0xf63   : > { %v1828_v39 = vadd.s32 %v1827_v47, %v1825_v38  ;;  %1039 = vmax.xlane.f32.xlu0 %v1038_v59  ;;  %v1706_v26 = vsel %vm1705_vm8, %v2693_v0, 0 }
 0xf64   : > { %v3146_v6 = vpop.xlane.xlu0 %1614  ;;  %v3153_v58 = vsel %vm711_vm12, %v1706_v26, 2147483648 }
 0xf65   : > { %v1829_v2 = vmul.u32 4, %v1828_v39  ;;  %vm1616_vm13 = vcmp.eq.f32.partialorder %v3054_v8, %v3146_v6  ;;  %v1709_v61 = vshra.s32 %v3153_v58, 16  ;;  %v1005_v39 = vcvt.s32.f32 %v1003_v28 }
 0xf66   : > { %v1617_v42 = vsel %vm1616_vm13, %v1612_v54, -inf }
 0xf67   : > { %v1830_v32 = vsub.s32 %v2920_v53, %v1829_v2  ;;  %1618 = vmax.xlane.f32.xlu0 %v1617_v42  ;;  %v3167_v8 = vcvt.s32.f32 %v1709_v61  ;;  %v1876_v2 = vld [vmem:[%s3459_s5 + $0x98] sm:$0xff]  ;;  %v1859_v61 = vld [vmem:[%s3459_s5 + $0x10] sm:$0xff] }
 0xf68   : > { %v3161_v5 = vpop.xlane.xlu0 %1677 }
 0xf69   : > { %vm1831_vm11 = vcmp.eq.s32.totalorder %v2504_v23, %v1830_v32  ;;  %vm1679_vm14 = vcmp.eq.f32.partialorder %v3067_v56, %v3161_v5  ;;  %1712 = vmax.xlane.f32.xlu1 %v3167_v8  ;;  %v3180_v56 = vcvt.s32.f32 %v1067_v7  ;;  %v2144_v32 = vpack.c.bf16 %v1876_v2, %v1875_v11 }
 0xf6a   : > { %v1680_v53 = vsel %vm1679_vm14, %v1675_v1, -inf  ;;  %v1832_v57 = vsel %vm1831_vm11, %v2693_v0, 0  ;;  %v3187_v0 = vpop.xlane.xlu1 %909  ;;  %v1877_v1 = vld [vmem:[%s3459_s5 + $0xa0] sm:$0xff]  ;;  %v2146_v7 = vpack.c.bf16 %v1860_v62, %v1859_v61  ;;  %v979_v2 = vcvt.f32.s32 %v3128_v25 }
 0xf6b   : > { %1681 = vmax.xlane.f32.xlu0 %v1680_v53  ;;  %v3184_v36 = vsel %vm711_vm12, %v1832_v57, 2147483648  ;;  %vm911_vm12 = vcmp.eq.f32.partialorder %v3052_v43, %v3187_v0  ;;  %v2148_v53 = vpack.c.bf16 %v1878_v35, %v1877_v1  ;;  %v1861_v61 = vld [vmem:[%s3459_s5 + $0x20] sm:$0xff] }
 0xf6c   : > { %v3175_v15 = vpop.xlane.xlu0 %1740  ;;  %v912_v49 = vsel %vm911_vm12, %v907_v52, -inf  ;;  %v3251_v52 = vadd.s32 128, %v2504_v23  ;;  %v980_v35 = vshll.u32 %v979_v2, 16 }
 0xf6d   : > { %vm1742_vm9 = vcmp.eq.f32.partialorder %v3083_v12, %v3175_v15  ;;  %1070 = vmax.xlane.f32.xlu1 %v3180_v56  ;;  %v1835_v12 = vshra.s32 %v3184_v36, 16 }
 0xf6e   : > { %v1743_v48 = vsel %vm1742_vm9, %v1738_v63, -inf  ;;  %v853_v63 = vcvt.f32.s32 %v3096_v37 }
 0xf6f   : > { %1744 = vmax.xlane.f32.xlu0 %v1743_v48  ;;  %v3200_v21 = vcvt.s32.f32 %v1835_v12  ;;  %v888_v48 = vcvt.f32.s32 %v3123_v13  ;;  %v1708_v13 = vand.u32 65535, %v3153_v58 }
 0xf70   : > { %v3189_v41 = vpop.xlane.xlu0 %1803  ;;  %v854_v44 = vshll.u32 %v853_v63, 16 }
 0xf71   : > { %vm1805_vm7 = vcmp.eq.f32.partialorder %v3100_v14, %v3189_v41  ;;  %1775 = vmax.xlane.f32.xlu1 %v3193_v3  ;;  %v3198_v51 = vpop.xlane.xlu1 %944  ;;  %v940_v14 = vand.u32 65535, %v3090_v19  ;;  %v1645_v19 = vand.u32 65535, %v3109_v46  ;;  %v1857_v46 = vld [vmem:[%s3459_s5] sm:$0xff] }
 0xf72   : > { %v1806_v24 = vsel %vm1805_vm7, %v1801_v34, -inf  ;;  %vm946_vm4 = vcmp.eq.f32.partialorder %v3102_v29, %v3198_v51 }
 0xf73   : > { %1807 = vmax.xlane.f32.xlu0 %v1806_v24  ;;  %v942_v38 = vcvt.s32.f32 %v940_v14  ;;  %v1647_v29 = vcvt.s32.f32 %v1645_v19  ;;  %v889_v24 = vshll.u32 %v888_v48, 16  ;;  %v1066_v19 = vand.u32 65535, %v3156_v22 }
 0xf74   : > { %v851_v57 = vpop.xlane.xlu0 %850  ;;  %v1834_v22 = vand.u32 65535, %v3184_v36 }
 0xf75   : > { %1838 = vmax.xlane.f32.xlu1 %v3200_v21  ;;  %v3206_v47 = vpop.xlane.xlu1 %1007  ;;  %v947_v59 = vsel %vm946_vm4, %v942_v38, -inf  ;;  %v852_v17 = vcvt.f32.s32 %v851_v57  ;;  %v1880_v57 = vld [vmem:[%s3459_s5 + $0xb8] sm:$0xff] }
 0xf76   : > { %vm1009_vm0 = vcmp.eq.f32.partialorder %v3112_v20, %v3206_v47  ;;  %v1874_v20 = vld [vmem:[%s3459_s5 + $0x88] sm:$0xff] }
 0xf77   : > { %v1010_v27 = vsel %vm1009_vm0, %v1005_v39, -inf  ;;  %v2140_v26 = vpack.c.bf16 %v1874_v20, %v1873_v33  ;;  %v855_v34 = vadd.s32 %v854_v44, %v852_v17  ;;  %v1710_v39 = vcvt.s32.f32 %v1708_v13 }
 0xf78   : > { %v1771_v33 = vand.u32 65535, %v3171_v4  ;;  %v916_v4 = vcvt.f32.s32 %v3187_v0  ;;  %v1862_v0 = vld [vmem:[%s3459_s5 + $0x28] sm:$0xff]  ;;  %v1014_v17 = vcvt.f32.s32 %v3206_v47 }
 0xf79   : > { %913 = vmax.xlane.f32.xlu1 %v912_v49  ;;  %v3213_v43 = vpop.xlane.xlu1 %1649  ;;  %2141 = vmatprep.subr.bf16.mxu0 %v2140_v26  ;;  %v891_v14 = vmul.u32 16, %v855_v34  ;;  %v2150_v62 = vpack.c.bf16 %v1862_v0, %v1861_v61  ;;  %v1864_v34 = vld [vmem:[%s3459_s5 + $0x38] sm:$0xff] }
 0xf7a   : > { %vm1651_vm15 = vcmp.eq.f32.partialorder %v3116_v30, %v3213_v43  ;;  %v1858_v30 = vld [vmem:[%s3459_s5 + $0x8] sm:$0xff]  ;;  %v1656_v13 = vcvt.f32.s32 %v3213_v43 }
 0xf7b   : > { %v1652_v54 = vsel %vm1651_vm15, %v1647_v29, -inf  ;;  %v2142_v42 = vpack.c.bf16 %v1858_v30, %v1857_v46  ;;  %v1773_v46 = vcvt.s32.f32 %v1771_v33  ;;  %v1836_v30 = vcvt.s32.f32 %v1834_v22  ;;  %v1866_v43 = vld [vmem:[%s3459_s5 + $0x48] sm:$0xff] }
 0xf7d   : > { %948 = vmax.xlane.f32.xlu1 %v947_v59  ;;  %2143 = vmatpush3.bf16.msra.mxu0 %v2142_v42  ;;  %v917_v42 = vshll.u32 %v916_v4, 16  ;;  %v1657_v4 = vshll.u32 %v1656_v13, 16 }
 0xf7e   : > { %2145 = vmatprep.subr.bf16.mxu0 %v2144_v32 }
 0xf81   : > { %1011 = vmax.xlane.f32.xlu1 %v1010_v27  ;;  %2147 = vmatpush3.bf16.msra.mxu0 %v2146_v7  ;;  %v1621_v7 = vcvt.f32.s32 %v3146_v6  ;;  %v1863_v6 = vld [vmem:[%s3459_s5 + $0x30] sm:$0xff] }
 0xf82   : > { %2149 = vmatprep.subr.bf16.mxu0 %v2148_v53 }
 0xf85   : > { %1653 = vmax.xlane.f32.xlu1 %v1652_v54  ;;  %v1068_v54 = vcvt.s32.f32 %v1066_v19  ;;  %2151 = vmatpush3.bf16.msra.mxu0 %v2150_v62  ;;  %v1882_v19 = vld [vmem:[%s3459_s5 + $0xc8] sm:$0xff]  ;;  %v1868_v62 = vld [vmem:[%s3459_s5 + $0x58] sm:$0xff] }
 0xfe8   : > { %v886_v12 = vpop.xlane.xlu0 %885 }
 0xfe9   : > { %v887_v31 = vcvt.f32.s32 %v886_v12 }
 0xfeb   : > { %v890_v49 = vadd.s32 %v889_v24, %v887_v31  ;;  %v2154_v24 = vpack.c.bf16 %v1864_v34, %v1863_v6 }
 0xfec   : > { %v977_v58 = vpop.xlane.xlu0 %976 }
 0xfed   : > { %v892_v28 = vadd.s32 %v891_v14, %v890_v49 }
 0xfef   : > { %vm894_vm6 = vcmp.eq.s32.totalorder %v2504_v23, %v892_v28  ;;  %vm895_vm3 = vcmp.eq.s32.totalorder %v3251_v52, %v892_v28  ;;  %v1622_v28 = vshll.u32 %v1621_v7, 16 }
 0xff0   : > { %v3256_v37 = vsel %vm894_vm6, %v2960_v60, 0.0  ;;  %v3259_v38 = vsel %vm895_vm3, %v2960_v60, 0.0 }
 0xff6   : > { %v3262_v59 = vpop.xlane.xlu1 %1712 }
 0xff7   : > { %vm1714_vm2 = vcmp.eq.f32.partialorder %v3167_v8, %v3262_v59 }
 0xff8   : > { %v1715_v27 = vsel %vm1714_vm2, %v1710_v39, -inf  ;;  %v1881_v39 = vld [vmem:[%s3459_s5 + $0xc0] sm:$0xff] }
 0xff9   : > { %1716 = vmax.xlane.f32.xlu1 %v1715_v27  ;;  %v1015_v27 = vshll.u32 %v1014_v17, 16 }
 0xffa   : > { %v3267_v29 = vpop.xlane.xlu1 %1070 }
 0xffb   : > { %vm1072_vm5 = vcmp.eq.f32.partialorder %v3180_v56, %v3267_v29  ;;  %v3282_v56 = vpop.xlane.xlu0 %1039 }
 0xffc   : > { %v1073_v60 = vsel %vm1072_vm5, %v1068_v54, -inf }
 0xffd   : > { %1074 = vmax.xlane.f32.xlu1 %v1073_v60  ;;  %v2156_v60 = vpack.c.bf16 %v1882_v19, %v1881_v39  ;;  %v1042_v19 = vcvt.f32.s32 %v3137_v10 }
 0xffe   : > { %v3272_v20 = vpop.xlane.xlu1 %1775 }
 0xfff   : > { %vm1777_vm8 = vcmp.eq.f32.partialorder %v3193_v3, %v3272_v20  ;;  %v951_v3 = vcvt.f32.s32 %v3198_v51  ;;  %v1619_v25 = vpop.xlane.xlu0 %1618  ;;  %v1879_v51 = vld [vmem:[%s3459_s5 + $0xb0] sm:$0xff] }
0x1000   : > { %v1778_v8 = vsel %vm1777_vm8, %v1773_v46, -inf  ;;  %v2152_v48 = vpack.c.bf16 %v1880_v57, %v1879_v51  ;;  %v1620_v31 = vcvt.f32.s32 %v1619_v25  ;;  %v1886_v51 = vld [vmem:[%s3459_s5 + $0xe8] sm:$0xff] }
0x1001   : > { %1779 = vmax.xlane.f32.xlu1 %v1778_v8  ;;  %v952_v63 = vshll.u32 %v951_v3, 16  ;;  %v1884_v3 = vld [vmem:[%s3459_s5 + $0xd8] sm:$0xff] }
0x1002   : > { %v3277_v26 = vpop.xlane.xlu1 %1838  ;;  %2153 = vmatprep.subr.bf16.mxu0 %v2152_v48  ;;  %v1623_v8 = vadd.s32 %v1622_v28, %v1620_v31  ;;  %v1870_v48 = vld [vmem:[%s3459_s5 + $0x68] sm:$0xff]  ;;  %v1888_v31 = vld [vmem:[%s3459_s5 + $0xf8] sm:$0xff] }
0x1003   : > { %vm1840_vm10 = vcmp.eq.f32.partialorder %v3200_v21, %v3277_v26  ;;  %v978_v21 = vcvt.f32.s32 %v977_v58  ;;  %2155 = vmatpush3.bf16.msra.mxu0 %v2154_v24  ;;  %v1865_v58 = vld [vmem:[%s3459_s5 + $0x40] sm:$0xff]  ;;  %v1887_v24 = vld [vmem:[%s3459_s5 + $0xf0] sm:$0xff]  ;;  %v1872_v28 = vld [vmem:[%s3459_s5 + $0x78] sm:$0xff]  ;;  %v1682_v13 = vpop.xlane.xlu0 %1681 }
0x1004   : > { %v1841_v11 = vsel %vm1840_vm10, %v1836_v30, -inf  ;;  %v2158_v22 = vpack.c.bf16 %v1866_v43, %v1865_v58  ;;  %2157 = vmatprep.subr.bf16.mxu0 %v2156_v60  ;;  %v1659_v7 = vmul.u32 16, %v1623_v8  ;;  %v1683_v39 = vcvt.f32.s32 %v1682_v13 }
0x1005   : > { %1842 = vmax.xlane.f32.xlu1 %v1841_v11  ;;  %v981_v12 = vadd.s32 %v980_v35, %v978_v21  ;;  %v1041_v60 = vcvt.f32.s32 %v3282_v56  ;;  %v1043_v43 = vshll.u32 %v1042_v19, 16  ;;  %v1782_v56 = vcvt.f32.s32 %v3272_v20 }
0x1006   : > { %v914_v36 = vpop.xlane.xlu1 %913 }
0x1007   : > { %v915_v32 = vcvt.f32.s32 %v914_v36  ;;  %v1017_v46 = vmul.u32 16, %v981_v12  ;;  %2159 = vmatpush3.bf16.msra.mxu0 %v2158_v22 }
0x1009   : > { %v918_v1 = vadd.s32 %v917_v42, %v915_v32  ;;  %v1883_v42 = vld [vmem:[%s3459_s5 + $0xd0] sm:$0xff] }
0x100a   : > { %v949_v53 = vpop.xlane.xlu1 %948 }
0x100b   : > { %v950_v44 = vcvt.f32.s32 %v949_v53  ;;  %v954_v14 = vmul.u32 16, %v918_v1  ;;  %v2160_v1 = vpack.c.bf16 %v1884_v3, %v1883_v42  ;;  %v1885_v53 = vld [vmem:[%s3459_s5 + $0xe0] sm:$0xff] }
0x100d   : > { %v953_v49 = vadd.s32 %v952_v63, %v950_v44  ;;  %2161 = vmatprep.subr.bf16.mxu0 %v2160_v1  ;;  %v2164_v44 = vpack.c.bf16 %v1886_v51, %v1885_v53  ;;  %v1845_v1 = vcvt.f32.s32 %v3277_v26 }
0x100e   : > { %v1012_v47 = vpop.xlane.xlu1 %1011 }
0x100f   : > { %v955_v54 = vadd.s32 %v954_v14, %v953_v49  ;;  %v1013_v33 = vcvt.f32.s32 %v1012_v47  ;;  %v1871_v14 = vld [vmem:[%s3459_s5 + $0x70] sm:$0xff]  ;;  %v2168_v49 = vpack.c.bf16 %v1888_v31, %v1887_v24  ;;  %v1684_v47 = vcvt.f32.s32 %v3161_v5 }
0x1011   : > { %vm957_vm13 = vcmp.eq.s32.totalorder %v2504_v23, %v955_v54  ;;  %vm958_vm11 = vcmp.eq.s32.totalorder %v3251_v52, %v955_v54  ;;  %v1016_v30 = vadd.s32 %v1015_v27, %v1013_v33  ;;  %v1685_v27 = vshll.u32 %v1684_v47, 16  ;;  %v1745_v33 = vpop.xlane.xlu0 %1744 }
0x1012   : > { %v959_v11 = vsel %vm957_vm13, %v2963_v16, 0.0  ;;  %v960_v2 = vsel %vm958_vm11, %v2963_v16, 0.0  ;;  %v1654_v36 = vpop.xlane.xlu1 %1653  ;;  %v1867_v16 = vld [vmem:[%s3459_s5 + $0x50] sm:$0xff]  ;;  %v1719_v54 = vcvt.f32.s32 %v3262_v59  ;;  %v1810_v59 = vcvt.f32.s32 %v3189_v41 }
0x1013   : > { %v961_v32 = vadd.f32 %v959_v11, %v3256_v37  ;;  %v962_v61 = vadd.f32 %v960_v2, %v3259_v38  ;;  %v1018_v0 = vadd.s32 %v1017_v46, %v1016_v30  ;;  %v1655_v21 = vcvt.f32.s32 %v1654_v36 }
0x1014   : > { %v2162_v35 = vpack.c.bf16 %v1868_v62, %v1867_v16  ;;  %v1686_v58 = vadd.s32 %v1685_v27, %v1683_v39  ;;  %v1747_v46 = vcvt.f32.s32 %v3175_v15  ;;  %v1720_v8 = vshll.u32 %v1719_v54, 16 }
0x1015   : > { %vm1020_vm14 = vcmp.eq.s32.totalorder %v2504_v23, %v1018_v0  ;;  %vm1021_vm9 = vcmp.eq.s32.totalorder %v3251_v52, %v1018_v0  ;;  %v1658_v37 = vadd.s32 %v1657_v4, %v1655_v21  ;;  %v1077_v30 = vcvt.f32.s32 %v3267_v29  ;;  %v1808_v36 = vpop.xlane.xlu0 %1807 }
0x1016   : > { %v1022_v38 = vsel %vm1020_vm14, %v2966_v55, 0.0  ;;  %v1023_v25 = vsel %vm1021_vm9, %v2966_v55, 0.0  ;;  %2163 = vmatpush3.bf16.msra.mxu0 %v2162_v35  ;;  %v1869_v55 = vld [vmem:[%s3459_s5 + $0x60] sm:$0xff]  ;;  %v1044_v11 = vadd.s32 %v1043_v43, %v1041_v60  ;;  %v1722_v5 = vmul.u32 16, %v1686_v58 }
0x1017   : > { %v3347_v57 = vadd.f32 %v1022_v38, %v961_v32  ;;  %v3349_v63 = vadd.f32 %v1023_v25, %v962_v61  ;;  %v1660_v17 = vadd.s32 %v1659_v7, %v1658_v37  ;;  %v2166_v6 = vpack.c.bf16 %v1870_v48, %v1869_v55  ;;  %2165 = vmatprep.subr.bf16.mxu0 %v2164_v44 }
0x1018   : > { %v1746_v2 = vcvt.f32.s32 %v1745_v33  ;;  %v1748_v42 = vshll.u32 %v1747_v46, 16  ;;  %v1078_v32 = vshll.u32 %v1077_v30, 16  ;;  %v1080_v15 = vmul.u32 16, %v1044_v11 }
0x1019   : > { %vm1662_vm7 = vcmp.eq.s32.totalorder %v2504_v23, %v1660_v17  ;;  %vm1663_vm12 = vcmp.eq.s32.totalorder %v3251_v52, %v1660_v17  ;;  %v1809_v21 = vcvt.f32.s32 %v1808_v36  ;;  %v1811_v62 = vshll.u32 %v1810_v59, 16 }
0x101a   : > { %v3360_v34 = vsel %vm1662_vm7, %v2971_v45, 0.0  ;;  %v3363_v12 = vsel %vm1663_vm12, %v2971_v45, 0.0  ;;  %2167 = vmatpush3.bf16.msra.mxu0 %v2166_v6  ;;  %v2170_v45 = vpack.c.bf16 %v1872_v28, %v1871_v14  ;;  %v1749_v16 = vadd.s32 %v1748_v42, %v1746_v2 }
0x101b   : > { %2169 = vmatprep.subr.bf16.mxu0 %v2168_v49  ;;  %v1783_v37 = vshll.u32 %v1782_v56, 16  ;;  %v1812_v25 = vadd.s32 %v1811_v62, %v1809_v21  ;;  %v1846_v17 = vshll.u32 %v1845_v1, 16 }
0x101c   : > { %v1785_v53 = vmul.u32 16, %v1749_v16 }
0x101d   : > { %v1848_v31 = vmul.u32 16, %v1812_v25 }
0x101e   : > { %2171 = vmatpush3.bf16.msra.mxu0 %v2170_v45 }
0x1086   : > { %v1717_v22 = vpop.xlane.xlu1 %1716 }
0x1087   : > { %v1718_v4 = vcvt.f32.s32 %v1717_v22 }
0x1089   : > { %v1721_v10 = vadd.s32 %v1720_v8, %v1718_v4 }
0x108a   : > { %v1075_v3 = vpop.xlane.xlu1 %1074 }
0x108b   : > { %v1723_v61 = vadd.s32 %v1722_v5, %v1721_v10  ;;  %v1076_v0 = vcvt.f32.s32 %v1075_v3 }
0x108d   : > { %vm1725_vm4 = vcmp.eq.s32.totalorder %v2504_v23, %v1723_v61  ;;  %vm1726_vm0 = vcmp.eq.s32.totalorder %v3251_v52, %v1723_v61  ;;  %v1079_v29 = vadd.s32 %v1078_v32, %v1076_v0 }
0x108e   : > { %v1727_v35 = vsel %vm1725_vm4, %v2974_v9, 0.0  ;;  %v1728_v41 = vsel %vm1726_vm0, %v2974_v9, 0.0  ;;  %v1780_v7 = vpop.xlane.xlu1 %1779 }
0x108f   : > { %v1081_v20 = vadd.s32 %v1080_v15, %v1079_v29  ;;  %v1781_v38 = vcvt.f32.s32 %v1780_v7 }
0x1091   : > { %vm1083_vm15 = vcmp.eq.s32.totalorder %v2504_v23, %v1081_v20  ;;  %vm1084_vm6 = vcmp.eq.s32.totalorder %v3251_v52, %v1081_v20  ;;  %v1784_v51 = vadd.s32 %v1783_v37, %v1781_v38 }
0x1092   : > { %v1085_v44 = vsel %vm1083_vm15, %v2968_v18, 0.0  ;;  %v1086_v26 = vsel %vm1084_vm6, %v2968_v18, 0.0  ;;  %v1843_v55 = vpop.xlane.xlu1 %1842 }
0x1093   : > { %v1087_v48 = vadd.f32 %v1085_v44, %v3347_v57  ;;  %v1088_v9 = vadd.f32 %v1086_v26, %v3349_v63  ;;  %v1786_v6 = vadd.s32 %v1785_v53, %v1784_v51  ;;  %v1844_v24 = vcvt.f32.s32 %v1843_v55 }
0x1095   : > { %v1666_v14 = vadd.f32 %v3360_v34, %v1087_v48  ;;  %vm1788_vm3 = vcmp.eq.s32.totalorder %v2504_v23, %v1786_v6  ;;  %vm1789_vm2 = vcmp.eq.s32.totalorder %v3251_v52, %v1786_v6  ;;  %v1847_v49 = vadd.s32 %v1846_v17, %v1844_v24 }
0x1096   : > { %v1790_v28 = vsel %vm1788_vm3, %v2977_v40, 0.0  ;;  %v1667_v18 = vadd.f32 %v3363_v12, %v1088_v9  ;;  %v1791_v45 = vsel %vm1789_vm2, %v2977_v40, 0.0 }
0x1097   : > { %v1729_v57 = vadd.f32 %v1727_v35, %v1666_v14  ;;  %v1849_v63 = vadd.s32 %v1848_v31, %v1847_v49 }
0x1098   : > { %v1730_v13 = vadd.f32 %v1728_v41, %v1667_v18 }
0x1099   : > { %v1792_v47 = vadd.f32 %v1790_v28, %v1729_v57  ;;  %vm1851_vm5 = vcmp.eq.s32.totalorder %v2504_v23, %v1849_v63  ;;  %vm1852_vm8 = vcmp.eq.s32.totalorder %v3251_v52, %v1849_v63 }
0x109a   : > { %v1853_v34 = vsel %vm1851_vm5, %v2979_v50, 0.0  ;;  %v1793_v39 = vadd.f32 %v1791_v45, %v1730_v13  ;;  %v1854_v19 = vsel %vm1852_vm8, %v2979_v50, 0.0 }
0x109b   : > { %v1855_v27 = vadd.f32 %v1853_v34, %v1792_v47 }
0x109c   : > { %v1856_v54 = vadd.f32 %v1854_v19, %v1793_v39 }
0x109e   : > { %1953 = vmatprep.mubr.f32.mxu0 %v1856_v54 }
0x109f   : > { %1954 = vmatmul.mubr.f32.vlgmr.msra.gmra.mrb[4].mxu0 %v1855_v27 }
0x1172   : > { %v2105_v40 = vpop.f32.mrb[4].mxu0 }
0x1173   : > { %v2106_v12 = vpop.f32.mrb[5].mxu0 }
0x1174   : > { %v2107_v23 = vadd.f32 %v2106_v12, %v2105_v40 }
0x1176   : > { %1959 = vst.msk [vmem:[%s242_s16] sm:$0xff] %vm267_vm1, %v2107_v23 }
0x1177   : > { %2269 = shalt.err (!%p2266_p3)
}
0x1178   : > { %s2270_s10 = scalar_lea.hbm %s3411_s20, 128  ;;  %s2274_s13 = scalar_lea.hbm %s3460_s6, 256 }
0x1179   : > { %p2271_p4 = scmp.ne.s32.totalorder %s3411_s20, %s2270_s10  ;;  %p2275_p9 = scmp.lt.u32.totalorder %s3411_s20, %s3460_s6 }
0x117a   : > { %p2276_p10 = scmp.lt.u32.totalorder %s2274_s13, %s2270_s10  ;;  %p2278_p12 = scmp.lt.u32.totalorder %s2270_s10, %s3411_s20 }
0x117b   : > { %p2272_p7 = pnand %p2271_p4, %p2405_p5 }
0x117c   : > { %p2277_p11 = por %p2276_p10, %p2275_p9 }
0x117d   : > { %p2273_p8 = pneg %p2272_p7 }
0x117e   : > { %p2279_p13 = por %p2278_p12, %p2277_p11 }
0x1180   : > { %p2280_p0 = pnand %p2279_p13, %p2273_p8 }
0x1182   : > { %2283 = shalt.err (!%p2280_p0)
}
0x1183   : > { %2172 = dma.vmem_to_hbm [thread:$0]  (%p2405_p5), %s3413_s17, 128, %s3411_s20, %s1961_s26  }
0x1184 PF: > { %p2178_p1 = scmp.ge.s32.totalorder %s2318_s24, 2  ;;  %s1986_s16 = sand.u32 1, %s2306_s21  }
0x1185   : > { %s1987_s19 = scalar_lea.sflag [#allocation3], %s1986_s16 }
0x1186   : > { %p2175_p2 = pnand %p2178_p1, %p2409_p6 }
0x1188   : > { %2301 = dma.done.wait (!%p2175_p2), %s1987_s19, 128  }
0x1189   : > { %2303 = vsyncadd (!%p2175_p2), %s1987_s19, 4294967168  ;;  %p16_p3 = scmp.ge.s32.totalorder %s2392_s27, 4   ;;  %s3479_s21 = smov %s2310_s22 }
0x118a   : > { %s3480_s22 = smov %s2314_s23  ;;  %s3481_s23 = smov %s2403_s30 }
0x118b   : > { %s3482_s24 = smov %s2392_s27  ;;  %18 = sbr.rel (!%p16_p3) target bundleno = 3 (0x3), region = 82 }
0x1192   :  { %1992 = vsyncpa [#allocation3], 1 }
0x1193   :  { %1994 = vsyncpa [#allocation3 + $0x1], 1 }

</bundles_post_ra>
